<compile_context>
chip_gen: v5e
topology: v5e:2x2
jax: 0.10.0
libtpu: 0.0.40
codegen_flags: <defaults>
</compile_context>

<pallas_src>
import jax
import jax.numpy as jnp
import numpy as np
from jax import lax
from jax.experimental import pallas as pl
from jax.experimental.pallas import tpu as pltpu


_HEAD_CIN = 16   # head-conv input channels padded to 16 so the bf16 im2col
                 # slabs land on packed-sublane (16-row) boundaries.
_TAIL_COUT = 8   # final conv output channels padded to 8 for aligned stores.


def _round_up(x, m):
    return ((x + m - 1) // m) * m


# ----------------------------------------------------------------------------
# Geometry of the "extended flat" layout: (C, Le) per image, spatial on lanes.
# ----------------------------------------------------------------------------
def _geom(H, W):
    hp, wp = H + 2, W + 2
    hpwp = hp * wp
    pad_f = wp + 1                                    # front zero lanes (>= wp+1)
    le = _round_up(pad_f + hpwp + wp + 1, 128)        # back zero lanes  (>= wp+1)
    return dict(H=H, W=W, hp=hp, wp=wp, hpwp=hpwp, pad_f=pad_f, le=le,
                n_pix=H * W)


def _make_mask(geom):
    """(1, Le) f32 mask: 1.0 at interior (original HxW) pixels, 0 elsewhere."""
    m = np.zeros((geom["hp"], geom["wp"]), np.float32)
    m[1:1 + geom["H"], 1:1 + geom["W"]] = 1.0
    ext = np.zeros((geom["le"],), np.float32)
    ext[geom["pad_f"]:geom["pad_f"] + geom["hpwp"]] = m.reshape(-1)
    return jnp.asarray(ext.reshape(1, geom["le"]))


def _to_ext(x_nchw, geom, c_pad=None):
    """(N,C,H,W) -> (N, C[_pad], Le) extended-flat channels-first layout."""
    N, C, H, W = x_nchw.shape
    xp = jnp.pad(x_nchw, ((0, 0), (0, 0), (1, 1), (1, 1)))
    xp = xp.reshape(N, C, geom["hpwp"])
    back = geom["le"] - geom["pad_f"] - geom["hpwp"]
    xe = jnp.pad(xp, ((0, 0), (0, 0), (geom["pad_f"], back)))
    if c_pad is not None and c_pad > C:
        xe = jnp.pad(xe, ((0, 0), (0, c_pad - C), (0, 0)))
    return xe


def _from_ext(x_ext, geom, c_out):
    """(N, C, Le) extended-flat -> (N, c_out, H, W)."""
    N = x_ext.shape[0]
    core = x_ext[:, :c_out, geom["pad_f"]:geom["pad_f"] + geom["hpwp"]]
    core = core.reshape(N, c_out, geom["hp"], geom["wp"])
    return core[:, :, 1:1 + geom["H"], 1:1 + geom["W"]]


# ----------------------------------------------------------------------------
# In-kernel 3x3 conv: im2col in VMEM (9 lane-rolled bf16 slabs) + one matmul.
# ----------------------------------------------------------------------------
def _conv3x3(x, w, scr_ref, geom):
    """x: (Cin, Le) f32, zero outside the padded image.
    w: (Cout, 9*Cin) bf16, tap-major (ky, kx) then cin (matches scratch layout).
    scr_ref: (9*Cin, Le) bf16 VMEM scratch.
    Returns (Cout, Le) f32 conv without bias; only interior lanes are
    meaningful -- callers multiply by the interior mask."""
    cin = x.shape[0]
    le, wp = geom["le"], geom["wp"]
    for ky in range(3):
        for kx in range(3):
            t = ky * 3 + kx
            delta = (ky - 1) * wp + (kx - 1)
            # shifted[:, p] = x[:, p + delta]; the circular wrap only ever hits
            # the (>= wp+1)-wide zero pads, which the mask zeroes downstream.
            if delta == 0:
                shifted = x
            else:
                shifted = pltpu.roll(x, shift=(-delta) % le, axis=1)
            scr_ref[t * cin:(t + 1) * cin, :] = shifted.astype(jnp.bfloat16)
    return jnp.dot(w, scr_ref[...], preferred_element_type=jnp.float32)


# ----------------------------------------------------------------------------
# Kernels
# ----------------------------------------------------------------------------
def _make_head_kernel(geom):
    def kernel(x_ref, w_ref, b_ref, mask_ref, o_ref, scr):
        h = _conv3x3(x_ref[...], w_ref[...], scr, geom)
        o_ref[...] = (h + b_ref[...]) * mask_ref[...]
    return kernel


def _make_rg_kernel(geom, num_rcab):
    inv_npix = 1.0 / geom["n_pix"]

    def kernel(x_ref, wconv_ref, bconv_ref, caw1_ref, cab1_ref, caw2_ref,
               cab2_ref, rgw_ref, rgb_ref, mask_ref, o_ref, scr):
        m = mask_ref[...]                                   # (1, Le)
        x0 = x_ref[...]                                     # (C, Le) RG residual
        g = x0
        for r in range(num_rcab):                           # unrolled (static)
            # conv1 + bias + relu; masked so the pads stay zero for conv2.
            h1 = _conv3x3(g, wconv_ref[2 * r], scr, geom)
            h1 = jnp.maximum(h1 + bconv_ref[2 * r], 0.0) * m
            # conv2 + bias (pads garbage -> masked wherever used below).
            h2 = _conv3x3(h1, wconv_ref[2 * r + 1], scr, geom)
            h2 = h2 + bconv_ref[2 * r + 1]
            # Channel attention: interior mean -> 1x1 -> relu -> 1x1 -> sigmoid.
            pooled = jnp.sum(h2 * m, axis=1, keepdims=True) * inv_npix   # (C,1)
            y = jnp.dot(caw1_ref[r], pooled, preferred_element_type=jnp.float32)
            y = jnp.maximum(y + cab1_ref[r], 0.0)
            z = jnp.dot(caw2_ref[r], y, preferred_element_type=jnp.float32)
            a = 1.0 / (1.0 + jnp.exp(-(z + cab2_ref[r])))                # (C,1)
            # RCAB output: residual + CA(h2) * h2, pads kept at zero.
            g = g + (h2 * a) * m
        # RG tail conv + RG residual.
        t = _conv3x3(g, rgw_ref[...], scr, geom)
        o_ref[...] = x0 + (t + rgb_ref[...]) * m

    return kernel


def _make_tail_kernel(geom):
    def kernel(x_ref, res_ref, w1_ref, b1_ref, w2_ref, b2_ref, w3_ref, b3_ref,
               mask_ref, o_ref, scr):
        m = mask_ref[...]
        h = _conv3x3(x_ref[...], w1_ref[...], scr, geom)        # conv1
        h = (h + b1_ref[...]) * m + res_ref[...]                # + global residual
        g = _conv3x3(h, w2_ref[...], scr, geom)                 # conv_image
        g = (g + b2_ref[...]) * m
        y = _conv3x3(g, w3_ref[...], scr, geom)                 # conv2_image
        o_ref[...] = (y + b3_ref[...]) * m
    return kernel


# ----------------------------------------------------------------------------
# pallas_call wrappers
# ----------------------------------------------------------------------------
def _img_spec(c, le):
    return pl.BlockSpec((None, c, le), lambda n: (n, 0, 0))


def _full_spec(shape):
    nd = len(shape)
    return pl.BlockSpec(shape, lambda n: (0,) * nd)


def _cparams():
    return pltpu.CompilerParams(dimension_semantics=("parallel",),
                                vmem_limit_bytes=32 * 1024 * 1024)


def head_call(xe, w, b, mask, geom, cout):
    N, cin, le = xe.shape
    return pl.pallas_call(
        _make_head_kernel(geom),
        out_shape=jax.ShapeDtypeStruct((N, cout, le), jnp.float32),
        grid=(N,),
        in_specs=[_img_spec(cin, le), _full_spec((cout, 9 * cin)),
                  _full_spec((cout, 1)), _full_spec((1, le))],
        out_specs=_img_spec(cout, le),
        scratch_shapes=[pltpu.VMEM((9 * cin, le), jnp.bfloat16)],
        compiler_params=_cparams(),
    )(xe, w, b, mask)


def rg_call(xe, rg, mask, geom):
    N, C, le = xe.shape
    num_rcab, Cr = rg["caw1"].shape[0], rg["caw1"].shape[1]
    return pl.pallas_call(
        _make_rg_kernel(geom, num_rcab),
        out_shape=jax.ShapeDtypeStruct((N, C, le), jnp.float32),
        grid=(N,),
        in_specs=[_img_spec(C, le),
                  _full_spec((2 * num_rcab, C, 9 * C)),
                  _full_spec((2 * num_rcab, C, 1)),
                  _full_spec((num_rcab, Cr, C)),
                  _full_spec((num_rcab, Cr, 1)),
                  _full_spec((num_rcab, C, Cr)),
                  _full_spec((num_rcab, C, 1)),
                  _full_spec((C, 9 * C)),
                  _full_spec((C, 1)),
                  _full_spec((1, le))],
        out_specs=_img_spec(C, le),
        scratch_shapes=[pltpu.VMEM((9 * C, le), jnp.bfloat16)],
        compiler_params=_cparams(),
    )(xe, rg["wconv"], rg["bconv"], rg["caw1"], rg["cab1"], rg["caw2"],
      rg["cab2"], rg["rgw"], rg["rgb"], mask)


def tail_call(xe, res, tp, mask, geom):
    N, C, le = xe.shape
    cout = tp["w3"].shape[0]
    return pl.pallas_call(
        _make_tail_kernel(geom),
        out_shape=jax.ShapeDtypeStruct((N, cout, le), jnp.float32),
        grid=(N,),
        in_specs=[_img_spec(C, le), _img_spec(C, le),
                  _full_spec((C, 9 * C)), _full_spec((C, 1)),
                  _full_spec((C, 9 * C)), _full_spec((C, 1)),
                  _full_spec((cout, 9 * C)), _full_spec((cout, 1)),
                  _full_spec((1, le))],
        out_specs=_img_spec(cout, le),
        scratch_shapes=[pltpu.VMEM((9 * C, le), jnp.bfloat16)],
        compiler_params=_cparams(),
    )(xe, res, tp["w1"], tp["b1"], tp["w2"], tp["b2"], tp["w3"], tp["b3"], mask)


# ----------------------------------------------------------------------------
# Weight packing (pre-reshaped, pre-cast bf16 conv weights; CA stays f32)
# ----------------------------------------------------------------------------
def _wflat(w, cin_pad=None, cout_pad=None):
    """(3,3,Cin,Cout) conv weight -> (Cout, 9*Cin) bf16, tap-major (ky,kx)."""
    _, _, cin, cout = w.shape
    if cin_pad is not None and cin_pad > cin:
        w = jnp.pad(w, ((0, 0), (0, 0), (0, cin_pad - cin), (0, 0)))
        cin = cin_pad
    if cout_pad is not None and cout_pad > cout:
        w = jnp.pad(w, ((0, 0), (0, 0), (0, 0), (0, cout_pad - cout)))
        cout = cout_pad
    return jnp.transpose(w.reshape(9 * cin, cout)).astype(jnp.bfloat16)


def _pack_rg(rgp, C, Cr):
    rcabs = rgp["rcabs"]
    wconv = jnp.stack([_wflat(rp[k]) for rp in rcabs for k in ("w1", "w2")])
    bconv = jnp.stack([rp[k].reshape(C, 1) for rp in rcabs for k in ("b1", "b2")])
    caw1 = jnp.stack([jnp.transpose(rp["ca_w1"]) for rp in rcabs])    # (R, Cr, C)
    cab1 = jnp.stack([rp["ca_b1"].reshape(Cr, 1) for rp in rcabs])    # (R, Cr, 1)
    caw2 = jnp.stack([jnp.transpose(rp["ca_w2"]) for rp in rcabs])    # (R, C, Cr)
    cab2 = jnp.stack([rp["ca_b2"].reshape(C, 1) for rp in rcabs])     # (R, C, 1)
    return dict(wconv=wconv, bconv=bconv, caw1=caw1, cab1=cab1,
                caw2=caw2, cab2=cab2,
                rgw=_wflat(rgp["conv_w"]), rgb=rgp["conv_b"].reshape(C, 1))


# ----------------------------------------------------------------------------
# RCAN forward (structure mirrors the PyTorch module)
# ----------------------------------------------------------------------------
def rcan_forward(x_nchw, params):
    N, _, H, W = x_nchw.shape
    C = params["sf_w"].shape[-1]
    Cr = params["rgs"][0]["rcabs"][0]["ca_w1"].shape[-1]
    assert C % 16 == 0, "TODO(synk): pad num_features to a multiple of 16"
    geom = _geom(H, W)
    mask = _make_mask(geom)

    xe = _to_ext(x_nchw, geom, c_pad=_HEAD_CIN)               # (N, 16, Le) f32

    sf_w = _wflat(params["sf_w"], cin_pad=_HEAD_CIN)          # (C, 144) bf16
    sf_b = params["sf_b"].reshape(C, 1)
    fe = head_call(xe, sf_w, sf_b, mask, geom, C)             # sf conv
    residual = fe

    h = fe
    for rgp in params["rgs"]:
        h = rg_call(h, _pack_rg(rgp, C, Cr), mask, geom)      # fused RG

    nc = params["conv2_image_b"].shape[0]
    tail = dict(
        w1=_wflat(params["conv1_w"]), b1=params["conv1_b"].reshape(C, 1),
        w2=_wflat(params["conv_image_w"]), b2=params["conv_image_b"].reshape(C, 1),
        w3=_wflat(params["conv2_image_w"], cout_pad=_TAIL_COUT),
        b3=jnp.pad(params["conv2_image_b"], (0, _TAIL_COUT - nc)).reshape(_TAIL_COUT, 1),
    )
    out_e = tail_call(h, residual, tail, mask, geom)          # fused tail
    return _from_ext(out_e, geom, nc)                         # (N, 3, H, W)


# ----------------------------------------------------------------------------
# Deterministic parameter initialization (matches PyTorch module shapes)
# ----------------------------------------------------------------------------
def init_params(key, num_features=16, num_rg=2, num_rcab=2, reduction=4):
    keys = iter(jax.random.split(key, 256))
    F, Fr = num_features, num_features // reduction

    def conv(cin, cout):
        w = jax.random.normal(next(keys), (3, 3, cin, cout), jnp.float32)
        w = w / np.sqrt(9.0 * cin)
        b = jax.random.normal(next(keys), (cout,), jnp.float32) * 0.01
        return w, b

    def dense(cin, cout):
        w = jax.random.normal(next(keys), (cin, cout), jnp.float32) / np.sqrt(cin)
        b = jax.random.normal(next(keys), (1, cout), jnp.float32) * 0.01
        return w, b

    sf_w, sf_b = conv(3, F)
    rgs = []
    for _ in range(num_rg):
        rcabs = []
        for _ in range(num_rcab):
            w1, b1 = conv(F, F)
            w2, b2 = conv(F, F)
            caw1, cab1 = dense(F, Fr)
            caw2, cab2 = dense(Fr, F)
            rcabs.append(dict(w1=w1, b1=b1, w2=w2, b2=b2,
                              ca_w1=caw1, ca_b1=cab1, ca_w2=caw2, ca_b2=cab2))
        cw, cb = conv(F, F)
        rgs.append(dict(rcabs=rcabs, conv_w=cw, conv_b=cb))
    conv1_w, conv1_b = conv(F, F)
    ci_w, ci_b = conv(F, F)
    c2_w, c2_b = conv(F, 3)
    return dict(sf_w=sf_w, sf_b=sf_b, rgs=rgs,
                conv1_w=conv1_w, conv1_b=conv1_b,
                conv_image_w=ci_w, conv_image_b=ci_b,
                conv2_image_w=c2_w, conv2_image_b=c2_b)


# ----------------------------------------------------------------------------
# Pure-JAX reference (bf16 matmul inputs + f32 accumulation, same as kernels)
# ----------------------------------------------------------------------------
def _conv3x3_ref(x, w, b, relu=False, res=None):
    out = lax.conv_general_dilated(
        x.astype(jnp.bfloat16), w.astype(jnp.bfloat16), (1, 1), "SAME",
        dimension_numbers=("NHWC", "HWIO", "NHWC"),
        preferred_element_type=jnp.float32)
    out = out + b.reshape(1, 1, 1, -1)
    if relu:
        out = jnp.maximum(out, 0.0)
    if res is not None:
        out = out + res
    return out


def _ca_res_ref(x, w1, b1, w2, b2, res):
    pooled = jnp.mean(x, axis=(1, 2))                       # (N, C) f32
    y = jnp.maximum(pooled @ w1 + b1, 0.0)
    a = jax.nn.sigmoid(y @ w2 + b2)
    return res + x * a[:, None, None, :]


def rcan_ref(x_nchw, params):
    x = jnp.transpose(x_nchw, (0, 2, 3, 1))
    x = _conv3x3_ref(x, params["sf_w"], params["sf_b"])
    residual = x
    h = x
    for rgp in params["rgs"]:
        g = h
        for rp in rgp["rcabs"]:
            t = _conv3x3_ref(g, rp["w1"], rp["b1"], relu=True)
            t = _conv3x3_ref(t, rp["w2"], rp["b2"])
            g = _ca_res_ref(t, rp["ca_w1"], rp["ca_b1"], rp["ca_w2"], rp["ca_b2"], res=g)
        h = _conv3x3_ref(g, rgp["conv_w"], rgp["conv_b"], res=h)
    h = _conv3x3_ref(h, params["conv1_w"], params["conv1_b"], res=residual)
    h = _conv3x3_ref(h, params["conv_image_w"], params["conv_image_b"])
    h = _conv3x3_ref(h, params["conv2_image_w"], params["conv2_image_b"])
    return jnp.transpose(h, (0, 3, 1, 2))


# ----------------------------------------------------------------------------
if __name__ == "__main__":
    key = jax.random.PRNGKey(0)
    kp, kx = jax.random.split(key)
    params = init_params(kp, num_features=16, num_rg=2, num_rcab=2, reduction=4)
    x = jax.random.normal(kx, (2, 3, 16, 16), jnp.float32)   # NCHW, like PyTorch

    out = jax.jit(rcan_forward)(x, params)
    out = jax.block_until_ready(out)
    assert out.shape == (2, 3, 16, 16)

    ref = rcan_ref(x, params)
    np.testing.assert_allclose(np.asarray(out), np.asarray(ref),
                               rtol=2e-2, atol=2e-2)
    print("KERNEL_OK")
</pallas_src>

<mosaic_0001>
module attributes {stable_mosaic.version = 11 : i64} {
  func.func @kernel(%arg0: i32, %arg1: memref<1x16x384xf32, #tpu.memory_space<vmem>>, %arg2: memref<16x144xbf16, #tpu.memory_space<vmem>>, %arg3: memref<16x1xf32, #tpu.memory_space<vmem>>, %arg4: memref<1x384xf32, #tpu.memory_space<vmem>>, %arg5: memref<1x16x384xf32, #tpu.memory_space<vmem>>, %arg6: memref<144x384xbf16, #tpu.memory_space<vmem>>) attributes {dimension_semantics = [#tpu.dimension_semantics<parallel>], iteration_bounds = array<i64: 2>, scalar_prefetch = 0 : i64, scratch_operands = 1 : i64, tpu.core_type = #tpu.core_type<tc>, window_params = [{transform_indices = @transform_0, window_bounds = array<i64: 1, 16, 384>}, {pipeline_mode = #tpu.pipeline_mode<synchronous>, transform_indices = @transform_1, window_bounds = array<i64: 16, 144>}, {pipeline_mode = #tpu.pipeline_mode<synchronous>, transform_indices = @transform_2, window_bounds = array<i64: 16, 1>}, {pipeline_mode = #tpu.pipeline_mode<synchronous>, transform_indices = @transform_3, window_bounds = array<i64: 1, 384>}, {transform_indices = @transform_4, window_bounds = array<i64: 1, 16, 384>}]} {
    %c0 = arith.constant 0 : index
    %c0_0 = arith.constant 0 : index
    %c0_1 = arith.constant 0 : index
    %0 = vector.load %arg1[%c0, %c0_0, %c0_1] : memref<1x16x384xf32, #tpu.memory_space<vmem>>, vector<1x16x384xf32>
    %1 = vector.shape_cast %0 : vector<1x16x384xf32> to vector<16x384xf32>
    %c0_2 = arith.constant 0 : index
    %c0_3 = arith.constant 0 : index
    %2 = vector.load %arg2[%c0_2, %c0_3] : memref<16x144xbf16, #tpu.memory_space<vmem>>, vector<16x144xbf16>
    %c19_i32 = arith.constant 19 : i32
    %3 = tpu.dynamic_rotate %1 by %c19_i32 dim 1 : vector<16x384xf32>, i32 -> vector<16x384xf32>
    %4 = arith.truncf %3 : vector<16x384xf32> to vector<16x384xbf16>
    %c0_4 = arith.constant 0 : index
    %c0_5 = arith.constant 0 : index
    %5 = vector.load %arg6[%c0_4, %c0_5] : memref<144x384xbf16, #tpu.memory_space<vmem>>, vector<16x384xbf16>
    tpu.vector_store %arg6[%c0_4, %c0_5], %4 {strides = array<i32>} : memref<144x384xbf16, #tpu.memory_space<vmem>>, vector<16x384xbf16>,
    %c18_i32 = arith.constant 18 : i32
    %6 = tpu.dynamic_rotate %1 by %c18_i32 dim 1 : vector<16x384xf32>, i32 -> vector<16x384xf32>
    %7 = arith.truncf %6 : vector<16x384xf32> to vector<16x384xbf16>
    %c16 = arith.constant 16 : index
    %c0_6 = arith.constant 0 : index
    %8 = vector.load %arg6[%c16, %c0_6] : memref<144x384xbf16, #tpu.memory_space<vmem>>, vector<16x384xbf16>
    tpu.vector_store %arg6[%c16, %c0_6], %7 {strides = array<i32>} : memref<144x384xbf16, #tpu.memory_space<vmem>>, vector<16x384xbf16>,
    %c17_i32 = arith.constant 17 : i32
    %9 = tpu.dynamic_rotate %1 by %c17_i32 dim 1 : vector<16x384xf32>, i32 -> vector<16x384xf32>
    %10 = arith.truncf %9 : vector<16x384xf32> to vector<16x384xbf16>
    %c32 = arith.constant 32 : index
    %c0_7 = arith.constant 0 : index
    %11 = vector.load %arg6[%c32, %c0_7] : memref<144x384xbf16, #tpu.memory_space<vmem>>, vector<16x384xbf16>
    tpu.vector_store %arg6[%c32, %c0_7], %10 {strides = array<i32>} : memref<144x384xbf16, #tpu.memory_space<vmem>>, vector<16x384xbf16>,
    %c1_i32 = arith.constant 1 : i32
    %12 = tpu.dynamic_rotate %1 by %c1_i32 dim 1 : vector<16x384xf32>, i32 -> vector<16x384xf32>
    %13 = arith.truncf %12 : vector<16x384xf32> to vector<16x384xbf16>
    %c48 = arith.constant 48 : index
    %c0_8 = arith.constant 0 : index
    %14 = vector.load %arg6[%c48, %c0_8] : memref<144x384xbf16, #tpu.memory_space<vmem>>, vector<16x384xbf16>
    tpu.vector_store %arg6[%c48, %c0_8], %13 {strides = array<i32>} : memref<144x384xbf16, #tpu.memory_space<vmem>>, vector<16x384xbf16>,
    %15 = arith.truncf %1 : vector<16x384xf32> to vector<16x384xbf16>
    %c64 = arith.constant 64 : index
    %c0_9 = arith.constant 0 : index
    %16 = vector.load %arg6[%c64, %c0_9] : memref<144x384xbf16, #tpu.memory_space<vmem>>, vector<16x384xbf16>
    tpu.vector_store %arg6[%c64, %c0_9], %15 {strides = array<i32>} : memref<144x384xbf16, #tpu.memory_space<vmem>>, vector<16x384xbf16>,
    %c383_i32 = arith.constant 383 : i32
    %17 = tpu.dynamic_rotate %1 by %c383_i32 dim 1 : vector<16x384xf32>, i32 -> vector<16x384xf32>
    %18 = arith.truncf %17 : vector<16x384xf32> to vector<16x384xbf16>
    %c80 = arith.constant 80 : index
    %c0_10 = arith.constant 0 : index
    %19 = vector.load %arg6[%c80, %c0_10] : memref<144x384xbf16, #tpu.memory_space<vmem>>, vector<16x384xbf16>
    tpu.vector_store %arg6[%c80, %c0_10], %18 {strides = array<i32>} : memref<144x384xbf16, #tpu.memory_space<vmem>>, vector<16x384xbf16>,
    %c367_i32 = arith.constant 367 : i32
    %20 = tpu.dynamic_rotate %1 by %c367_i32 dim 1 : vector<16x384xf32>, i32 -> vector<16x384xf32>
    %21 = arith.truncf %20 : vector<16x384xf32> to vector<16x384xbf16>
    %c96 = arith.constant 96 : index
    %c0_11 = arith.constant 0 : index
    %22 = vector.load %arg6[%c96, %c0_11] : memref<144x384xbf16, #tpu.memory_space<vmem>>, vector<16x384xbf16>
    tpu.vector_store %arg6[%c96, %c0_11], %21 {strides = array<i32>} : memref<144x384xbf16, #tpu.memory_space<vmem>>, vector<16x384xbf16>,
    %c366_i32 = arith.constant 366 : i32
    %23 = tpu.dynamic_rotate %1 by %c366_i32 dim 1 : vector<16x384xf32>, i32 -> vector<16x384xf32>
    %24 = arith.truncf %23 : vector<16x384xf32> to vector<16x384xbf16>
    %c112 = arith.constant 112 : index
    %c0_12 = arith.constant 0 : index
    %25 = vector.load %arg6[%c112, %c0_12] : memref<144x384xbf16, #tpu.memory_space<vmem>>, vector<16x384xbf16>
    tpu.vector_store %arg6[%c112, %c0_12], %24 {strides = array<i32>} : memref<144x384xbf16, #tpu.memory_space<vmem>>, vector<16x384xbf16>,
    %c365_i32 = arith.constant 365 : i32
    %26 = tpu.dynamic_rotate %1 by %c365_i32 dim 1 : vector<16x384xf32>, i32 -> vector<16x384xf32>
    %27 = arith.truncf %26 : vector<16x384xf32> to vector<16x384xbf16>
    %c128 = arith.constant 128 : index
    %c0_13 = arith.constant 0 : index
    %28 = vector.load %arg6[%c128, %c0_13] : memref<144x384xbf16, #tpu.memory_space<vmem>>, vector<16x384xbf16>
    tpu.vector_store %arg6[%c128, %c0_13], %27 {strides = array<i32>} : memref<144x384xbf16, #tpu.memory_space<vmem>>, vector<16x384xbf16>,
    %c0_14 = arith.constant 0 : index
    %c0_15 = arith.constant 0 : index
    %29 = vector.load %arg6[%c0_14, %c0_15] : memref<144x384xbf16, #tpu.memory_space<vmem>>, vector<144x384xbf16>
    %cst = arith.constant dense<0.000000e+00> : vector<16x384xf32>
    %30 = tpu.matmul %2, %29, %cst {dimension_numbers = #tpu.dot_dimension_numbers<[1], [0], [0], [1], [0, 0, 1, 1], [], []>} : vector<16x144xbf16>, vector<144x384xbf16>, vector<16x384xf32> -> vector<16x384xf32>
    %c0_16 = arith.constant 0 : index
    %c0_17 = arith.constant 0 : index
    %31 = vector.load %arg3[%c0_16, %c0_17] : memref<16x1xf32, #tpu.memory_space<vmem>>, vector<16x1xf32>
    %32 = vector.broadcast %31 : vector<16x1xf32> to vector<16x384xf32>
    %33 = arith.addf %30, %32 : vector<16x384xf32>
    %c0_18 = arith.constant 0 : index
    %c0_19 = arith.constant 0 : index
    %34 = vector.load %arg4[%c0_18, %c0_19] : memref<1x384xf32, #tpu.memory_space<vmem>>, vector<1x384xf32>
    %35 = vector.broadcast %34 : vector<1x384xf32> to vector<16x384xf32>
    %36 = arith.mulf %33, %35 : vector<16x384xf32>
    %c0_20 = arith.constant 0 : index
    %c0_21 = arith.constant 0 : index
    %c0_22 = arith.constant 0 : index
    %37 = vector.load %arg5[%c0_20, %c0_21, %c0_22] : memref<1x16x384xf32, #tpu.memory_space<vmem>>, vector<1x16x384xf32>
    %38 = vector.shape_cast %37 : vector<1x16x384xf32> to vector<16x384xf32>
    %39 = vector.shape_cast %36 : vector<16x384xf32> to vector<1x16x384xf32>
    tpu.vector_store %arg5[%c0_20, %c0_21, %c0_22], %39 {strides = array<i32>} : memref<1x16x384xf32, #tpu.memory_space<vmem>>, vector<1x16x384xf32>,
    return
  }
  func.func @transform_0(%arg0: i32) -> (i32, i32, i32) {
    %c0_i32 = arith.constant 0 : i32
    %c0_i32_0 = arith.constant 0 : i32
    %c0_i32_1 = arith.constant 0 : i32
    return %arg0, %c0_i32, %c0_i32_0 : i32, i32, i32
  }
  func.func @transform_1(%arg0: i32) -> (i32, i32) {
    %c0_i32 = arith.constant 0 : i32
    %c0_i32_0 = arith.constant 0 : i32
    %c0_i32_1 = arith.constant 0 : i32
    return %c0_i32, %c0_i32_0 : i32, i32
  }
  func.func @transform_2(%arg0: i32) -> (i32, i32) {
    %c0_i32 = arith.constant 0 : i32
    %c0_i32_0 = arith.constant 0 : i32
    %c0_i32_1 = arith.constant 0 : i32
    return %c0_i32, %c0_i32_0 : i32, i32
  }
  func.func @transform_3(%arg0: i32) -> (i32, i32) {
    %c0_i32 = arith.constant 0 : i32
    %c0_i32_0 = arith.constant 0 : i32
    %c0_i32_1 = arith.constant 0 : i32
    return %c0_i32, %c0_i32_0 : i32, i32
  }
  func.func @transform_4(%arg0: i32) -> (i32, i32, i32) {
    %c0_i32 = arith.constant 0 : i32
    %c0_i32_0 = arith.constant 0 : i32
    %c0_i32_1 = arith.constant 0 : i32
    return %arg0, %c0_i32, %c0_i32_0 : i32, i32, i32
  }
}

module attributes {stable_mosaic.version = 11 : i64} {
  func.func @kernel(%arg0: i32, %arg1: memref<1x16x384xf32, #tpu.memory_space<vmem>>, %arg2: memref<4x16x144xbf16, #tpu.memory_space<vmem>>, %arg3: memref<4x16x1xf32, #tpu.memory_space<vmem>>, %arg4: memref<2x4x16xf32, #tpu.memory_space<vmem>>, %arg5: memref<2x4x1xf32, #tpu.memory_space<vmem>>, %arg6: memref<2x16x4xf32, #tpu.memory_space<vmem>>, %arg7: memref<2x16x1xf32, #tpu.memory_space<vmem>>, %arg8: memref<16x144xbf16, #tpu.memory_space<vmem>>, %arg9: memref<16x1xf32, #tpu.memory_space<vmem>>, %arg10: memref<1x384xf32, #tpu.memory_space<vmem>>, %arg11: memref<1x16x384xf32, #tpu.memory_space<vmem>>, %arg12: memref<144x384xbf16, #tpu.memory_space<vmem>>) attributes {dimension_semantics = [#tpu.dimension_semantics<parallel>], iteration_bounds = array<i64: 2>, scalar_prefetch = 0 : i64, scratch_operands = 1 : i64, tpu.core_type = #tpu.core_type<tc>, window_params = [{transform_indices = @transform_0, window_bounds = array<i64: 1, 16, 384>}, {pipeline_mode = #tpu.pipeline_mode<synchronous>, transform_indices = @transform_1, window_bounds = array<i64: 4, 16, 144>}, {pipeline_mode = #tpu.pipeline_mode<synchronous>, transform_indices = @transform_2, window_bounds = array<i64: 4, 16, 1>}, {pipeline_mode = #tpu.pipeline_mode<synchronous>, transform_indices = @transform_3, window_bounds = array<i64: 2, 4, 16>}, {pipeline_mode = #tpu.pipeline_mode<synchronous>, transform_indices = @transform_4, window_bounds = array<i64: 2, 4, 1>}, {pipeline_mode = #tpu.pipeline_mode<synchronous>, transform_indices = @transform_5, window_bounds = array<i64: 2, 16, 4>}, {pipeline_mode = #tpu.pipeline_mode<synchronous>, transform_indices = @transform_6, window_bounds = array<i64: 2, 16, 1>}, {pipeline_mode = #tpu.pipeline_mode<synchronous>, transform_indices = @transform_7, window_bounds = array<i64: 16, 144>}, {pipeline_mode = #tpu.pipeline_mode<synchronous>, transform_indices = @transform_8, window_bounds = array<i64: 16, 1>}, {pipeline_mode = #tpu.pipeline_mode<synchronous>, transform_indices = @transform_9, window_bounds = array<i64: 1, 384>}, {transform_indices = @transform_10, window_bounds = array<i64: 1, 16, 384>}]} {
    %c0 = arith.constant 0 : index
    %c0_0 = arith.constant 0 : index
    %0 = vector.load %arg10[%c0, %c0_0] : memref<1x384xf32, #tpu.memory_space<vmem>>, vector<1x384xf32>
    %c0_1 = arith.constant 0 : index
    %c0_2 = arith.constant 0 : index
    %c0_3 = arith.constant 0 : index
    %1 = vector.load %arg1[%c0_1, %c0_2, %c0_3] : memref<1x16x384xf32, #tpu.memory_space<vmem>>, vector<1x16x384xf32>
    %2 = vector.shape_cast %1 : vector<1x16x384xf32> to vector<16x384xf32>
    %c0_4 = arith.constant 0 : index
    %c0_5 = arith.constant 0 : index
    %c0_6 = arith.constant 0 : index
    %3 = vector.load %arg2[%c0_4, %c0_5, %c0_6] : memref<4x16x144xbf16, #tpu.memory_space<vmem>>, vector<1x16x144xbf16>
    %4 = vector.shape_cast %3 : vector<1x16x144xbf16> to vector<16x144xbf16>
    %c19_i32 = arith.constant 19 : i32
    %5 = tpu.dynamic_rotate %2 by %c19_i32 dim 1 : vector<16x384xf32>, i32 -> vector<16x384xf32>
    %6 = arith.truncf %5 : vector<16x384xf32> to vector<16x384xbf16>
    %c0_7 = arith.constant 0 : index
    %c0_8 = arith.constant 0 : index
    %7 = vector.load %arg12[%c0_7, %c0_8] : memref<144x384xbf16, #tpu.memory_space<vmem>>, vector<16x384xbf16>
    tpu.vector_store %arg12[%c0_7, %c0_8], %6 {strides = array<i32>} : memref<144x384xbf16, #tpu.memory_space<vmem>>, vector<16x384xbf16>,
    %c18_i32 = arith.constant 18 : i32
    %8 = tpu.dynamic_rotate %2 by %c18_i32 dim 1 : vector<16x384xf32>, i32 -> vector<16x384xf32>
    %9 = arith.truncf %8 : vector<16x384xf32> to vector<16x384xbf16>
    %c16 = arith.constant 16 : index
    %c0_9 = arith.constant 0 : index
    %10 = vector.load %arg12[%c16, %c0_9] : memref<144x384xbf16, #tpu.memory_space<vmem>>, vector<16x384xbf16>
    tpu.vector_store %arg12[%c16, %c0_9], %9 {strides = array<i32>} : memref<144x384xbf16, #tpu.memory_space<vmem>>, vector<16x384xbf16>,
    %c17_i32 = arith.constant 17 : i32
    %11 = tpu.dynamic_rotate %2 by %c17_i32 dim 1 : vector<16x384xf32>, i32 -> vector<16x384xf32>
    %12 = arith.truncf %11 : vector<16x384xf32> to vector<16x384xbf16>
    %c32 = arith.constant 32 : index
    %c0_10 = arith.constant 0 : index
    %13 = vector.load %arg12[%c32, %c0_10] : memref<144x384xbf16, #tpu.memory_space<vmem>>, vector<16x384xbf16>
    tpu.vector_store %arg12[%c32, %c0_10], %12 {strides = array<i32>} : memref<144x384xbf16, #tpu.memory_space<vmem>>, vector<16x384xbf16>,
    %c1_i32 = arith.constant 1 : i32
    %14 = tpu.dynamic_rotate %2 by %c1_i32 dim 1 : vector<16x384xf32>, i32 -> vector<16x384xf32>
    %15 = arith.truncf %14 : vector<16x384xf32> to vector<16x384xbf16>
    %c48 = arith.constant 48 : index
    %c0_11 = arith.constant 0 : index
    %16 = vector.load %arg12[%c48, %c0_11] : memref<144x384xbf16, #tpu.memory_space<vmem>>, vector<16x384xbf16>
    tpu.vector_store %arg12[%c48, %c0_11], %15 {strides = array<i32>} : memref<144x384xbf16, #tpu.memory_space<vmem>>, vector<16x384xbf16>,
    %17 = arith.truncf %2 : vector<16x384xf32> to vector<16x384xbf16>
    %c64 = arith.constant 64 : index
    %c0_12 = arith.constant 0 : index
    %18 = vector.load %arg12[%c64, %c0_12] : memref<144x384xbf16, #tpu.memory_space<vmem>>, vector<16x384xbf16>
    tpu.vector_store %arg12[%c64, %c0_12], %17 {strides = array<i32>} : memref<144x384xbf16, #tpu.memory_space<vmem>>, vector<16x384xbf16>,
    %c383_i32 = arith.constant 383 : i32
    %19 = tpu.dynamic_rotate %2 by %c383_i32 dim 1 : vector<16x384xf32>, i32 -> vector<16x384xf32>
    %20 = arith.truncf %19 : vector<16x384xf32> to vector<16x384xbf16>
    %c80 = arith.constant 80 : index
    %c0_13 = arith.constant 0 : index
    %21 = vector.load %arg12[%c80, %c0_13] : memref<144x384xbf16, #tpu.memory_space<vmem>>, vector<16x384xbf16>
    tpu.vector_store %arg12[%c80, %c0_13], %20 {strides = array<i32>} : memref<144x384xbf16, #tpu.memory_space<vmem>>, vector<16x384xbf16>,
    %c367_i32 = arith.constant 367 : i32
    %22 = tpu.dynamic_rotate %2 by %c367_i32 dim 1 : vector<16x384xf32>, i32 -> vector<16x384xf32>
    %23 = arith.truncf %22 : vector<16x384xf32> to vector<16x384xbf16>
    %c96 = arith.constant 96 : index
    %c0_14 = arith.constant 0 : index
    %24 = vector.load %arg12[%c96, %c0_14] : memref<144x384xbf16, #tpu.memory_space<vmem>>, vector<16x384xbf16>
    tpu.vector_store %arg12[%c96, %c0_14], %23 {strides = array<i32>} : memref<144x384xbf16, #tpu.memory_space<vmem>>, vector<16x384xbf16>,
    %c366_i32 = arith.constant 366 : i32
    %25 = tpu.dynamic_rotate %2 by %c366_i32 dim 1 : vector<16x384xf32>, i32 -> vector<16x384xf32>
    %26 = arith.truncf %25 : vector<16x384xf32> to vector<16x384xbf16>
    %c112 = arith.constant 112 : index
    %c0_15 = arith.constant 0 : index
    %27 = vector.load %arg12[%c112, %c0_15] : memref<144x384xbf16, #tpu.memory_space<vmem>>, vector<16x384xbf16>
    tpu.vector_store %arg12[%c112, %c0_15], %26 {strides = array<i32>} : memref<144x384xbf16, #tpu.memory_space<vmem>>, vector<16x384xbf16>,
    %c365_i32 = arith.constant 365 : i32
    %28 = tpu.dynamic_rotate %2 by %c365_i32 dim 1 : vector<16x384xf32>, i32 -> vector<16x384xf32>
    %29 = arith.truncf %28 : vector<16x384xf32> to vector<16x384xbf16>
    %c128 = arith.constant 128 : index
    %c0_16 = arith.constant 0 : index
    %30 = vector.load %arg12[%c128, %c0_16] : memref<144x384xbf16, #tpu.memory_space<vmem>>, vector<16x384xbf16>
    tpu.vector_store %arg12[%c128, %c0_16], %29 {strides = array<i32>} : memref<144x384xbf16, #tpu.memory_space<vmem>>, vector<16x384xbf16>,
    %c0_17 = arith.constant 0 : index
    %c0_18 = arith.constant 0 : index
    %31 = vector.load %arg12[%c0_17, %c0_18] : memref<144x384xbf16, #tpu.memory_space<vmem>>, vector<144x384xbf16>
    %cst = arith.constant dense<0.000000e+00> : vector<16x384xf32>
    %32 = tpu.matmul %4, %31, %cst {dimension_numbers = #tpu.dot_dimension_numbers<[1], [0], [0], [1], [0, 0, 1, 1], [], []>} : vector<16x144xbf16>, vector<144x384xbf16>, vector<16x384xf32> -> vector<16x384xf32>
    %c0_19 = arith.constant 0 : index
    %c0_20 = arith.constant 0 : index
    %c0_21 = arith.constant 0 : index
    %33 = vector.load %arg3[%c0_19, %c0_20, %c0_21] : memref<4x16x1xf32, #tpu.memory_space<vmem>>, vector<1x16x1xf32>
    %34 = vector.shape_cast %33 : vector<1x16x1xf32> to vector<16x1xf32>
    %35 = vector.broadcast %34 : vector<16x1xf32> to vector<16x384xf32>
    %36 = arith.addf %32, %35 : vector<16x384xf32>
    %cst_22 = arith.constant 0.000000e+00 : f32
    %37 = vector.broadcast %cst_22 : f32 to vector<16x384xf32>
    %38 = arith.maximumf %36, %37 : vector<16x384xf32>
    %39 = vector.broadcast %0 : vector<1x384xf32> to vector<16x384xf32>
    %40 = arith.mulf %38, %39 : vector<16x384xf32>
    %c1 = arith.constant 1 : index
    %c0_23 = arith.constant 0 : index
    %c0_24 = arith.constant 0 : index
    %41 = vector.load %arg2[%c1, %c0_23, %c0_24] : memref<4x16x144xbf16, #tpu.memory_space<vmem>>, vector<1x16x144xbf16>
    %42 = vector.shape_cast %41 : vector<1x16x144xbf16> to vector<16x144xbf16>
    %c19_i32_25 = arith.constant 19 : i32
    %43 = tpu.dynamic_rotate %40 by %c19_i32_25 dim 1 : vector<16x384xf32>, i32 -> vector<16x384xf32>
    %44 = arith.truncf %43 : vector<16x384xf32> to vector<16x384xbf16>
    %c0_26 = arith.constant 0 : index
    %c0_27 = arith.constant 0 : index
    %45 = vector.load %arg12[%c0_26, %c0_27] : memref<144x384xbf16, #tpu.memory_space<vmem>>, vector<16x384xbf16>
    tpu.vector_store %arg12[%c0_26, %c0_27], %44 {strides = array<i32>} : memref<144x384xbf16, #tpu.memory_space<vmem>>, vector<16x384xbf16>,
    %c18_i32_28 = arith.constant 18 : i32
    %46 = tpu.dynamic_rotate %40 by %c18_i32_28 dim 1 : vector<16x384xf32>, i32 -> vector<16x384xf32>
    %47 = arith.truncf %46 : vector<16x384xf32> to vector<16x384xbf16>
    %c16_29 = arith.constant 16 : index
    %c0_30 = arith.constant 0 : index
    %48 = vector.load %arg12[%c16_29, %c0_30] : memref<144x384xbf16, #tpu.memory_space<vmem>>, vector<16x384xbf16>
    tpu.vector_store %arg12[%c16_29, %c0_30], %47 {strides = array<i32>} : memref<144x384xbf16, #tpu.memory_space<vmem>>, vector<16x384xbf16>,
    %c17_i32_31 = arith.constant 17 : i32
    %49 = tpu.dynamic_rotate %40 by %c17_i32_31 dim 1 : vector<16x384xf32>, i32 -> vector<16x384xf32>
    %50 = arith.truncf %49 : vector<16x384xf32> to vector<16x384xbf16>
    %c32_32 = arith.constant 32 : index
    %c0_33 = arith.constant 0 : index
    %51 = vector.load %arg12[%c32_32, %c0_33] : memref<144x384xbf16, #tpu.memory_space<vmem>>, vector<16x384xbf16>
    tpu.vector_store %arg12[%c32_32, %c0_33], %50 {strides = array<i32>} : memref<144x384xbf16, #tpu.memory_space<vmem>>, vector<16x384xbf16>,
    %c1_i32_34 = arith.constant 1 : i32
    %52 = tpu.dynamic_rotate %40 by %c1_i32_34 dim 1 : vector<16x384xf32>, i32 -> vector<16x384xf32>
    %53 = arith.truncf %52 : vector<16x384xf32> to vector<16x384xbf16>
    %c48_35 = arith.constant 48 : index
    %c0_36 = arith.constant 0 : index
    %54 = vector.load %arg12[%c48_35, %c0_36] : memref<144x384xbf16, #tpu.memory_space<vmem>>, vector<16x384xbf16>
    tpu.vector_store %arg12[%c48_35, %c0_36], %53 {strides = array<i32>} : memref<144x384xbf16, #tpu.memory_space<vmem>>, vector<16x384xbf16>,
    %55 = arith.truncf %40 : vector<16x384xf32> to vector<16x384xbf16>
    %c64_37 = arith.constant 64 : index
    %c0_38 = arith.constant 0 : index
    %56 = vector.load %arg12[%c64_37, %c0_38] : memref<144x384xbf16, #tpu.memory_space<vmem>>, vector<16x384xbf16>
    tpu.vector_store %arg12[%c64_37, %c0_38], %55 {strides = array<i32>} : memref<144x384xbf16, #tpu.memory_space<vmem>>, vector<16x384xbf16>,
    %c383_i32_39 = arith.constant 383 : i32
    %57 = tpu.dynamic_rotate %40 by %c383_i32_39 dim 1 : vector<16x384xf32>, i32 -> vector<16x384xf32>
    %58 = arith.truncf %57 : vector<16x384xf32> to vector<16x384xbf16>
    %c80_40 = arith.constant 80 : index
    %c0_41 = arith.constant 0 : index
    %59 = vector.load %arg12[%c80_40, %c0_41] : memref<144x384xbf16, #tpu.memory_space<vmem>>, vector<16x384xbf16>
    tpu.vector_store %arg12[%c80_40, %c0_41], %58 {strides = array<i32>} : memref<144x384xbf16, #tpu.memory_space<vmem>>, vector<16x384xbf16>,
    %c367_i32_42 = arith.constant 367 : i32
    %60 = tpu.dynamic_rotate %40 by %c367_i32_42 dim 1 : vector<16x384xf32>, i32 -> vector<16x384xf32>
    %61 = arith.truncf %60 : vector<16x384xf32> to vector<16x384xbf16>
    %c96_43 = arith.constant 96 : index
    %c0_44 = arith.constant 0 : index
    %62 = vector.load %arg12[%c96_43, %c0_44] : memref<144x384xbf16, #tpu.memory_space<vmem>>, vector<16x384xbf16>
    tpu.vector_store %arg12[%c96_43, %c0_44], %61 {strides = array<i32>} : memref<144x384xbf16, #tpu.memory_space<vmem>>, vector<16x384xbf16>,
    %c366_i32_45 = arith.constant 366 : i32
    %63 = tpu.dynamic_rotate %40 by %c366_i32_45 dim 1 : vector<16x384xf32>, i32 -> vector<16x384xf32>
    %64 = arith.truncf %63 : vector<16x384xf32> to vector<16x384xbf16>
    %c112_46 = arith.constant 112 : index
    %c0_47 = arith.constant 0 : index
    %65 = vector.load %arg12[%c112_46, %c0_47] : memref<144x384xbf16, #tpu.memory_space<vmem>>, vector<16x384xbf16>
    tpu.vector_store %arg12[%c112_46, %c0_47], %64 {strides = array<i32>} : memref<144x384xbf16, #tpu.memory_space<vmem>>, vector<16x384xbf16>,
    %c365_i32_48 = arith.constant 365 : i32
    %66 = tpu.dynamic_rotate %40 by %c365_i32_48 dim 1 : vector<16x384xf32>, i32 -> vector<16x384xf32>
    %67 = arith.truncf %66 : vector<16x384xf32> to vector<16x384xbf16>
    %c128_49 = arith.constant 128 : index
    %c0_50 = arith.constant 0 : index
    %68 = vector.load %arg12[%c128_49, %c0_50] : memref<144x384xbf16, #tpu.memory_space<vmem>>, vector<16x384xbf16>
    tpu.vector_store %arg12[%c128_49, %c0_50], %67 {strides = array<i32>} : memref<144x384xbf16, #tpu.memory_space<vmem>>, vector<16x384xbf16>,
    %c0_51 = arith.constant 0 : index
    %c0_52 = arith.constant 0 : index
    %69 = vector.load %arg12[%c0_51, %c0_52] : memref<144x384xbf16, #tpu.memory_space<vmem>>, vector<144x384xbf16>
    %cst_53 = arith.constant dense<0.000000e+00> : vector<16x384xf32>
    %70 = tpu.matmul %42, %69, %cst_53 {dimension_numbers = #tpu.dot_dimension_numbers<[1], [0], [0], [1], [0, 0, 1, 1], [], []>} : vector<16x144xbf16>, vector<144x384xbf16>, vector<16x384xf32> -> vector<16x384xf32>
    %c1_54 = arith.constant 1 : index
    %c0_55 = arith.constant 0 : index
    %c0_56 = arith.constant 0 : index
    %71 = vector.load %arg3[%c1_54, %c0_55, %c0_56] : memref<4x16x1xf32, #tpu.memory_space<vmem>>, vector<1x16x1xf32>
    %72 = vector.shape_cast %71 : vector<1x16x1xf32> to vector<16x1xf32>
    %73 = vector.broadcast %72 : vector<16x1xf32> to vector<16x384xf32>
    %74 = arith.addf %70, %73 : vector<16x384xf32>
    %75 = vector.broadcast %0 : vector<1x384xf32> to vector<16x384xf32>
    %76 = arith.mulf %74, %75 : vector<16x384xf32>
    %cst_57 = arith.constant dense<0.000000e+00> : vector<16xf32>
    %77 = vector.multi_reduction <add>, %76, %cst_57 [1] : vector<16x384xf32> to vector<16xf32>
    %78 = vector.shape_cast %77 : vector<16xf32> to vector<16x1xf32>
    %cst_58 = arith.constant 3.906250e-03 : f32
    %79 = vector.broadcast %cst_58 : f32 to vector<16x1xf32>
    %80 = arith.mulf %78, %79 : vector<16x1xf32>
    %c0_59 = arith.constant 0 : index
    %c0_60 = arith.constant 0 : index
    %c0_61 = arith.constant 0 : index
    %81 = vector.load %arg4[%c0_59, %c0_60, %c0_61] : memref<2x4x16xf32, #tpu.memory_space<vmem>>, vector<1x4x16xf32>
    %82 = vector.shape_cast %81 : vector<1x4x16xf32> to vector<4x16xf32>
    %cst_62 = arith.constant dense<0.000000e+00> : vector<4x1xf32>
    %83 = tpu.matmul %82, %80, %cst_62 {dimension_numbers = #tpu.dot_dimension_numbers<[1], [0], [0], [1], [0, 0, 1, 1], [], []>} : vector<4x16xf32>, vector<16x1xf32>, vector<4x1xf32> -> vector<4x1xf32>
    %c0_63 = arith.constant 0 : index
    %c0_64 = arith.constant 0 : index
    %c0_65 = arith.constant 0 : index
    %84 = vector.load %arg5[%c0_63, %c0_64, %c0_65] : memref<2x4x1xf32, #tpu.memory_space<vmem>>, vector<1x4x1xf32>
    %85 = vector.shape_cast %84 : vector<1x4x1xf32> to vector<4x1xf32>
    %86 = arith.addf %83, %85 : vector<4x1xf32>
    %cst_66 = arith.constant 0.000000e+00 : f32
    %87 = vector.broadcast %cst_66 : f32 to vector<4x1xf32>
    %88 = arith.maximumf %86, %87 : vector<4x1xf32>
    %c0_67 = arith.constant 0 : index
    %c0_68 = arith.constant 0 : index
    %c0_69 = arith.constant 0 : index
    %89 = vector.load %arg6[%c0_67, %c0_68, %c0_69] : memref<2x16x4xf32, #tpu.memory_space<vmem>>, vector<1x16x4xf32>
    %90 = vector.shape_cast %89 : vector<1x16x4xf32> to vector<16x4xf32>
    %cst_70 = arith.constant dense<0.000000e+00> : vector<16x1xf32>
    %91 = tpu.matmul %90, %88, %cst_70 {dimension_numbers = #tpu.dot_dimension_numbers<[1], [0], [0], [1], [0, 0, 1, 1], [], []>} : vector<16x4xf32>, vector<4x1xf32>, vector<16x1xf32> -> vector<16x1xf32>
    %c0_71 = arith.constant 0 : index
    %c0_72 = arith.constant 0 : index
    %c0_73 = arith.constant 0 : index
    %92 = vector.load %arg7[%c0_71, %c0_72, %c0_73] : memref<2x16x1xf32, #tpu.memory_space<vmem>>, vector<1x16x1xf32>
    %93 = vector.shape_cast %92 : vector<1x16x1xf32> to vector<16x1xf32>
    %94 = arith.addf %91, %93 : vector<16x1xf32>
    %cst_74 = arith.constant 0.000000e+00 : f32
    %95 = vector.broadcast %cst_74 : f32 to vector<16x1xf32>
    %96 = arith.subf %95, %94 : vector<16x1xf32>
    %97 = math.exp %96 : vector<16x1xf32>
    %cst_75 = arith.constant 1.000000e+00 : f32
    %98 = vector.broadcast %cst_75 : f32 to vector<16x1xf32>
    %99 = arith.addf %98, %97 : vector<16x1xf32>
    %cst_76 = arith.constant 1.000000e+00 : f32
    %100 = vector.broadcast %cst_76 : f32 to vector<16x1xf32>
    %101 = arith.divf %100, %99 : vector<16x1xf32>
    %102 = vector.broadcast %101 : vector<16x1xf32> to vector<16x384xf32>
    %103 = arith.mulf %74, %102 : vector<16x384xf32>
    %104 = vector.broadcast %0 : vector<1x384xf32> to vector<16x384xf32>
    %105 = arith.mulf %103, %104 : vector<16x384xf32>
    %106 = arith.addf %2, %105 : vector<16x384xf32>
    %c2 = arith.constant 2 : index
    %c0_77 = arith.constant 0 : index
    %c0_78 = arith.constant 0 : index
    %107 = vector.load %arg2[%c2, %c0_77, %c0_78] : memref<4x16x144xbf16, #tpu.memory_space<vmem>>, vector<1x16x144xbf16>
    %108 = vector.shape_cast %107 : vector<1x16x144xbf16> to vector<16x144xbf16>
    %c19_i32_79 = arith.constant 19 : i32
    %109 = tpu.dynamic_rotate %106 by %c19_i32_79 dim 1 : vector<16x384xf32>, i32 -> vector<16x384xf32>
    %110 = arith.truncf %109 : vector<16x384xf32> to vector<16x384xbf16>
    %c0_80 = arith.constant 0 : index
    %c0_81 = arith.constant 0 : index
    %111 = vector.load %arg12[%c0_80, %c0_81] : memref<144x384xbf16, #tpu.memory_space<vmem>>, vector<16x384xbf16>
    tpu.vector_store %arg12[%c0_80, %c0_81], %110 {strides = array<i32>} : memref<144x384xbf16, #tpu.memory_space<vmem>>, vector<16x384xbf16>,
    %c18_i32_82 = arith.constant 18 : i32
    %112 = tpu.dynamic_rotate %106 by %c18_i32_82 dim 1 : vector<16x384xf32>, i32 -> vector<16x384xf32>
    %113 = arith.truncf %112 : vector<16x384xf32> to vector<16x384xbf16>
    %c16_83 = arith.constant 16 : index
    %c0_84 = arith.constant 0 : index
    %114 = vector.load %arg12[%c16_83, %c0_84] : memref<144x384xbf16, #tpu.memory_space<vmem>>, vector<16x384xbf16>
    tpu.vector_store %arg12[%c16_83, %c0_84], %113 {strides = array<i32>} : memref<144x384xbf16, #tpu.memory_space<vmem>>, vector<16x384xbf16>,
    %c17_i32_85 = arith.constant 17 : i32
    %115 = tpu.dynamic_rotate %106 by %c17_i32_85 dim 1 : vector<16x384xf32>, i32 -> vector<16x384xf32>
    %116 = arith.truncf %115 : vector<16x384xf32> to vector<16x384xbf16>
    %c32_86 = arith.constant 32 : index
    %c0_87 = arith.constant 0 : index
    %117 = vector.load %arg12[%c32_86, %c0_87] : memref<144x384xbf16, #tpu.memory_space<vmem>>, vector<16x384xbf16>
    tpu.vector_store %arg12[%c32_86, %c0_87], %116 {strides = array<i32>} : memref<144x384xbf16, #tpu.memory_space<vmem>>, vector<16x384xbf16>,
    %c1_i32_88 = arith.constant 1 : i32
    %118 = tpu.dynamic_rotate %106 by %c1_i32_88 dim 1 : vector<16x384xf32>, i32 -> vector<16x384xf32>
    %119 = arith.truncf %118 : vector<16x384xf32> to vector<16x384xbf16>
    %c48_89 = arith.constant 48 : index
    %c0_90 = arith.constant 0 : index
    %120 = vector.load %arg12[%c48_89, %c0_90] : memref<144x384xbf16, #tpu.memory_space<vmem>>, vector<16x384xbf16>
    tpu.vector_store %arg12[%c48_89, %c0_90], %119 {strides = array<i32>} : memref<144x384xbf16, #tpu.memory_space<vmem>>, vector<16x384xbf16>,
    %121 = arith.truncf %106 : vector<16x384xf32> to vector<16x384xbf16>
    %c64_91 = arith.constant 64 : index
    %c0_92 = arith.constant 0 : index
    %122 = vector.load %arg12[%c64_91, %c0_92] : memref<144x384xbf16, #tpu.memory_space<vmem>>, vector<16x384xbf16>
    tpu.vector_store %arg12[%c64_91, %c0_92], %121 {strides = array<i32>} : memref<144x384xbf16, #tpu.memory_space<vmem>>, vector<16x384xbf16>,
    %c383_i32_93 = arith.constant 383 : i32
    %123 = tpu.dynamic_rotate %106 by %c383_i32_93 dim 1 : vector<16x384xf32>, i32 -> vector<16x384xf32>
    %124 = arith.truncf %123 : vector<16x384xf32> to vector<16x384xbf16>
    %c80_94 = arith.constant 80 : index
    %c0_95 = arith.constant 0 : index
    %125 = vector.load %arg12[%c80_94, %c0_95] : memref<144x384xbf16, #tpu.memory_space<vmem>>, vector<16x384xbf16>
    tpu.vector_store %arg12[%c80_94, %c0_95], %124 {strides = array<i32>} : memref<144x384xbf16, #tpu.memory_space<vmem>>, vector<16x384xbf16>,
    %c367_i32_96 = arith.constant 367 : i32
    %126 = tpu.dynamic_rotate %106 by %c367_i32_96 dim 1 : vector<16x384xf32>, i32 -> vector<16x384xf32>
    %127 = arith.truncf %126 : vector<16x384xf32> to vector<16x384xbf16>
    %c96_97 = arith.constant 96 : index
    %c0_98 = arith.constant 0 : index
    %128 = vector.load %arg12[%c96_97, %c0_98] : memref<144x384xbf16, #tpu.memory_space<vmem>>, vector<16x384xbf16>
    tpu.vector_store %arg12[%c96_97, %c0_98], %127 {strides = array<i32>} : memref<144x384xbf16, #tpu.memory_space<vmem>>, vector<16x384xbf16>,
    %c366_i32_99 = arith.constant 366 : i32
    %129 = tpu.dynamic_rotate %106 by %c366_i32_99 dim 1 : vector<16x384xf32>, i32 -> vector<16x384xf32>
    %130 = arith.truncf %129 : vector<16x384xf32> to vector<16x384xbf16>
    %c112_100 = arith.constant 112 : index
    %c0_101 = arith.constant 0 : index
    %131 = vector.load %arg12[%c112_100, %c0_101] : memref<144x384xbf16, #tpu.memory_space<vmem>>, vector<16x384xbf16>
    tpu.vector_store %arg12[%c112_100, %c0_101], %130 {strides = array<i32>} : memref<144x384xbf16, #tpu.memory_space<vmem>>, vector<16x384xbf16>,
    %c365_i32_102 = arith.constant 365 : i32
    %132 = tpu.dynamic_rotate %106 by %c365_i32_102 dim 1 : vector<16x384xf32>, i32 -> vector<16x384xf32>
    %133 = arith.truncf %132 : vector<16x384xf32> to vector<16x384xbf16>
    %c128_103 = arith.constant 128 : index
    %c0_104 = arith.constant 0 : index
    %134 = vector.load %arg12[%c128_103, %c0_104] : memref<144x384xbf16, #tpu.memory_space<vmem>>, vector<16x384xbf16>
    tpu.vector_store %arg12[%c128_103, %c0_104], %133 {strides = array<i32>} : memref<144x384xbf16, #tpu.memory_space<vmem>>, vector<16x384xbf16>,
    %c0_105 = arith.constant 0 : index
    %c0_106 = arith.constant 0 : index
    %135 = vector.load %arg12[%c0_105, %c0_106] : memref<144x384xbf16, #tpu.memory_space<vmem>>, vector<144x384xbf16>
    %cst_107 = arith.constant dense<0.000000e+00> : vector<16x384xf32>
    %136 = tpu.matmul %108, %135, %cst_107 {dimension_numbers = #tpu.dot_dimension_numbers<[1], [0], [0], [1], [0, 0, 1, 1], [], []>} : vector<16x144xbf16>, vector<144x384xbf16>, vector<16x384xf32> -> vector<16x384xf32>
    %c2_108 = arith.constant 2 : index
    %c0_109 = arith.constant 0 : index
    %c0_110 = arith.constant 0 : index
    %137 = vector.load %arg3[%c2_108, %c0_109, %c0_110] : memref<4x16x1xf32, #tpu.memory_space<vmem>>, vector<1x16x1xf32>
    %138 = vector.shape_cast %137 : vector<1x16x1xf32> to vector<16x1xf32>
    %139 = vector.broadcast %138 : vector<16x1xf32> to vector<16x384xf32>
    %140 = arith.addf %136, %139 : vector<16x384xf32>
    %cst_111 = arith.constant 0.000000e+00 : f32
    %141 = vector.broadcast %cst_111 : f32 to vector<16x384xf32>
    %142 = arith.maximumf %140, %141 : vector<16x384xf32>
    %143 = vector.broadcast %0 : vector<1x384xf32> to vector<16x384xf32>
    %144 = arith.mulf %142, %143 : vector<16x384xf32>
    %c3 = arith.constant 3 : index
    %c0_112 = arith.constant 0 : index
    %c0_113 = arith.constant 0 : index
    %145 = vector.load %arg2[%c3, %c0_112, %c0_113] : memref<4x16x144xbf16, #tpu.memory_space<vmem>>, vector<1x16x144xbf16>
    %146 = vector.shape_cast %145 : vector<1x16x144xbf16> to vector<16x144xbf16>
    %c19_i32_114 = arith.constant 19 : i32
    %147 = tpu.dynamic_rotate %144 by %c19_i32_114 dim 1 : vector<16x384xf32>, i32 -> vector<16x384xf32>
    %148 = arith.truncf %147 : vector<16x384xf32> to vector<16x384xbf16>
    %c0_115 = arith.constant 0 : index
    %c0_116 = arith.constant 0 : index
    %149 = vector.load %arg12[%c0_115, %c0_116] : memref<144x384xbf16, #tpu.memory_space<vmem>>, vector<16x384xbf16>
    tpu.vector_store %arg12[%c0_115, %c0_116], %148 {strides = array<i32>} : memref<144x384xbf16, #tpu.memory_space<vmem>>, vector<16x384xbf16>,
    %c18_i32_117 = arith.constant 18 : i32
    %150 = tpu.dynamic_rotate %144 by %c18_i32_117 dim 1 : vector<16x384xf32>, i32 -> vector<16x384xf32>
    %151 = arith.truncf %150 : vector<16x384xf32> to vector<16x384xbf16>
    %c16_118 = arith.constant 16 : index
    %c0_119 = arith.constant 0 : index
    %152 = vector.load %arg12[%c16_118, %c0_119] : memref<144x384xbf16, #tpu.memory_space<vmem>>, vector<16x384xbf16>
    tpu.vector_store %arg12[%c16_118, %c0_119], %151 {strides = array<i32>} : memref<144x384xbf16, #tpu.memory_space<vmem>>, vector<16x384xbf16>,
    %c17_i32_120 = arith.constant 17 : i32
    %153 = tpu.dynamic_rotate %144 by %c17_i32_120 dim 1 : vector<16x384xf32>, i32 -> vector<16x384xf32>
    %154 = arith.truncf %153 : vector<16x384xf32> to vector<16x384xbf16>
    %c32_121 = arith.constant 32 : index
    %c0_122 = arith.constant 0 : index
    %155 = vector.load %arg12[%c32_121, %c0_122] : memref<144x384xbf16, #tpu.memory_space<vmem>>, vector<16x384xbf16>
    tpu.vector_store %arg12[%c32_121, %c0_122], %154 {strides = array<i32>} : memref<144x384xbf16, #tpu.memory_space<vmem>>, vector<16x384xbf16>,
    %c1_i32_123 = arith.constant 1 : i32
    %156 = tpu.dynamic_rotate %144 by %c1_i32_123 dim 1 : vector<16x384xf32>, i32 -> vector<16x384xf32>
    %157 = arith.truncf %156 : vector<16x384xf32> to vector<16x384xbf16>
    %c48_124 = arith.constant 48 : index
    %c0_125 = arith.constant 0 : index
    %158 = vector.load %arg12[%c48_124, %c0_125] : memref<144x384xbf16, #tpu.memory_space<vmem>>, vector<16x384xbf16>
    tpu.vector_store %arg12[%c48_124, %c0_125], %157 {strides = array<i32>} : memref<144x384xbf16, #tpu.memory_space<vmem>>, vector<16x384xbf16>,
    %159 = arith.truncf %144 : vector<16x384xf32> to vector<16x384xbf16>
    %c64_126 = arith.constant 64 : index
    %c0_127 = arith.constant 0 : index
    %160 = vector.load %arg12[%c64_126, %c0_127] : memref<144x384xbf16, #tpu.memory_space<vmem>>, vector<16x384xbf16>
    tpu.vector_store %arg12[%c64_126, %c0_127], %159 {strides = array<i32>} : memref<144x384xbf16, #tpu.memory_space<vmem>>, vector<16x384xbf16>,
    %c383_i32_128 = arith.constant 383 : i32
    %161 = tpu.dynamic_rotate %144 by %c383_i32_128 dim 1 : vector<16x384xf32>, i32 -> vector<16x384xf32>
    %162 = arith.truncf %161 : vector<16x384xf32> to vector<16x384xbf16>
    %c80_129 = arith.constant 80 : index
    %c0_130 = arith.constant 0 : index
    %163 = vector.load %arg12[%c80_129, %c0_130] : memref<144x384xbf16, #tpu.memory_space<vmem>>, vector<16x384xbf16>
    tpu.vector_store %arg12[%c80_129, %c0_130], %162 {strides = array<i32>} : memref<144x384xbf16, #tpu.memory_space<vmem>>, vector<16x384xbf16>,
    %c367_i32_131 = arith.constant 367 : i32
    %164 = tpu.dynamic_rotate %144 by %c367_i32_131 dim 1 : vector<16x384xf32>, i32 -> vector<16x384xf32>
    %165 = arith.truncf %164 : vector<16x384xf32> to vector<16x384xbf16>
    %c96_132 = arith.constant 96 : index
    %c0_133 = arith.constant 0 : index
    %166 = vector.load %arg12[%c96_132, %c0_133] : memref<144x384xbf16, #tpu.memory_space<vmem>>, vector<16x384xbf16>
    tpu.vector_store %arg12[%c96_132, %c0_133], %165 {strides = array<i32>} : memref<144x384xbf16, #tpu.memory_space<vmem>>, vector<16x384xbf16>,
    %c366_i32_134 = arith.constant 366 : i32
    %167 = tpu.dynamic_rotate %144 by %c366_i32_134 dim 1 : vector<16x384xf32>, i32 -> vector<16x384xf32>
    %168 = arith.truncf %167 : vector<16x384xf32> to vector<16x384xbf16>
    %c112_135 = arith.constant 112 : index
    %c0_136 = arith.constant 0 : index
    %169 = vector.load %arg12[%c112_135, %c0_136] : memref<144x384xbf16, #tpu.memory_space<vmem>>, vector<16x384xbf16>
    tpu.vector_store %arg12[%c112_135, %c0_136], %168 {strides = array<i32>} : memref<144x384xbf16, #tpu.memory_space<vmem>>, vector<16x384xbf16>,
    %c365_i32_137 = arith.constant 365 : i32
    %170 = tpu.dynamic_rotate %144 by %c365_i32_137 dim 1 : vector<16x384xf32>, i32 -> vector<16x384xf32>
    %171 = arith.truncf %170 : vector<16x384xf32> to vector<16x384xbf16>
    %c128_138 = arith.constant 128 : index
    %c0_139 = arith.constant 0 : index
    %172 = vector.load %arg12[%c128_138, %c0_139] : memref<144x384xbf16, #tpu.memory_space<vmem>>, vector<16x384xbf16>
    tpu.vector_store %arg12[%c128_138, %c0_139], %171 {strides = array<i32>} : memref<144x384xbf16, #tpu.memory_space<vmem>>, vector<16x384xbf16>,
    %c0_140 = arith.constant 0 : index
    %c0_141 = arith.constant 0 : index
    %173 = vector.load %arg12[%c0_140, %c0_141] : memref<144x384xbf16, #tpu.memory_space<vmem>>, vector<144x384xbf16>
    %cst_142 = arith.constant dense<0.000000e+00> : vector<16x384xf32>
    %174 = tpu.matmul %146, %173, %cst_142 {dimension_numbers = #tpu.dot_dimension_numbers<[1], [0], [0], [1], [0, 0, 1, 1], [], []>} : vector<16x144xbf16>, vector<144x384xbf16>, vector<16x384xf32> -> vector<16x384xf32>
    %c3_143 = arith.constant 3 : index
    %c0_144 = arith.constant 0 : index
    %c0_145 = arith.constant 0 : index
    %175 = vector.load %arg3[%c3_143, %c0_144, %c0_145] : memref<4x16x1xf32, #tpu.memory_space<vmem>>, vector<1x16x1xf32>
    %176 = vector.shape_cast %175 : vector<1x16x1xf32> to vector<16x1xf32>
    %177 = vector.broadcast %176 : vector<16x1xf32> to vector<16x384xf32>
    %178 = arith.addf %174, %177 : vector<16x384xf32>
    %179 = vector.broadcast %0 : vector<1x384xf32> to vector<16x384xf32>
    %180 = arith.mulf %178, %179 : vector<16x384xf32>
    %cst_146 = arith.constant dense<0.000000e+00> : vector<16xf32>
    %181 = vector.multi_reduction <add>, %180, %cst_146 [1] : vector<16x384xf32> to vector<16xf32>
    %182 = vector.shape_cast %181 : vector<16xf32> to vector<16x1xf32>
    %cst_147 = arith.constant 3.906250e-03 : f32
    %183 = vector.broadcast %cst_147 : f32 to vector<16x1xf32>
    %184 = arith.mulf %182, %183 : vector<16x1xf32>
    %c1_148 = arith.constant 1 : index
    %c0_149 = arith.constant 0 : index
    %c0_150 = arith.constant 0 : index
    %185 = vector.load %arg4[%c1_148, %c0_149, %c0_150] : memref<2x4x16xf32, #tpu.memory_space<vmem>>, vector<1x4x16xf32>
    %186 = vector.shape_cast %185 : vector<1x4x16xf32> to vector<4x16xf32>
    %cst_151 = arith.constant dense<0.000000e+00> : vector<4x1xf32>
    %187 = tpu.matmul %186, %184, %cst_151 {dimension_numbers = #tpu.dot_dimension_numbers<[1], [0], [0], [1], [0, 0, 1, 1], [], []>} : vector<4x16xf32>, vector<16x1xf32>, vector<4x1xf32> -> vector<4x1xf32>
    %c1_152 = arith.constant 1 : index
    %c0_153 = arith.constant 0 : index
    %c0_154 = arith.constant 0 : index
    %188 = vector.load %arg5[%c1_152, %c0_153, %c0_154] : memref<2x4x1xf32, #tpu.memory_space<vmem>>, vector<1x4x1xf32>
    %189 = vector.shape_cast %188 : vector<1x4x1xf32> to vector<4x1xf32>
    %190 = arith.addf %187, %189 : vector<4x1xf32>
    %cst_155 = arith.constant 0.000000e+00 : f32
    %191 = vector.broadcast %cst_155 : f32 to vector<4x1xf32>
    %192 = arith.maximumf %190, %191 : vector<4x1xf32>
    %c1_156 = arith.constant 1 : index
    %c0_157 = arith.constant 0 : index
    %c0_158 = arith.constant 0 : index
    %193 = vector.load %arg6[%c1_156, %c0_157, %c0_158] : memref<2x16x4xf32, #tpu.memory_space<vmem>>, vector<1x16x4xf32>
    %194 = vector.shape_cast %193 : vector<1x16x4xf32> to vector<16x4xf32>
    %cst_159 = arith.constant dense<0.000000e+00> : vector<16x1xf32>
    %195 = tpu.matmul %194, %192, %cst_159 {dimension_numbers = #tpu.dot_dimension_numbers<[1], [0], [0], [1], [0, 0, 1, 1], [], []>} : vector<16x4xf32>, vector<4x1xf32>, vector<16x1xf32> -> vector<16x1xf32>
    %c1_160 = arith.constant 1 : index
    %c0_161 = arith.constant 0 : index
    %c0_162 = arith.constant 0 : index
    %196 = vector.load %arg7[%c1_160, %c0_161, %c0_162] : memref<2x16x1xf32, #tpu.memory_space<vmem>>, vector<1x16x1xf32>
    %197 = vector.shape_cast %196 : vector<1x16x1xf32> to vector<16x1xf32>
    %198 = arith.addf %195, %197 : vector<16x1xf32>
    %cst_163 = arith.constant 0.000000e+00 : f32
    %199 = vector.broadcast %cst_163 : f32 to vector<16x1xf32>
    %200 = arith.subf %199, %198 : vector<16x1xf32>
    %201 = math.exp %200 : vector<16x1xf32>
    %cst_164 = arith.constant 1.000000e+00 : f32
    %202 = vector.broadcast %cst_164 : f32 to vector<16x1xf32>
    %203 = arith.addf %202, %201 : vector<16x1xf32>
    %cst_165 = arith.constant 1.000000e+00 : f32
    %204 = vector.broadcast %cst_165 : f32 to vector<16x1xf32>
    %205 = arith.divf %204, %203 : vector<16x1xf32>
    %206 = vector.broadcast %205 : vector<16x1xf32> to vector<16x384xf32>
    %207 = arith.mulf %178, %206 : vector<16x384xf32>
    %208 = vector.broadcast %0 : vector<1x384xf32> to vector<16x384xf32>
    %209 = arith.mulf %207, %208 : vector<16x384xf32>
    %210 = arith.addf %106, %209 : vector<16x384xf32>
    %c0_166 = arith.constant 0 : index
    %c0_167 = arith.constant 0 : index
    %211 = vector.load %arg8[%c0_166, %c0_167] : memref<16x144xbf16, #tpu.memory_space<vmem>>, vector<16x144xbf16>
    %c19_i32_168 = arith.constant 19 : i32
    %212 = tpu.dynamic_rotate %210 by %c19_i32_168 dim 1 : vector<16x384xf32>, i32 -> vector<16x384xf32>
    %213 = arith.truncf %212 : vector<16x384xf32> to vector<16x384xbf16>
    %c0_169 = arith.constant 0 : index
    %c0_170 = arith.constant 0 : index
    %214 = vector.load %arg12[%c0_169, %c0_170] : memref<144x384xbf16, #tpu.memory_space<vmem>>, vector<16x384xbf16>
    tpu.vector_store %arg12[%c0_169, %c0_170], %213 {strides = array<i32>} : memref<144x384xbf16, #tpu.memory_space<vmem>>, vector<16x384xbf16>,
    %c18_i32_171 = arith.constant 18 : i32
    %215 = tpu.dynamic_rotate %210 by %c18_i32_171 dim 1 : vector<16x384xf32>, i32 -> vector<16x384xf32>
    %216 = arith.truncf %215 : vector<16x384xf32> to vector<16x384xbf16>
    %c16_172 = arith.constant 16 : index
    %c0_173 = arith.constant 0 : index
    %217 = vector.load %arg12[%c16_172, %c0_173] : memref<144x384xbf16, #tpu.memory_space<vmem>>, vector<16x384xbf16>
    tpu.vector_store %arg12[%c16_172, %c0_173], %216 {strides = array<i32>} : memref<144x384xbf16, #tpu.memory_space<vmem>>, vector<16x384xbf16>,
    %c17_i32_174 = arith.constant 17 : i32
    %218 = tpu.dynamic_rotate %210 by %c17_i32_174 dim 1 : vector<16x384xf32>, i32 -> vector<16x384xf32>
    %219 = arith.truncf %218 : vector<16x384xf32> to vector<16x384xbf16>
    %c32_175 = arith.constant 32 : index
    %c0_176 = arith.constant 0 : index
    %220 = vector.load %arg12[%c32_175, %c0_176] : memref<144x384xbf16, #tpu.memory_space<vmem>>, vector<16x384xbf16>
    tpu.vector_store %arg12[%c32_175, %c0_176], %219 {strides = array<i32>} : memref<144x384xbf16, #tpu.memory_space<vmem>>, vector<16x384xbf16>,
    %c1_i32_177 = arith.constant 1 : i32
    %221 = tpu.dynamic_rotate %210 by %c1_i32_177 dim 1 : vector<16x384xf32>, i32 -> vector<16x384xf32>
    %222 = arith.truncf %221 : vector<16x384xf32> to vector<16x384xbf16>
    %c48_178 = arith.constant 48 : index
    %c0_179 = arith.constant 0 : index
    %223 = vector.load %arg12[%c48_178, %c0_179] : memref<144x384xbf16, #tpu.memory_space<vmem>>, vector<16x384xbf16>
    tpu.vector_store %arg12[%c48_178, %c0_179], %222 {strides = array<i32>} : memref<144x384xbf16, #tpu.memory_space<vmem>>, vector<16x384xbf16>,
    %224 = arith.truncf %210 : vector<16x384xf32> to vector<16x384xbf16>
    %c64_180 = arith.constant 64 : index
    %c0_181 = arith.constant 0 : index
    %225 = vector.load %arg12[%c64_180, %c0_181] : memref<144x384xbf16, #tpu.memory_space<vmem>>, vector<16x384xbf16>
    tpu.vector_store %arg12[%c64_180, %c0_181], %224 {strides = array<i32>} : memref<144x384xbf16, #tpu.memory_space<vmem>>, vector<16x384xbf16>,
    %c383_i32_182 = arith.constant 383 : i32
    %226 = tpu.dynamic_rotate %210 by %c383_i32_182 dim 1 : vector<16x384xf32>, i32 -> vector<16x384xf32>
    %227 = arith.truncf %226 : vector<16x384xf32> to vector<16x384xbf16>
    %c80_183 = arith.constant 80 : index
    %c0_184 = arith.constant 0 : index
    %228 = vector.load %arg12[%c80_183, %c0_184] : memref<144x384xbf16, #tpu.memory_space<vmem>>, vector<16x384xbf16>
    tpu.vector_store %arg12[%c80_183, %c0_184], %227 {strides = array<i32>} : memref<144x384xbf16, #tpu.memory_space<vmem>>, vector<16x384xbf16>,
    %c367_i32_185 = arith.constant 367 : i32
    %229 = tpu.dynamic_rotate %210 by %c367_i32_185 dim 1 : vector<16x384xf32>, i32 -> vector<16x384xf32>
    %230 = arith.truncf %229 : vector<16x384xf32> to vector<16x384xbf16>
    %c96_186 = arith.constant 96 : index
    %c0_187 = arith.constant 0 : index
    %231 = vector.load %arg12[%c96_186, %c0_187] : memref<144x384xbf16, #tpu.memory_space<vmem>>, vector<16x384xbf16>
    tpu.vector_store %arg12[%c96_186, %c0_187], %230 {strides = array<i32>} : memref<144x384xbf16, #tpu.memory_space<vmem>>, vector<16x384xbf16>,
    %c366_i32_188 = arith.constant 366 : i32
    %232 = tpu.dynamic_rotate %210 by %c366_i32_188 dim 1 : vector<16x384xf32>, i32 -> vector<16x384xf32>
    %233 = arith.truncf %232 : vector<16x384xf32> to vector<16x384xbf16>
    %c112_189 = arith.constant 112 : index
    %c0_190 = arith.constant 0 : index
    %234 = vector.load %arg12[%c112_189, %c0_190] : memref<144x384xbf16, #tpu.memory_space<vmem>>, vector<16x384xbf16>
    tpu.vector_store %arg12[%c112_189, %c0_190], %233 {strides = array<i32>} : memref<144x384xbf16, #tpu.memory_space<vmem>>, vector<16x384xbf16>,
    %c365_i32_191 = arith.constant 365 : i32
    %235 = tpu.dynamic_rotate %210 by %c365_i32_191 dim 1 : vector<16x384xf32>, i32 -> vector<16x384xf32>
    %236 = arith.truncf %235 : vector<16x384xf32> to vector<16x384xbf16>
    %c128_192 = arith.constant 128 : index
    %c0_193 = arith.constant 0 : index
    %237 = vector.load %arg12[%c128_192, %c0_193] : memref<144x384xbf16, #tpu.memory_space<vmem>>, vector<16x384xbf16>
    tpu.vector_store %arg12[%c128_192, %c0_193], %236 {strides = array<i32>} : memref<144x384xbf16, #tpu.memory_space<vmem>>, vector<16x384xbf16>,
    %c0_194 = arith.constant 0 : index
    %c0_195 = arith.constant 0 : index
    %238 = vector.load %arg12[%c0_194, %c0_195] : memref<144x384xbf16, #tpu.memory_space<vmem>>, vector<144x384xbf16>
    %cst_196 = arith.constant dense<0.000000e+00> : vector<16x384xf32>
    %239 = tpu.matmul %211, %238, %cst_196 {dimension_numbers = #tpu.dot_dimension_numbers<[1], [0], [0], [1], [0, 0, 1, 1], [], []>} : vector<16x144xbf16>, vector<144x384xbf16>, vector<16x384xf32> -> vector<16x384xf32>
    %c0_197 = arith.constant 0 : index
    %c0_198 = arith.constant 0 : index
    %240 = vector.load %arg9[%c0_197, %c0_198] : memref<16x1xf32, #tpu.memory_space<vmem>>, vector<16x1xf32>
    %241 = vector.broadcast %240 : vector<16x1xf32> to vector<16x384xf32>
    %242 = arith.addf %239, %241 : vector<16x384xf32>
    %243 = vector.broadcast %0 : vector<1x384xf32> to vector<16x384xf32>
    %244 = arith.mulf %242, %243 : vector<16x384xf32>
    %245 = arith.addf %2, %244 : vector<16x384xf32>
    %c0_199 = arith.constant 0 : index
    %c0_200 = arith.constant 0 : index
    %c0_201 = arith.constant 0 : index
    %246 = vector.load %arg11[%c0_199, %c0_200, %c0_201] : memref<1x16x384xf32, #tpu.memory_space<vmem>>, vector<1x16x384xf32>
    %247 = vector.shape_cast %246 : vector<1x16x384xf32> to vector<16x384xf32>
    %248 = vector.shape_cast %245 : vector<16x384xf32> to vector<1x16x384xf32>
    tpu.vector_store %arg11[%c0_199, %c0_200, %c0_201], %248 {strides = array<i32>} : memref<1x16x384xf32, #tpu.memory_space<vmem>>, vector<1x16x384xf32>,
    return
  }
  func.func @transform_0(%arg0: i32) -> (i32, i32, i32) {
    %c0_i32 = arith.constant 0 : i32
    %c0_i32_0 = arith.constant 0 : i32
    %c0_i32_1 = arith.constant 0 : i32
    return %arg0, %c0_i32, %c0_i32_0 : i32, i32, i32
  }
  func.func @transform_1(%arg0: i32) -> (i32, i32, i32) {
    %c0_i32 = arith.constant 0 : i32
    %c0_i32_0 = arith.constant 0 : i32
    %c0_i32_1 = arith.constant 0 : i32
    %c0_i32_2 = arith.constant 0 : i32
    return %c0_i32, %c0_i32_0, %c0_i32_1 : i32, i32, i32
  }
  func.func @transform_2(%arg0: i32) -> (i32, i32, i32) {
    %c0_i32 = arith.constant 0 : i32
    %c0_i32_0 = arith.constant 0 : i32
    %c0_i32_1 = arith.constant 0 : i32
    %c0_i32_2 = arith.constant 0 : i32
    return %c0_i32, %c0_i32_0, %c0_i32_1 : i32, i32, i32
  }
  func.func @transform_3(%arg0: i32) -> (i32, i32, i32) {
    %c0_i32 = arith.constant 0 : i32
    %c0_i32_0 = arith.constant 0 : i32
    %c0_i32_1 = arith.constant 0 : i32
    %c0_i32_2 = arith.constant 0 : i32
    return %c0_i32, %c0_i32_0, %c0_i32_1 : i32, i32, i32
  }
  func.func @transform_4(%arg0: i32) -> (i32, i32, i32) {
    %c0_i32 = arith.constant 0 : i32
    %c0_i32_0 = arith.constant 0 : i32
    %c0_i32_1 = arith.constant 0 : i32
    %c0_i32_2 = arith.constant 0 : i32
    return %c0_i32, %c0_i32_0, %c0_i32_1 : i32, i32, i32
  }
  func.func @transform_5(%arg0: i32) -> (i32, i32, i32) {
    %c0_i32 = arith.constant 0 : i32
    %c0_i32_0 = arith.constant 0 : i32
    %c0_i32_1 = arith.constant 0 : i32
    %c0_i32_2 = arith.constant 0 : i32
    return %c0_i32, %c0_i32_0, %c0_i32_1 : i32, i32, i32
  }
  func.func @transform_6(%arg0: i32) -> (i32, i32, i32) {
    %c0_i32 = arith.constant 0 : i32
    %c0_i32_0 = arith.constant 0 : i32
    %c0_i32_1 = arith.constant 0 : i32
    %c0_i32_2 = arith.constant 0 : i32
    return %c0_i32, %c0_i32_0, %c0_i32_1 : i32, i32, i32
  }
  func.func @transform_7(%arg0: i32) -> (i32, i32) {
    %c0_i32 = arith.constant 0 : i32
    %c0_i32_0 = arith.constant 0 : i32
    %c0_i32_1 = arith.constant 0 : i32
    return %c0_i32, %c0_i32_0 : i32, i32
  }
  func.func @transform_8(%arg0: i32) -> (i32, i32) {
    %c0_i32 = arith.constant 0 : i32
    %c0_i32_0 = arith.constant 0 : i32
    %c0_i32_1 = arith.constant 0 : i32
    return %c0_i32, %c0_i32_0 : i32, i32
  }
  func.func @transform_9(%arg0: i32) -> (i32, i32) {
    %c0_i32 = arith.constant 0 : i32
    %c0_i32_0 = arith.constant 0 : i32
    %c0_i32_1 = arith.constant 0 : i32
    return %c0_i32, %c0_i32_0 : i32, i32
  }
  func.func @transform_10(%arg0: i32) -> (i32, i32, i32) {
    %c0_i32 = arith.constant 0 : i32
    %c0_i32_0 = arith.constant 0 : i32
    %c0_i32_1 = arith.constant 0 : i32
    return %arg0, %c0_i32, %c0_i32_0 : i32, i32, i32
  }
}

module attributes {stable_mosaic.version = 11 : i64} {
  func.func @kernel(%arg0: i32, %arg1: memref<1x16x384xf32, #tpu.memory_space<vmem>>, %arg2: memref<1x16x384xf32, #tpu.memory_space<vmem>>, %arg3: memref<16x144xbf16, #tpu.memory_space<vmem>>, %arg4: memref<16x1xf32, #tpu.memory_space<vmem>>, %arg5: memref<16x144xbf16, #tpu.memory_space<vmem>>, %arg6: memref<16x1xf32, #tpu.memory_space<vmem>>, %arg7: memref<8x144xbf16, #tpu.memory_space<vmem>>, %arg8: memref<8x1xf32, #tpu.memory_space<vmem>>, %arg9: memref<1x384xf32, #tpu.memory_space<vmem>>, %arg10: memref<1x8x384xf32, #tpu.memory_space<vmem>>, %arg11: memref<144x384xbf16, #tpu.memory_space<vmem>>) attributes {dimension_semantics = [#tpu.dimension_semantics<parallel>], iteration_bounds = array<i64: 2>, scalar_prefetch = 0 : i64, scratch_operands = 1 : i64, tpu.core_type = #tpu.core_type<tc>, window_params = [{transform_indices = @transform_0, window_bounds = array<i64: 1, 16, 384>}, {transform_indices = @transform_1, window_bounds = array<i64: 1, 16, 384>}, {pipeline_mode = #tpu.pipeline_mode<synchronous>, transform_indices = @transform_2, window_bounds = array<i64: 16, 144>}, {pipeline_mode = #tpu.pipeline_mode<synchronous>, transform_indices = @transform_3, window_bounds = array<i64: 16, 1>}, {pipeline_mode = #tpu.pipeline_mode<synchronous>, transform_indices = @transform_4, window_bounds = array<i64: 16, 144>}, {pipeline_mode = #tpu.pipeline_mode<synchronous>, transform_indices = @transform_5, window_bounds = array<i64: 16, 1>}, {pipeline_mode = #tpu.pipeline_mode<synchronous>, transform_indices = @transform_6, window_bounds = array<i64: 8, 144>}, {pipeline_mode = #tpu.pipeline_mode<synchronous>, transform_indices = @transform_7, window_bounds = array<i64: 8, 1>}, {pipeline_mode = #tpu.pipeline_mode<synchronous>, transform_indices = @transform_8, window_bounds = array<i64: 1, 384>}, {transform_indices = @transform_9, window_bounds = array<i64: 1, 8, 384>}]} {
    %c0 = arith.constant 0 : index
    %c0_0 = arith.constant 0 : index
    %0 = vector.load %arg9[%c0, %c0_0] : memref<1x384xf32, #tpu.memory_space<vmem>>, vector<1x384xf32>
    %c0_1 = arith.constant 0 : index
    %c0_2 = arith.constant 0 : index
    %c0_3 = arith.constant 0 : index
    %1 = vector.load %arg1[%c0_1, %c0_2, %c0_3] : memref<1x16x384xf32, #tpu.memory_space<vmem>>, vector<1x16x384xf32>
    %2 = vector.shape_cast %1 : vector<1x16x384xf32> to vector<16x384xf32>
    %c0_4 = arith.constant 0 : index
    %c0_5 = arith.constant 0 : index
    %3 = vector.load %arg3[%c0_4, %c0_5] : memref<16x144xbf16, #tpu.memory_space<vmem>>, vector<16x144xbf16>
    %c19_i32 = arith.constant 19 : i32
    %4 = tpu.dynamic_rotate %2 by %c19_i32 dim 1 : vector<16x384xf32>, i32 -> vector<16x384xf32>
    %5 = arith.truncf %4 : vector<16x384xf32> to vector<16x384xbf16>
    %c0_6 = arith.constant 0 : index
    %c0_7 = arith.constant 0 : index
    %6 = vector.load %arg11[%c0_6, %c0_7] : memref<144x384xbf16, #tpu.memory_space<vmem>>, vector<16x384xbf16>
    tpu.vector_store %arg11[%c0_6, %c0_7], %5 {strides = array<i32>} : memref<144x384xbf16, #tpu.memory_space<vmem>>, vector<16x384xbf16>,
    %c18_i32 = arith.constant 18 : i32
    %7 = tpu.dynamic_rotate %2 by %c18_i32 dim 1 : vector<16x384xf32>, i32 -> vector<16x384xf32>
    %8 = arith.truncf %7 : vector<16x384xf32> to vector<16x384xbf16>
    %c16 = arith.constant 16 : index
    %c0_8 = arith.constant 0 : index
    %9 = vector.load %arg11[%c16, %c0_8] : memref<144x384xbf16, #tpu.memory_space<vmem>>, vector<16x384xbf16>
    tpu.vector_store %arg11[%c16, %c0_8], %8 {strides = array<i32>} : memref<144x384xbf16, #tpu.memory_space<vmem>>, vector<16x384xbf16>,
    %c17_i32 = arith.constant 17 : i32
    %10 = tpu.dynamic_rotate %2 by %c17_i32 dim 1 : vector<16x384xf32>, i32 -> vector<16x384xf32>
    %11 = arith.truncf %10 : vector<16x384xf32> to vector<16x384xbf16>
    %c32 = arith.constant 32 : index
    %c0_9 = arith.constant 0 : index
    %12 = vector.load %arg11[%c32, %c0_9] : memref<144x384xbf16, #tpu.memory_space<vmem>>, vector<16x384xbf16>
    tpu.vector_store %arg11[%c32, %c0_9], %11 {strides = array<i32>} : memref<144x384xbf16, #tpu.memory_space<vmem>>, vector<16x384xbf16>,
    %c1_i32 = arith.constant 1 : i32
    %13 = tpu.dynamic_rotate %2 by %c1_i32 dim 1 : vector<16x384xf32>, i32 -> vector<16x384xf32>
    %14 = arith.truncf %13 : vector<16x384xf32> to vector<16x384xbf16>
    %c48 = arith.constant 48 : index
    %c0_10 = arith.constant 0 : index
    %15 = vector.load %arg11[%c48, %c0_10] : memref<144x384xbf16, #tpu.memory_space<vmem>>, vector<16x384xbf16>
    tpu.vector_store %arg11[%c48, %c0_10], %14 {strides = array<i32>} : memref<144x384xbf16, #tpu.memory_space<vmem>>, vector<16x384xbf16>,
    %16 = arith.truncf %2 : vector<16x384xf32> to vector<16x384xbf16>
    %c64 = arith.constant 64 : index
    %c0_11 = arith.constant 0 : index
    %17 = vector.load %arg11[%c64, %c0_11] : memref<144x384xbf16, #tpu.memory_space<vmem>>, vector<16x384xbf16>
    tpu.vector_store %arg11[%c64, %c0_11], %16 {strides = array<i32>} : memref<144x384xbf16, #tpu.memory_space<vmem>>, vector<16x384xbf16>,
    %c383_i32 = arith.constant 383 : i32
    %18 = tpu.dynamic_rotate %2 by %c383_i32 dim 1 : vector<16x384xf32>, i32 -> vector<16x384xf32>
    %19 = arith.truncf %18 : vector<16x384xf32> to vector<16x384xbf16>
    %c80 = arith.constant 80 : index
    %c0_12 = arith.constant 0 : index
    %20 = vector.load %arg11[%c80, %c0_12] : memref<144x384xbf16, #tpu.memory_space<vmem>>, vector<16x384xbf16>
    tpu.vector_store %arg11[%c80, %c0_12], %19 {strides = array<i32>} : memref<144x384xbf16, #tpu.memory_space<vmem>>, vector<16x384xbf16>,
    %c367_i32 = arith.constant 367 : i32
    %21 = tpu.dynamic_rotate %2 by %c367_i32 dim 1 : vector<16x384xf32>, i32 -> vector<16x384xf32>
    %22 = arith.truncf %21 : vector<16x384xf32> to vector<16x384xbf16>
    %c96 = arith.constant 96 : index
    %c0_13 = arith.constant 0 : index
    %23 = vector.load %arg11[%c96, %c0_13] : memref<144x384xbf16, #tpu.memory_space<vmem>>, vector<16x384xbf16>
    tpu.vector_store %arg11[%c96, %c0_13], %22 {strides = array<i32>} : memref<144x384xbf16, #tpu.memory_space<vmem>>, vector<16x384xbf16>,
    %c366_i32 = arith.constant 366 : i32
    %24 = tpu.dynamic_rotate %2 by %c366_i32 dim 1 : vector<16x384xf32>, i32 -> vector<16x384xf32>
    %25 = arith.truncf %24 : vector<16x384xf32> to vector<16x384xbf16>
    %c112 = arith.constant 112 : index
    %c0_14 = arith.constant 0 : index
    %26 = vector.load %arg11[%c112, %c0_14] : memref<144x384xbf16, #tpu.memory_space<vmem>>, vector<16x384xbf16>
    tpu.vector_store %arg11[%c112, %c0_14], %25 {strides = array<i32>} : memref<144x384xbf16, #tpu.memory_space<vmem>>, vector<16x384xbf16>,
    %c365_i32 = arith.constant 365 : i32
    %27 = tpu.dynamic_rotate %2 by %c365_i32 dim 1 : vector<16x384xf32>, i32 -> vector<16x384xf32>
    %28 = arith.truncf %27 : vector<16x384xf32> to vector<16x384xbf16>
    %c128 = arith.constant 128 : index
    %c0_15 = arith.constant 0 : index
    %29 = vector.load %arg11[%c128, %c0_15] : memref<144x384xbf16, #tpu.memory_space<vmem>>, vector<16x384xbf16>
    tpu.vector_store %arg11[%c128, %c0_15], %28 {strides = array<i32>} : memref<144x384xbf16, #tpu.memory_space<vmem>>, vector<16x384xbf16>,
    %c0_16 = arith.constant 0 : index
    %c0_17 = arith.constant 0 : index
    %30 = vector.load %arg11[%c0_16, %c0_17] : memref<144x384xbf16, #tpu.memory_space<vmem>>, vector<144x384xbf16>
    %cst = arith.constant dense<0.000000e+00> : vector<16x384xf32>
    %31 = tpu.matmul %3, %30, %cst {dimension_numbers = #tpu.dot_dimension_numbers<[1], [0], [0], [1], [0, 0, 1, 1], [], []>} : vector<16x144xbf16>, vector<144x384xbf16>, vector<16x384xf32> -> vector<16x384xf32>
    %c0_18 = arith.constant 0 : index
    %c0_19 = arith.constant 0 : index
    %32 = vector.load %arg4[%c0_18, %c0_19] : memref<16x1xf32, #tpu.memory_space<vmem>>, vector<16x1xf32>
    %33 = vector.broadcast %32 : vector<16x1xf32> to vector<16x384xf32>
    %34 = arith.addf %31, %33 : vector<16x384xf32>
    %35 = vector.broadcast %0 : vector<1x384xf32> to vector<16x384xf32>
    %36 = arith.mulf %34, %35 : vector<16x384xf32>
    %c0_20 = arith.constant 0 : index
    %c0_21 = arith.constant 0 : index
    %c0_22 = arith.constant 0 : index
    %37 = vector.load %arg2[%c0_20, %c0_21, %c0_22] : memref<1x16x384xf32, #tpu.memory_space<vmem>>, vector<1x16x384xf32>
    %38 = vector.shape_cast %37 : vector<1x16x384xf32> to vector<16x384xf32>
    %39 = arith.addf %36, %38 : vector<16x384xf32>
    %c0_23 = arith.constant 0 : index
    %c0_24 = arith.constant 0 : index
    %40 = vector.load %arg5[%c0_23, %c0_24] : memref<16x144xbf16, #tpu.memory_space<vmem>>, vector<16x144xbf16>
    %c19_i32_25 = arith.constant 19 : i32
    %41 = tpu.dynamic_rotate %39 by %c19_i32_25 dim 1 : vector<16x384xf32>, i32 -> vector<16x384xf32>
    %42 = arith.truncf %41 : vector<16x384xf32> to vector<16x384xbf16>
    %c0_26 = arith.constant 0 : index
    %c0_27 = arith.constant 0 : index
    %43 = vector.load %arg11[%c0_26, %c0_27] : memref<144x384xbf16, #tpu.memory_space<vmem>>, vector<16x384xbf16>
    tpu.vector_store %arg11[%c0_26, %c0_27], %42 {strides = array<i32>} : memref<144x384xbf16, #tpu.memory_space<vmem>>, vector<16x384xbf16>,
    %c18_i32_28 = arith.constant 18 : i32
    %44 = tpu.dynamic_rotate %39 by %c18_i32_28 dim 1 : vector<16x384xf32>, i32 -> vector<16x384xf32>
    %45 = arith.truncf %44 : vector<16x384xf32> to vector<16x384xbf16>
    %c16_29 = arith.constant 16 : index
    %c0_30 = arith.constant 0 : index
    %46 = vector.load %arg11[%c16_29, %c0_30] : memref<144x384xbf16, #tpu.memory_space<vmem>>, vector<16x384xbf16>
    tpu.vector_store %arg11[%c16_29, %c0_30], %45 {strides = array<i32>} : memref<144x384xbf16, #tpu.memory_space<vmem>>, vector<16x384xbf16>,
    %c17_i32_31 = arith.constant 17 : i32
    %47 = tpu.dynamic_rotate %39 by %c17_i32_31 dim 1 : vector<16x384xf32>, i32 -> vector<16x384xf32>
    %48 = arith.truncf %47 : vector<16x384xf32> to vector<16x384xbf16>
    %c32_32 = arith.constant 32 : index
    %c0_33 = arith.constant 0 : index
    %49 = vector.load %arg11[%c32_32, %c0_33] : memref<144x384xbf16, #tpu.memory_space<vmem>>, vector<16x384xbf16>
    tpu.vector_store %arg11[%c32_32, %c0_33], %48 {strides = array<i32>} : memref<144x384xbf16, #tpu.memory_space<vmem>>, vector<16x384xbf16>,
    %c1_i32_34 = arith.constant 1 : i32
    %50 = tpu.dynamic_rotate %39 by %c1_i32_34 dim 1 : vector<16x384xf32>, i32 -> vector<16x384xf32>
    %51 = arith.truncf %50 : vector<16x384xf32> to vector<16x384xbf16>
    %c48_35 = arith.constant 48 : index
    %c0_36 = arith.constant 0 : index
    %52 = vector.load %arg11[%c48_35, %c0_36] : memref<144x384xbf16, #tpu.memory_space<vmem>>, vector<16x384xbf16>
    tpu.vector_store %arg11[%c48_35, %c0_36], %51 {strides = array<i32>} : memref<144x384xbf16, #tpu.memory_space<vmem>>, vector<16x384xbf16>,
    %53 = arith.truncf %39 : vector<16x384xf32> to vector<16x384xbf16>
    %c64_37 = arith.constant 64 : index
    %c0_38 = arith.constant 0 : index
    %54 = vector.load %arg11[%c64_37, %c0_38] : memref<144x384xbf16, #tpu.memory_space<vmem>>, vector<16x384xbf16>
    tpu.vector_store %arg11[%c64_37, %c0_38], %53 {strides = array<i32>} : memref<144x384xbf16, #tpu.memory_space<vmem>>, vector<16x384xbf16>,
    %c383_i32_39 = arith.constant 383 : i32
    %55 = tpu.dynamic_rotate %39 by %c383_i32_39 dim 1 : vector<16x384xf32>, i32 -> vector<16x384xf32>
    %56 = arith.truncf %55 : vector<16x384xf32> to vector<16x384xbf16>
    %c80_40 = arith.constant 80 : index
    %c0_41 = arith.constant 0 : index
    %57 = vector.load %arg11[%c80_40, %c0_41] : memref<144x384xbf16, #tpu.memory_space<vmem>>, vector<16x384xbf16>
    tpu.vector_store %arg11[%c80_40, %c0_41], %56 {strides = array<i32>} : memref<144x384xbf16, #tpu.memory_space<vmem>>, vector<16x384xbf16>,
    %c367_i32_42 = arith.constant 367 : i32
    %58 = tpu.dynamic_rotate %39 by %c367_i32_42 dim 1 : vector<16x384xf32>, i32 -> vector<16x384xf32>
    %59 = arith.truncf %58 : vector<16x384xf32> to vector<16x384xbf16>
    %c96_43 = arith.constant 96 : index
    %c0_44 = arith.constant 0 : index
    %60 = vector.load %arg11[%c96_43, %c0_44] : memref<144x384xbf16, #tpu.memory_space<vmem>>, vector<16x384xbf16>
    tpu.vector_store %arg11[%c96_43, %c0_44], %59 {strides = array<i32>} : memref<144x384xbf16, #tpu.memory_space<vmem>>, vector<16x384xbf16>,
    %c366_i32_45 = arith.constant 366 : i32
    %61 = tpu.dynamic_rotate %39 by %c366_i32_45 dim 1 : vector<16x384xf32>, i32 -> vector<16x384xf32>
    %62 = arith.truncf %61 : vector<16x384xf32> to vector<16x384xbf16>
    %c112_46 = arith.constant 112 : index
    %c0_47 = arith.constant 0 : index
    %63 = vector.load %arg11[%c112_46, %c0_47] : memref<144x384xbf16, #tpu.memory_space<vmem>>, vector<16x384xbf16>
    tpu.vector_store %arg11[%c112_46, %c0_47], %62 {strides = array<i32>} : memref<144x384xbf16, #tpu.memory_space<vmem>>, vector<16x384xbf16>,
    %c365_i32_48 = arith.constant 365 : i32
    %64 = tpu.dynamic_rotate %39 by %c365_i32_48 dim 1 : vector<16x384xf32>, i32 -> vector<16x384xf32>
    %65 = arith.truncf %64 : vector<16x384xf32> to vector<16x384xbf16>
    %c128_49 = arith.constant 128 : index
    %c0_50 = arith.constant 0 : index
    %66 = vector.load %arg11[%c128_49, %c0_50] : memref<144x384xbf16, #tpu.memory_space<vmem>>, vector<16x384xbf16>
    tpu.vector_store %arg11[%c128_49, %c0_50], %65 {strides = array<i32>} : memref<144x384xbf16, #tpu.memory_space<vmem>>, vector<16x384xbf16>,
    %c0_51 = arith.constant 0 : index
    %c0_52 = arith.constant 0 : index
    %67 = vector.load %arg11[%c0_51, %c0_52] : memref<144x384xbf16, #tpu.memory_space<vmem>>, vector<144x384xbf16>
    %cst_53 = arith.constant dense<0.000000e+00> : vector<16x384xf32>
    %68 = tpu.matmul %40, %67, %cst_53 {dimension_numbers = #tpu.dot_dimension_numbers<[1], [0], [0], [1], [0, 0, 1, 1], [], []>} : vector<16x144xbf16>, vector<144x384xbf16>, vector<16x384xf32> -> vector<16x384xf32>
    %c0_54 = arith.constant 0 : index
    %c0_55 = arith.constant 0 : index
    %69 = vector.load %arg6[%c0_54, %c0_55] : memref<16x1xf32, #tpu.memory_space<vmem>>, vector<16x1xf32>
    %70 = vector.broadcast %69 : vector<16x1xf32> to vector<16x384xf32>
    %71 = arith.addf %68, %70 : vector<16x384xf32>
    %72 = vector.broadcast %0 : vector<1x384xf32> to vector<16x384xf32>
    %73 = arith.mulf %71, %72 : vector<16x384xf32>
    %c0_56 = arith.constant 0 : index
    %c0_57 = arith.constant 0 : index
    %74 = vector.load %arg7[%c0_56, %c0_57] : memref<8x144xbf16, #tpu.memory_space<vmem>>, vector<8x144xbf16>
    %c19_i32_58 = arith.constant 19 : i32
    %75 = tpu.dynamic_rotate %73 by %c19_i32_58 dim 1 : vector<16x384xf32>, i32 -> vector<16x384xf32>
    %76 = arith.truncf %75 : vector<16x384xf32> to vector<16x384xbf16>
    %c0_59 = arith.constant 0 : index
    %c0_60 = arith.constant 0 : index
    %77 = vector.load %arg11[%c0_59, %c0_60] : memref<144x384xbf16, #tpu.memory_space<vmem>>, vector<16x384xbf16>
    tpu.vector_store %arg11[%c0_59, %c0_60], %76 {strides = array<i32>} : memref<144x384xbf16, #tpu.memory_space<vmem>>, vector<16x384xbf16>,
    %c18_i32_61 = arith.constant 18 : i32
    %78 = tpu.dynamic_rotate %73 by %c18_i32_61 dim 1 : vector<16x384xf32>, i32 -> vector<16x384xf32>
    %79 = arith.truncf %78 : vector<16x384xf32> to vector<16x384xbf16>
    %c16_62 = arith.constant 16 : index
    %c0_63 = arith.constant 0 : index
    %80 = vector.load %arg11[%c16_62, %c0_63] : memref<144x384xbf16, #tpu.memory_space<vmem>>, vector<16x384xbf16>
    tpu.vector_store %arg11[%c16_62, %c0_63], %79 {strides = array<i32>} : memref<144x384xbf16, #tpu.memory_space<vmem>>, vector<16x384xbf16>,
    %c17_i32_64 = arith.constant 17 : i32
    %81 = tpu.dynamic_rotate %73 by %c17_i32_64 dim 1 : vector<16x384xf32>, i32 -> vector<16x384xf32>
    %82 = arith.truncf %81 : vector<16x384xf32> to vector<16x384xbf16>
    %c32_65 = arith.constant 32 : index
    %c0_66 = arith.constant 0 : index
    %83 = vector.load %arg11[%c32_65, %c0_66] : memref<144x384xbf16, #tpu.memory_space<vmem>>, vector<16x384xbf16>
    tpu.vector_store %arg11[%c32_65, %c0_66], %82 {strides = array<i32>} : memref<144x384xbf16, #tpu.memory_space<vmem>>, vector<16x384xbf16>,
    %c1_i32_67 = arith.constant 1 : i32
    %84 = tpu.dynamic_rotate %73 by %c1_i32_67 dim 1 : vector<16x384xf32>, i32 -> vector<16x384xf32>
    %85 = arith.truncf %84 : vector<16x384xf32> to vector<16x384xbf16>
    %c48_68 = arith.constant 48 : index
    %c0_69 = arith.constant 0 : index
    %86 = vector.load %arg11[%c48_68, %c0_69] : memref<144x384xbf16, #tpu.memory_space<vmem>>, vector<16x384xbf16>
    tpu.vector_store %arg11[%c48_68, %c0_69], %85 {strides = array<i32>} : memref<144x384xbf16, #tpu.memory_space<vmem>>, vector<16x384xbf16>,
    %87 = arith.truncf %73 : vector<16x384xf32> to vector<16x384xbf16>
    %c64_70 = arith.constant 64 : index
    %c0_71 = arith.constant 0 : index
    %88 = vector.load %arg11[%c64_70, %c0_71] : memref<144x384xbf16, #tpu.memory_space<vmem>>, vector<16x384xbf16>
    tpu.vector_store %arg11[%c64_70, %c0_71], %87 {strides = array<i32>} : memref<144x384xbf16, #tpu.memory_space<vmem>>, vector<16x384xbf16>,
    %c383_i32_72 = arith.constant 383 : i32
    %89 = tpu.dynamic_rotate %73 by %c383_i32_72 dim 1 : vector<16x384xf32>, i32 -> vector<16x384xf32>
    %90 = arith.truncf %89 : vector<16x384xf32> to vector<16x384xbf16>
    %c80_73 = arith.constant 80 : index
    %c0_74 = arith.constant 0 : index
    %91 = vector.load %arg11[%c80_73, %c0_74] : memref<144x384xbf16, #tpu.memory_space<vmem>>, vector<16x384xbf16>
    tpu.vector_store %arg11[%c80_73, %c0_74], %90 {strides = array<i32>} : memref<144x384xbf16, #tpu.memory_space<vmem>>, vector<16x384xbf16>,
    %c367_i32_75 = arith.constant 367 : i32
    %92 = tpu.dynamic_rotate %73 by %c367_i32_75 dim 1 : vector<16x384xf32>, i32 -> vector<16x384xf32>
    %93 = arith.truncf %92 : vector<16x384xf32> to vector<16x384xbf16>
    %c96_76 = arith.constant 96 : index
    %c0_77 = arith.constant 0 : index
    %94 = vector.load %arg11[%c96_76, %c0_77] : memref<144x384xbf16, #tpu.memory_space<vmem>>, vector<16x384xbf16>
    tpu.vector_store %arg11[%c96_76, %c0_77], %93 {strides = array<i32>} : memref<144x384xbf16, #tpu.memory_space<vmem>>, vector<16x384xbf16>,
    %c366_i32_78 = arith.constant 366 : i32
    %95 = tpu.dynamic_rotate %73 by %c366_i32_78 dim 1 : vector<16x384xf32>, i32 -> vector<16x384xf32>
    %96 = arith.truncf %95 : vector<16x384xf32> to vector<16x384xbf16>
    %c112_79 = arith.constant 112 : index
    %c0_80 = arith.constant 0 : index
    %97 = vector.load %arg11[%c112_79, %c0_80] : memref<144x384xbf16, #tpu.memory_space<vmem>>, vector<16x384xbf16>
    tpu.vector_store %arg11[%c112_79, %c0_80], %96 {strides = array<i32>} : memref<144x384xbf16, #tpu.memory_space<vmem>>, vector<16x384xbf16>,
    %c365_i32_81 = arith.constant 365 : i32
    %98 = tpu.dynamic_rotate %73 by %c365_i32_81 dim 1 : vector<16x384xf32>, i32 -> vector<16x384xf32>
    %99 = arith.truncf %98 : vector<16x384xf32> to vector<16x384xbf16>
    %c128_82 = arith.constant 128 : index
    %c0_83 = arith.constant 0 : index
    %100 = vector.load %arg11[%c128_82, %c0_83] : memref<144x384xbf16, #tpu.memory_space<vmem>>, vector<16x384xbf16>
    tpu.vector_store %arg11[%c128_82, %c0_83], %99 {strides = array<i32>} : memref<144x384xbf16, #tpu.memory_space<vmem>>, vector<16x384xbf16>,
    %c0_84 = arith.constant 0 : index
    %c0_85 = arith.constant 0 : index
    %101 = vector.load %arg11[%c0_84, %c0_85] : memref<144x384xbf16, #tpu.memory_space<vmem>>, vector<144x384xbf16>
    %cst_86 = arith.constant dense<0.000000e+00> : vector<8x384xf32>
    %102 = tpu.matmul %74, %101, %cst_86 {dimension_numbers = #tpu.dot_dimension_numbers<[1], [0], [0], [1], [0, 0, 1, 1], [], []>} : vector<8x144xbf16>, vector<144x384xbf16>, vector<8x384xf32> -> vector<8x384xf32>
    %c0_87 = arith.constant 0 : index
    %c0_88 = arith.constant 0 : index
    %103 = vector.load %arg8[%c0_87, %c0_88] : memref<8x1xf32, #tpu.memory_space<vmem>>, vector<8x1xf32>
    %104 = vector.broadcast %103 : vector<8x1xf32> to vector<8x384xf32>
    %105 = arith.addf %102, %104 : vector<8x384xf32>
    %106 = vector.broadcast %0 : vector<1x384xf32> to vector<8x384xf32>
    %107 = arith.mulf %105, %106 : vector<8x384xf32>
    %c0_89 = arith.constant 0 : index
    %c0_90 = arith.constant 0 : index
    %c0_91 = arith.constant 0 : index
    %108 = vector.load %arg10[%c0_89, %c0_90, %c0_91] : memref<1x8x384xf32, #tpu.memory_space<vmem>>, vector<1x8x384xf32>
    %109 = vector.shape_cast %108 : vector<1x8x384xf32> to vector<8x384xf32>
    %110 = vector.shape_cast %107 : vector<8x384xf32> to vector<1x8x384xf32>
    tpu.vector_store %arg10[%c0_89, %c0_90, %c0_91], %110 {strides = array<i32>} : memref<1x8x384xf32, #tpu.memory_space<vmem>>, vector<1x8x384xf32>,
    return
  }
  func.func @transform_0(%arg0: i32) -> (i32, i32, i32) {
    %c0_i32 = arith.constant 0 : i32
    %c0_i32_0 = arith.constant 0 : i32
    %c0_i32_1 = arith.constant 0 : i32
    return %arg0, %c0_i32, %c0_i32_0 : i32, i32, i32
  }
  func.func @transform_1(%arg0: i32) -> (i32, i32, i32) {
    %c0_i32 = arith.constant 0 : i32
    %c0_i32_0 = arith.constant 0 : i32
    %c0_i32_1 = arith.constant 0 : i32
    return %arg0, %c0_i32, %c0_i32_0 : i32, i32, i32
  }
  func.func @transform_2(%arg0: i32) -> (i32, i32) {
    %c0_i32 = arith.constant 0 : i32
    %c0_i32_0 = arith.constant 0 : i32
    %c0_i32_1 = arith.constant 0 : i32
    return %c0_i32, %c0_i32_0 : i32, i32
  }
  func.func @transform_3(%arg0: i32) -> (i32, i32) {
    %c0_i32 = arith.constant 0 : i32
    %c0_i32_0 = arith.constant 0 : i32
    %c0_i32_1 = arith.constant 0 : i32
    return %c0_i32, %c0_i32_0 : i32, i32
  }
  func.func @transform_4(%arg0: i32) -> (i32, i32) {
    %c0_i32 = arith.constant 0 : i32
    %c0_i32_0 = arith.constant 0 : i32
    %c0_i32_1 = arith.constant 0 : i32
    return %c0_i32, %c0_i32_0 : i32, i32
  }
  func.func @transform_5(%arg0: i32) -> (i32, i32) {
    %c0_i32 = arith.constant 0 : i32
    %c0_i32_0 = arith.constant 0 : i32
    %c0_i32_1 = arith.constant 0 : i32
    return %c0_i32, %c0_i32_0 : i32, i32
  }
  func.func @transform_6(%arg0: i32) -> (i32, i32) {
    %c0_i32 = arith.constant 0 : i32
    %c0_i32_0 = arith.constant 0 : i32
    %c0_i32_1 = arith.constant 0 : i32
    return %c0_i32, %c0_i32_0 : i32, i32
  }
  func.func @transform_7(%arg0: i32) -> (i32, i32) {
    %c0_i32 = arith.constant 0 : i32
    %c0_i32_0 = arith.constant 0 : i32
    %c0_i32_1 = arith.constant 0 : i32
    return %c0_i32, %c0_i32_0 : i32, i32
  }
  func.func @transform_8(%arg0: i32) -> (i32, i32) {
    %c0_i32 = arith.constant 0 : i32
    %c0_i32_0 = arith.constant 0 : i32
    %c0_i32_1 = arith.constant 0 : i32
    return %c0_i32, %c0_i32_0 : i32, i32
  }
  func.func @transform_9(%arg0: i32) -> (i32, i32, i32) {
    %c0_i32 = arith.constant 0 : i32
    %c0_i32_0 = arith.constant 0 : i32
    %c0_i32_1 = arith.constant 0 : i32
    return %arg0, %c0_i32, %c0_i32_0 : i32, i32, i32
  }
}

</mosaic_0001>

<bundles_post_ra>
// kernel: rcan_forward.4
= control target key start
LH: loop header
LB: loop body
LE: loop exit
PB: predicated region body
PF: predicated region fallthrough
CT: control target
= control target key end

     0   :  { %s1136_s15 = smov 0   ;;  %s1341_s0 = inlined_call_operand.vmem [shape: f32[2,16,384], index: 0, kind: input, shape index: {}]   ;;  %s1342_s1 = inlined_call_operand.vmem [shape: bf16[16,144], index: 1, kind: input, shape index: {}]   ;;  %s1343_s2 = inlined_call_operand.vmem [shape: f32[16,1], index: 2, kind: input, shape index: {}]   ;;  %s1344_s3 = inlined_call_operand.vmem [shape: f32[1,384], index: 3, kind: input, shape index: {}]   ;;  %s1345_s4 = inlined_call_operand.vmem [shape: f32[2,16,384], index: 4, kind: output, shape index: {}]  }
   0x1 LB: > { %s797_s16 = sadd.s32 4294967295, %s1100_s15   ;;  %p801_p0 = scmp.ge.s32.totalorder %s1100_s15, 1  ;;  %s1100_s15 = sphi %s1136_s15, %s14_s15  }
   0x2   : > { %p162_p1 = scmp.lt.s32.totalorder %s1100_s15, 3 }
   0x4   : > { %p163_p2 = pnand %p801_p0, %p162_p1 }
   0x5   : > { %p188_p3 = scmp.lt.s32.totalorder (!%p163_p2), %s797_s16, 1  ;;  %s1102_s21 = smov (!%p163_p2), 110  }
   0x6   : > { %166 = sbr.rel (%p163_p2) target bundleno = 358 (0x166), region = 36  ;;  %s1103_s22 = smov (!%p163_p2), 111  }
   0x7   : > { %s1104_s23 = smov (!%p163_p2), 127   ;;  %s1105_s24 = smov (!%p163_p2), 109  }
   0x8   : > { %s1106_s25 = smov (!%p163_p2), 1   ;;  %s1107_s26 = smov (!%p163_p2), 17  }
   0x9   : > { %s1108_s27 = smov (!%p163_p2), 18   ;;  %s1109_s28 = smov (!%p163_p2), 19  }
   0xb   : > { %s1347_s16 = smov (!%p188_p3, %s797_s16), 1  ;;  %v219_v10 = vlaneseq  ;;  %vm634_vm6 = vcmask 130048  }
   0xc   : > { %s954_s17 = smul.u32 48, %s1347_s16 }
   0xd   : > { %v1170_v12 = vand.u32 127, %v219_v10 }
   0xe   : > { %s192_s20 = scalar_lea.vmem %s1341_s0, %s954_s17 }
   0xf   : > { %v1152_v0 = vld [vmem:[%s192_s20 + $0x10] sm:$0xff]  ;;  %v1154_v1 = vld [vmem:[%s192_s20 + $0x28] sm:$0xff]  ;;  %v1156_v2 = vld [vmem:[%s192_s20] sm:$0xff]  ;;  %vm391_vm0 = vcmp.lt.s32.totalorder %v1170_v12, 110  ;;  %vm364_vm1 = vcmp.lt.s32.totalorder %v1170_v12, 111  ;;  %vm337_vm2 = vcmp.lt.s32.totalorder %v1170_v12, 127 }
  0x10   : > { %v982_v3 = vpack.i.bf16 %v1154_v1, %v1152_v0  ;;  %v1160_v4 = vld [vmem:[%s192_s20 + $0x18] sm:$0xff]  ;;  %v1162_v5 = vld [vmem:[%s192_s20 + $0x8] sm:$0xff]  ;;  %v1164_v6 = vld [vmem:[%s192_s20 + $0x20] sm:$0xff]  ;;  %v318_v56 = vpack.c.bf16 %v1152_v0, %v1152_v0  ;;  %v320_v60 = vpack.c.bf16 %v1154_v1, %v1154_v1  ;;  %vm418_vm3 = vcmp.lt.s32.totalorder %v1170_v12, 109 }
  0x11   : > { %v972_v7 = vpack.i.bf16 %v1160_v4, %v1156_v2  ;;  %v992_v8 = vpack.i.bf16 %v1164_v6, %v1162_v5  ;;  %v317_v28 = vpack.c.bf16 %v1162_v5, %v1156_v2  ;;  %v319_v29 = vpack.c.bf16 %v1164_v6, %v1160_v4 }
  0x12   : > { %983 = vrot.lane.b32.xlu1 %v982_v3, %s1102_s21  ;;  %322 = vst [vmem:[#allocation2 + $0x68] sm:$0xf] %v318_v56  ;;  %vm302_vm4 = vcmp.lt.s32.totalorder %v1170_v12, 1  ;;  %vm275_vm5 = vcmp.lt.s32.totalorder %v1170_v12, 17  ;;  %vm248_vm7 = vcmp.lt.s32.totalorder %v1170_v12, 18  ;;  %vm221_vm8 = vcmp.lt.s32.totalorder %v1170_v12, 19 }
  0x13   : > { %973 = vrot.lane.b32.xlu0 %v972_v7, %s1102_s21  ;;  %993 = vrot.lane.b32.xlu2 %v992_v8, %s1103_s22  ;;  %321 = vst [vmem:[#allocation2 + $0x60] sm:$0xff] %v317_v28 }
  0x14   : > { %323 = vst [vmem:[#allocation2 + $0x6c] sm:$0xff] %v319_v29 }
  0x15   : > { %324 = vst [vmem:[#allocation2 + $0x74] sm:$0xf] %v320_v60 }
  0x1a   : > { %988 = vrot.lane.b32.xlu1 %v972_v7, %s1103_s22  ;;  %v862_v56 = vld [vmem:[#allocation2 + $0x60] sm:$0xf]  ;;  %v939_v60 = vld [vmem:[#allocation2 + $0x64] sm:$0xf] }
  0x1b   : > { %978 = vrot.lane.b32.xlu0 %v992_v8, %s1102_s21  ;;  %998 = vrot.lane.b32.xlu2 %v982_v3, %s1103_s22  ;;  %s197_s22 = scalar_lea.vmem %s1345_s4, %s954_s17 }
  0x22   : > { %1008 = vrot.lane.b32.xlu1 %v992_v8, %s1104_s23 }
  0x23   : > { %1003 = vrot.lane.b32.xlu0 %v972_v7, %s1104_s23  ;;  %1013 = vrot.lane.b32.xlu2 %v982_v3, %s1104_s23 }
  0x2a   : > { %1023 = vrot.lane.b32.xlu1 %v992_v8, %s1105_s24 }
  0x2b   : > { %1018 = vrot.lane.b32.xlu0 %v972_v7, %s1105_s24  ;;  %1028 = vrot.lane.b32.xlu2 %v982_v3, %s1105_s24 }
  0x32   : > { %1038 = vrot.lane.b32.xlu1 %v992_v8, %s1106_s25 }
  0x33   : > { %1033 = vrot.lane.b32.xlu0 %v972_v7, %s1106_s25  ;;  %1043 = vrot.lane.b32.xlu2 %v982_v3, %s1106_s25 }
  0x3a   : > { %1053 = vrot.lane.b32.xlu1 %v992_v8, %s1107_s26 }
  0x3b   : > { %1048 = vrot.lane.b32.xlu0 %v972_v7, %s1107_s26  ;;  %1058 = vrot.lane.b32.xlu2 %v982_v3, %s1107_s26 }
  0x42   : > { %1068 = vrot.lane.b32.xlu1 %v992_v8, %s1108_s27 }
  0x43   : > { %1063 = vrot.lane.b32.xlu0 %v972_v7, %s1108_s27  ;;  %1073 = vrot.lane.b32.xlu2 %v982_v3, %s1108_s27 }
  0x4a   : > { %1083 = vrot.lane.b32.xlu1 %v992_v8, %s1109_s28 }
  0x4b   : > { %1078 = vrot.lane.b32.xlu0 %v972_v7, %s1109_s28  ;;  %1088 = vrot.lane.b32.xlu2 %v982_v3, %s1109_s28 }
  0x6d   : > { %v994_v9 = vpop.permute.xlu2 %993 }
  0x6e   : > { %v996_v22 = vunpack.i.h.bf16 %v994_v9  ;;  %v995_v23 = vunpack.i.l.bf16 %v994_v9 }
  0x75   : > { %v999_v11 = vpop.permute.xlu2 %998 }
  0x76   : > { %v1001_v26 = vunpack.i.h.bf16 %v999_v11  ;;  %v1000_v27 = vunpack.i.l.bf16 %v999_v11 }
  0x78   : > { %v365_v34 = vsel %vm364_vm1, %v995_v23, %v1000_v27  ;;  %v366_v35 = vsel %vm364_vm1, %v996_v22, %v1001_v26 }
  0x7d   : > { %v1173_v19 = vpop.permute.xlu2 %1013 }
  0x7e   : > { %v1016_v53 = vunpack.i.h.bf16 %v1173_v19  ;;  %v1015_v54 = vunpack.i.l.bf16 %v1173_v19 }
  0x84   : > { %v984_v13 = vpop.permute.xlu1 %983 }
  0x85   : > { %v986_v14 = vunpack.i.h.bf16 %v984_v13  ;;  %v985_v15 = vunpack.i.l.bf16 %v984_v13  ;;  %v974_v16 = vpop.permute.xlu0 %973  ;;  %v1196_v46 = vpop.permute.xlu2 %1028 }
  0x86   : > { %v976_v17 = vunpack.i.h.bf16 %v974_v16  ;;  %v975_v18 = vunpack.i.l.bf16 %v974_v16  ;;  %v1031_v10 = vunpack.i.h.bf16 %v1196_v46  ;;  %v1030_v11 = vunpack.i.l.bf16 %v1196_v46 }
  0x88   : > { %v397_v20 = vsel %vm391_vm0, %v986_v14, %v976_v17  ;;  %v396_v21 = vsel %vm391_vm0, %v985_v15, %v975_v18 }
  0x89   : > { %v401_v24 = vpack.c.bf16 %v397_v20, %v397_v20  ;;  %v399_v25 = vpack.c.bf16 %v396_v21, %v396_v21 }
  0x8b   : > { %405 = vst [vmem:[#allocation2 + $0xbc] sm:$0xf] %v401_v24 }
  0x8c   : > { %403 = vst [vmem:[#allocation2 + $0xb0] sm:$0xf] %v399_v25  ;;  %v989_v30 = vpop.permute.xlu1 %988 }
  0x8d   : > { %v991_v31 = vunpack.i.h.bf16 %v989_v30  ;;  %v990_v32 = vunpack.i.l.bf16 %v989_v30  ;;  %v979_v33 = vpop.permute.xlu0 %978  ;;  %v1225_v9 = vpop.permute.xlu2 %1043 }
  0x8e   : > { %v981_v36 = vunpack.i.h.bf16 %v979_v33  ;;  %v980_v37 = vunpack.i.l.bf16 %v979_v33 }
  0x8f   : > { %v368_v38 = vsel %vm364_vm1, %v991_v31, %v996_v22  ;;  %v370_v39 = vsel %vm364_vm1, %v1001_v26, %v991_v31  ;;  %v367_v40 = vsel %vm364_vm1, %v990_v32, %v995_v23  ;;  %v369_v41 = vsel %vm364_vm1, %v1000_v27, %v990_v32 }
  0x90   : > { %v373_v42 = vpack.c.bf16 %v366_v35, %v368_v38  ;;  %v374_v43 = vpack.c.bf16 %v370_v39, %v370_v39  ;;  %v371_v44 = vpack.c.bf16 %v365_v34, %v367_v40  ;;  %v372_v45 = vpack.c.bf16 %v369_v41, %v369_v41 }
  0x91   : > { %v393_v47 = vsel %vm391_vm0, %v981_v36, %v986_v14  ;;  %v392_v48 = vsel %vm391_vm0, %v980_v37, %v985_v15  ;;  %v394_v49 = vsel %vm391_vm0, %v975_v18, %v980_v37  ;;  %v395_v50 = vsel %vm391_vm0, %v976_v17, %v981_v36 }
  0x92   : > { %377 = vst [vmem:[#allocation2 + $0x9c] sm:$0xff] %v373_v42  ;;  %v398_v51 = vpack.c.bf16 %v392_v48, %v394_v49  ;;  %v400_v52 = vpack.c.bf16 %v393_v47, %v395_v50  ;;  %v1046_v41 = vunpack.i.h.bf16 %v1225_v9  ;;  %v1045_v42 = vunpack.i.l.bf16 %v1225_v9 }
  0x93   : > { %378 = vst [vmem:[#allocation2 + $0xa4] sm:$0xf] %v374_v43 }
  0x94   : > { %375 = vst [vmem:[#allocation2 + $0x90] sm:$0xff] %v371_v44  ;;  %v1009_v55 = vpop.permute.xlu1 %1008 }
  0x95   : > { %376 = vst [vmem:[#allocation2 + $0x98] sm:$0xf] %v372_v45  ;;  %v1011_v57 = vunpack.i.h.bf16 %v1009_v55  ;;  %v1010_v58 = vunpack.i.l.bf16 %v1009_v55  ;;  %v1004_v59 = vpop.permute.xlu0 %1003  ;;  %v1245_v48 = vpop.permute.xlu2 %1058 }
  0x96   : > { %402 = vst [vmem:[#allocation2 + $0xa8] sm:$0xff] %v398_v51  ;;  %v1006_v61 = vunpack.i.h.bf16 %v1004_v59  ;;  %v1005_v62 = vunpack.i.l.bf16 %v1004_v59 }
  0x97   : > { %404 = vst [vmem:[#allocation2 + $0xb4] sm:$0xff] %v400_v52  ;;  %v339_v63 = vsel %vm337_vm2, %v1011_v57, %v1016_v53  ;;  %v338_v2 = vsel %vm337_vm2, %v1010_v58, %v1015_v54 }
  0x98   : > { %v341_v0 = vsel %vm337_vm2, %v1006_v61, %v1011_v57  ;;  %v343_v3 = vsel %vm337_vm2, %v1016_v53, %v1006_v61  ;;  %v340_v4 = vsel %vm337_vm2, %v1005_v62, %v1010_v58  ;;  %v342_v1 = vsel %vm337_vm2, %v1015_v54, %v1005_v62  ;;  %v940_v57 = vld [vmem:[#allocation2 + $0x68] sm:$0xf0]  ;;  %v864_v61 = vld [vmem:[#allocation2 + $0x6c] sm:$0xf0] }
  0x99   : > { %v346_v5 = vpack.c.bf16 %v339_v63, %v341_v0  ;;  %v347_v6 = vpack.c.bf16 %v343_v3, %v343_v3  ;;  %v344_v7 = vpack.c.bf16 %v338_v2, %v340_v4  ;;  %v345_v8 = vpack.c.bf16 %v342_v1, %v342_v1  ;;  %v946_v32 = vld [vmem:[#allocation2 + $0x98] sm:$0xf0]  ;;  %v888_v37 = vld [vmem:[#allocation2 + $0x9c] sm:$0xf0] }
  0x9b   : > { %350 = vst [vmem:[#allocation2 + $0x84] sm:$0xff] %v346_v5  ;;  %v886_v31 = vld [vmem:[#allocation2 + $0x90] sm:$0xf]  ;;  %v945_v36 = vld [vmem:[#allocation2 + $0x94] sm:$0xf] }
  0x9c   : > { %351 = vst [vmem:[#allocation2 + $0x8c] sm:$0xf] %v347_v6  ;;  %v1024_v13 = vpop.permute.xlu1 %1023  ;;  %v887_v40 = vor.u32 %v946_v32, %v886_v31  ;;  %v891_v44 = vor.u32 %v945_v36, %v888_v37  ;;  %v906_v5 = vld [vmem:[#allocation2 + $0xb0] sm:$0xf]  ;;  %v950_v6 = vld [vmem:[#allocation2 + $0xb8] sm:$0xf0] }
  0x9d   : > { %348 = vst [vmem:[#allocation2 + $0x78] sm:$0xff] %v344_v7  ;;  %v1026_v14 = vunpack.i.h.bf16 %v1024_v13  ;;  %v1025_v15 = vunpack.i.l.bf16 %v1024_v13  ;;  %v1019_v16 = vpop.permute.xlu0 %1018  ;;  %v898_v17 = vld [vmem:[#allocation2 + $0xa8] sm:$0xf]  ;;  %v948_v18 = vld [vmem:[#allocation2 + $0xac] sm:$0xf]  ;;  %v863_v7 = vor.u32 %v940_v57, %v862_v56  ;;  %v867_v13 = vor.u32 %v939_v60, %v864_v61  ;;  %v1268_v31 = vpop.permute.xlu2 %1073 }
  0x9e   : > { %349 = vst [vmem:[#allocation2 + $0x80] sm:$0xf] %v345_v8  ;;  %v1021_v19 = vunpack.i.h.bf16 %v1019_v16  ;;  %v1020_v20 = vunpack.i.l.bf16 %v1019_v16  ;;  %v949_v21 = vld [vmem:[#allocation2 + $0xb0] sm:$0xf0]  ;;  %v900_v22 = vld [vmem:[#allocation2 + $0xb4] sm:$0xf0] }
  0x9f   : > { %v420_v23 = vsel %vm418_vm3, %v1026_v14, %v1031_v10  ;;  %v419_v24 = vsel %vm418_vm3, %v1025_v15, %v1030_v11  ;;  %v899_v25 = vor.u32 %v949_v21, %v898_v17  ;;  %v903_v26 = vor.u32 %v948_v18, %v900_v22  ;;  %v925_v8 = vld [vmem:[%s1342_s1 + $0x4] sm:$0xf]  ;;  %v808_v17 = vld [vmem:[%s1342_s1 + $0x8] sm:$0xf0] }
  0xa0   : > { %v422_v27 = vsel %vm418_vm3, %v1021_v19, %v1026_v14  ;;  %v424_v28 = vsel %vm418_vm3, %v1031_v10, %v1021_v19  ;;  %v421_v29 = vsel %vm418_vm3, %v1020_v20, %v1025_v15  ;;  %v423_v30 = vsel %vm418_vm3, %v1030_v11, %v1020_v20  ;;  %v947_v36 = vld [vmem:[#allocation2 + $0xa0] sm:$0xf0] }
  0xa1   : > { %v427_v33 = vpack.c.bf16 %v420_v23, %v422_v27  ;;  %v428_v34 = vpack.c.bf16 %v424_v28, %v424_v28  ;;  %v425_v35 = vpack.c.bf16 %v419_v24, %v421_v29  ;;  %638 = vmatpush.bf16.msra.mxu0 %v899_v25  ;;  %v426_v38 = vpack.c.bf16 %v423_v30, %v423_v30 }
  0xa2   : > { %666 = vmatpush.bf16.msra.mxu2 %v903_v26  ;;  %v943_v39 = vld [vmem:[#allocation2 + $0x80] sm:$0xf0]  ;;  %v876_v43 = vld [vmem:[#allocation2 + $0x84] sm:$0xf0]  ;;  %v1061_v14 = vunpack.i.h.bf16 %v1245_v48  ;;  %v1060_v15 = vunpack.i.l.bf16 %v1245_v48  ;;  %v907_v21 = vor.u32 %v950_v6, %v906_v5  ;;  %v1270_v32 = vor.u32 %v925_v8, %v808_v17 }
  0xa3   : > { %431 = vst [vmem:[#allocation2 + $0xcc] sm:$0xff] %v427_v33  ;;  %v870_v48 = vld [vmem:[#allocation2 + $0x68] sm:$0xf] }
  0xa4   : > { %432 = vst [vmem:[#allocation2 + $0xd4] sm:$0xf] %v428_v34  ;;  %v1039_v45 = vpop.permute.xlu1 %1038  ;;  %v874_v46 = vld [vmem:[#allocation2 + $0x78] sm:$0xf]  ;;  %v942_v47 = vld [vmem:[#allocation2 + $0x7c] sm:$0xf] }
  0xa5   : > { %429 = vst [vmem:[#allocation2 + $0xc0] sm:$0xff] %v425_v35  ;;  %639 = vmatpush.bf16.msra.mxu0 %v887_v40  ;;  %v1041_v49 = vunpack.i.h.bf16 %v1039_v45  ;;  %v1040_v50 = vunpack.i.l.bf16 %v1039_v45  ;;  %v1034_v51 = vpop.permute.xlu0 %1033  ;;  %v875_v52 = vor.u32 %v943_v39, %v874_v46  ;;  %v879_v55 = vor.u32 %v942_v47, %v876_v43  ;;  %v894_v35 = vld [vmem:[#allocation2 + $0x98] sm:$0xf]  ;;  %v882_v47 = vld [vmem:[#allocation2 + $0x80] sm:$0xf] }
  0xa6   : > { %430 = vst [vmem:[#allocation2 + $0xc8] sm:$0xf] %v426_v38  ;;  %667 = vmatpush.bf16.msra.mxu2 %v891_v44  ;;  %v1036_v53 = vunpack.i.h.bf16 %v1034_v51  ;;  %v1035_v54 = vunpack.i.l.bf16 %v1034_v51  ;;  %v944_v44 = vld [vmem:[#allocation2 + $0x88] sm:$0xf0]  ;;  %v895_v46 = vor.u32 %v947_v36, %v894_v35  ;;  %v1076_v51 = vunpack.i.h.bf16 %v1268_v31 }
  0xa7   : > { %v304_v58 = vsel %vm302_vm4, %v1041_v49, %v1046_v41  ;;  %v303_v59 = vsel %vm302_vm4, %v1040_v50, %v1045_v42 }
  0xa8   : > { %v312_v62 = vpack.c.bf16 %v304_v58, %v304_v58  ;;  %v310_v63 = vpack.c.bf16 %v303_v59, %v303_v59  ;;  %v306_v2 = vsel %vm302_vm4, %v1036_v53, %v1041_v49  ;;  %v308_v0 = vsel %vm302_vm4, %v1046_v41, %v1036_v53  ;;  %v941_v49 = vld [vmem:[#allocation2 + $0x70] sm:$0xf0]  ;;  %v470_v59 = vld [vmem:[%s1343_s2 + $0x8] sm:$0xff] }
  0xa9   : > { %v311_v3 = vpack.c.bf16 %v306_v2, %v308_v0  ;;  %v305_v4 = vsel %vm302_vm4, %v1035_v54, %v1040_v50  ;;  %v307_v1 = vsel %vm302_vm4, %v1045_v42, %v1035_v54  ;;  %640 = vmatpush.bf16.msra.mxu0 %v875_v52  ;;  %v469_v50 = vld [vmem:[%s1343_s2] sm:$0xff]  ;;  %v1075_v52 = vunpack.i.l.bf16 %v1268_v31 }
  0xaa   : > { %316 = vst [vmem:[#allocation2 + $0x5c] sm:$0xf] %v312_v62  ;;  %v309_v9 = vpack.c.bf16 %v305_v4, %v307_v1  ;;  %668 = vmatpush.bf16.msra.mxu2 %v879_v55  ;;  %v952_v10 = vld [vmem:[#allocation2 + $0xc8] sm:$0xf0]  ;;  %v912_v11 = vld [vmem:[#allocation2 + $0xcc] sm:$0xf0]  ;;  %v883_v4 = vor.u32 %v944_v44, %v882_v47  ;;  %v871_v6 = vor.u32 %v941_v49, %v870_v48 }
  0xab   : > { %314 = vst [vmem:[#allocation2 + $0x50] sm:$0xf] %v310_v63  ;;  %v953_v16 = vld [vmem:[#allocation2 + $0xd0] sm:$0xf0]  ;;  %v1110_v55 = vmov 0  }
  0xac   : > { %315 = vst [vmem:[#allocation2 + $0x54] sm:$0xff] %v311_v3  ;;  %v1054_v18 = vpop.permute.xlu1 %1053  ;;  %v910_v19 = vld [vmem:[#allocation2 + $0xc0] sm:$0xf]  ;;  %v951_v20 = vld [vmem:[#allocation2 + $0xc4] sm:$0xf]  ;;  %1092 = vset.pattern.permute.xlu0 %v1110_v55  ;;  %1093 = vset.pattern.permute.xlu1 %v1110_v55 }
  0xad   : > { %313 = vst [vmem:[#allocation2 + $0x48] sm:$0xff] %v309_v9  ;;  %v1056_v22 = vunpack.i.h.bf16 %v1054_v18  ;;  %v1055_v23 = vunpack.i.l.bf16 %v1054_v18  ;;  %v1049_v24 = vpop.permute.xlu0 %1048  ;;  %v911_v25 = vor.u32 %v952_v10, %v910_v19  ;;  %v915_v26 = vor.u32 %v951_v20, %v912_v11  ;;  %v918_v27 = vld [vmem:[#allocation2 + $0xc8] sm:$0xf]  ;;  %641 = vmatpush.bf16.msra.mxu0 %v863_v7  ;;  %473 = vperm.xlu0 %1092, %v469_v50   ;;  %v1089_v11 = vpop.permute.xlu2 %1088 }
  0xae   : > { %v1051_v28 = vunpack.i.h.bf16 %v1049_v24  ;;  %v1050_v29 = vunpack.i.l.bf16 %v1049_v24  ;;  %v919_v30 = vor.u32 %v953_v16, %v918_v27  ;;  %669 = vmatpush.bf16.msra.mxu2 %v867_v13  ;;  %478 = vperm.xlu1 %1093, %v470_v59   ;;  %v1091_v19 = vunpack.i.h.bf16 %v1089_v11 }
  0xaf   : > { %v277_v33 = vsel %vm275_vm5, %v1056_v22, %v1061_v14  ;;  %v276_v34 = vsel %vm275_vm5, %v1055_v23, %v1060_v15  ;;  %659 = vmatpush.bf16.msra.mxu1 %v911_v25  ;;  %687 = vmatpush.bf16.msra.mxu3 %v915_v26  ;;  %v1090_v20 = vunpack.i.l.bf16 %v1089_v11 }
  0xb0   : > { %v285_v37 = vpack.c.bf16 %v277_v33, %v277_v33  ;;  %v283_v38 = vpack.c.bf16 %v276_v34, %v276_v34  ;;  %v279_v39 = vsel %vm275_vm5, %v1051_v28, %v1056_v22  ;;  %v281_v40 = vsel %vm275_vm5, %v1061_v14, %v1051_v28 }
  0xb1   : > { %v284_v41 = vpack.c.bf16 %v279_v39, %v281_v40  ;;  %v278_v42 = vsel %vm275_vm5, %v1050_v29, %v1055_v23  ;;  %v280_v43 = vsel %vm275_vm5, %v1060_v15, %v1050_v29  ;;  %v938_v18 = vld [vmem:[#allocation2 + $0x58] sm:$0xf0] }
  0xb2   : > { %289 = vst [vmem:[#allocation2 + $0x44] sm:$0xf] %v285_v37  ;;  %v282_v45 = vpack.c.bf16 %v278_v42, %v280_v43  ;;  %921 = vmatmul.msk.bf16.vlgmr.msra.gmra.mxu3 %vm634_vm6, %v1270_v32  ;;  %920 = vmatmul.msk.bf16.vlgmr.msra.gmra.mxu1 %vm634_vm6, %v1270_v32  ;;  %v858_v17 = vld [vmem:[#allocation2 + $0x50] sm:$0xf] }
  0xb3   : > { %694 = vmatpush.bf16.msrb.mxu1 %v907_v21  ;;  %715 = vmatpush.bf16.msrb.mxu3 %v919_v30  ;;  %287 = vst [vmem:[#allocation2 + $0x38] sm:$0xf] %v283_v38  ;;  %v937_v53 = vld [vmem:[#allocation2 + $0x50] sm:$0xf0]  ;;  %v852_v54 = vld [vmem:[#allocation2 + $0x54] sm:$0xf0]  ;;  %v859_v34 = vor.u32 %v938_v18, %v858_v17 }
  0xb4   : > { %288 = vst [vmem:[#allocation2 + $0x3c] sm:$0xff] %v284_v41  ;;  %v1069_v56 = vpop.permute.xlu1 %1068  ;;  %v850_v57 = vld [vmem:[#allocation2 + $0x48] sm:$0xf]  ;;  %v936_v58 = vld [vmem:[#allocation2 + $0x4c] sm:$0xf] }
  0xb5   : > { %286 = vst [vmem:[#allocation2 + $0x30] sm:$0xff] %v282_v45  ;;  %v1071_v60 = vunpack.i.h.bf16 %v1069_v56  ;;  %v1070_v61 = vunpack.i.l.bf16 %v1069_v56  ;;  %v1064_v62 = vpop.permute.xlu0 %1063  ;;  %v851_v63 = vor.u32 %v937_v53, %v850_v57  ;;  %v855_v2 = vor.u32 %v936_v58, %v852_v54  ;;  %v806_v57 = vld [vmem:[%s1342_s1] sm:$0xf] }
  0xb6   : > { %v1066_v0 = vunpack.i.h.bf16 %v1064_v62  ;;  %v1065_v3 = vunpack.i.l.bf16 %v1064_v62 }
  0xb7   : > { %695 = vmatpush.bf16.msrb.mxu1 %v895_v46  ;;  %v250_v1 = vsel %vm248_vm7, %v1071_v60, %v1076_v51  ;;  %v249_v5 = vsel %vm248_vm7, %v1070_v61, %v1075_v52  ;;  %642 = vmatpush.bf16.msra.mxu0 %v851_v63 }
  0xb8   : > { %670 = vmatpush.bf16.msra.mxu2 %v855_v2  ;;  %v258_v7 = vpack.c.bf16 %v250_v1, %v250_v1  ;;  %v256_v8 = vpack.c.bf16 %v249_v5, %v249_v5  ;;  %v252_v9 = vsel %vm248_vm7, %v1066_v0, %v1071_v60  ;;  %v254_v10 = vsel %vm248_vm7, %v1076_v51, %v1066_v0 }
  0xb9   : > { %v257_v13 = vpack.c.bf16 %v252_v9, %v254_v10  ;;  %v251_v14 = vsel %vm248_vm7, %v1065_v3, %v1070_v61  ;;  %v253_v15 = vsel %vm248_vm7, %v1075_v52, %v1065_v3  ;;  %v935_v38 = vld [vmem:[#allocation2 + $0x40] sm:$0xf0] }
  0xba   : > { %262 = vst [vmem:[#allocation2 + $0x2c] sm:$0xf] %v258_v7  ;;  %v255_v16 = vpack.c.bf16 %v251_v14, %v253_v15  ;;  %v846_v37 = vld [vmem:[#allocation2 + $0x38] sm:$0xf] }
  0xbb   : > { %696 = vmatpush.bf16.msrb.mxu1 %v883_v4  ;;  %260 = vst [vmem:[#allocation2 + $0x20] sm:$0xf] %v256_v8  ;;  %v934_v21 = vld [vmem:[#allocation2 + $0x38] sm:$0xf0]  ;;  %v840_v22 = vld [vmem:[#allocation2 + $0x3c] sm:$0xf0]  ;;  %v847_v48 = vor.u32 %v935_v38, %v846_v37 }
  0xbc   : > { %261 = vst [vmem:[#allocation2 + $0x24] sm:$0xff] %v257_v13  ;;  %v1084_v23 = vpop.permute.xlu1 %1083  ;;  %v838_v24 = vld [vmem:[#allocation2 + $0x30] sm:$0xf]  ;;  %v933_v25 = vld [vmem:[#allocation2 + $0x34] sm:$0xf] }
  0xbd   : > { %259 = vst [vmem:[#allocation2 + $0x18] sm:$0xff] %v255_v16  ;;  %v1086_v26 = vunpack.i.h.bf16 %v1084_v23  ;;  %v1085_v27 = vunpack.i.l.bf16 %v1084_v23  ;;  %v1079_v28 = vpop.permute.xlu0 %1078  ;;  %v839_v29 = vor.u32 %v934_v21, %v838_v24  ;;  %v843_v30 = vor.u32 %v933_v25, %v840_v22  ;;  %v722_v8 = vld [vmem:[%s1344_s3] sm:$0x7] }
  0xbe   : > { %v1081_v31 = vunpack.i.h.bf16 %v1079_v28  ;;  %v1080_v33 = vunpack.i.l.bf16 %v1079_v28  ;;  %v726_v13 = vperm.slane %v722_v8, 2  ;;  %v724_v16 = vperm.slane %v722_v8, 0 }
  0xbf   : > { %697 = vmatpush.bf16.msrb.mxu1 %v871_v6  ;;  %v223_v35 = vsel %vm221_vm8, %v1086_v26, %v1091_v19  ;;  %v222_v36 = vsel %vm221_vm8, %v1085_v27, %v1090_v20  ;;  %643 = vmatpush.bf16.msra.mxu0 %v839_v29  ;;  %v725_v25 = vperm.slane %v722_v8, 1 }
  0xc0   : > { %671 = vmatpush.bf16.msra.mxu2 %v843_v30  ;;  %v231_v39 = vpack.c.bf16 %v223_v35, %v223_v35  ;;  %v229_v40 = vpack.c.bf16 %v222_v36, %v222_v36  ;;  %v225_v41 = vsel %vm221_vm8, %v1081_v31, %v1086_v26  ;;  %v227_v42 = vsel %vm221_vm8, %v1091_v19, %v1081_v31 }
  0xc1   : > { %v230_v43 = vpack.c.bf16 %v225_v41, %v227_v42  ;;  %v224_v44 = vsel %vm221_vm8, %v1080_v33, %v1085_v27  ;;  %v226_v45 = vsel %vm221_vm8, %v1090_v20, %v1080_v33  ;;  %v932_v46 = vld [vmem:[#allocation2 + $0x28] sm:$0xf0] }
  0xc2   : > { %235 = vst [vmem:[#allocation2 + $0x14] sm:$0xf] %v231_v39  ;;  %v228_v47 = vpack.c.bf16 %v224_v44, %v226_v45  ;;  %v834_v49 = vld [vmem:[#allocation2 + $0x20] sm:$0xf]  ;;  %922 = vmatmul.msk.bf16.vlgmr.msrb.gmra.mxu3 %vm634_vm6, %v1270_v32  ;;  %v926_v32 = vld [vmem:[%s1342_s1 + $0x4] sm:$0xf0] }
  0xc3   : > { %698 = vmatpush.bf16.msrb.mxu1 %v859_v34  ;;  %233 = vst [vmem:[#allocation2 + $0x8] sm:$0xf] %v229_v40  ;;  %v931_v50 = vld [vmem:[#allocation2 + $0x20] sm:$0xf0]  ;;  %v828_v51 = vld [vmem:[#allocation2 + $0x24] sm:$0xf0]  ;;  %v835_v54 = vor.u32 %v932_v46, %v834_v49  ;;  %v807_v2 = vor.u32 %v926_v32, %v806_v57 }
  0xc4   : > { %234 = vst [vmem:[#allocation2 + $0xc] sm:$0xff] %v230_v43  ;;  %v826_v52 = vld [vmem:[#allocation2 + $0x18] sm:$0xf]  ;;  %v930_v53 = vld [vmem:[#allocation2 + $0x1c] sm:$0xf] }
  0xc5   : > { %232 = vst [vmem:[#allocation2] sm:$0xff] %v228_v47  ;;  %v827_v55 = vor.u32 %v931_v50, %v826_v52  ;;  %v831_v12 = vor.u32 %v930_v53, %v828_v51 }
  0xc7   : > { %699 = vmatpush.bf16.msrb.mxu1 %v847_v48  ;;  %644 = vmatpush.bf16.msra.mxu0 %v827_v55 }
  0xc8   : > { %672 = vmatpush.bf16.msra.mxu2 %v831_v12 }
  0xc9   : > { %v929_v56 = vld [vmem:[#allocation2 + $0x10] sm:$0xf0] }
  0xca   : > { %v822_v58 = vld [vmem:[#allocation2 + $0x8] sm:$0xf] }
  0xcb   : > { %700 = vmatpush.bf16.msrb.mxu1 %v835_v54  ;;  %v928_v59 = vld [vmem:[#allocation2 + $0x8] sm:$0xf0]  ;;  %v816_v60 = vld [vmem:[#allocation2 + $0xc] sm:$0xf0]  ;;  %v823_v61 = vor.u32 %v929_v56, %v822_v58 }
  0xcc   : > { %v814_v62 = vld [vmem:[#allocation2] sm:$0xf]  ;;  %v927_v63 = vld [vmem:[#allocation2 + $0x4] sm:$0xf] }
  0xcd   : > { %v815_v0 = vor.u32 %v928_v59, %v814_v62  ;;  %v819_v3 = vor.u32 %v927_v63, %v816_v60 }
  0xcf   : > { %701 = vmatpush.bf16.msrb.mxu1 %v823_v61  ;;  %645 = vmatpush.bf16.msra.mxu0 %v815_v0 }
  0xd0   : > { %673 = vmatpush.bf16.msra.mxu2 %v819_v3 }
  0xd2   : > { %702 = vmatmul.bf16.vlgmr.msrb.gmra.mxu1 %v807_v2  ;;  %646 = vmatmul.bf16.vlgmr.msra.gmra.mxu0 %v807_v2 }
  0xd3   : > { %674 = vmatmul.bf16.vlgmr.msra.gmra.mxu2 %v807_v2 }
 0x11f   : > { %v474_v7 = vpop.permute.xlu0 %473 }
 0x120   : > { %v479_v20 = vpop.permute.xlu1 %478 }
 0x12f   : > { %v661_v1 = vpop.f32.mrf.mxu1 }
 0x135   : > { %v689_v4 = vpop.f32.mrf.mxu3 }
 0x137   : > { %v663_v6 = vpop.f32.mrf.mxu1 }
 0x13d   : > { %v691_v5 = vpop.f32.mrf.mxu3 }
 0x145   : > { %v717_v10 = vpop.f32.mrf.mxu3 }
 0x14d   : > { %v719_v28 = vpop.f32.mrf.mxu3 }
 0x14f   : > { %v703_v9 = vpop.f32.mrf.mxu1  ;;  %v647_v14 = vpop.f32.mrf.mxu0 }
 0x150   : > { %v704_v11 = vadd.f32 %v703_v9, %v474_v7  ;;  %v648_v15 = vadd.f32 %v647_v14, %v474_v7 }
 0x152   : > { %v718_v17 = vadd.f32 %v717_v10, %v704_v11  ;;  %v662_v18 = vadd.f32 %v661_v1, %v648_v15 }
 0x154   : > { %v732_v19 = vmul.f32 %v726_v13, %v718_v17  ;;  %v730_v21 = vmul.f32 %v724_v16, %v662_v18 }
 0x156   : > { %738 = vst [vmem:[%s197_s22 + $0x10] sm:$0xff] %v732_v19  ;;  %v675_v22 = vpop.f32.mrf.mxu2 }
 0x157   : > { %v705_v23 = vpop.f32.mrf.mxu1  ;;  %736 = vst [vmem:[%s197_s22] sm:$0xff] %v730_v21  ;;  %v676_v24 = vadd.f32 %v675_v22, %v474_v7  ;;  %v649_v27 = vpop.f32.mrf.mxu0 }
 0x158   : > { %v706_v26 = vadd.f32 %v705_v23, %v479_v20  ;;  %v650_v30 = vadd.f32 %v649_v27, %v479_v20 }
 0x159   : > { %v690_v29 = vadd.f32 %v689_v4, %v676_v24 }
 0x15a   : > { %v720_v31 = vadd.f32 %v719_v28, %v706_v26  ;;  %v664_v34 = vadd.f32 %v663_v6, %v650_v30 }
 0x15b   : > { %v731_v33 = vmul.f32 %v725_v25, %v690_v29 }
 0x15c   : > { %v735_v35 = vmul.f32 %v726_v13, %v720_v31  ;;  %v733_v36 = vmul.f32 %v724_v16, %v664_v34 }
 0x15d   : > { %737 = vst [vmem:[%s197_s22 + $0x8] sm:$0xff] %v731_v33 }
 0x15e   : > { %741 = vst [vmem:[%s197_s22 + $0x28] sm:$0xff] %v735_v35  ;;  %v677_v37 = vpop.f32.mrf.mxu2 }
 0x15f   : > { %739 = vst [vmem:[%s197_s22 + $0x18] sm:$0xff] %v733_v36  ;;  %v678_v38 = vadd.f32 %v677_v37, %v479_v20 }
 0x161   : > { %v692_v39 = vadd.f32 %v691_v5, %v678_v38 }
 0x163   : > { %v734_v40 = vmul.f32 %v725_v25, %v692_v39 }
 0x165   : > { %740 = vst [vmem:[%s197_s22 + $0x20] sm:$0xff] %v734_v40 }
 0x166 PF: > { %s14_s15 = sadd.s32 1, %s1100_s15  }
 0x167   : > { %p11_p4 = scmp.ge.s32.totalorder %s14_s15, 4  }
 0x169   :  { %13 = sbr.rel (!%p11_p4) target bundleno = 1 (0x1), region = 66 }

// kernel: rcan_forward.7
= control target key start
LH: loop header
LB: loop body
LE: loop exit
PB: predicated region body
PF: predicated region fallthrough
CT: control target
= control target key end

     0   :  { %s2871_s30 = smov 0   ;;  %s3436_s0 = inlined_call_operand.vmem [shape: f32[2,16,384], index: 0, kind: input, shape index: {}]   ;;  %s3437_s1 = inlined_call_operand.vmem [shape: f32[2,16,384], index: 1, kind: input, shape index: {}]   ;;  %s3438_s2 = inlined_call_operand.vmem [shape: bf16[16,144], index: 2, kind: input, shape index: {}]   ;;  %s3439_s3 = inlined_call_operand.vmem [shape: f32[16,1], index: 3, kind: input, shape index: {}]   ;;  %s3440_s4 = inlined_call_operand.vmem [shape: bf16[16,144], index: 4, kind: input, shape index: {}]   ;;  %s3441_s5 = inlined_call_operand.vmem [shape: f32[16,1], index: 5, kind: input, shape index: {}]   ;;  %s3442_s6 = inlined_call_operand.vmem [shape: bf16[8,144], index: 6, kind: input, shape index: {}]   ;;  %s3443_s7 = inlined_call_operand.vmem [shape: f32[8,1], index: 7, kind: input, shape index: {}]   ;;  %s3444_s8 = inlined_call_operand.vmem [shape: f32[1,384], index: 8, kind: input, shape index: {}]   ;;  %s3445_s9 = inlined_call_operand.vmem [shape: f32[2,8,384], index: 9, kind: output, shape index: {}]  }
   0x1 LB: > { %s1978_s10 = sadd.s32 4294967295, %s2810_s30   ;;  %p1982_p0 = scmp.ge.s32.totalorder %s2810_s30, 1  ;;  %s2810_s30 = sphi %s2871_s30, %s19_s30  }
   0x2   : > { %p297_p1 = scmp.lt.s32.totalorder %s2810_s30, 3 }
   0x4   : > { %p298_p2 = pnand %p1982_p0, %p297_p1 }
   0x5   : > { %p338_p3 = scmp.lt.s32.totalorder (!%p298_p2), %s1978_s10, 1  ;;  %s2812_s15 = smov (!%p298_p2), 110  }
   0x6   : > { %301 = sbr.rel (%p298_p2) target bundleno = 1065 (0x429), region = 56  ;;  %s2813_s16 = smov (!%p298_p2), 111  }
   0x7   : > { %s2814_s17 = smov (!%p298_p2), 127   ;;  %s2815_s18 = smov (!%p298_p2), 109  }
   0x8   : > { %s2816_s19 = smov (!%p298_p2), 1   ;;  %s2817_s20 = smov (!%p298_p2), 17  }
   0x9   : > { %s2818_s21 = smov (!%p298_p2), 18   ;;  %s2819_s22 = smov (!%p298_p2), 19  }
   0xb   : > { %s3447_s10 = smov (!%p338_p3, %s1978_s10), 1  ;;  %v375_v10 = vlaneseq  ;;  %vm790_vm6 = vcmask 130048  }
   0xc   : > { %s2422_s11 = smul.u32 48, %s3447_s10 }
   0xd   : > { %v2929_v12 = vand.u32 127, %v375_v10 }
   0xe   : > { %s342_s14 = scalar_lea.vmem %s3436_s0, %s2422_s11  ;;  %s3099_s29 = scalar_lea.vmem %s3437_s1, %s2422_s11 }
   0xf   : > { %v2887_v0 = vld [vmem:[%s342_s14 + $0x10] sm:$0xff]  ;;  %v2889_v1 = vld [vmem:[%s342_s14 + $0x28] sm:$0xff]  ;;  %v2891_v2 = vld [vmem:[%s342_s14] sm:$0xff]  ;;  %vm547_vm0 = vcmp.lt.s32.totalorder %v2929_v12, 110  ;;  %vm520_vm1 = vcmp.lt.s32.totalorder %v2929_v12, 111  ;;  %vm493_vm2 = vcmp.lt.s32.totalorder %v2929_v12, 127 }
  0x10   : > { %v2451_v3 = vpack.i.bf16 %v2889_v1, %v2887_v0  ;;  %v2895_v4 = vld [vmem:[%s342_s14 + $0x18] sm:$0xff]  ;;  %v2897_v5 = vld [vmem:[%s342_s14 + $0x8] sm:$0xff]  ;;  %v2899_v6 = vld [vmem:[%s342_s14 + $0x20] sm:$0xff]  ;;  %v474_v56 = vpack.c.bf16 %v2887_v0, %v2887_v0  ;;  %v476_v60 = vpack.c.bf16 %v2889_v1, %v2889_v1  ;;  %vm574_vm3 = vcmp.lt.s32.totalorder %v2929_v12, 109 }
  0x11   : > { %v2441_v7 = vpack.i.bf16 %v2895_v4, %v2891_v2  ;;  %v2461_v8 = vpack.i.bf16 %v2899_v6, %v2897_v5  ;;  %v473_v28 = vpack.c.bf16 %v2897_v5, %v2891_v2  ;;  %v475_v29 = vpack.c.bf16 %v2899_v6, %v2895_v4 }
  0x12   : > { %2452 = vrot.lane.b32.xlu1 %v2451_v3, %s2812_s15  ;;  %478 = vst [vmem:[#allocation2 + $0x68] sm:$0xf] %v474_v56  ;;  %vm458_vm4 = vcmp.lt.s32.totalorder %v2929_v12, 1  ;;  %vm431_vm5 = vcmp.lt.s32.totalorder %v2929_v12, 17  ;;  %vm404_vm7 = vcmp.lt.s32.totalorder %v2929_v12, 18  ;;  %vm377_vm8 = vcmp.lt.s32.totalorder %v2929_v12, 19 }
  0x13   : > { %2442 = vrot.lane.b32.xlu0 %v2441_v7, %s2812_s15  ;;  %2462 = vrot.lane.b32.xlu2 %v2461_v8, %s2813_s16  ;;  %477 = vst [vmem:[#allocation2 + $0x60] sm:$0xff] %v473_v28 }
  0x14   : > { %479 = vst [vmem:[#allocation2 + $0x6c] sm:$0xff] %v475_v29 }
  0x15   : > { %480 = vst [vmem:[#allocation2 + $0x74] sm:$0xf] %v476_v60 }
  0x1a   : > { %2457 = vrot.lane.b32.xlu1 %v2441_v7, %s2813_s16  ;;  %v2044_v56 = vld [vmem:[#allocation2 + $0x60] sm:$0xf]  ;;  %v2351_v60 = vld [vmem:[#allocation2 + $0x64] sm:$0xf] }
  0x1b   : > { %2447 = vrot.lane.b32.xlu0 %v2461_v8, %s2812_s15  ;;  %2467 = vrot.lane.b32.xlu2 %v2451_v3, %s2813_s16 }
  0x22   : > { %2477 = vrot.lane.b32.xlu1 %v2461_v8, %s2814_s17 }
  0x23   : > { %2472 = vrot.lane.b32.xlu0 %v2441_v7, %s2814_s17  ;;  %2482 = vrot.lane.b32.xlu2 %v2451_v3, %s2814_s17 }
  0x2a   : > { %2492 = vrot.lane.b32.xlu1 %v2461_v8, %s2815_s18 }
  0x2b   : > { %2487 = vrot.lane.b32.xlu0 %v2441_v7, %s2815_s18  ;;  %2497 = vrot.lane.b32.xlu2 %v2451_v3, %s2815_s18 }
  0x32   : > { %2507 = vrot.lane.b32.xlu1 %v2461_v8, %s2816_s19 }
  0x33   : > { %2502 = vrot.lane.b32.xlu0 %v2441_v7, %s2816_s19  ;;  %2512 = vrot.lane.b32.xlu2 %v2451_v3, %s2816_s19 }
  0x3a   : > { %2522 = vrot.lane.b32.xlu1 %v2461_v8, %s2817_s20 }
  0x3b   : > { %2517 = vrot.lane.b32.xlu0 %v2441_v7, %s2817_s20  ;;  %2527 = vrot.lane.b32.xlu2 %v2451_v3, %s2817_s20 }
  0x42   : > { %2537 = vrot.lane.b32.xlu1 %v2461_v8, %s2818_s21 }
  0x43   : > { %2532 = vrot.lane.b32.xlu0 %v2441_v7, %s2818_s21  ;;  %2542 = vrot.lane.b32.xlu2 %v2451_v3, %s2818_s21 }
  0x4a   : > { %2552 = vrot.lane.b32.xlu1 %v2461_v8, %s2819_s22 }
  0x4b   : > { %2547 = vrot.lane.b32.xlu0 %v2441_v7, %s2819_s22  ;;  %2557 = vrot.lane.b32.xlu2 %v2451_v3, %s2819_s22 }
  0x6d   : > { %v2463_v9 = vpop.permute.xlu2 %2462 }
  0x6e   : > { %v2465_v22 = vunpack.i.h.bf16 %v2463_v9  ;;  %v2464_v23 = vunpack.i.l.bf16 %v2463_v9 }
  0x75   : > { %v2468_v11 = vpop.permute.xlu2 %2467 }
  0x76   : > { %v2470_v26 = vunpack.i.h.bf16 %v2468_v11  ;;  %v2469_v27 = vunpack.i.l.bf16 %v2468_v11 }
  0x78   : > { %v521_v34 = vsel %vm520_vm1, %v2464_v23, %v2469_v27  ;;  %v522_v35 = vsel %vm520_vm1, %v2465_v22, %v2470_v26 }
  0x7d   : > { %v2932_v19 = vpop.permute.xlu2 %2482 }
  0x7e   : > { %v2485_v53 = vunpack.i.h.bf16 %v2932_v19  ;;  %v2484_v54 = vunpack.i.l.bf16 %v2932_v19 }
  0x84   : > { %v2453_v13 = vpop.permute.xlu1 %2452 }
  0x85   : > { %v2455_v14 = vunpack.i.h.bf16 %v2453_v13  ;;  %v2454_v15 = vunpack.i.l.bf16 %v2453_v13  ;;  %v2443_v16 = vpop.permute.xlu0 %2442  ;;  %v2955_v46 = vpop.permute.xlu2 %2497 }
  0x86   : > { %v2445_v17 = vunpack.i.h.bf16 %v2443_v16  ;;  %v2444_v18 = vunpack.i.l.bf16 %v2443_v16  ;;  %v2500_v10 = vunpack.i.h.bf16 %v2955_v46  ;;  %v2499_v11 = vunpack.i.l.bf16 %v2955_v46 }
  0x88   : > { %v553_v20 = vsel %vm547_vm0, %v2455_v14, %v2445_v17  ;;  %v552_v21 = vsel %vm547_vm0, %v2454_v15, %v2444_v18 }
  0x89   : > { %v557_v24 = vpack.c.bf16 %v553_v20, %v553_v20  ;;  %v555_v25 = vpack.c.bf16 %v552_v21, %v552_v21 }
  0x8b   : > { %561 = vst [vmem:[#allocation2 + $0xbc] sm:$0xf] %v557_v24 }
  0x8c   : > { %559 = vst [vmem:[#allocation2 + $0xb0] sm:$0xf] %v555_v25  ;;  %v2458_v30 = vpop.permute.xlu1 %2457 }
  0x8d   : > { %v2460_v31 = vunpack.i.h.bf16 %v2458_v30  ;;  %v2459_v32 = vunpack.i.l.bf16 %v2458_v30  ;;  %v2448_v33 = vpop.permute.xlu0 %2447  ;;  %v2984_v9 = vpop.permute.xlu2 %2512 }
  0x8e   : > { %v2450_v36 = vunpack.i.h.bf16 %v2448_v33  ;;  %v2449_v37 = vunpack.i.l.bf16 %v2448_v33 }
  0x8f   : > { %v524_v38 = vsel %vm520_vm1, %v2460_v31, %v2465_v22  ;;  %v526_v39 = vsel %vm520_vm1, %v2470_v26, %v2460_v31  ;;  %v523_v40 = vsel %vm520_vm1, %v2459_v32, %v2464_v23  ;;  %v525_v41 = vsel %vm520_vm1, %v2469_v27, %v2459_v32 }
  0x90   : > { %v529_v42 = vpack.c.bf16 %v522_v35, %v524_v38  ;;  %v530_v43 = vpack.c.bf16 %v526_v39, %v526_v39  ;;  %v527_v44 = vpack.c.bf16 %v521_v34, %v523_v40  ;;  %v528_v45 = vpack.c.bf16 %v525_v41, %v525_v41 }
  0x91   : > { %v549_v47 = vsel %vm547_vm0, %v2450_v36, %v2455_v14  ;;  %v548_v48 = vsel %vm547_vm0, %v2449_v37, %v2454_v15  ;;  %v550_v49 = vsel %vm547_vm0, %v2444_v18, %v2449_v37  ;;  %v551_v50 = vsel %vm547_vm0, %v2445_v17, %v2450_v36 }
  0x92   : > { %533 = vst [vmem:[#allocation2 + $0x9c] sm:$0xff] %v529_v42  ;;  %v554_v51 = vpack.c.bf16 %v548_v48, %v550_v49  ;;  %v556_v52 = vpack.c.bf16 %v549_v47, %v551_v50  ;;  %v2515_v41 = vunpack.i.h.bf16 %v2984_v9  ;;  %v2514_v42 = vunpack.i.l.bf16 %v2984_v9 }
  0x93   : > { %534 = vst [vmem:[#allocation2 + $0xa4] sm:$0xf] %v530_v43 }
  0x94   : > { %531 = vst [vmem:[#allocation2 + $0x90] sm:$0xff] %v527_v44  ;;  %v2478_v55 = vpop.permute.xlu1 %2477 }
  0x95   : > { %532 = vst [vmem:[#allocation2 + $0x98] sm:$0xf] %v528_v45  ;;  %v2480_v57 = vunpack.i.h.bf16 %v2478_v55  ;;  %v2479_v58 = vunpack.i.l.bf16 %v2478_v55  ;;  %v2473_v59 = vpop.permute.xlu0 %2472  ;;  %v3004_v48 = vpop.permute.xlu2 %2527 }
  0x96   : > { %558 = vst [vmem:[#allocation2 + $0xa8] sm:$0xff] %v554_v51  ;;  %v2475_v61 = vunpack.i.h.bf16 %v2473_v59  ;;  %v2474_v62 = vunpack.i.l.bf16 %v2473_v59 }
  0x97   : > { %560 = vst [vmem:[#allocation2 + $0xb4] sm:$0xff] %v556_v52  ;;  %v495_v63 = vsel %vm493_vm2, %v2480_v57, %v2485_v53  ;;  %v494_v2 = vsel %vm493_vm2, %v2479_v58, %v2484_v54 }
  0x98   : > { %v497_v0 = vsel %vm493_vm2, %v2475_v61, %v2480_v57  ;;  %v499_v3 = vsel %vm493_vm2, %v2485_v53, %v2475_v61  ;;  %v496_v4 = vsel %vm493_vm2, %v2474_v62, %v2479_v58  ;;  %v498_v1 = vsel %vm493_vm2, %v2484_v54, %v2474_v62  ;;  %v2352_v57 = vld [vmem:[#allocation2 + $0x68] sm:$0xf0]  ;;  %v2046_v61 = vld [vmem:[#allocation2 + $0x6c] sm:$0xf0] }
  0x99   : > { %v502_v5 = vpack.c.bf16 %v495_v63, %v497_v0  ;;  %v503_v6 = vpack.c.bf16 %v499_v3, %v499_v3  ;;  %v500_v7 = vpack.c.bf16 %v494_v2, %v496_v4  ;;  %v501_v8 = vpack.c.bf16 %v498_v1, %v498_v1  ;;  %v2358_v32 = vld [vmem:[#allocation2 + $0x98] sm:$0xf0]  ;;  %v2070_v37 = vld [vmem:[#allocation2 + $0x9c] sm:$0xf0] }
  0x9b   : > { %506 = vst [vmem:[#allocation2 + $0x84] sm:$0xff] %v502_v5  ;;  %v2068_v31 = vld [vmem:[#allocation2 + $0x90] sm:$0xf]  ;;  %v2357_v36 = vld [vmem:[#allocation2 + $0x94] sm:$0xf] }
  0x9c   : > { %507 = vst [vmem:[#allocation2 + $0x8c] sm:$0xf] %v503_v6  ;;  %v2493_v13 = vpop.permute.xlu1 %2492  ;;  %v2069_v40 = vor.u32 %v2358_v32, %v2068_v31  ;;  %v2073_v44 = vor.u32 %v2357_v36, %v2070_v37  ;;  %v2088_v5 = vld [vmem:[#allocation2 + $0xb0] sm:$0xf]  ;;  %v2362_v6 = vld [vmem:[#allocation2 + $0xb8] sm:$0xf0] }
  0x9d   : > { %504 = vst [vmem:[#allocation2 + $0x78] sm:$0xff] %v500_v7  ;;  %v2495_v14 = vunpack.i.h.bf16 %v2493_v13  ;;  %v2494_v15 = vunpack.i.l.bf16 %v2493_v13  ;;  %v2488_v16 = vpop.permute.xlu0 %2487  ;;  %v2080_v17 = vld [vmem:[#allocation2 + $0xa8] sm:$0xf]  ;;  %v2360_v18 = vld [vmem:[#allocation2 + $0xac] sm:$0xf]  ;;  %v2045_v7 = vor.u32 %v2352_v57, %v2044_v56  ;;  %v2049_v13 = vor.u32 %v2351_v60, %v2046_v61  ;;  %v3027_v31 = vpop.permute.xlu2 %2542 }
  0x9e   : > { %505 = vst [vmem:[#allocation2 + $0x80] sm:$0xf] %v501_v8  ;;  %v2490_v19 = vunpack.i.h.bf16 %v2488_v16  ;;  %v2489_v20 = vunpack.i.l.bf16 %v2488_v16  ;;  %v2361_v21 = vld [vmem:[#allocation2 + $0xb0] sm:$0xf0]  ;;  %v2082_v22 = vld [vmem:[#allocation2 + $0xb4] sm:$0xf0] }
  0x9f   : > { %v576_v23 = vsel %vm574_vm3, %v2495_v14, %v2500_v10  ;;  %v575_v24 = vsel %vm574_vm3, %v2494_v15, %v2499_v11  ;;  %v2081_v25 = vor.u32 %v2361_v21, %v2080_v17  ;;  %v2085_v26 = vor.u32 %v2360_v18, %v2082_v22  ;;  %v2337_v8 = vld [vmem:[%s3438_s2 + $0x4] sm:$0xf]  ;;  %v1990_v17 = vld [vmem:[%s3438_s2 + $0x8] sm:$0xf0] }
  0xa0   : > { %v578_v27 = vsel %vm574_vm3, %v2490_v19, %v2495_v14  ;;  %v580_v28 = vsel %vm574_vm3, %v2500_v10, %v2490_v19  ;;  %v577_v29 = vsel %vm574_vm3, %v2489_v20, %v2494_v15  ;;  %v579_v30 = vsel %vm574_vm3, %v2499_v11, %v2489_v20  ;;  %v2359_v36 = vld [vmem:[#allocation2 + $0xa0] sm:$0xf0] }
  0xa1   : > { %v583_v33 = vpack.c.bf16 %v576_v23, %v578_v27  ;;  %v584_v34 = vpack.c.bf16 %v580_v28, %v580_v28  ;;  %v581_v35 = vpack.c.bf16 %v575_v24, %v577_v29  ;;  %794 = vmatpush.bf16.msra.mxu0 %v2081_v25  ;;  %v582_v38 = vpack.c.bf16 %v579_v30, %v579_v30 }
  0xa2   : > { %822 = vmatpush.bf16.msra.mxu2 %v2085_v26  ;;  %v2355_v39 = vld [vmem:[#allocation2 + $0x80] sm:$0xf0]  ;;  %v2058_v43 = vld [vmem:[#allocation2 + $0x84] sm:$0xf0]  ;;  %v2530_v14 = vunpack.i.h.bf16 %v3004_v48  ;;  %v2529_v15 = vunpack.i.l.bf16 %v3004_v48  ;;  %v2089_v21 = vor.u32 %v2362_v6, %v2088_v5  ;;  %v3029_v32 = vor.u32 %v2337_v8, %v1990_v17 }
  0xa3   : > { %587 = vst [vmem:[#allocation2 + $0xcc] sm:$0xff] %v583_v33  ;;  %v2052_v48 = vld [vmem:[#allocation2 + $0x68] sm:$0xf] }
  0xa4   : > { %588 = vst [vmem:[#allocation2 + $0xd4] sm:$0xf] %v584_v34  ;;  %v2508_v45 = vpop.permute.xlu1 %2507  ;;  %v2056_v46 = vld [vmem:[#allocation2 + $0x78] sm:$0xf]  ;;  %v2354_v47 = vld [vmem:[#allocation2 + $0x7c] sm:$0xf] }
  0xa5   : > { %585 = vst [vmem:[#allocation2 + $0xc0] sm:$0xff] %v581_v35  ;;  %795 = vmatpush.bf16.msra.mxu0 %v2069_v40  ;;  %v2510_v49 = vunpack.i.h.bf16 %v2508_v45  ;;  %v2509_v50 = vunpack.i.l.bf16 %v2508_v45  ;;  %v2503_v51 = vpop.permute.xlu0 %2502  ;;  %v2057_v52 = vor.u32 %v2355_v39, %v2056_v46  ;;  %v2061_v55 = vor.u32 %v2354_v47, %v2058_v43  ;;  %v2076_v35 = vld [vmem:[#allocation2 + $0x98] sm:$0xf]  ;;  %v2064_v47 = vld [vmem:[#allocation2 + $0x80] sm:$0xf] }
  0xa6   : > { %586 = vst [vmem:[#allocation2 + $0xc8] sm:$0xf] %v582_v38  ;;  %823 = vmatpush.bf16.msra.mxu2 %v2073_v44  ;;  %v2505_v53 = vunpack.i.h.bf16 %v2503_v51  ;;  %v2504_v54 = vunpack.i.l.bf16 %v2503_v51  ;;  %v2356_v44 = vld [vmem:[#allocation2 + $0x88] sm:$0xf0]  ;;  %v2077_v46 = vor.u32 %v2359_v36, %v2076_v35  ;;  %v2545_v51 = vunpack.i.h.bf16 %v3027_v31 }
  0xa7   : > { %v460_v58 = vsel %vm458_vm4, %v2510_v49, %v2515_v41  ;;  %v459_v59 = vsel %vm458_vm4, %v2509_v50, %v2514_v42 }
  0xa8   : > { %v468_v62 = vpack.c.bf16 %v460_v58, %v460_v58  ;;  %v466_v63 = vpack.c.bf16 %v459_v59, %v459_v59  ;;  %v462_v2 = vsel %vm458_vm4, %v2505_v53, %v2510_v49  ;;  %v464_v0 = vsel %vm458_vm4, %v2515_v41, %v2505_v53  ;;  %v2353_v49 = vld [vmem:[#allocation2 + $0x70] sm:$0xf0]  ;;  %v626_v59 = vld [vmem:[%s3439_s3 + $0x8] sm:$0xff] }
  0xa9   : > { %v467_v3 = vpack.c.bf16 %v462_v2, %v464_v0  ;;  %v461_v4 = vsel %vm458_vm4, %v2504_v54, %v2509_v50  ;;  %v463_v1 = vsel %vm458_vm4, %v2514_v42, %v2504_v54  ;;  %796 = vmatpush.bf16.msra.mxu0 %v2057_v52  ;;  %v625_v50 = vld [vmem:[%s3439_s3] sm:$0xff]  ;;  %v2544_v52 = vunpack.i.l.bf16 %v3027_v31 }
  0xaa   : > { %472 = vst [vmem:[#allocation2 + $0x5c] sm:$0xf] %v468_v62  ;;  %v465_v9 = vpack.c.bf16 %v461_v4, %v463_v1  ;;  %824 = vmatpush.bf16.msra.mxu2 %v2061_v55  ;;  %v2364_v10 = vld [vmem:[#allocation2 + $0xc8] sm:$0xf0]  ;;  %v2094_v11 = vld [vmem:[#allocation2 + $0xcc] sm:$0xf0]  ;;  %v2065_v4 = vor.u32 %v2356_v44, %v2064_v47  ;;  %v2053_v6 = vor.u32 %v2353_v49, %v2052_v48 }
  0xab   : > { %470 = vst [vmem:[#allocation2 + $0x50] sm:$0xf] %v466_v63  ;;  %v2365_v16 = vld [vmem:[#allocation2 + $0xd0] sm:$0xf0]  ;;  %v2820_v55 = vmov 0  }
  0xac   : > { %471 = vst [vmem:[#allocation2 + $0x54] sm:$0xff] %v467_v3  ;;  %v2523_v18 = vpop.permute.xlu1 %2522  ;;  %v2092_v19 = vld [vmem:[#allocation2 + $0xc0] sm:$0xf]  ;;  %v2363_v20 = vld [vmem:[#allocation2 + $0xc4] sm:$0xf]  ;;  %2561 = vset.pattern.permute.xlu0 %v2820_v55  ;;  %2562 = vset.pattern.permute.xlu1 %v2820_v55 }
  0xad   : > { %469 = vst [vmem:[#allocation2 + $0x48] sm:$0xff] %v465_v9  ;;  %v2525_v22 = vunpack.i.h.bf16 %v2523_v18  ;;  %v2524_v23 = vunpack.i.l.bf16 %v2523_v18  ;;  %v2518_v24 = vpop.permute.xlu0 %2517  ;;  %v2093_v25 = vor.u32 %v2364_v10, %v2092_v19  ;;  %v2097_v26 = vor.u32 %v2363_v20, %v2094_v11  ;;  %v2100_v27 = vld [vmem:[#allocation2 + $0xc8] sm:$0xf]  ;;  %797 = vmatpush.bf16.msra.mxu0 %v2045_v7  ;;  %629 = vperm.xlu0 %2561, %v625_v50   ;;  %v2558_v11 = vpop.permute.xlu2 %2557 }
  0xae   : > { %v2520_v28 = vunpack.i.h.bf16 %v2518_v24  ;;  %v2519_v29 = vunpack.i.l.bf16 %v2518_v24  ;;  %v2101_v30 = vor.u32 %v2365_v16, %v2100_v27  ;;  %825 = vmatpush.bf16.msra.mxu2 %v2049_v13  ;;  %634 = vperm.xlu1 %2562, %v626_v59   ;;  %v2560_v19 = vunpack.i.h.bf16 %v2558_v11 }
  0xaf   : > { %v433_v33 = vsel %vm431_vm5, %v2525_v22, %v2530_v14  ;;  %v432_v34 = vsel %vm431_vm5, %v2524_v23, %v2529_v15  ;;  %815 = vmatpush.bf16.msra.mxu1 %v2093_v25  ;;  %843 = vmatpush.bf16.msra.mxu3 %v2097_v26  ;;  %v2559_v20 = vunpack.i.l.bf16 %v2558_v11 }
  0xb0   : > { %v441_v37 = vpack.c.bf16 %v433_v33, %v433_v33  ;;  %v439_v38 = vpack.c.bf16 %v432_v34, %v432_v34  ;;  %v435_v39 = vsel %vm431_vm5, %v2520_v28, %v2525_v22  ;;  %v437_v40 = vsel %vm431_vm5, %v2530_v14, %v2520_v28  ;;  %2803 = vset.pattern.permute.xlu2 %v2820_v55 }
  0xb1   : > { %v440_v41 = vpack.c.bf16 %v435_v39, %v437_v40  ;;  %v434_v42 = vsel %vm431_vm5, %v2519_v29, %v2524_v23  ;;  %v436_v43 = vsel %vm431_vm5, %v2529_v15, %v2519_v29  ;;  %v2350_v18 = vld [vmem:[#allocation2 + $0x58] sm:$0xf0] }
  0xb2   : > { %445 = vst [vmem:[#allocation2 + $0x44] sm:$0xf] %v441_v37  ;;  %v438_v45 = vpack.c.bf16 %v434_v42, %v436_v43  ;;  %2103 = vmatmul.msk.bf16.vlgmr.msra.gmra.mxu3 %vm790_vm6, %v3029_v32  ;;  %2102 = vmatmul.msk.bf16.vlgmr.msra.gmra.mxu1 %vm790_vm6, %v3029_v32  ;;  %v2040_v17 = vld [vmem:[#allocation2 + $0x50] sm:$0xf] }
  0xb3   : > { %850 = vmatpush.bf16.msrb.mxu1 %v2089_v21  ;;  %871 = vmatpush.bf16.msrb.mxu3 %v2101_v30  ;;  %443 = vst [vmem:[#allocation2 + $0x38] sm:$0xf] %v439_v38  ;;  %v2349_v53 = vld [vmem:[#allocation2 + $0x50] sm:$0xf0]  ;;  %v2034_v54 = vld [vmem:[#allocation2 + $0x54] sm:$0xf0]  ;;  %v2041_v34 = vor.u32 %v2350_v18, %v2040_v17 }
  0xb4   : > { %444 = vst [vmem:[#allocation2 + $0x3c] sm:$0xff] %v440_v41  ;;  %v2538_v56 = vpop.permute.xlu1 %2537  ;;  %v2032_v57 = vld [vmem:[#allocation2 + $0x48] sm:$0xf]  ;;  %v2348_v58 = vld [vmem:[#allocation2 + $0x4c] sm:$0xf]  ;;  %v893_v17 = vld [vmem:[%s3099_s29 + $0x10] sm:$0xff] }
  0xb5   : > { %442 = vst [vmem:[#allocation2 + $0x30] sm:$0xff] %v438_v45  ;;  %v2540_v60 = vunpack.i.h.bf16 %v2538_v56  ;;  %v2539_v61 = vunpack.i.l.bf16 %v2538_v56  ;;  %v2533_v62 = vpop.permute.xlu0 %2532  ;;  %v2033_v63 = vor.u32 %v2349_v53, %v2032_v57  ;;  %v2037_v2 = vor.u32 %v2348_v58, %v2034_v54 }
  0xb6   : > { %v2535_v0 = vunpack.i.h.bf16 %v2533_v62  ;;  %v2534_v3 = vunpack.i.l.bf16 %v2533_v62  ;;  %v2338_v62 = vld [vmem:[%s3438_s2 + $0x4] sm:$0xf0] }
  0xb7   : > { %851 = vmatpush.bf16.msrb.mxu1 %v2077_v46  ;;  %v406_v1 = vsel %vm404_vm7, %v2540_v60, %v2545_v51  ;;  %v405_v5 = vsel %vm404_vm7, %v2539_v61, %v2544_v52  ;;  %798 = vmatpush.bf16.msra.mxu0 %v2033_v63 }
  0xb8   : > { %826 = vmatpush.bf16.msra.mxu2 %v2037_v2  ;;  %v414_v7 = vpack.c.bf16 %v406_v1, %v406_v1  ;;  %v412_v8 = vpack.c.bf16 %v405_v5, %v405_v5  ;;  %v408_v9 = vsel %vm404_vm7, %v2535_v0, %v2540_v60  ;;  %v410_v10 = vsel %vm404_vm7, %v2545_v51, %v2535_v0 }
  0xb9   : > { %v413_v13 = vpack.c.bf16 %v408_v9, %v410_v10  ;;  %v407_v14 = vsel %vm404_vm7, %v2534_v3, %v2539_v61  ;;  %v409_v15 = vsel %vm404_vm7, %v2544_v52, %v2534_v3  ;;  %v2347_v38 = vld [vmem:[#allocation2 + $0x40] sm:$0xf0]  ;;  %v354_v9 = vld [vmem:[%s3444_s8] sm:$0x7] }
  0xba   : > { %418 = vst [vmem:[#allocation2 + $0x2c] sm:$0xf] %v414_v7  ;;  %v411_v16 = vpack.c.bf16 %v407_v14, %v409_v15  ;;  %v2028_v37 = vld [vmem:[#allocation2 + $0x38] sm:$0xf]  ;;  %v3092_v14 = vperm.slane %v354_v9, 2 }
  0xbb   : > { %852 = vmatpush.bf16.msrb.mxu1 %v2065_v4  ;;  %416 = vst [vmem:[#allocation2 + $0x20] sm:$0xf] %v412_v8  ;;  %v2346_v21 = vld [vmem:[#allocation2 + $0x38] sm:$0xf0]  ;;  %v2022_v22 = vld [vmem:[#allocation2 + $0x3c] sm:$0xf0]  ;;  %v2029_v48 = vor.u32 %v2347_v38, %v2028_v37 }
  0xbc   : > { %417 = vst [vmem:[#allocation2 + $0x24] sm:$0xff] %v413_v13  ;;  %v2553_v23 = vpop.permute.xlu1 %2552  ;;  %v2020_v24 = vld [vmem:[#allocation2 + $0x30] sm:$0xf]  ;;  %v2345_v25 = vld [vmem:[#allocation2 + $0x34] sm:$0xf]  ;;  %v891_v38 = vld [vmem:[%s3099_s29] sm:$0xff] }
  0xbd   : > { %415 = vst [vmem:[#allocation2 + $0x18] sm:$0xff] %v411_v16  ;;  %v2555_v26 = vunpack.i.h.bf16 %v2553_v23  ;;  %v2554_v27 = vunpack.i.l.bf16 %v2553_v23  ;;  %v2548_v28 = vpop.permute.xlu0 %2547  ;;  %v2021_v29 = vor.u32 %v2346_v21, %v2020_v24  ;;  %v2025_v30 = vor.u32 %v2345_v25, %v2022_v22 }
  0xbe   : > { %v2550_v31 = vunpack.i.h.bf16 %v2548_v28  ;;  %v2549_v33 = vunpack.i.l.bf16 %v2548_v28  ;;  %v3103_v23 = vperm.slane %v354_v9, 0 }
  0xbf   : > { %853 = vmatpush.bf16.msrb.mxu1 %v2053_v6  ;;  %v379_v35 = vsel %vm377_vm8, %v2555_v26, %v2560_v19  ;;  %v378_v36 = vsel %vm377_vm8, %v2554_v27, %v2559_v20  ;;  %799 = vmatpush.bf16.msra.mxu0 %v2021_v29 }
  0xc0   : > { %827 = vmatpush.bf16.msra.mxu2 %v2025_v30  ;;  %v387_v39 = vpack.c.bf16 %v379_v35, %v379_v35  ;;  %v385_v40 = vpack.c.bf16 %v378_v36, %v378_v36  ;;  %v381_v41 = vsel %vm377_vm8, %v2550_v31, %v2555_v26  ;;  %v383_v42 = vsel %vm377_vm8, %v2560_v19, %v2550_v31 }
  0xc1   : > { %v386_v43 = vpack.c.bf16 %v381_v41, %v383_v42  ;;  %v380_v44 = vsel %vm377_vm8, %v2549_v33, %v2554_v27  ;;  %v382_v45 = vsel %vm377_vm8, %v2559_v20, %v2549_v33  ;;  %v2344_v46 = vld [vmem:[#allocation2 + $0x28] sm:$0xf0]  ;;  %v3105_v30 = vperm.slane %v354_v9, 1 }
  0xc2   : > { %391 = vst [vmem:[#allocation2 + $0x14] sm:$0xf] %v387_v39  ;;  %v384_v47 = vpack.c.bf16 %v380_v44, %v382_v45  ;;  %v2016_v49 = vld [vmem:[#allocation2 + $0x20] sm:$0xf]  ;;  %2104 = vmatmul.msk.bf16.vlgmr.msrb.gmra.mxu3 %vm790_vm6, %v3029_v32  ;;  %v892_v42 = vld [vmem:[%s3099_s29 + $0x8] sm:$0xff] }
  0xc3   : > { %854 = vmatpush.bf16.msrb.mxu1 %v2041_v34  ;;  %389 = vst [vmem:[#allocation2 + $0x8] sm:$0xf] %v385_v40  ;;  %v2343_v50 = vld [vmem:[#allocation2 + $0x20] sm:$0xf0]  ;;  %v2010_v51 = vld [vmem:[#allocation2 + $0x24] sm:$0xf0]  ;;  %v2017_v54 = vor.u32 %v2344_v46, %v2016_v49 }
  0xc4   : > { %390 = vst [vmem:[#allocation2 + $0xc] sm:$0xff] %v386_v43  ;;  %v2008_v52 = vld [vmem:[#allocation2 + $0x18] sm:$0xf]  ;;  %v2342_v53 = vld [vmem:[#allocation2 + $0x1c] sm:$0xf]  ;;  %v896_v44 = vld [vmem:[%s3099_s29 + $0x28] sm:$0xff] }
  0xc5   : > { %388 = vst [vmem:[#allocation2] sm:$0xff] %v384_v47  ;;  %v2009_v55 = vor.u32 %v2343_v50, %v2008_v52  ;;  %v2013_v56 = vor.u32 %v2342_v53, %v2010_v51  ;;  %v1988_v32 = vld [vmem:[%s3438_s2] sm:$0xf]  ;;  %v894_v40 = vld [vmem:[%s3099_s29 + $0x18] sm:$0xff] }
  0xc6   : > { %v1989_v4 = vor.u32 %v2338_v62, %v1988_v32  ;;  %v895_v53 = vld [vmem:[%s3099_s29 + $0x20] sm:$0xff] }
  0xc7   : > { %855 = vmatpush.bf16.msrb.mxu1 %v2029_v48  ;;  %800 = vmatpush.bf16.msra.mxu0 %v2009_v55 }
  0xc8   : > { %828 = vmatpush.bf16.msra.mxu2 %v2013_v56 }
  0xc9   : > { %v2341_v57 = vld [vmem:[#allocation2 + $0x10] sm:$0xf0] }
  0xca   : > { %v2004_v58 = vld [vmem:[#allocation2 + $0x8] sm:$0xf] }
  0xcb   : > { %856 = vmatpush.bf16.msrb.mxu1 %v2017_v54  ;;  %v2340_v59 = vld [vmem:[#allocation2 + $0x8] sm:$0xf0]  ;;  %v1998_v60 = vld [vmem:[#allocation2 + $0xc] sm:$0xf0]  ;;  %v2005_v61 = vor.u32 %v2341_v57, %v2004_v58 }
  0xcc   : > { %v1996_v63 = vld [vmem:[#allocation2] sm:$0xf]  ;;  %v2339_v2 = vld [vmem:[#allocation2 + $0x4] sm:$0xf] }
  0xcd   : > { %v1997_v0 = vor.u32 %v2340_v59, %v1996_v63  ;;  %v2001_v3 = vor.u32 %v2339_v2, %v1998_v60  ;;  %v1157_v60 = vld [vmem:[%s3441_s5] sm:$0xff] }
  0xcf   : > { %857 = vmatpush.bf16.msrb.mxu1 %v2005_v61  ;;  %801 = vmatpush.bf16.msra.mxu0 %v1997_v0  ;;  %v1158_v61 = vld [vmem:[%s3441_s5 + $0x8] sm:$0xff] }
  0xd0   : > { %829 = vmatpush.bf16.msra.mxu2 %v2001_v3 }
  0xd2   : > { %858 = vmatmul.bf16.vlgmr.msrb.gmra.mxu1 %v1989_v4  ;;  %802 = vmatmul.bf16.vlgmr.msra.gmra.mxu0 %v1989_v4 }
  0xd3   : > { %830 = vmatmul.bf16.vlgmr.msra.gmra.mxu2 %v1989_v4 }
 0x11f   : > { %v630_v10 = vpop.permute.xlu0 %629 }
 0x120   : > { %v635_v20 = vpop.permute.xlu1 %634 }
 0x12f   : > { %v817_v5 = vpop.f32.mrf.mxu1 }
 0x135   : > { %v845_v1 = vpop.f32.mrf.mxu3 }
 0x137   : > { %v819_v7 = vpop.f32.mrf.mxu1 }
 0x13d   : > { %v847_v6 = vpop.f32.mrf.mxu3 }
 0x145   : > { %v873_v8 = vpop.f32.mrf.mxu3 }
 0x14d   : > { %v875_v22 = vpop.f32.mrf.mxu3 }
 0x14f   : > { %v859_v11 = vpop.f32.mrf.mxu1  ;;  %v803_v15 = vpop.f32.mrf.mxu0 }
 0x150   : > { %v860_v13 = vadd.f32 %v859_v11, %v630_v10  ;;  %v804_v18 = vadd.f32 %v803_v15, %v630_v10 }
 0x152   : > { %v874_v16 = vadd.f32 %v873_v8, %v860_v13  ;;  %v818_v26 = vadd.f32 %v817_v5, %v804_v18 }
 0x154   : > { %v887_v19 = vmul.f32 %v3092_v14, %v874_v16  ;;  %v885_v36 = vmul.f32 %v3103_v23, %v818_v26 }
 0x156   : > { %v899_v21 = vadd.f32 %v893_v17, %v887_v19  ;;  %v831_v24 = vpop.f32.mrf.mxu2  ;;  %v897_v46 = vadd.f32 %v891_v38, %v885_v36 }
 0x157   : > { %v861_v25 = vpop.f32.mrf.mxu1  ;;  %v832_v27 = vadd.f32 %v831_v24, %v630_v10  ;;  %v805_v31 = vpop.f32.mrf.mxu0 }
 0x158   : > { %v862_v28 = vadd.f32 %v861_v25, %v635_v20  ;;  %v1010_v29 = vpack.c.bf16 %v899_v21, %v899_v21  ;;  %v806_v34 = vadd.f32 %v805_v31, %v635_v20 }
 0x159   : > { %v846_v33 = vadd.f32 %v845_v1, %v832_v27 }
 0x15a   : > { %v876_v35 = vadd.f32 %v875_v22, %v862_v28  ;;  %1014 = vst [vmem:[#allocation2 + $0x68] sm:$0xf] %v1010_v29  ;;  %v820_v37 = vadd.f32 %v819_v7, %v806_v34 }
 0x15b   : > { %v886_v39 = vmul.f32 %v3105_v30, %v846_v33 }
 0x15c   : > { %v890_v41 = vmul.f32 %v3092_v14, %v876_v35  ;;  %v888_v43 = vmul.f32 %v3103_v23, %v820_v37 }
 0x15d   : > { %v898_v49 = vadd.f32 %v892_v42, %v886_v39 }
 0x15e   : > { %v833_v45 = vpop.f32.mrf.mxu2  ;;  %v900_v47 = vadd.f32 %v894_v40, %v888_v43  ;;  %v902_v50 = vadd.f32 %v896_v44, %v890_v41 }
 0x15f   : > { %v834_v48 = vadd.f32 %v833_v45, %v635_v20  ;;  %v1009_v55 = vpack.c.bf16 %v898_v49, %v897_v46 }
 0x160   : > { %v2573_v52 = vpack.i.bf16 %v900_v47, %v897_v46  ;;  %v1012_v56 = vpack.c.bf16 %v902_v50, %v902_v50  ;;  %v2568_v32 = vpack.i.bf16 %v902_v50, %v899_v21 }
 0x161   : > { %v848_v51 = vadd.f32 %v847_v6, %v834_v48  ;;  %1013 = vst [vmem:[#allocation2 + $0x60] sm:$0xff] %v1009_v55 }
 0x162   : > { %2574 = vrot.lane.b32.xlu0 %v2573_v52, %s2813_s16  ;;  %2564 = vrot.lane.b32.xlu2 %v2573_v52, %s2812_s15  ;;  %1016 = vst [vmem:[#allocation2 + $0x74] sm:$0xf] %v1012_v56 }
 0x163   : > { %v889_v54 = vmul.f32 %v3105_v30, %v848_v51 }
 0x165   : > { %v901_v57 = vadd.f32 %v895_v53, %v889_v54 }
 0x167   : > { %v2638_v58 = vpack.i.bf16 %v901_v57, %v898_v49  ;;  %v1011_v59 = vpack.c.bf16 %v901_v57, %v900_v47 }
 0x169   : > { %2639 = vrot.lane.b32.xlu1 %v2638_v58, %s2812_s15  ;;  %1015 = vst [vmem:[#allocation2 + $0x6c] sm:$0xff] %v1011_v59 }
 0x16a   : > { %2584 = vrot.lane.b32.xlu0 %v2573_v52, %s2814_s17  ;;  %2569 = vrot.lane.b32.xlu2 %v2568_v32, %s2812_s15 }
 0x171   : > { %2644 = vrot.lane.b32.xlu1 %v2638_v58, %s2813_s16 }
 0x172   : > { %2594 = vrot.lane.b32.xlu0 %v2573_v52, %s2816_s19  ;;  %2579 = vrot.lane.b32.xlu2 %v2568_v32, %s2813_s16 }
 0x179   : > { %2649 = vrot.lane.b32.xlu1 %v2638_v58, %s2814_s17 }
 0x17a   : > { %2604 = vrot.lane.b32.xlu0 %v2573_v52, %s2815_s18  ;;  %2589 = vrot.lane.b32.xlu2 %v2568_v32, %s2814_s17 }
 0x181   : > { %2654 = vrot.lane.b32.xlu1 %v2638_v58, %s2816_s19 }
 0x182   : > { %2614 = vrot.lane.b32.xlu0 %v2573_v52, %s2817_s20  ;;  %2599 = vrot.lane.b32.xlu2 %v2568_v32, %s2816_s19 }
 0x189   : > { %2659 = vrot.lane.b32.xlu1 %v2638_v58, %s2815_s18 }
 0x18a   : > { %2624 = vrot.lane.b32.xlu0 %v2573_v52, %s2818_s21  ;;  %2609 = vrot.lane.b32.xlu2 %v2568_v32, %s2815_s18 }
 0x191   : > { %2664 = vrot.lane.b32.xlu1 %v2638_v58, %s2817_s20 }
 0x192   : > { %2634 = vrot.lane.b32.xlu0 %v2573_v52, %s2819_s22  ;;  %2619 = vrot.lane.b32.xlu2 %v2568_v32, %s2817_s20 }
 0x199   : > { %2669 = vrot.lane.b32.xlu1 %v2638_v58, %s2818_s21 }
 0x19a   : > { %1161 = vperm.xlu0 %2561, %v1157_v60   ;;  %2629 = vrot.lane.b32.xlu2 %v2568_v32, %s2818_s21 }
 0x1a1   : > { %2674 = vrot.lane.b32.xlu1 %v2638_v58, %s2819_s22 }
 0x1a2   : > { %2679 = vrot.lane.b32.xlu2 %v2568_v32, %s2819_s22 }
 0x1a9   : > { %1166 = vperm.xlu1 %2562, %v1158_v61  }
 0x1bc   : > { %v2565_v62 = vpop.permute.xlu2 %2564 }
 0x1bd   : > { %v2567_v2 = vunpack.i.h.bf16 %v2565_v62  ;;  %v2566_v0 = vunpack.i.l.bf16 %v2565_v62 }
 0x1c4   : > { %v2570_v63 = vpop.permute.xlu2 %2569 }
 0x1c5   : > { %v2572_v3 = vunpack.i.h.bf16 %v2570_v63  ;;  %v2571_v4 = vunpack.i.l.bf16 %v2570_v63 }
 0x1c7   : > { %v1085_v1 = vsel %vm547_vm0, %v2571_v4, %v2566_v0  ;;  %v1086_v5 = vsel %vm547_vm0, %v2572_v3, %v2567_v2 }
 0x1c8   : > { %v1088_v6 = vpack.c.bf16 %v1085_v1, %v1085_v1  ;;  %v1090_v7 = vpack.c.bf16 %v1086_v5, %v1086_v5 }
 0x1ca   : > { %1092 = vst [vmem:[#allocation2 + $0xb0] sm:$0xf] %v1088_v6 }
 0x1cb   : > { %1094 = vst [vmem:[#allocation2 + $0xbc] sm:$0xf] %v1090_v7 }
 0x1cc   : > { %v2580_v8 = vpop.permute.xlu2 %2579 }
 0x1cd   : > { %v2582_v10 = vunpack.i.h.bf16 %v2580_v8  ;;  %v2581_v11 = vunpack.i.l.bf16 %v2580_v8 }
 0x1d4   : > { %v2575_v9 = vpop.permute.xlu0 %2574  ;;  %v2590_v16 = vpop.permute.xlu2 %2589 }
 0x1d5   : > { %v2577_v13 = vunpack.i.h.bf16 %v2575_v9  ;;  %v2576_v15 = vunpack.i.l.bf16 %v2575_v9  ;;  %v2592_v25 = vunpack.i.h.bf16 %v2590_v16  ;;  %v2591_v26 = vunpack.i.l.bf16 %v2590_v16 }
 0x1d7   : > { %v1059_v17 = vsel %vm520_vm1, %v2581_v11, %v2576_v15  ;;  %v1060_v18 = vsel %vm520_vm1, %v2582_v10, %v2577_v13 }
 0x1d8   : > { %v1062_v19 = vpack.c.bf16 %v1059_v17, %v1059_v17  ;;  %v1064_v20 = vpack.c.bf16 %v1060_v18, %v1060_v18 }
 0x1da   : > { %1066 = vst [vmem:[#allocation2 + $0x98] sm:$0xf] %v1062_v19 }
 0x1db   : > { %v2640_v21 = vpop.permute.xlu1 %2639  ;;  %1068 = vst [vmem:[#allocation2 + $0xa4] sm:$0xf] %v1064_v20 }
 0x1dc   : > { %v2642_v22 = vunpack.i.h.bf16 %v2640_v21  ;;  %v2641_v24 = vunpack.i.l.bf16 %v2640_v21  ;;  %v2585_v27 = vpop.permute.xlu0 %2584  ;;  %v3163_v38 = vpop.permute.xlu2 %2599 }
 0x1dd   : > { %v2587_v36 = vunpack.i.h.bf16 %v2585_v27  ;;  %v2586_v37 = vunpack.i.l.bf16 %v2585_v27 }
 0x1de   : > { %v1082_v28 = vsel %vm547_vm0, %v2642_v22, %v2572_v3  ;;  %v1084_v29 = vsel %vm547_vm0, %v2567_v2, %v2642_v22  ;;  %v1081_v31 = vsel %vm547_vm0, %v2641_v24, %v2571_v4  ;;  %v1083_v33 = vsel %vm547_vm0, %v2566_v0, %v2641_v24 }
 0x1df   : > { %v1089_v34 = vpack.c.bf16 %v1082_v28, %v1084_v29  ;;  %v1087_v35 = vpack.c.bf16 %v1081_v31, %v1083_v33  ;;  %v1033_v39 = vsel %vm493_vm2, %v2591_v26, %v2586_v37  ;;  %v1034_v40 = vsel %vm493_vm2, %v2592_v25, %v2587_v36 }
 0x1e0   : > { %v1036_v41 = vpack.c.bf16 %v1033_v39, %v1033_v39  ;;  %v1038_v42 = vpack.c.bf16 %v1034_v40, %v1034_v40  ;;  %v2602_v24 = vunpack.i.h.bf16 %v3163_v38 }
 0x1e1   : > { %1093 = vst [vmem:[#allocation2 + $0xb4] sm:$0xff] %v1089_v34 }
 0x1e2   : > { %1091 = vst [vmem:[#allocation2 + $0xa8] sm:$0xff] %v1087_v35 }
 0x1e3   : > { %v2645_v43 = vpop.permute.xlu1 %2644  ;;  %1040 = vst [vmem:[#allocation2 + $0x80] sm:$0xf] %v1036_v41 }
 0x1e4   : > { %v2647_v44 = vunpack.i.h.bf16 %v2645_v43  ;;  %v2646_v45 = vunpack.i.l.bf16 %v2645_v43  ;;  %1042 = vst [vmem:[#allocation2 + $0x8c] sm:$0xf] %v1038_v42  ;;  %v2595_v46 = vpop.permute.xlu0 %2594  ;;  %v3177_v57 = vpop.permute.xlu2 %2609 }
 0x1e5   : > { %v2612_v62 = vunpack.i.h.bf16 %v3177_v57  ;;  %v2611_v63 = vunpack.i.l.bf16 %v3177_v57 }
 0x1e6   : > { %v1056_v47 = vsel %vm520_vm1, %v2647_v44, %v2582_v10  ;;  %v1058_v48 = vsel %vm520_vm1, %v2577_v13, %v2647_v44  ;;  %v1055_v49 = vsel %vm520_vm1, %v2646_v45, %v2581_v11  ;;  %v1057_v50 = vsel %vm520_vm1, %v2576_v15, %v2646_v45 }
 0x1e7   : > { %v1063_v51 = vpack.c.bf16 %v1056_v47, %v1058_v48  ;;  %v1061_v52 = vpack.c.bf16 %v1055_v49, %v1057_v50  ;;  %v2597_v11 = vunpack.i.h.bf16 %v2595_v46  ;;  %v2596_v13 = vunpack.i.l.bf16 %v2595_v46  ;;  %v2381_v48 = vld [vmem:[#allocation2 + $0x68] sm:$0xf0]  ;;  %v2165_v49 = vld [vmem:[#allocation2 + $0x6c] sm:$0xf0] }
 0x1e8   : > { %v2390_v53 = vld [vmem:[#allocation2 + $0xb0] sm:$0xf0]  ;;  %v2201_v54 = vld [vmem:[#allocation2 + $0xb4] sm:$0xf0] }
 0x1e9   : > { %1067 = vst [vmem:[#allocation2 + $0x9c] sm:$0xff] %v1063_v51  ;;  %v2199_v55 = vld [vmem:[#allocation2 + $0xa8] sm:$0xf]  ;;  %v2389_v56 = vld [vmem:[#allocation2 + $0xac] sm:$0xf]  ;;  %v1000_v31 = vsel %vm458_vm4, %v2602_v24, %v2597_v11 }
 0x1ea   : > { %1065 = vst [vmem:[#allocation2 + $0x90] sm:$0xff] %v1061_v52  ;;  %v2200_v58 = vor.u32 %v2390_v53, %v2199_v55  ;;  %v2204_v32 = vor.u32 %v2389_v56, %v2201_v54  ;;  %v2163_v54 = vld [vmem:[#allocation2 + $0x60] sm:$0xf]  ;;  %v2380_v55 = vld [vmem:[#allocation2 + $0x64] sm:$0xf] }
 0x1eb   : > { %v2650_v59 = vpop.permute.xlu1 %2649  ;;  %v2164_v56 = vor.u32 %v2381_v48, %v2163_v54 }
 0x1ec   : > { %v2652_v60 = vunpack.i.h.bf16 %v2650_v59  ;;  %v2651_v61 = vunpack.i.l.bf16 %v2650_v59  ;;  %1325 = vmatpush.bf16.msra.mxu3 %v2200_v58  ;;  %1353 = vmatpush.bf16.msrb.mxu2 %v2204_v32  ;;  %v3181_v2 = vpop.permute.xlu0 %2604  ;;  %v2620_v51 = vpop.permute.xlu2 %2619  ;;  %v2168_v58 = vor.u32 %v2380_v55, %v2165_v49 }
 0x1ed   : > { %v2607_v7 = vunpack.i.h.bf16 %v3181_v2  ;;  %v2606_v8 = vunpack.i.l.bf16 %v3181_v2  ;;  %v2621_v57 = vunpack.i.l.bf16 %v2620_v51 }
 0x1ee   : > { %v1030_v0 = vsel %vm493_vm2, %v2652_v60, %v2592_v25  ;;  %v1032_v3 = vsel %vm493_vm2, %v2587_v36, %v2652_v60  ;;  %v1029_v4 = vsel %vm493_vm2, %v2651_v61, %v2591_v26  ;;  %v1031_v1 = vsel %vm493_vm2, %v2586_v37, %v2651_v61 }
 0x1ef   : > { %v1037_v5 = vpack.c.bf16 %v1030_v0, %v1032_v3  ;;  %v1035_v6 = vpack.c.bf16 %v1029_v4, %v1031_v1  ;;  %v1111_v15 = vsel %vm574_vm3, %v2611_v63, %v2606_v8  ;;  %v1112_v16 = vsel %vm574_vm3, %v2612_v62, %v2607_v7 }
 0x1f0   : > { %v2387_v9 = vld [vmem:[#allocation2 + $0x98] sm:$0xf0]  ;;  %v2189_v10 = vld [vmem:[#allocation2 + $0x9c] sm:$0xf0]  ;;  %v1114_v19 = vpack.c.bf16 %v1111_v15, %v1111_v15  ;;  %v1116_v20 = vpack.c.bf16 %v1112_v16, %v1112_v16  ;;  %v2601_v25 = vunpack.i.l.bf16 %v3163_v38 }
 0x1f1   : > { %1041 = vst [vmem:[#allocation2 + $0x84] sm:$0xff] %v1037_v5  ;;  %v2187_v17 = vld [vmem:[#allocation2 + $0x90] sm:$0xf]  ;;  %v2386_v18 = vld [vmem:[#allocation2 + $0x94] sm:$0xf] }
 0x1f2   : > { %1039 = vst [vmem:[#allocation2 + $0x78] sm:$0xff] %v1035_v6  ;;  %v2188_v21 = vor.u32 %v2387_v9, %v2187_v17  ;;  %v2192_v22 = vor.u32 %v2386_v18, %v2189_v10  ;;  %v999_v29 = vsel %vm458_vm4, %v2601_v25, %v2596_v13 }
 0x1f3   : > { %v2655_v26 = vpop.permute.xlu1 %2654  ;;  %1118 = vst [vmem:[#allocation2 + $0xc8] sm:$0xf] %v1114_v19 }
 0x1f4   : > { %v2657_v27 = vunpack.i.h.bf16 %v2655_v26  ;;  %v2656_v28 = vunpack.i.l.bf16 %v2655_v26  ;;  %1326 = vmatpush.bf16.msra.mxu3 %v2188_v21  ;;  %1354 = vmatpush.bf16.msrb.mxu2 %v2192_v22  ;;  %1120 = vst [vmem:[#allocation2 + $0xd4] sm:$0xf] %v1116_v20  ;;  %v2615_v45 = vpop.permute.xlu0 %2614  ;;  %v2630_v17 = vpop.permute.xlu2 %2629  ;;  %v2207_v22 = vld [vmem:[#allocation2 + $0xb0] sm:$0xf] }
 0x1f5   : > { %v2617_v1 = vunpack.i.h.bf16 %v2615_v45  ;;  %v2616_v5 = vunpack.i.l.bf16 %v2615_v45  ;;  %v2631_v45 = vunpack.i.l.bf16 %v2630_v17 }
 0x1f6   : > { %v996_v33 = vsel %vm458_vm4, %v2657_v27, %v2602_v24  ;;  %v998_v34 = vsel %vm458_vm4, %v2597_v11, %v2657_v27  ;;  %v995_v35 = vsel %vm458_vm4, %v2656_v28, %v2601_v25  ;;  %v997_v36 = vsel %vm458_vm4, %v2596_v13, %v2656_v28  ;;  %v2391_v24 = vld [vmem:[#allocation2 + $0xb8] sm:$0xf0] }
 0x1f7   : > { %v1003_v37 = vpack.c.bf16 %v998_v34, %v1000_v31  ;;  %v1004_v38 = vpack.c.bf16 %v996_v33, %v996_v33  ;;  %v1001_v39 = vpack.c.bf16 %v997_v36, %v999_v29  ;;  %v1002_v40 = vpack.c.bf16 %v995_v35, %v995_v35  ;;  %v2366_v29 = vld [vmem:[%s3440_s4 + $0x4] sm:$0xf]  ;;  %v2109_v31 = vld [vmem:[%s3440_s4 + $0x8] sm:$0xf0] }
 0x1f8   : > { %v2384_v41 = vld [vmem:[#allocation2 + $0x80] sm:$0xf0]  ;;  %v2177_v42 = vld [vmem:[#allocation2 + $0x84] sm:$0xf0]  ;;  %v973_v15 = vsel %vm431_vm5, %v2621_v57, %v2616_v5  ;;  %v3245_v48 = vor.u32 %v2366_v29, %v2109_v31 }
 0x1f9   : > { %1007 = vst [vmem:[#allocation2 + $0x54] sm:$0xff] %v1003_v37  ;;  %v2175_v43 = vld [vmem:[#allocation2 + $0x78] sm:$0xf]  ;;  %v2383_v44 = vld [vmem:[#allocation2 + $0x7c] sm:$0xf] }
 0x1fa   : > { %1008 = vst [vmem:[#allocation2 + $0x5c] sm:$0xf] %v1004_v38  ;;  %v2176_v46 = vor.u32 %v2384_v41, %v2175_v43  ;;  %v2180_v47 = vor.u32 %v2383_v44, %v2177_v42  ;;  %v2219_v28 = vld [vmem:[#allocation2 + $0xc8] sm:$0xf]  ;;  %v2208_v43 = vor.u32 %v2391_v24, %v2207_v22  ;;  %v2632_v44 = vunpack.i.h.bf16 %v2630_v17  ;;  %v2382_v22 = vld [vmem:[#allocation2 + $0x70] sm:$0xf0] }
 0x1fb   : > { %1005 = vst [vmem:[#allocation2 + $0x48] sm:$0xff] %v1001_v39  ;;  %v2660_v50 = vpop.permute.xlu1 %2659  ;;  %v2394_v36 = vld [vmem:[#allocation2 + $0xd0] sm:$0xf0] }
 0x1fc   : > { %1006 = vst [vmem:[#allocation2 + $0x50] sm:$0xf] %v1002_v40  ;;  %v2662_v52 = vunpack.i.h.bf16 %v2660_v50  ;;  %v2661_v53 = vunpack.i.l.bf16 %v2660_v50  ;;  %1327 = vmatpush.bf16.msra.mxu3 %v2176_v46  ;;  %1355 = vmatpush.bf16.msrb.mxu2 %v2180_v47  ;;  %v2625_v11 = vpop.permute.xlu0 %2624  ;;  %v2220_v47 = vor.u32 %v2394_v36, %v2219_v28 }
 0x1fd   : > { %v2627_v37 = vunpack.i.h.bf16 %v2625_v11  ;;  %v2626_v38 = vunpack.i.l.bf16 %v2625_v11 }
 0x1fe   : > { %v1108_v32 = vsel %vm574_vm3, %v2662_v52, %v2612_v62  ;;  %v1110_v59 = vsel %vm574_vm3, %v2607_v7, %v2662_v52  ;;  %v1107_v60 = vsel %vm574_vm3, %v2661_v53, %v2611_v63  ;;  %v1109_v61 = vsel %vm574_vm3, %v2606_v8, %v2661_v53  ;;  %v2388_v52 = vld [vmem:[#allocation2 + $0xa0] sm:$0xf0] }
 0x1ff   : > { %v1115_v2 = vpack.c.bf16 %v1108_v32, %v1110_v59  ;;  %v1113_v0 = vpack.c.bf16 %v1107_v60, %v1109_v61  ;;  %v2622_v7 = vunpack.i.h.bf16 %v2620_v51  ;;  %v2195_v51 = vld [vmem:[#allocation2 + $0x98] sm:$0xf]  ;;  %v947_v53 = vsel %vm404_vm7, %v2631_v45, %v2626_v38 }
 0x200   : > { %1328 = vmatpush.bf16.msra.mxu3 %v2164_v56  ;;  %1356 = vmatpush.bf16.msrb.mxu2 %v2168_v58  ;;  %v2378_v3 = vld [vmem:[#allocation2 + $0x50] sm:$0xf0]  ;;  %v2153_v4 = vld [vmem:[#allocation2 + $0x54] sm:$0xf0]  ;;  %v948_v54 = vsel %vm404_vm7, %v2632_v44, %v2627_v37 }
 0x201   : > { %1119 = vst [vmem:[#allocation2 + $0xcc] sm:$0xff] %v1115_v2  ;;  %v974_v16 = vsel %vm431_vm5, %v2622_v7, %v2617_v1 }
 0x202   : > { %1117 = vst [vmem:[#allocation2 + $0xc0] sm:$0xff] %v1113_v0  ;;  %v2151_v62 = vld [vmem:[#allocation2 + $0x48] sm:$0xf]  ;;  %v2377_v6 = vld [vmem:[#allocation2 + $0x4c] sm:$0xf]  ;;  %v2196_v0 = vor.u32 %v2388_v52, %v2195_v51 }
 0x203   : > { %v2665_v9 = vpop.permute.xlu1 %2664  ;;  %v2152_v10 = vor.u32 %v2378_v3, %v2151_v62  ;;  %v2156_v63 = vor.u32 %v2377_v6, %v2153_v4  ;;  %v2680_v3 = vpop.permute.xlu2 %2679 }
 0x204   : > { %v2667_v13 = vunpack.i.h.bf16 %v2665_v9  ;;  %v2666_v8 = vunpack.i.l.bf16 %v2665_v9  ;;  %v2635_v55 = vpop.permute.xlu0 %2634  ;;  %v2681_v11 = vunpack.i.l.bf16 %v2680_v3 }
 0x205   : > { %1329 = vmatpush.bf16.msra.mxu3 %v2152_v10  ;;  %1357 = vmatpush.bf16.msrb.mxu2 %v2156_v63  ;;  %v2637_v62 = vunpack.i.h.bf16 %v2635_v55  ;;  %v2636_v6 = vunpack.i.l.bf16 %v2635_v55  ;;  %v2682_v63 = vunpack.i.h.bf16 %v2680_v3 }
 0x206   : > { %v970_v18 = vsel %vm431_vm5, %v2667_v13, %v2622_v7  ;;  %v972_v19 = vsel %vm431_vm5, %v2617_v1, %v2667_v13  ;;  %v969_v20 = vsel %vm431_vm5, %v2666_v8, %v2621_v57  ;;  %v971_v21 = vsel %vm431_vm5, %v2616_v5, %v2666_v8  ;;  %v2183_v7 = vld [vmem:[#allocation2 + $0x80] sm:$0xf]  ;;  %v2385_v57 = vld [vmem:[#allocation2 + $0x88] sm:$0xf0] }
 0x207   : > { %v977_v25 = vpack.c.bf16 %v972_v19, %v974_v16  ;;  %v978_v26 = vpack.c.bf16 %v970_v18, %v970_v18  ;;  %v975_v27 = vpack.c.bf16 %v971_v21, %v973_v15  ;;  %v976_v33 = vpack.c.bf16 %v969_v20, %v969_v20  ;;  %v2171_v21 = vld [vmem:[#allocation2 + $0x68] sm:$0xf] }
 0x208   : > { %v2393_v34 = vld [vmem:[#allocation2 + $0xc8] sm:$0xf0]  ;;  %v2213_v35 = vld [vmem:[#allocation2 + $0xcc] sm:$0xf0]  ;;  %v2184_v18 = vor.u32 %v2385_v57, %v2183_v7  ;;  %v921_v19 = vsel %vm377_vm8, %v2681_v11, %v2636_v6  ;;  %v922_v20 = vsel %vm377_vm8, %v2682_v63, %v2637_v62 }
 0x209   : > { %981 = vst [vmem:[#allocation2 + $0x3c] sm:$0xff] %v977_v25  ;;  %v2211_v39 = vld [vmem:[#allocation2 + $0xc0] sm:$0xf]  ;;  %v2392_v40 = vld [vmem:[#allocation2 + $0xc4] sm:$0xf] }
 0x20a   : > { %982 = vst [vmem:[#allocation2 + $0x44] sm:$0xf] %v978_v26  ;;  %v2212_v41 = vor.u32 %v2393_v34, %v2211_v39  ;;  %v2216_v42 = vor.u32 %v2392_v40, %v2213_v35  ;;  %v2172_v34 = vor.u32 %v2382_v22, %v2171_v21 }
 0x20b   : > { %979 = vst [vmem:[#allocation2 + $0x30] sm:$0xff] %v975_v27  ;;  %v2670_v46 = vpop.permute.xlu1 %2669 }
 0x20c   : > { %980 = vst [vmem:[#allocation2 + $0x38] sm:$0xf] %v976_v33  ;;  %v2672_v49 = vunpack.i.h.bf16 %v2670_v46  ;;  %v2671_v50 = vunpack.i.l.bf16 %v2670_v46  ;;  %1346 = vmatpush.bf16.msrb.mxu0 %v2212_v41  ;;  %1374 = vmatpush.bf16.msra.mxu1 %v2216_v42 }
 0x20e   : > { %v944_v56 = vsel %vm404_vm7, %v2672_v49, %v2632_v44  ;;  %v946_v58 = vsel %vm404_vm7, %v2627_v37, %v2672_v49  ;;  %v943_v32 = vsel %vm404_vm7, %v2671_v50, %v2631_v45  ;;  %v945_v59 = vsel %vm404_vm7, %v2626_v38, %v2671_v50  ;;  %v2159_v37 = vld [vmem:[#allocation2 + $0x50] sm:$0xf]  ;;  %v2379_v38 = vld [vmem:[#allocation2 + $0x58] sm:$0xf0]  ;;  %v2107_v50 = vld [vmem:[%s3440_s4] sm:$0xf] }
 0x20f   : > { %v951_v60 = vpack.c.bf16 %v946_v58, %v948_v54  ;;  %v952_v61 = vpack.c.bf16 %v944_v56, %v944_v56  ;;  %v949_v2 = vpack.c.bf16 %v945_v59, %v947_v53  ;;  %2221 = vmatmul.msk.bf16.vlgmr.msrb.gmra.mxu0 %vm790_vm6, %v3245_v48  ;;  %v950_v4 = vpack.c.bf16 %v943_v32, %v943_v32  ;;  %v2367_v53 = vld [vmem:[%s3440_s4 + $0x4] sm:$0xf0] }
 0x210   : > { %1381 = vmatpush.bf16.msra.mxu0 %v2208_v43  ;;  %1402 = vmatpush.bf16.msrb.mxu1 %v2220_v47  ;;  %v2375_v1 = vld [vmem:[#allocation2 + $0x38] sm:$0xf0]  ;;  %v2141_v5 = vld [vmem:[#allocation2 + $0x3c] sm:$0xf0]  ;;  %v2160_v43 = vor.u32 %v2379_v38, %v2159_v37  ;;  %v2108_v59 = vor.u32 %v2367_v53, %v2107_v50 }
 0x211   : > { %2222 = vmatmul.msk.bf16.vlgmr.msra.gmra.mxu1 %vm790_vm6, %v3245_v48  ;;  %955 = vst [vmem:[#allocation2 + $0x24] sm:$0xff] %v951_v60  ;;  %v2376_v45 = vld [vmem:[#allocation2 + $0x40] sm:$0xf0] }
 0x212   : > { %956 = vst [vmem:[#allocation2 + $0x2c] sm:$0xf] %v952_v61  ;;  %v2139_v9 = vld [vmem:[#allocation2 + $0x30] sm:$0xf]  ;;  %v2374_v10 = vld [vmem:[#allocation2 + $0x34] sm:$0xf] }
 0x213   : > { %953 = vst [vmem:[#allocation2 + $0x18] sm:$0xff] %v949_v2  ;;  %v2675_v13 = vpop.permute.xlu1 %2674  ;;  %v2140_v8 = vor.u32 %v2375_v1, %v2139_v9  ;;  %v2144_v15 = vor.u32 %v2374_v10, %v2141_v5  ;;  %v2147_v44 = vld [vmem:[#allocation2 + $0x38] sm:$0xf]  ;;  %v1162_v1 = vpop.permute.xlu0 %1161 }
 0x214   : > { %1382 = vmatpush.bf16.msra.mxu0 %v2196_v0  ;;  %954 = vst [vmem:[#allocation2 + $0x20] sm:$0xf] %v950_v4  ;;  %v2677_v16 = vunpack.i.h.bf16 %v2675_v13  ;;  %v2676_v17 = vunpack.i.l.bf16 %v2675_v13  ;;  %v2148_v46 = vor.u32 %v2376_v45, %v2147_v44 }
 0x215   : > { %1330 = vmatpush.bf16.msra.mxu3 %v2140_v8  ;;  %1358 = vmatpush.bf16.msrb.mxu2 %v2144_v15 }
 0x216   : > { %v918_v24 = vsel %vm377_vm8, %v2677_v16, %v2682_v63  ;;  %v920_v25 = vsel %vm377_vm8, %v2637_v62, %v2677_v16  ;;  %v917_v26 = vsel %vm377_vm8, %v2676_v17, %v2681_v11  ;;  %v919_v27 = vsel %vm377_vm8, %v2636_v6, %v2676_v17 }
 0x217   : > { %v925_v28 = vpack.c.bf16 %v920_v25, %v922_v20  ;;  %v926_v29 = vpack.c.bf16 %v918_v24, %v918_v24  ;;  %v923_v31 = vpack.c.bf16 %v919_v27, %v921_v19  ;;  %v924_v33 = vpack.c.bf16 %v917_v26, %v917_v26 }
 0x218   : > { %1383 = vmatpush.bf16.msra.mxu0 %v2184_v18  ;;  %v2372_v35 = vld [vmem:[#allocation2 + $0x20] sm:$0xf0]  ;;  %v2129_v36 = vld [vmem:[#allocation2 + $0x24] sm:$0xf0] }
 0x219   : > { %929 = vst [vmem:[#allocation2 + $0xc] sm:$0xff] %v925_v28  ;;  %v2373_v52 = vld [vmem:[#allocation2 + $0x28] sm:$0xf0] }
 0x21a   : > { %930 = vst [vmem:[#allocation2 + $0x14] sm:$0xf] %v926_v29  ;;  %v2127_v39 = vld [vmem:[#allocation2 + $0x18] sm:$0xf]  ;;  %v2371_v40 = vld [vmem:[#allocation2 + $0x1c] sm:$0xf] }
 0x21b   : > { %927 = vst [vmem:[#allocation2] sm:$0xff] %v923_v31  ;;  %v2128_v41 = vor.u32 %v2372_v35, %v2127_v39  ;;  %v2132_v42 = vor.u32 %v2371_v40, %v2129_v36  ;;  %v2135_v51 = vld [vmem:[#allocation2 + $0x20] sm:$0xf]  ;;  %v1167_v18 = vpop.permute.xlu1 %1166 }
 0x21c   : > { %1384 = vmatpush.bf16.msra.mxu0 %v2172_v34  ;;  %928 = vst [vmem:[#allocation2 + $0x8] sm:$0xf] %v924_v33  ;;  %v2136_v32 = vor.u32 %v2373_v52, %v2135_v51 }
 0x21d   : > { %1331 = vmatpush.bf16.msra.mxu3 %v2128_v41  ;;  %1359 = vmatpush.bf16.msrb.mxu2 %v2132_v42 }
 0x220   : > { %1385 = vmatpush.bf16.msra.mxu0 %v2160_v43  ;;  %v2369_v47 = vld [vmem:[#allocation2 + $0x8] sm:$0xf0]  ;;  %v2117_v49 = vld [vmem:[#allocation2 + $0xc] sm:$0xf0] }
 0x221   : > { %2223 = vmatmul.msk.bf16.vlgmr.msrb.gmra.mxu1 %vm790_vm6, %v3245_v48  ;;  %v2370_v61 = vld [vmem:[#allocation2 + $0x10] sm:$0xf0] }
 0x222   : > { %v2115_v54 = vld [vmem:[#allocation2] sm:$0xf]  ;;  %v2368_v55 = vld [vmem:[#allocation2 + $0x4] sm:$0xf] }
 0x223   : > { %v2116_v56 = vor.u32 %v2369_v47, %v2115_v54  ;;  %v2120_v58 = vor.u32 %v2368_v55, %v2117_v49  ;;  %v2123_v60 = vld [vmem:[#allocation2 + $0x8] sm:$0xf] }
 0x224   : > { %1386 = vmatpush.bf16.msra.mxu0 %v2148_v46  ;;  %v2124_v48 = vor.u32 %v2370_v61, %v2123_v60 }
 0x225   : > { %1332 = vmatpush.bf16.msra.mxu3 %v2116_v56  ;;  %1360 = vmatpush.bf16.msrb.mxu2 %v2120_v58 }
 0x228   : > { %1387 = vmatpush.bf16.msra.mxu0 %v2136_v32  ;;  %1333 = vmatmul.bf16.vlgmr.msra.gmra.mxu3 %v2108_v59 }
 0x229   : > { %1361 = vmatmul.bf16.vlgmr.msrb.gmra.mxu2 %v2108_v59 }
 0x22c   : > { %1388 = vmatpush.bf16.msra.mxu0 %v2124_v48 }
 0x22f   : > { %1389 = vmatmul.bf16.vlgmr.msra.gmra.mxu0 %v2108_v59 }
 0x28c   : > { %v1348_v0 = vpop.f32.mrf.mxu0 }
 0x28e   : > { %v1376_v2 = vpop.f32.mrf.mxu1 }
 0x294   : > { %v1350_v4 = vpop.f32.mrf.mxu0 }
 0x296   : > { %v1378_v3 = vpop.f32.mrf.mxu1 }
 0x29e   : > { %v1404_v5 = vpop.f32.mrf.mxu1 }
 0x2a6   : > { %v1406_v25 = vpop.f32.mrf.mxu1 }
 0x2ab   : > { %v1334_v7 = vpop.f32.mrf.mxu3 }
 0x2ac   : > { %v1390_v62 = vpop.f32.mrf.mxu0  ;;  %v1362_v57 = vpop.f32.mrf.mxu2  ;;  %v1335_v9 = vadd.f32 %v1334_v7, %v1162_v1 }
 0x2ad   : > { %v1391_v6 = vadd.f32 %v1390_v62, %v1162_v1  ;;  %v1363_v10 = vadd.f32 %v1362_v57, %v1162_v1 }
 0x2ae   : > { %v1349_v11 = vadd.f32 %v1348_v0, %v1335_v9 }
 0x2af   : > { %v1405_v63 = vadd.f32 %v1404_v5, %v1391_v6  ;;  %v1377_v13 = vadd.f32 %v1376_v2, %v1363_v10 }
 0x2b0   : > { %v1409_v15 = vmul.f32 %v1349_v11, %v3103_v23 }
 0x2b1   : > { %v1411_v8 = vmul.f32 %v1405_v63, %v3092_v14  ;;  %v1410_v16 = vmul.f32 %v1377_v13, %v3105_v30 }
 0x2b3   : > { %v1521_v17 = vpack.c.bf16 %v1411_v8, %v1411_v8  ;;  %v1520_v19 = vpack.c.bf16 %v1410_v16, %v1409_v15  ;;  %v1336_v22 = vpop.f32.mrf.mxu3 }
 0x2b4   : > { %v1392_v20 = vpop.f32.mrf.mxu0  ;;  %v1364_v24 = vpop.f32.mrf.mxu2  ;;  %v1337_v26 = vadd.f32 %v1336_v22, %v1167_v18 }
 0x2b5   : > { %v1393_v21 = vadd.f32 %v1392_v20, %v1167_v18  ;;  %1525 = vst [vmem:[#allocation2 + $0x68] sm:$0xf] %v1521_v17  ;;  %v1365_v27 = vadd.f32 %v1364_v24, %v1167_v18 }
 0x2b6   : > { %1524 = vst [vmem:[#allocation2 + $0x60] sm:$0xff] %v1520_v19  ;;  %v1351_v29 = vadd.f32 %v1350_v4, %v1337_v26 }
 0x2b7   : > { %v1407_v28 = vadd.f32 %v1406_v25, %v1393_v21  ;;  %v1379_v31 = vadd.f32 %v1378_v3, %v1365_v27 }
 0x2b8   : > { %v1412_v34 = vmul.f32 %v1351_v29, %v3103_v23 }
 0x2b9   : > { %v1414_v33 = vmul.f32 %v1407_v28, %v3092_v14  ;;  %v1413_v35 = vmul.f32 %v1379_v31, %v3105_v30 }
 0x2ba   : > { %v2718_v38 = vpack.i.bf16 %v1412_v34, %v1409_v15 }
 0x2bb   : > { %v2683_v36 = vpack.i.bf16 %v1414_v33, %v1411_v8  ;;  %v1522_v37 = vpack.c.bf16 %v1413_v35, %v1412_v34  ;;  %v2723_v39 = vpack.i.bf16 %v1413_v35, %v1410_v16  ;;  %v1523_v40 = vpack.c.bf16 %v1414_v33, %v1414_v33 }
 0x2bc   : > { %2719 = vrot.lane.b32.xlu2 %v2718_v38, %s2812_s15 }
 0x2bd   : > { %2684 = vrot.lane.b32.xlu1 %v2683_v36, %s2812_s15  ;;  %1526 = vst [vmem:[#allocation2 + $0x6c] sm:$0xff] %v1522_v37  ;;  %2724 = vrot.lane.b32.xlu0 %v2723_v39, %s2812_s15 }
 0x2be   : > { %1527 = vst [vmem:[#allocation2 + $0x74] sm:$0xf] %v1523_v40 }
 0x2c4   : > { %2729 = vrot.lane.b32.xlu2 %v2718_v38, %s2813_s16 }
 0x2c5   : > { %2689 = vrot.lane.b32.xlu1 %v2683_v36, %s2813_s16  ;;  %2734 = vrot.lane.b32.xlu0 %v2723_v39, %s2813_s16 }
 0x2cc   : > { %2739 = vrot.lane.b32.xlu2 %v2718_v38, %s2814_s17 }
 0x2cd   : > { %2694 = vrot.lane.b32.xlu1 %v2683_v36, %s2814_s17  ;;  %2744 = vrot.lane.b32.xlu0 %v2723_v39, %s2814_s17 }
 0x2d4   : > { %2749 = vrot.lane.b32.xlu2 %v2718_v38, %s2816_s19 }
 0x2d5   : > { %2699 = vrot.lane.b32.xlu1 %v2683_v36, %s2816_s19  ;;  %2754 = vrot.lane.b32.xlu0 %v2723_v39, %s2816_s19  ;;  %s2423_s19 = smul.u32 24, %s3447_s10 }
 0x2dc   : > { %2759 = vrot.lane.b32.xlu2 %v2718_v38, %s2817_s20 }
 0x2dd   : > { %2704 = vrot.lane.b32.xlu1 %v2683_v36, %s2817_s20  ;;  %2764 = vrot.lane.b32.xlu0 %v2723_v39, %s2817_s20 }
 0x2e4   : > { %2769 = vrot.lane.b32.xlu2 %v2718_v38, %s2818_s21 }
 0x2e5   : > { %2709 = vrot.lane.b32.xlu1 %v2683_v36, %s2818_s21  ;;  %2774 = vrot.lane.b32.xlu0 %v2723_v39, %s2818_s21 }
 0x2ec   : > { %2779 = vrot.lane.b32.xlu2 %v2718_v38, %s2819_s22 }
 0x2ed   : > { %2714 = vrot.lane.b32.xlu1 %v2683_v36, %s2819_s22  ;;  %2784 = vrot.lane.b32.xlu0 %v2723_v39, %s2819_s22  ;;  %s352_s22 = scalar_lea.vmem %s3445_s9, %s2423_s19 }
 0x2f4   : > { %2789 = vrot.lane.b32.xlu2 %v2718_v38, %s2815_s18 }
 0x2f5   : > { %2799 = vrot.lane.b32.xlu1 %v2683_v36, %s2815_s18  ;;  %2794 = vrot.lane.b32.xlu0 %v2723_v39, %s2815_s18 }
 0x316   : > { %v2720_v41 = vpop.permute.xlu2 %2719 }
 0x317   : > { %v2722_v44 = vunpack.i.h.bf16 %v2720_v41  ;;  %v2721_v45 = vunpack.i.l.bf16 %v2720_v41 }
 0x31e   : > { %v2730_v42 = vpop.permute.xlu2 %2729 }
 0x31f   : > { %v2732_v0 = vunpack.i.h.bf16 %v2730_v42  ;;  %v2731_v3 = vunpack.i.l.bf16 %v2730_v42 }
 0x326   : > { %v3313_v52 = vpop.permute.xlu2 %2739 }
 0x327   : > { %v2742_v20 = vunpack.i.h.bf16 %v3313_v52  ;;  %v2741_v21 = vunpack.i.l.bf16 %v3313_v52 }
 0x32e   : > { %v3335_v13 = vpop.permute.xlu2 %2749 }
 0x32f   : > { %v2685_v43 = vpop.permute.xlu1 %2684  ;;  %v2725_v49 = vpop.permute.xlu0 %2724 }
 0x330   : > { %v2687_v46 = vunpack.i.h.bf16 %v2685_v43  ;;  %v2686_v47 = vunpack.i.l.bf16 %v2685_v43  ;;  %v2727_v50 = vunpack.i.h.bf16 %v2725_v49  ;;  %v2726_v51 = vunpack.i.l.bf16 %v2725_v49 }
 0x331   : > { %v2752_v49 = vunpack.i.h.bf16 %v3335_v13 }
 0x332   : > { %v1596_v53 = vsel %vm547_vm0, %v2686_v47, %v2721_v45  ;;  %v1597_v54 = vsel %vm547_vm0, %v2687_v46, %v2722_v44  ;;  %v1593_v58 = vsel %vm547_vm0, %v2727_v50, %v2687_v46  ;;  %v1595_v32 = vsel %vm547_vm0, %v2722_v44, %v2727_v50 }
 0x333   : > { %v1599_v55 = vpack.c.bf16 %v1596_v53, %v1596_v53  ;;  %v1601_v56 = vpack.c.bf16 %v1597_v54, %v1597_v54  ;;  %v1600_v59 = vpack.c.bf16 %v1593_v58, %v1595_v32  ;;  %v1592_v60 = vsel %vm547_vm0, %v2726_v51, %v2686_v47 }
 0x334   : > { %v1594_v61 = vsel %vm547_vm0, %v2721_v45, %v2726_v51  ;;  %v2751_v50 = vunpack.i.l.bf16 %v3335_v13 }
 0x335   : > { %1603 = vst [vmem:[#allocation2 + $0xb0] sm:$0xf] %v1599_v55  ;;  %v1598_v48 = vpack.c.bf16 %v1592_v60, %v1594_v61 }
 0x336   : > { %1605 = vst [vmem:[#allocation2 + $0xbc] sm:$0xf] %v1601_v56  ;;  %v2760_v45 = vpop.permute.xlu2 %2759 }
 0x337   : > { %1604 = vst [vmem:[#allocation2 + $0xb4] sm:$0xff] %v1600_v59  ;;  %v2690_v2 = vpop.permute.xlu1 %2689  ;;  %v2735_v5 = vpop.permute.xlu0 %2734 }
 0x338   : > { %1602 = vst [vmem:[#allocation2 + $0xa8] sm:$0xff] %v1598_v48  ;;  %v2692_v4 = vunpack.i.h.bf16 %v2690_v2  ;;  %v2691_v1 = vunpack.i.l.bf16 %v2690_v2  ;;  %v2737_v62 = vunpack.i.h.bf16 %v2735_v5  ;;  %v2736_v6 = vunpack.i.l.bf16 %v2735_v5 }
 0x33a   : > { %v1570_v7 = vsel %vm520_vm1, %v2691_v1, %v2731_v3  ;;  %v1571_v57 = vsel %vm520_vm1, %v2692_v4, %v2732_v0  ;;  %v1567_v63 = vsel %vm520_vm1, %v2737_v62, %v2692_v4  ;;  %v1569_v11 = vsel %vm520_vm1, %v2732_v0, %v2737_v62 }
 0x33b   : > { %v1573_v9 = vpack.c.bf16 %v1570_v7, %v1570_v7  ;;  %v1575_v10 = vpack.c.bf16 %v1571_v57, %v1571_v57  ;;  %v1574_v8 = vpack.c.bf16 %v1567_v63, %v1569_v11  ;;  %v1566_v15 = vsel %vm520_vm1, %v2736_v6, %v2691_v1  ;;  %v2408_v7 = vld [vmem:[#allocation2 + $0x68] sm:$0xf0] }
 0x33c   : > { %v1568_v16 = vsel %vm520_vm1, %v2731_v3, %v2736_v6  ;;  %v2761_v63 = vunpack.i.l.bf16 %v2760_v45 }
 0x33d   : > { %1577 = vst [vmem:[#allocation2 + $0x98] sm:$0xf] %v1573_v9  ;;  %v1572_v17 = vpack.c.bf16 %v1566_v15, %v1568_v16 }
 0x33e   : > { %1579 = vst [vmem:[#allocation2 + $0xa4] sm:$0xf] %v1575_v10  ;;  %v2417_v18 = vld [vmem:[#allocation2 + $0xb0] sm:$0xf0]  ;;  %v2312_v19 = vld [vmem:[#allocation2 + $0xb4] sm:$0xf0]  ;;  %v2762_v10 = vunpack.i.h.bf16 %v2760_v45  ;;  %v2770_v15 = vpop.permute.xlu2 %2769 }
 0x33f   : > { %1578 = vst [vmem:[#allocation2 + $0x9c] sm:$0xff] %v1574_v8  ;;  %v2695_v22 = vpop.permute.xlu1 %2694  ;;  %v2310_v24 = vld [vmem:[#allocation2 + $0xa8] sm:$0xf]  ;;  %v2416_v25 = vld [vmem:[#allocation2 + $0xac] sm:$0xf]  ;;  %v2745_v28 = vpop.permute.xlu0 %2744 }
 0x340   : > { %1576 = vst [vmem:[#allocation2 + $0x90] sm:$0xff] %v1572_v17  ;;  %v2697_v26 = vunpack.i.h.bf16 %v2695_v22  ;;  %v2696_v27 = vunpack.i.l.bf16 %v2695_v22  ;;  %v2311_v29 = vor.u32 %v2417_v18, %v2310_v24  ;;  %v2315_v31 = vor.u32 %v2416_v25, %v2312_v19  ;;  %v2274_v24 = vld [vmem:[#allocation2 + $0x60] sm:$0xf]  ;;  %v2276_v25 = vld [vmem:[#allocation2 + $0x6c] sm:$0xf0] }
 0x341   : > { %v2747_v33 = vunpack.i.h.bf16 %v2745_v28  ;;  %v2746_v34 = vunpack.i.l.bf16 %v2745_v28  ;;  %v2275_v28 = vor.u32 %v2408_v7, %v2274_v24 }
 0x342   : > { %v1544_v35 = vsel %vm493_vm2, %v2696_v27, %v2741_v21  ;;  %v1545_v36 = vsel %vm493_vm2, %v2697_v26, %v2742_v20  ;;  %1827 = vmatpush.bf16.msrb.mxu3 %v2311_v29  ;;  %1853 = vmatpush.bf16.msra.mxu1 %v2315_v31 }
 0x343   : > { %v1547_v37 = vpack.c.bf16 %v1544_v35, %v1544_v35  ;;  %v1549_v38 = vpack.c.bf16 %v1545_v36, %v1545_v36  ;;  %v1541_v39 = vsel %vm493_vm2, %v2747_v33, %v2697_v26  ;;  %v1543_v40 = vsel %vm493_vm2, %v2742_v20, %v2747_v33  ;;  %v2407_v35 = vld [vmem:[#allocation2 + $0x64] sm:$0xf] }
 0x344   : > { %v1548_v41 = vpack.c.bf16 %v1541_v39, %v1543_v40  ;;  %v1540_v42 = vsel %vm493_vm2, %v2746_v34, %v2696_v27  ;;  %v1542_v43 = vsel %vm493_vm2, %v2741_v21, %v2746_v34  ;;  %v2279_v39 = vor.u32 %v2407_v35, %v2276_v25 }
 0x345   : > { %1551 = vst [vmem:[#allocation2 + $0x80] sm:$0xf] %v1547_v37  ;;  %v1546_v44 = vpack.c.bf16 %v1540_v42, %v1542_v43  ;;  %v2772_v43 = vunpack.i.h.bf16 %v2770_v15 }
 0x346   : > { %1553 = vst [vmem:[#allocation2 + $0x8c] sm:$0xf] %v1549_v38  ;;  %v2414_v46 = vld [vmem:[#allocation2 + $0x98] sm:$0xf0]  ;;  %v2300_v47 = vld [vmem:[#allocation2 + $0x9c] sm:$0xf0] }
 0x347   : > { %1552 = vst [vmem:[#allocation2 + $0x84] sm:$0xff] %v1548_v41  ;;  %v2700_v51 = vpop.permute.xlu1 %2699  ;;  %v2298_v52 = vld [vmem:[#allocation2 + $0x90] sm:$0xf]  ;;  %v2413_v53 = vld [vmem:[#allocation2 + $0x94] sm:$0xf]  ;;  %v2755_v56 = vpop.permute.xlu0 %2754 }
 0x348   : > { %1550 = vst [vmem:[#allocation2 + $0x78] sm:$0xff] %v1546_v44  ;;  %v2702_v54 = vunpack.i.h.bf16 %v2700_v51  ;;  %v2701_v55 = vunpack.i.l.bf16 %v2700_v51  ;;  %v2299_v58 = vor.u32 %v2414_v46, %v2298_v52  ;;  %v2303_v32 = vor.u32 %v2413_v53, %v2300_v47 }
 0x349   : > { %v2757_v59 = vunpack.i.h.bf16 %v2755_v56  ;;  %v2756_v60 = vunpack.i.l.bf16 %v2755_v56  ;;  %v2771_v44 = vunpack.i.l.bf16 %v2770_v15  ;;  %v2780_v56 = vpop.permute.xlu2 %2779 }
 0x34a   : > { %v1510_v61 = vsel %vm458_vm4, %v2701_v55, %v2751_v50  ;;  %v1511_v48 = vsel %vm458_vm4, %v2702_v54, %v2752_v49  ;;  %1828 = vmatpush.bf16.msrb.mxu3 %v2299_v58  ;;  %1854 = vmatpush.bf16.msra.mxu1 %v2303_v32 }
 0x34b   : > { %v1507_v2 = vsel %vm458_vm4, %v2757_v59, %v2702_v54  ;;  %v1509_v0 = vsel %vm458_vm4, %v2752_v49, %v2757_v59  ;;  %v1506_v3 = vsel %vm458_vm4, %v2756_v60, %v2701_v55  ;;  %v1508_v4 = vsel %vm458_vm4, %v2751_v50, %v2756_v60 }
 0x34c   : > { %v1514_v1 = vpack.c.bf16 %v1509_v0, %v1511_v48  ;;  %v1515_v5 = vpack.c.bf16 %v1507_v2, %v1507_v2  ;;  %v1512_v62 = vpack.c.bf16 %v1508_v4, %v1510_v61  ;;  %v1513_v6 = vpack.c.bf16 %v1506_v3, %v1506_v3 }
 0x34e   : > { %1518 = vst [vmem:[#allocation2 + $0x54] sm:$0xff] %v1514_v1  ;;  %v2411_v57 = vld [vmem:[#allocation2 + $0x80] sm:$0xf0]  ;;  %v2288_v9 = vld [vmem:[#allocation2 + $0x84] sm:$0xf0] }
 0x34f   : > { %1519 = vst [vmem:[#allocation2 + $0x5c] sm:$0xf] %v1515_v5  ;;  %v2705_v11 = vpop.permute.xlu1 %2704  ;;  %v2286_v13 = vld [vmem:[#allocation2 + $0x78] sm:$0xf]  ;;  %v2410_v8 = vld [vmem:[#allocation2 + $0x7c] sm:$0xf]  ;;  %v2765_v18 = vpop.permute.xlu0 %2764 }
 0x350   : > { %1516 = vst [vmem:[#allocation2 + $0x48] sm:$0xff] %v1512_v62  ;;  %v2707_v16 = vunpack.i.h.bf16 %v2705_v11  ;;  %v2706_v17 = vunpack.i.l.bf16 %v2705_v11  ;;  %v2287_v19 = vor.u32 %v2411_v57, %v2286_v13  ;;  %v2291_v20 = vor.u32 %v2410_v8, %v2288_v9 }
 0x351   : > { %1517 = vst [vmem:[#allocation2 + $0x50] sm:$0xf] %v1513_v6  ;;  %v2767_v21 = vunpack.i.h.bf16 %v2765_v18  ;;  %v2766_v22 = vunpack.i.l.bf16 %v2765_v18  ;;  %v2782_v62 = vunpack.i.h.bf16 %v2780_v56  ;;  %v2781_v6 = vunpack.i.l.bf16 %v2780_v56  ;;  %v2790_v24 = vpop.permute.xlu2 %2789 }
 0x352   : > { %v1484_v26 = vsel %vm431_vm5, %v2706_v17, %v2761_v63  ;;  %v1485_v27 = vsel %vm431_vm5, %v2707_v16, %v2762_v10  ;;  %1829 = vmatpush.bf16.msrb.mxu3 %v2287_v19  ;;  %1855 = vmatpush.bf16.msra.mxu1 %v2291_v20 }
 0x353   : > { %v1481_v29 = vsel %vm431_vm5, %v2767_v21, %v2707_v16  ;;  %v1483_v31 = vsel %vm431_vm5, %v2762_v10, %v2767_v21  ;;  %v1480_v33 = vsel %vm431_vm5, %v2766_v22, %v2706_v17  ;;  %v1482_v34 = vsel %vm431_vm5, %v2761_v63, %v2766_v22 }
 0x354   : > { %v1488_v36 = vpack.c.bf16 %v1483_v31, %v1485_v27  ;;  %v1489_v37 = vpack.c.bf16 %v1481_v29, %v1481_v29  ;;  %v1486_v38 = vpack.c.bf16 %v1482_v34, %v1484_v26  ;;  %v1487_v40 = vpack.c.bf16 %v1480_v33, %v1480_v33 }
 0x355   : > { %v2405_v41 = vld [vmem:[#allocation2 + $0x50] sm:$0xf0]  ;;  %v2264_v42 = vld [vmem:[#allocation2 + $0x54] sm:$0xf0]  ;;  %v2792_v33 = vunpack.i.h.bf16 %v2790_v24  ;;  %v2791_v34 = vunpack.i.l.bf16 %v2790_v24 }
 0x356   : > { %1492 = vst [vmem:[#allocation2 + $0x3c] sm:$0xff] %v1488_v36  ;;  %1830 = vmatpush.bf16.msrb.mxu3 %v2275_v28  ;;  %1856 = vmatpush.bf16.msra.mxu1 %v2279_v39 }
 0x357   : > { %1493 = vst [vmem:[#allocation2 + $0x44] sm:$0xf] %v1489_v37  ;;  %v2710_v45 = vpop.permute.xlu1 %2709  ;;  %v2262_v46 = vld [vmem:[#allocation2 + $0x48] sm:$0xf]  ;;  %v2404_v47 = vld [vmem:[#allocation2 + $0x4c] sm:$0xf]  ;;  %v2775_v51 = vpop.permute.xlu0 %2774 }
 0x358   : > { %1490 = vst [vmem:[#allocation2 + $0x30] sm:$0xff] %v1486_v38  ;;  %v2712_v49 = vunpack.i.h.bf16 %v2710_v45  ;;  %v2711_v50 = vunpack.i.l.bf16 %v2710_v45  ;;  %v2263_v52 = vor.u32 %v2405_v41, %v2262_v46  ;;  %v2267_v53 = vor.u32 %v2404_v47, %v2264_v42  ;;  %v1415_v47 = vld [vmem:[%s3442_s6] sm:$0xff] }
 0x359   : > { %1491 = vst [vmem:[#allocation2 + $0x38] sm:$0xf] %v1487_v40  ;;  %v2777_v54 = vunpack.i.h.bf16 %v2775_v51  ;;  %v2776_v55 = vunpack.i.l.bf16 %v2775_v51  ;;  %v1676_v12 = vunpack.c.h.b16 %v1415_v47 }
 0x35a   : > { %v1458_v58 = vsel %vm404_vm7, %v2711_v50, %v2771_v44  ;;  %v1459_v32 = vsel %vm404_vm7, %v2712_v49, %v2772_v43  ;;  %1831 = vmatpush.bf16.msrb.mxu3 %v2263_v52  ;;  %1857 = vmatpush.bf16.msra.mxu1 %v2267_v53 }
 0x35b   : > { %v1455_v59 = vsel %vm404_vm7, %v2777_v54, %v2712_v49  ;;  %v1457_v60 = vsel %vm404_vm7, %v2772_v43, %v2777_v54  ;;  %v1454_v61 = vsel %vm404_vm7, %v2776_v55, %v2711_v50  ;;  %v1456_v48 = vsel %vm404_vm7, %v2771_v44, %v2776_v55 }
 0x35c   : > { %v1462_v2 = vpack.c.bf16 %v1457_v60, %v1459_v32  ;;  %v1463_v0 = vpack.c.bf16 %v1455_v59, %v1455_v59  ;;  %v1460_v3 = vpack.c.bf16 %v1456_v48, %v1458_v58  ;;  %v1461_v4 = vpack.c.bf16 %v1454_v61, %v1454_v61 }
 0x35d   : > { %v2402_v1 = vld [vmem:[#allocation2 + $0x38] sm:$0xf0]  ;;  %v2252_v5 = vld [vmem:[#allocation2 + $0x3c] sm:$0xf0]  ;;  %v1675_v59 = vunpack.c.l.b16 %v1415_v47 }
 0x35e   : > { %1466 = vst [vmem:[#allocation2 + $0x24] sm:$0xff] %v1462_v2 }
 0x35f   : > { %1467 = vst [vmem:[#allocation2 + $0x2c] sm:$0xf] %v1463_v0  ;;  %v2715_v7 = vpop.permute.xlu1 %2714  ;;  %v2250_v57 = vld [vmem:[#allocation2 + $0x30] sm:$0xf]  ;;  %v2401_v9 = vld [vmem:[#allocation2 + $0x34] sm:$0xf]  ;;  %v2785_v11 = vpop.permute.xlu0 %2784  ;;  %v1677_v0 = vpack.c.b16 %v1675_v59, %v1675_v59 }
 0x360   : > { %1464 = vst [vmem:[#allocation2 + $0x18] sm:$0xff] %v1460_v3  ;;  %v2717_v10 = vunpack.i.h.bf16 %v2715_v7  ;;  %v2716_v63 = vunpack.i.l.bf16 %v2715_v7  ;;  %v2251_v13 = vor.u32 %v2402_v1, %v2250_v57  ;;  %v2255_v8 = vor.u32 %v2401_v9, %v2252_v5  ;;  %v2318_v1 = vld [vmem:[#allocation2 + $0xb0] sm:$0xf]  ;;  %v2418_v7 = vld [vmem:[#allocation2 + $0xb8] sm:$0xf0] }
 0x361   : > { %1465 = vst [vmem:[#allocation2 + $0x20] sm:$0xf] %v1461_v4  ;;  %v2787_v15 = vunpack.i.h.bf16 %v2785_v11  ;;  %v2786_v16 = vunpack.i.l.bf16 %v2785_v11  ;;  %v2319_v11 = vor.u32 %v2418_v7, %v2318_v1 }
 0x362   : > { %v1432_v17 = vsel %vm377_vm8, %v2716_v63, %v2781_v6  ;;  %v1433_v18 = vsel %vm377_vm8, %v2717_v10, %v2782_v62  ;;  %1832 = vmatpush.bf16.msrb.mxu3 %v2251_v13  ;;  %1858 = vmatpush.bf16.msra.mxu1 %v2255_v8  ;;  %v1678_v13 = vpack.c.b16 %v1676_v12, %v1676_v12  ;;  %v2306_v8 = vld [vmem:[#allocation2 + $0x98] sm:$0xf] }
 0x363   : > { %v1429_v19 = vsel %vm377_vm8, %v2787_v15, %v2717_v10  ;;  %v1431_v20 = vsel %vm377_vm8, %v2782_v62, %v2787_v15  ;;  %v1428_v21 = vsel %vm377_vm8, %v2786_v16, %v2716_v63  ;;  %v1430_v22 = vsel %vm377_vm8, %v2781_v6, %v2786_v16  ;;  %v2415_v15 = vld [vmem:[#allocation2 + $0xa0] sm:$0xf0] }
 0x364   : > { %v1436_v25 = vpack.c.bf16 %v1431_v20, %v1433_v18  ;;  %v1437_v26 = vpack.c.bf16 %v1429_v19, %v1429_v19  ;;  %v1434_v27 = vpack.c.bf16 %v1430_v22, %v1432_v17  ;;  %v1435_v28 = vpack.c.bf16 %v1428_v21, %v1428_v21  ;;  %v1668_v16 = vld [vmem:[%s3443_s7] sm:$0xff]  ;;  %v2412_v19 = vld [vmem:[#allocation2 + $0x88] sm:$0xf0]  ;;  %v2409_v21 = vld [vmem:[#allocation2 + $0x70] sm:$0xf0] }
 0x365   : > { %v2399_v29 = vld [vmem:[#allocation2 + $0x20] sm:$0xf0]  ;;  %v2240_v31 = vld [vmem:[#allocation2 + $0x24] sm:$0xf0]  ;;  %1671 = vperm.xlu2 %2803, %v1668_v16   ;;  %v2307_v17 = vor.u32 %v2415_v15, %v2306_v8  ;;  %v2294_v18 = vld [vmem:[#allocation2 + $0x80] sm:$0xf] }
 0x366   : > { %1440 = vst [vmem:[#allocation2 + $0xc] sm:$0xff] %v1436_v25  ;;  %v2295_v20 = vor.u32 %v2412_v19, %v2294_v18  ;;  %v2282_v22 = vld [vmem:[#allocation2 + $0x68] sm:$0xf]  ;;  %v2270_v25 = vld [vmem:[#allocation2 + $0x50] sm:$0xf] }
 0x367   : > { %1441 = vst [vmem:[#allocation2 + $0x14] sm:$0xf] %v1437_v26  ;;  %v2800_v35 = vpop.permute.xlu1 %2799  ;;  %v2238_v36 = vld [vmem:[#allocation2 + $0x18] sm:$0xf]  ;;  %v2398_v37 = vld [vmem:[#allocation2 + $0x1c] sm:$0xf]  ;;  %v2795_v40 = vpop.permute.xlu0 %2794  ;;  %v2283_v24 = vor.u32 %v2409_v21, %v2282_v22 }
 0x368   : > { %1438 = vst [vmem:[#allocation2] sm:$0xff] %v1434_v27  ;;  %v2802_v38 = vunpack.i.h.bf16 %v2800_v35  ;;  %v2801_v39 = vunpack.i.l.bf16 %v2800_v35  ;;  %v2239_v41 = vor.u32 %v2399_v29, %v2238_v36  ;;  %v2243_v42 = vor.u32 %v2398_v37, %v2240_v31  ;;  %v2406_v26 = vld [vmem:[#allocation2 + $0x58] sm:$0xf0]  ;;  %v2403_v29 = vld [vmem:[#allocation2 + $0x40] sm:$0xf0] }
 0x369   : > { %1439 = vst [vmem:[#allocation2 + $0x8] sm:$0xf] %v1435_v28  ;;  %v2797_v43 = vunpack.i.h.bf16 %v2795_v40  ;;  %v2796_v44 = vunpack.i.l.bf16 %v2795_v40  ;;  %v2271_v27 = vor.u32 %v2406_v26, %v2270_v25  ;;  %v2258_v28 = vld [vmem:[#allocation2 + $0x38] sm:$0xf] }
 0x36a   : > { %v1622_v45 = vsel %vm574_vm3, %v2801_v39, %v2791_v34  ;;  %v1623_v46 = vsel %vm574_vm3, %v2802_v38, %v2792_v33  ;;  %1833 = vmatpush.bf16.msrb.mxu3 %v2239_v41  ;;  %1859 = vmatpush.bf16.msra.mxu1 %v2243_v42  ;;  %v2259_v31 = vor.u32 %v2403_v29, %v2258_v28 }
 0x36b   : > { %v1625_v49 = vpack.c.bf16 %v1622_v45, %v1622_v45  ;;  %v1627_v50 = vpack.c.bf16 %v1623_v46, %v1623_v46  ;;  %v1619_v51 = vsel %vm574_vm3, %v2797_v43, %v2802_v38  ;;  %v1621_v52 = vsel %vm574_vm3, %v2792_v33, %v2797_v43  ;;  %v2246_v33 = vld [vmem:[#allocation2 + $0x20] sm:$0xf] }
 0x36c   : > { %v1626_v53 = vpack.c.bf16 %v1619_v51, %v1621_v52  ;;  %v1618_v54 = vsel %vm574_vm3, %v2796_v44, %v2801_v39  ;;  %v1620_v55 = vsel %vm574_vm3, %v2791_v34, %v2796_v44  ;;  %v2400_v34 = vld [vmem:[#allocation2 + $0x28] sm:$0xf0] }
 0x36d   : > { %1629 = vst [vmem:[#allocation2 + $0xc8] sm:$0xf] %v1625_v49  ;;  %v1624_v56 = vpack.c.bf16 %v1618_v54, %v1620_v55  ;;  %v2396_v58 = vld [vmem:[#allocation2 + $0x8] sm:$0xf0]  ;;  %v2228_v32 = vld [vmem:[#allocation2 + $0xc] sm:$0xf0]  ;;  %v2247_v35 = vor.u32 %v2400_v34, %v2246_v33 }
 0x36e   : > { %1631 = vst [vmem:[#allocation2 + $0xd4] sm:$0xf] %v1627_v50  ;;  %v2397_v37 = vld [vmem:[#allocation2 + $0x10] sm:$0xf0] }
 0x36f   : > { %1630 = vst [vmem:[#allocation2 + $0xcc] sm:$0xff] %v1626_v53  ;;  %v2226_v60 = vld [vmem:[#allocation2] sm:$0xf]  ;;  %v2395_v61 = vld [vmem:[#allocation2 + $0x4] sm:$0xf] }
 0x370   : > { %1628 = vst [vmem:[#allocation2 + $0xc0] sm:$0xff] %v1624_v56  ;;  %v2227_v48 = vor.u32 %v2396_v58, %v2226_v60  ;;  %v2231_v2 = vor.u32 %v2395_v61, %v2228_v32  ;;  %v2234_v36 = vld [vmem:[#allocation2 + $0x8] sm:$0xf] }
 0x371   : > { %v2235_v38 = vor.u32 %v2397_v37, %v2234_v36 }
 0x372   : > { %1834 = vmatpush.bf16.msrb.mxu3 %v2227_v48  ;;  %1860 = vmatpush.bf16.msra.mxu1 %v2231_v2 }
 0x374   : > { %v2330_v3 = vld [vmem:[#allocation2 + $0xc8] sm:$0xf] }
 0x375   : > { %v2421_v4 = vld [vmem:[#allocation2 + $0xd0] sm:$0xf0]  ;;  %1835 = vmatmul.bf16.vlgmr.msrb.gmra.mxu3 %v1677_v0  ;;  %1861 = vmatmul.bf16.vlgmr.msra.gmra.mxu1 %v1677_v0 }
 0x376   : > { %v2331_v5 = vor.u32 %v2421_v4, %v2330_v3  ;;  %v2420_v62 = vld [vmem:[#allocation2 + $0xc8] sm:$0xf0]  ;;  %v2324_v6 = vld [vmem:[#allocation2 + $0xcc] sm:$0xf0] }
 0x377   : > { %v2322_v57 = vld [vmem:[#allocation2 + $0xc0] sm:$0xf]  ;;  %v2419_v9 = vld [vmem:[#allocation2 + $0xc4] sm:$0xf] }
 0x378   : > { %1899 = vmatpush.bf16.msra.mxu3 %v2331_v5  ;;  %v2323_v10 = vor.u32 %v2420_v62, %v2322_v57  ;;  %v2327_v63 = vor.u32 %v2419_v9, %v2324_v6 }
 0x37a   : > { %1847 = vmatpush.bf16.msra.mxu2 %v2323_v10  ;;  %1873 = vmatpush.bf16.msrb.mxu0 %v2327_v63 }
 0x37d   : > { %2332 = vmatmul.msk.bf16.vlgmr.msra.gmra.mxu2 %vm790_vm6, %v1678_v13  ;;  %2333 = vmatmul.msk.bf16.vlgmr.msrb.gmra.mxu0 %vm790_vm6, %v1678_v13 }
 0x37e   : > { %1879 = vmatpush.bf16.msrb.mxu2 %v2319_v11 }
 0x382   : > { %1880 = vmatpush.bf16.msrb.mxu2 %v2307_v17 }
 0x385   : > { %2334 = vmatmul.msk.bf16.vlgmr.msra.gmra.mxu3 %vm790_vm6, %v1678_v13 }
 0x386   : > { %1881 = vmatpush.bf16.msrb.mxu2 %v2295_v20 }
 0x38a   : > { %1882 = vmatpush.bf16.msrb.mxu2 %v2283_v24 }
 0x38e   : > { %1883 = vmatpush.bf16.msrb.mxu2 %v2271_v27 }
 0x392   : > { %1884 = vmatpush.bf16.msrb.mxu2 %v2259_v31 }
 0x396   : > { %1885 = vmatpush.bf16.msrb.mxu2 %v2247_v35 }
 0x39a   : > { %1886 = vmatpush.bf16.msrb.mxu2 %v2235_v38 }
 0x39d   : > { %1887 = vmatmul.bf16.vlgmr.msrb.gmra.mxu2 %v1677_v0 }
 0x3bf   : > { %v1672_v40 = vpop.permute.xlu2 %1671 }
 0x3f2   : > { %v1862_v39 = vpop.f32.mrf.mxu1 }
 0x3f3   : > { %v1863_v41 = vadd.f32 %v1862_v39, %v1672_v40 }
 0x3f8   : > { %v1836_v42 = vpop.f32.mrf.mxu3 }
 0x3f9   : > { %v1837_v46 = vadd.f32 %v1836_v42, %v1672_v40 }
 0x3fa   : > { %v1875_v43 = vpop.f32.mrf.mxu0  ;;  %v1864_v44 = vpop.f32.mrf.mxu1 }
 0x3fb   : > { %v1876_v45 = vadd.f32 %v1875_v43, %v1863_v41 }
 0x3fd   : > { %v1906_v47 = vmul.f32 %v1876_v45, %v3105_v30 }
 0x3ff   : > { %1909 = vst [vmem:[%s352_s22 + $0x8] sm:$0xff] %v1906_v47 }
 0x400   : > { %v1849_v49 = vpop.f32.mrf.mxu2  ;;  %v1838_v50 = vpop.f32.mrf.mxu3 }
 0x401   : > { %v1850_v51 = vadd.f32 %v1849_v49, %v1837_v46 }
 0x402   : > { %v1877_v52 = vpop.f32.mrf.mxu0 }
 0x403   : > { %v1905_v53 = vmul.f32 %v1850_v51, %v3103_v23 }
 0x405   : > { %1908 = vst [vmem:[%s352_s22] sm:$0xff] %v1905_v53 }
 0x408   : > { %v1851_v54 = vpop.f32.mrf.mxu2  ;;  %v1901_v55 = vpop.f32.mrf.mxu3 }
 0x410   : > { %v1903_v56 = vpop.f32.mrf.mxu3 }
 0x420   : > { %v1888_v58 = vpop.f32.mrf.mxu2 }
 0x421   : > { %v1889_v32 = vadd.f32 %v1888_v58, %v1672_v40 }
 0x423   : > { %v1902_v59 = vadd.f32 %v1901_v55, %v1889_v32 }
 0x425   : > { %v1907_v30 = vmul.f32 %v1902_v59, %v3092_v14 }
 0x427   : > { %1910 = vst [vmem:[%s352_s22 + $0x10] sm:$0xff] %v1907_v30 }
 0x428   : > { %v1890_v60 = vpop.f32.mrf.mxu2 }
 0x429 PF: > { %s19_s30 = sadd.s32 1, %s2810_s30  }
 0x42a   : > { %p16_p4 = scmp.ge.s32.totalorder %s19_s30, 4  }
 0x42c   :  { %18 = sbr.rel (!%p16_p4) target bundleno = 1 (0x1), region = 89 }

// kernel: rcan_forward.5
= control target key start
LH: loop header
LB: loop body
LE: loop exit
PB: predicated region body
PF: predicated region fallthrough
CT: control target
= control target key end

     0   :  { %s4809_s13 = smov 0   ;;  %s5985_s0 = inlined_call_operand.vmem [shape: f32[2,16,384], index: 0, kind: input, shape index: {}]   ;;  %s5986_s1 = inlined_call_operand.vmem [shape: bf16[4,16,144], index: 1, kind: input, shape index: {}]   ;;  %s5987_s2 = inlined_call_operand.vmem [shape: f32[4,16,1], index: 2, kind: input, shape index: {}]   ;;  %s5988_s3 = inlined_call_operand.vmem [shape: f32[2,4,16], index: 3, kind: input, shape index: {}]   ;;  %s5989_s4 = inlined_call_operand.vmem [shape: f32[2,4,1], index: 4, kind: input, shape index: {}]   ;;  %s5990_s5 = inlined_call_operand.vmem [shape: f32[2,16,4], index: 5, kind: input, shape index: {}]   ;;  %s5991_s6 = inlined_call_operand.vmem [shape: f32[2,16,1], index: 6, kind: input, shape index: {}]   ;;  %s5992_s7 = inlined_call_operand.vmem [shape: bf16[16,144], index: 7, kind: input, shape index: {}]   ;;  %s5993_s8 = inlined_call_operand.vmem [shape: f32[16,1], index: 8, kind: input, shape index: {}]   ;;  %s5994_s9 = inlined_call_operand.vmem [shape: f32[1,384], index: 9, kind: input, shape index: {}]   ;;  %s5995_s10 = inlined_call_operand.vmem [shape: f32[2,16,384], index: 10, kind: output, shape index: {}]  }
   0x1 LB: > { %s3313_s14 = sadd.s32 4294967295, %s4743_s13   ;;  %p3317_p0 = scmp.ge.s32.totalorder %s4743_s13, 1  ;;  %s4743_s13 = sphi %s4809_s13, %s20_s13  }
   0x2   : > { %p312_p1 = scmp.lt.s32.totalorder %s4743_s13, 3 }
   0x4   : > { %p313_p2 = pnand %p3317_p0, %p312_p1 }
   0x5   : > { %p350_p3 = scmp.lt.s32.totalorder (!%p313_p2), %s3313_s14, 1  ;;  %s4745_s19 = smov (!%p313_p2), 110  }
   0x6   : > { %316 = sbr.rel (%p313_p2) target bundleno = 2899 (0xb53), region = 60  ;;  %s4746_s20 = smov (!%p313_p2), 111  }
   0x7   : > { %s4747_s21 = smov (!%p313_p2), 127   ;;  %s4748_s22 = smov (!%p313_p2), 109  }
   0x8   : > { %s4749_s23 = smov (!%p313_p2), 1   ;;  %s4750_s24 = smov (!%p313_p2), 17  }
   0x9   : > { %s4751_s25 = smov (!%p313_p2), 18   ;;  %s4752_s26 = smov (!%p313_p2), 19  }
   0xb   : > { %s6006_s14 = smov (!%p350_p3, %s3313_s14), 1  ;;  %v382_v10 = vlaneseq  ;;  %vm5998_vm6 = vcmask 130048   ;;  %vm5997_vm9 = vcmask 1043456   ;;  %vm5996_vm10 = vcmask 31744  }
   0xc   : > { %s4088_s15 = smul.u32 48, %s6006_s14 }
   0xd   : > { %v4875_v12 = vand.u32 127, %v382_v10 }
   0xe   : > { %s4825_s18 = scalar_lea.vmem %s5985_s0, %s4088_s15  ;;  %s5964_s27 = scalar_lea.vmem %s5995_s10, %s4088_s15 }
   0xf   : > { %v4828_v0 = vld [vmem:[%s4825_s18 + $0x10] sm:$0xff]  ;;  %v4831_v1 = vld [vmem:[%s4825_s18 + $0x28] sm:$0xff]  ;;  %v4834_v2 = vld [vmem:[%s4825_s18] sm:$0xff]  ;;  %vm554_vm0 = vcmp.lt.s32.totalorder %v4875_v12, 110  ;;  %vm527_vm1 = vcmp.lt.s32.totalorder %v4875_v12, 111  ;;  %vm500_vm2 = vcmp.lt.s32.totalorder %v4875_v12, 127 }
  0x10   : > { %v4116_v3 = vpack.i.bf16 %v4831_v1, %v4828_v0  ;;  %v4839_v4 = vld [vmem:[%s4825_s18 + $0x18] sm:$0xff]  ;;  %v4842_v5 = vld [vmem:[%s4825_s18 + $0x8] sm:$0xff]  ;;  %v4845_v6 = vld [vmem:[%s4825_s18 + $0x20] sm:$0xff]  ;;  %v481_v56 = vpack.c.bf16 %v4828_v0, %v4828_v0  ;;  %v483_v60 = vpack.c.bf16 %v4831_v1, %v4831_v1  ;;  %vm581_vm3 = vcmp.lt.s32.totalorder %v4875_v12, 109 }
  0x11   : > { %v4106_v7 = vpack.i.bf16 %v4839_v4, %v4834_v2  ;;  %v4126_v8 = vpack.i.bf16 %v4845_v6, %v4842_v5  ;;  %v480_v28 = vpack.c.bf16 %v4842_v5, %v4834_v2  ;;  %v482_v29 = vpack.c.bf16 %v4845_v6, %v4839_v4 }
  0x12   : > { %4117 = vrot.lane.b32.xlu1 %v4116_v3, %s4745_s19  ;;  %485 = vst [vmem:[#allocation2 + $0x68] sm:$0xf] %v481_v56  ;;  %vm465_vm4 = vcmp.lt.s32.totalorder %v4875_v12, 1  ;;  %vm438_vm5 = vcmp.lt.s32.totalorder %v4875_v12, 17  ;;  %vm411_vm7 = vcmp.lt.s32.totalorder %v4875_v12, 18  ;;  %vm384_vm8 = vcmp.lt.s32.totalorder %v4875_v12, 19 }
  0x13   : > { %4107 = vrot.lane.b32.xlu0 %v4106_v7, %s4745_s19  ;;  %4127 = vrot.lane.b32.xlu2 %v4126_v8, %s4746_s20  ;;  %484 = vst [vmem:[#allocation2 + $0x60] sm:$0xff] %v480_v28 }
  0x14   : > { %486 = vst [vmem:[#allocation2 + $0x6c] sm:$0xff] %v482_v29 }
  0x15   : > { %487 = vst [vmem:[#allocation2 + $0x74] sm:$0xf] %v483_v60 }
  0x1a   : > { %4122 = vrot.lane.b32.xlu1 %v4106_v7, %s4746_s20  ;;  %v3378_v56 = vld [vmem:[#allocation2 + $0x60] sm:$0xf]  ;;  %v3957_v60 = vld [vmem:[#allocation2 + $0x64] sm:$0xf] }
  0x1b   : > { %4112 = vrot.lane.b32.xlu0 %v4126_v8, %s4745_s19  ;;  %4132 = vrot.lane.b32.xlu2 %v4116_v3, %s4746_s20 }
  0x22   : > { %4142 = vrot.lane.b32.xlu1 %v4126_v8, %s4747_s21 }
  0x23   : > { %4137 = vrot.lane.b32.xlu0 %v4106_v7, %s4747_s21  ;;  %4147 = vrot.lane.b32.xlu2 %v4116_v3, %s4747_s21 }
  0x2a   : > { %4157 = vrot.lane.b32.xlu1 %v4126_v8, %s4748_s22 }
  0x2b   : > { %4152 = vrot.lane.b32.xlu0 %v4106_v7, %s4748_s22  ;;  %4162 = vrot.lane.b32.xlu2 %v4116_v3, %s4748_s22 }
  0x32   : > { %4172 = vrot.lane.b32.xlu1 %v4126_v8, %s4749_s23 }
  0x33   : > { %4167 = vrot.lane.b32.xlu0 %v4106_v7, %s4749_s23  ;;  %4177 = vrot.lane.b32.xlu2 %v4116_v3, %s4749_s23 }
  0x3a   : > { %4187 = vrot.lane.b32.xlu1 %v4126_v8, %s4750_s24 }
  0x3b   : > { %4182 = vrot.lane.b32.xlu0 %v4106_v7, %s4750_s24  ;;  %4192 = vrot.lane.b32.xlu2 %v4116_v3, %s4750_s24 }
  0x42   : > { %4202 = vrot.lane.b32.xlu1 %v4126_v8, %s4751_s25 }
  0x43   : > { %4197 = vrot.lane.b32.xlu0 %v4106_v7, %s4751_s25  ;;  %4207 = vrot.lane.b32.xlu2 %v4116_v3, %s4751_s25 }
  0x4a   : > { %4217 = vrot.lane.b32.xlu1 %v4126_v8, %s4752_s26 }
  0x4b   : > { %4212 = vrot.lane.b32.xlu0 %v4106_v7, %s4752_s26  ;;  %4222 = vrot.lane.b32.xlu2 %v4116_v3, %s4752_s26 }
  0x6d   : > { %v4128_v9 = vpop.permute.xlu2 %4127 }
  0x6e   : > { %v4130_v22 = vunpack.i.h.bf16 %v4128_v9  ;;  %v4129_v23 = vunpack.i.l.bf16 %v4128_v9 }
  0x75   : > { %v4133_v11 = vpop.permute.xlu2 %4132 }
  0x76   : > { %v4135_v26 = vunpack.i.h.bf16 %v4133_v11  ;;  %v4134_v27 = vunpack.i.l.bf16 %v4133_v11 }
  0x78   : > { %v528_v34 = vsel %vm527_vm1, %v4129_v23, %v4134_v27  ;;  %v529_v35 = vsel %vm527_vm1, %v4130_v22, %v4135_v26 }
  0x7d   : > { %v4878_v19 = vpop.permute.xlu2 %4147 }
  0x7e   : > { %v4150_v53 = vunpack.i.h.bf16 %v4878_v19  ;;  %v4149_v54 = vunpack.i.l.bf16 %v4878_v19 }
  0x84   : > { %v4118_v13 = vpop.permute.xlu1 %4117 }
  0x85   : > { %v4120_v14 = vunpack.i.h.bf16 %v4118_v13  ;;  %v4119_v15 = vunpack.i.l.bf16 %v4118_v13  ;;  %v4108_v16 = vpop.permute.xlu0 %4107  ;;  %v4901_v46 = vpop.permute.xlu2 %4162 }
  0x86   : > { %v4110_v17 = vunpack.i.h.bf16 %v4108_v16  ;;  %v4109_v18 = vunpack.i.l.bf16 %v4108_v16  ;;  %v4165_v10 = vunpack.i.h.bf16 %v4901_v46  ;;  %v4164_v11 = vunpack.i.l.bf16 %v4901_v46 }
  0x88   : > { %v560_v20 = vsel %vm554_vm0, %v4120_v14, %v4110_v17  ;;  %v559_v21 = vsel %vm554_vm0, %v4119_v15, %v4109_v18 }
  0x89   : > { %v564_v24 = vpack.c.bf16 %v560_v20, %v560_v20  ;;  %v562_v25 = vpack.c.bf16 %v559_v21, %v559_v21 }
  0x8b   : > { %568 = vst [vmem:[#allocation2 + $0xbc] sm:$0xf] %v564_v24 }
  0x8c   : > { %566 = vst [vmem:[#allocation2 + $0xb0] sm:$0xf] %v562_v25  ;;  %v4123_v30 = vpop.permute.xlu1 %4122 }
  0x8d   : > { %v4125_v31 = vunpack.i.h.bf16 %v4123_v30  ;;  %v4124_v32 = vunpack.i.l.bf16 %v4123_v30  ;;  %v4113_v33 = vpop.permute.xlu0 %4112  ;;  %v4930_v9 = vpop.permute.xlu2 %4177 }
  0x8e   : > { %v4115_v36 = vunpack.i.h.bf16 %v4113_v33  ;;  %v4114_v37 = vunpack.i.l.bf16 %v4113_v33 }
  0x8f   : > { %v531_v38 = vsel %vm527_vm1, %v4125_v31, %v4130_v22  ;;  %v533_v39 = vsel %vm527_vm1, %v4135_v26, %v4125_v31  ;;  %v530_v40 = vsel %vm527_vm1, %v4124_v32, %v4129_v23  ;;  %v532_v41 = vsel %vm527_vm1, %v4134_v27, %v4124_v32 }
  0x90   : > { %v536_v42 = vpack.c.bf16 %v529_v35, %v531_v38  ;;  %v537_v43 = vpack.c.bf16 %v533_v39, %v533_v39  ;;  %v534_v44 = vpack.c.bf16 %v528_v34, %v530_v40  ;;  %v535_v45 = vpack.c.bf16 %v532_v41, %v532_v41 }
  0x91   : > { %v556_v47 = vsel %vm554_vm0, %v4115_v36, %v4120_v14  ;;  %v555_v48 = vsel %vm554_vm0, %v4114_v37, %v4119_v15  ;;  %v557_v49 = vsel %vm554_vm0, %v4109_v18, %v4114_v37  ;;  %v558_v50 = vsel %vm554_vm0, %v4110_v17, %v4115_v36 }
  0x92   : > { %540 = vst [vmem:[#allocation2 + $0x9c] sm:$0xff] %v536_v42  ;;  %v561_v51 = vpack.c.bf16 %v555_v48, %v557_v49  ;;  %v563_v52 = vpack.c.bf16 %v556_v47, %v558_v50  ;;  %v4180_v41 = vunpack.i.h.bf16 %v4930_v9  ;;  %v4179_v42 = vunpack.i.l.bf16 %v4930_v9 }
  0x93   : > { %541 = vst [vmem:[#allocation2 + $0xa4] sm:$0xf] %v537_v43 }
  0x94   : > { %538 = vst [vmem:[#allocation2 + $0x90] sm:$0xff] %v534_v44  ;;  %v4143_v55 = vpop.permute.xlu1 %4142 }
  0x95   : > { %539 = vst [vmem:[#allocation2 + $0x98] sm:$0xf] %v535_v45  ;;  %v4145_v57 = vunpack.i.h.bf16 %v4143_v55  ;;  %v4144_v58 = vunpack.i.l.bf16 %v4143_v55  ;;  %v4138_v59 = vpop.permute.xlu0 %4137  ;;  %v4950_v48 = vpop.permute.xlu2 %4192 }
  0x96   : > { %565 = vst [vmem:[#allocation2 + $0xa8] sm:$0xff] %v561_v51  ;;  %v4140_v61 = vunpack.i.h.bf16 %v4138_v59  ;;  %v4139_v62 = vunpack.i.l.bf16 %v4138_v59 }
  0x97   : > { %567 = vst [vmem:[#allocation2 + $0xb4] sm:$0xff] %v563_v52  ;;  %v502_v63 = vsel %vm500_vm2, %v4145_v57, %v4150_v53  ;;  %v501_v2 = vsel %vm500_vm2, %v4144_v58, %v4149_v54 }
  0x98   : > { %v504_v0 = vsel %vm500_vm2, %v4140_v61, %v4145_v57  ;;  %v506_v3 = vsel %vm500_vm2, %v4150_v53, %v4140_v61  ;;  %v503_v4 = vsel %vm500_vm2, %v4139_v62, %v4144_v58  ;;  %v505_v1 = vsel %vm500_vm2, %v4149_v54, %v4139_v62  ;;  %v3958_v57 = vld [vmem:[#allocation2 + $0x68] sm:$0xf0]  ;;  %v3380_v61 = vld [vmem:[#allocation2 + $0x6c] sm:$0xf0] }
  0x99   : > { %v509_v5 = vpack.c.bf16 %v502_v63, %v504_v0  ;;  %v510_v6 = vpack.c.bf16 %v506_v3, %v506_v3  ;;  %v507_v7 = vpack.c.bf16 %v501_v2, %v503_v4  ;;  %v508_v8 = vpack.c.bf16 %v505_v1, %v505_v1  ;;  %v3964_v32 = vld [vmem:[#allocation2 + $0x98] sm:$0xf0]  ;;  %v3404_v37 = vld [vmem:[#allocation2 + $0x9c] sm:$0xf0] }
  0x9b   : > { %513 = vst [vmem:[#allocation2 + $0x84] sm:$0xff] %v509_v5  ;;  %v3402_v31 = vld [vmem:[#allocation2 + $0x90] sm:$0xf]  ;;  %v3963_v36 = vld [vmem:[#allocation2 + $0x94] sm:$0xf] }
  0x9c   : > { %514 = vst [vmem:[#allocation2 + $0x8c] sm:$0xf] %v510_v6  ;;  %v4158_v13 = vpop.permute.xlu1 %4157  ;;  %v3403_v40 = vor.u32 %v3964_v32, %v3402_v31  ;;  %v3407_v44 = vor.u32 %v3963_v36, %v3404_v37  ;;  %v3422_v5 = vld [vmem:[#allocation2 + $0xb0] sm:$0xf]  ;;  %v3968_v6 = vld [vmem:[#allocation2 + $0xb8] sm:$0xf0] }
  0x9d   : > { %511 = vst [vmem:[#allocation2 + $0x78] sm:$0xff] %v507_v7  ;;  %v4160_v14 = vunpack.i.h.bf16 %v4158_v13  ;;  %v4159_v15 = vunpack.i.l.bf16 %v4158_v13  ;;  %v4153_v16 = vpop.permute.xlu0 %4152  ;;  %v3414_v17 = vld [vmem:[#allocation2 + $0xa8] sm:$0xf]  ;;  %v3966_v18 = vld [vmem:[#allocation2 + $0xac] sm:$0xf]  ;;  %v3379_v7 = vor.u32 %v3958_v57, %v3378_v56  ;;  %v3383_v13 = vor.u32 %v3957_v60, %v3380_v61  ;;  %v4973_v31 = vpop.permute.xlu2 %4207 }
  0x9e   : > { %512 = vst [vmem:[#allocation2 + $0x80] sm:$0xf] %v508_v8  ;;  %v4155_v19 = vunpack.i.h.bf16 %v4153_v16  ;;  %v4154_v20 = vunpack.i.l.bf16 %v4153_v16  ;;  %v3967_v21 = vld [vmem:[#allocation2 + $0xb0] sm:$0xf0]  ;;  %v3416_v22 = vld [vmem:[#allocation2 + $0xb4] sm:$0xf0] }
  0x9f   : > { %v583_v23 = vsel %vm581_vm3, %v4160_v14, %v4165_v10  ;;  %v582_v24 = vsel %vm581_vm3, %v4159_v15, %v4164_v11  ;;  %v3415_v25 = vor.u32 %v3967_v21, %v3414_v17  ;;  %v3419_v26 = vor.u32 %v3966_v18, %v3416_v22  ;;  %v3943_v8 = vld [vmem:[%s5986_s1 + $0x4] sm:$0xf]  ;;  %v3324_v17 = vld [vmem:[%s5986_s1 + $0x8] sm:$0xf0] }
  0xa0   : > { %v585_v27 = vsel %vm581_vm3, %v4155_v19, %v4160_v14  ;;  %v587_v28 = vsel %vm581_vm3, %v4165_v10, %v4155_v19  ;;  %v584_v29 = vsel %vm581_vm3, %v4154_v20, %v4159_v15  ;;  %v586_v30 = vsel %vm581_vm3, %v4164_v11, %v4154_v20  ;;  %v3965_v36 = vld [vmem:[#allocation2 + $0xa0] sm:$0xf0] }
  0xa1   : > { %v590_v33 = vpack.c.bf16 %v583_v23, %v585_v27  ;;  %v591_v34 = vpack.c.bf16 %v587_v28, %v587_v28  ;;  %v588_v35 = vpack.c.bf16 %v582_v24, %v584_v29  ;;  %801 = vmatpush.bf16.msra.mxu0 %v3415_v25  ;;  %v589_v38 = vpack.c.bf16 %v586_v30, %v586_v30 }
  0xa2   : > { %829 = vmatpush.bf16.msra.mxu2 %v3419_v26  ;;  %v3961_v39 = vld [vmem:[#allocation2 + $0x80] sm:$0xf0]  ;;  %v3392_v43 = vld [vmem:[#allocation2 + $0x84] sm:$0xf0]  ;;  %v4195_v14 = vunpack.i.h.bf16 %v4950_v48  ;;  %v4194_v15 = vunpack.i.l.bf16 %v4950_v48  ;;  %v3423_v21 = vor.u32 %v3968_v6, %v3422_v5  ;;  %v4975_v32 = vor.u32 %v3943_v8, %v3324_v17 }
  0xa3   : > { %594 = vst [vmem:[#allocation2 + $0xcc] sm:$0xff] %v590_v33  ;;  %v3386_v48 = vld [vmem:[#allocation2 + $0x68] sm:$0xf] }
  0xa4   : > { %595 = vst [vmem:[#allocation2 + $0xd4] sm:$0xf] %v591_v34  ;;  %v4173_v45 = vpop.permute.xlu1 %4172  ;;  %v3390_v46 = vld [vmem:[#allocation2 + $0x78] sm:$0xf]  ;;  %v3960_v47 = vld [vmem:[#allocation2 + $0x7c] sm:$0xf] }
  0xa5   : > { %592 = vst [vmem:[#allocation2 + $0xc0] sm:$0xff] %v588_v35  ;;  %802 = vmatpush.bf16.msra.mxu0 %v3403_v40  ;;  %v4175_v49 = vunpack.i.h.bf16 %v4173_v45  ;;  %v4174_v50 = vunpack.i.l.bf16 %v4173_v45  ;;  %v4168_v51 = vpop.permute.xlu0 %4167  ;;  %v3391_v52 = vor.u32 %v3961_v39, %v3390_v46  ;;  %v3395_v55 = vor.u32 %v3960_v47, %v3392_v43  ;;  %v3410_v35 = vld [vmem:[#allocation2 + $0x98] sm:$0xf]  ;;  %v3398_v47 = vld [vmem:[#allocation2 + $0x80] sm:$0xf] }
  0xa6   : > { %593 = vst [vmem:[#allocation2 + $0xc8] sm:$0xf] %v589_v38  ;;  %830 = vmatpush.bf16.msra.mxu2 %v3407_v44  ;;  %v4170_v53 = vunpack.i.h.bf16 %v4168_v51  ;;  %v4169_v54 = vunpack.i.l.bf16 %v4168_v51  ;;  %v3962_v44 = vld [vmem:[#allocation2 + $0x88] sm:$0xf0]  ;;  %v3411_v46 = vor.u32 %v3965_v36, %v3410_v35  ;;  %v4210_v51 = vunpack.i.h.bf16 %v4973_v31 }
  0xa7   : > { %v467_v58 = vsel %vm465_vm4, %v4175_v49, %v4180_v41  ;;  %v466_v59 = vsel %vm465_vm4, %v4174_v50, %v4179_v42 }
  0xa8   : > { %v475_v62 = vpack.c.bf16 %v467_v58, %v467_v58  ;;  %v473_v63 = vpack.c.bf16 %v466_v59, %v466_v59  ;;  %v469_v2 = vsel %vm465_vm4, %v4170_v53, %v4175_v49  ;;  %v471_v0 = vsel %vm465_vm4, %v4180_v41, %v4170_v53  ;;  %v3959_v49 = vld [vmem:[#allocation2 + $0x70] sm:$0xf0]  ;;  %v633_v59 = vld [vmem:[%s5987_s2 + $0x8] sm:$0xff] }
  0xa9   : > { %v474_v3 = vpack.c.bf16 %v469_v2, %v471_v0  ;;  %v468_v4 = vsel %vm465_vm4, %v4169_v54, %v4174_v50  ;;  %v470_v1 = vsel %vm465_vm4, %v4179_v42, %v4169_v54  ;;  %803 = vmatpush.bf16.msra.mxu0 %v3391_v52  ;;  %v632_v50 = vld [vmem:[%s5987_s2] sm:$0xff]  ;;  %v4209_v52 = vunpack.i.l.bf16 %v4973_v31 }
  0xaa   : > { %479 = vst [vmem:[#allocation2 + $0x5c] sm:$0xf] %v475_v62  ;;  %v472_v9 = vpack.c.bf16 %v468_v4, %v470_v1  ;;  %831 = vmatpush.bf16.msra.mxu2 %v3395_v55  ;;  %v3970_v10 = vld [vmem:[#allocation2 + $0xc8] sm:$0xf0]  ;;  %v3428_v11 = vld [vmem:[#allocation2 + $0xcc] sm:$0xf0]  ;;  %v3399_v4 = vor.u32 %v3962_v44, %v3398_v47  ;;  %v3387_v6 = vor.u32 %v3959_v49, %v3386_v48 }
  0xab   : > { %477 = vst [vmem:[#allocation2 + $0x50] sm:$0xf] %v473_v63  ;;  %v3971_v16 = vld [vmem:[#allocation2 + $0xd0] sm:$0xf0]  ;;  %v4753_v55 = vmov 0  }
  0xac   : > { %478 = vst [vmem:[#allocation2 + $0x54] sm:$0xff] %v474_v3  ;;  %v4188_v18 = vpop.permute.xlu1 %4187  ;;  %v3426_v19 = vld [vmem:[#allocation2 + $0xc0] sm:$0xf]  ;;  %v3969_v20 = vld [vmem:[#allocation2 + $0xc4] sm:$0xf]  ;;  %4226 = vset.pattern.permute.xlu0 %v4753_v55  ;;  %4227 = vset.pattern.permute.xlu1 %v4753_v55 }
  0xad   : > { %476 = vst [vmem:[#allocation2 + $0x48] sm:$0xff] %v472_v9  ;;  %v4190_v22 = vunpack.i.h.bf16 %v4188_v18  ;;  %v4189_v23 = vunpack.i.l.bf16 %v4188_v18  ;;  %v4183_v24 = vpop.permute.xlu0 %4182  ;;  %v3427_v25 = vor.u32 %v3970_v10, %v3426_v19  ;;  %v3431_v26 = vor.u32 %v3969_v20, %v3428_v11  ;;  %v3434_v27 = vld [vmem:[#allocation2 + $0xc8] sm:$0xf]  ;;  %804 = vmatpush.bf16.msra.mxu0 %v3379_v7  ;;  %636 = vperm.xlu0 %4226, %v632_v50   ;;  %v4223_v11 = vpop.permute.xlu2 %4222 }
  0xae   : > { %v4185_v28 = vunpack.i.h.bf16 %v4183_v24  ;;  %v4184_v29 = vunpack.i.l.bf16 %v4183_v24  ;;  %v3435_v30 = vor.u32 %v3971_v16, %v3434_v27  ;;  %832 = vmatpush.bf16.msra.mxu2 %v3383_v13  ;;  %641 = vperm.xlu1 %4227, %v633_v59   ;;  %v4225_v19 = vunpack.i.h.bf16 %v4223_v11 }
  0xaf   : > { %v440_v33 = vsel %vm438_vm5, %v4190_v22, %v4195_v14  ;;  %v439_v34 = vsel %vm438_vm5, %v4189_v23, %v4194_v15  ;;  %822 = vmatpush.bf16.msra.mxu1 %v3427_v25  ;;  %850 = vmatpush.bf16.msra.mxu3 %v3431_v26  ;;  %v4224_v20 = vunpack.i.l.bf16 %v4223_v11 }
  0xb0   : > { %v448_v37 = vpack.c.bf16 %v440_v33, %v440_v33  ;;  %v446_v38 = vpack.c.bf16 %v439_v34, %v439_v34  ;;  %v442_v39 = vsel %vm438_vm5, %v4185_v28, %v4190_v22  ;;  %v444_v40 = vsel %vm438_vm5, %v4195_v14, %v4185_v28  ;;  %4588 = vset.pattern.permute.xlu2 %v4753_v55 }
  0xb1   : > { %v447_v41 = vpack.c.bf16 %v442_v39, %v444_v40  ;;  %v441_v42 = vsel %vm438_vm5, %v4184_v29, %v4189_v23  ;;  %v443_v43 = vsel %vm438_vm5, %v4194_v15, %v4184_v29  ;;  %v3956_v18 = vld [vmem:[#allocation2 + $0x58] sm:$0xf0] }
  0xb2   : > { %452 = vst [vmem:[#allocation2 + $0x44] sm:$0xf] %v448_v37  ;;  %v445_v45 = vpack.c.bf16 %v441_v42, %v443_v43  ;;  %3437 = vmatmul.msk.bf16.vlgmr.msra.gmra.mxu3 %vm5998_vm6, %v4975_v32  ;;  %3436 = vmatmul.msk.bf16.vlgmr.msra.gmra.mxu1 %vm5998_vm6, %v4975_v32  ;;  %v3374_v17 = vld [vmem:[#allocation2 + $0x50] sm:$0xf] }
  0xb3   : > { %857 = vmatpush.bf16.msrb.mxu1 %v3423_v21  ;;  %878 = vmatpush.bf16.msrb.mxu3 %v3435_v30  ;;  %450 = vst [vmem:[#allocation2 + $0x38] sm:$0xf] %v446_v38  ;;  %v3955_v53 = vld [vmem:[#allocation2 + $0x50] sm:$0xf0]  ;;  %v3368_v54 = vld [vmem:[#allocation2 + $0x54] sm:$0xf0]  ;;  %v3375_v34 = vor.u32 %v3956_v18, %v3374_v17 }
  0xb4   : > { %451 = vst [vmem:[#allocation2 + $0x3c] sm:$0xff] %v447_v41  ;;  %v4203_v56 = vpop.permute.xlu1 %4202  ;;  %v3366_v57 = vld [vmem:[#allocation2 + $0x48] sm:$0xf]  ;;  %v3954_v58 = vld [vmem:[#allocation2 + $0x4c] sm:$0xf] }
  0xb5   : > { %449 = vst [vmem:[#allocation2 + $0x30] sm:$0xff] %v445_v45  ;;  %v4205_v60 = vunpack.i.h.bf16 %v4203_v56  ;;  %v4204_v61 = vunpack.i.l.bf16 %v4203_v56  ;;  %v4198_v62 = vpop.permute.xlu0 %4197  ;;  %v3367_v63 = vor.u32 %v3955_v53, %v3366_v57  ;;  %v3371_v2 = vor.u32 %v3954_v58, %v3368_v54 }
  0xb6   : > { %v4200_v0 = vunpack.i.h.bf16 %v4198_v62  ;;  %v4199_v3 = vunpack.i.l.bf16 %v4198_v62  ;;  %v3944_v62 = vld [vmem:[%s5986_s1 + $0x4] sm:$0xf0] }
  0xb7   : > { %858 = vmatpush.bf16.msrb.mxu1 %v3411_v46  ;;  %v413_v1 = vsel %vm411_vm7, %v4205_v60, %v4210_v51  ;;  %v412_v5 = vsel %vm411_vm7, %v4204_v61, %v4209_v52  ;;  %805 = vmatpush.bf16.msra.mxu0 %v3367_v63 }
  0xb8   : > { %833 = vmatpush.bf16.msra.mxu2 %v3371_v2  ;;  %v421_v7 = vpack.c.bf16 %v413_v1, %v413_v1  ;;  %v419_v8 = vpack.c.bf16 %v412_v5, %v412_v5  ;;  %v415_v9 = vsel %vm411_vm7, %v4200_v0, %v4205_v60  ;;  %v417_v10 = vsel %vm411_vm7, %v4210_v51, %v4200_v0 }
  0xb9   : > { %v420_v13 = vpack.c.bf16 %v415_v9, %v417_v10  ;;  %v414_v14 = vsel %vm411_vm7, %v4199_v3, %v4204_v61  ;;  %v416_v15 = vsel %vm411_vm7, %v4209_v52, %v4199_v3  ;;  %v3953_v38 = vld [vmem:[#allocation2 + $0x40] sm:$0xf0] }
  0xba   : > { %425 = vst [vmem:[#allocation2 + $0x2c] sm:$0xf] %v421_v7  ;;  %v418_v16 = vpack.c.bf16 %v414_v14, %v416_v15  ;;  %v3362_v37 = vld [vmem:[#allocation2 + $0x38] sm:$0xf]  ;;  %v361_v14 = vld [vmem:[%s5994_s9] sm:$0x7] }
  0xbb   : > { %859 = vmatpush.bf16.msrb.mxu1 %v3399_v4  ;;  %423 = vst [vmem:[#allocation2 + $0x20] sm:$0xf] %v419_v8  ;;  %v3952_v21 = vld [vmem:[#allocation2 + $0x38] sm:$0xf0]  ;;  %v3356_v22 = vld [vmem:[#allocation2 + $0x3c] sm:$0xf0]  ;;  %v3363_v48 = vor.u32 %v3953_v38, %v3362_v37 }
  0xbc   : > { %424 = vst [vmem:[#allocation2 + $0x24] sm:$0xff] %v420_v13  ;;  %v4218_v23 = vpop.permute.xlu1 %4217  ;;  %v3354_v24 = vld [vmem:[#allocation2 + $0x30] sm:$0xf]  ;;  %v3951_v25 = vld [vmem:[#allocation2 + $0x34] sm:$0xf]  ;;  %v5043_v38 = vperm.slane %v361_v14, 1 }
  0xbd   : > { %422 = vst [vmem:[#allocation2 + $0x18] sm:$0xff] %v418_v16  ;;  %v4220_v26 = vunpack.i.h.bf16 %v4218_v23  ;;  %v4219_v27 = vunpack.i.l.bf16 %v4218_v23  ;;  %v4213_v28 = vpop.permute.xlu0 %4212  ;;  %v3355_v29 = vor.u32 %v3952_v21, %v3354_v24  ;;  %v3359_v30 = vor.u32 %v3951_v25, %v3356_v22 }
  0xbe   : > { %v4215_v31 = vunpack.i.h.bf16 %v4213_v28  ;;  %v4214_v33 = vunpack.i.l.bf16 %v4213_v28  ;;  %v5038_v16 = vperm.slane %v361_v14, 2 }
  0xbf   : > { %860 = vmatpush.bf16.msrb.mxu1 %v3387_v6  ;;  %v386_v35 = vsel %vm384_vm8, %v4220_v26, %v4225_v19  ;;  %v385_v36 = vsel %vm384_vm8, %v4219_v27, %v4224_v20  ;;  %806 = vmatpush.bf16.msra.mxu0 %v3355_v29 }
  0xc0   : > { %834 = vmatpush.bf16.msra.mxu2 %v3359_v30  ;;  %v394_v39 = vpack.c.bf16 %v386_v35, %v386_v35  ;;  %v392_v40 = vpack.c.bf16 %v385_v36, %v385_v36  ;;  %v388_v41 = vsel %vm384_vm8, %v4215_v31, %v4220_v26  ;;  %v390_v42 = vsel %vm384_vm8, %v4225_v19, %v4215_v31 }
  0xc1   : > { %v393_v43 = vpack.c.bf16 %v388_v41, %v390_v42  ;;  %v387_v44 = vsel %vm384_vm8, %v4214_v33, %v4219_v27  ;;  %v389_v45 = vsel %vm384_vm8, %v4224_v20, %v4214_v33  ;;  %v3950_v46 = vld [vmem:[#allocation2 + $0x28] sm:$0xf0]  ;;  %v5041_v33 = vperm.slane %v361_v14, 0 }
  0xc2   : > { %398 = vst [vmem:[#allocation2 + $0x14] sm:$0xf] %v394_v39  ;;  %v391_v47 = vpack.c.bf16 %v387_v44, %v389_v45  ;;  %v3350_v49 = vld [vmem:[#allocation2 + $0x20] sm:$0xf]  ;;  %3438 = vmatmul.msk.bf16.vlgmr.msrb.gmra.mxu3 %vm5998_vm6, %v4975_v32 }
  0xc3   : > { %861 = vmatpush.bf16.msrb.mxu1 %v3375_v34  ;;  %396 = vst [vmem:[#allocation2 + $0x8] sm:$0xf] %v392_v40  ;;  %v3949_v50 = vld [vmem:[#allocation2 + $0x20] sm:$0xf0]  ;;  %v3344_v51 = vld [vmem:[#allocation2 + $0x24] sm:$0xf0]  ;;  %v3351_v54 = vor.u32 %v3950_v46, %v3350_v49 }
  0xc4   : > { %397 = vst [vmem:[#allocation2 + $0xc] sm:$0xff] %v393_v43  ;;  %v3342_v52 = vld [vmem:[#allocation2 + $0x18] sm:$0xf]  ;;  %v3948_v53 = vld [vmem:[#allocation2 + $0x1c] sm:$0xf] }
  0xc5   : > { %395 = vst [vmem:[#allocation2] sm:$0xff] %v391_v47  ;;  %v3343_v55 = vor.u32 %v3949_v50, %v3342_v52  ;;  %v3347_v56 = vor.u32 %v3948_v53, %v3344_v51  ;;  %v3322_v32 = vld [vmem:[%s5986_s1] sm:$0xf] }
  0xc6   : > { %v3323_v4 = vor.u32 %v3944_v62, %v3322_v32 }
  0xc7   : > { %862 = vmatpush.bf16.msrb.mxu1 %v3363_v48  ;;  %807 = vmatpush.bf16.msra.mxu0 %v3343_v55  ;;  %v3442_v55 = vld [vmem:[%s5987_s2 + $0x18] sm:$0xff] }
  0xc8   : > { %835 = vmatpush.bf16.msra.mxu2 %v3347_v56  ;;  %v3441_v56 = vld [vmem:[%s5987_s2 + $0x10] sm:$0xff] }
  0xc9   : > { %v3947_v57 = vld [vmem:[#allocation2 + $0x10] sm:$0xf0] }
  0xca   : > { %v3338_v58 = vld [vmem:[#allocation2 + $0x8] sm:$0xf] }
  0xcb   : > { %863 = vmatpush.bf16.msrb.mxu1 %v3351_v54  ;;  %v3946_v59 = vld [vmem:[#allocation2 + $0x8] sm:$0xf0]  ;;  %v3332_v60 = vld [vmem:[#allocation2 + $0xc] sm:$0xf0]  ;;  %v3339_v61 = vor.u32 %v3947_v57, %v3338_v58 }
  0xcc   : > { %v3330_v63 = vld [vmem:[#allocation2] sm:$0xf]  ;;  %v3945_v2 = vld [vmem:[#allocation2 + $0x4] sm:$0xf] }
  0xcd   : > { %v3331_v0 = vor.u32 %v3946_v59, %v3330_v63  ;;  %v3335_v3 = vor.u32 %v3945_v2, %v3332_v60 }
  0xcf   : > { %864 = vmatpush.bf16.msrb.mxu1 %v3339_v61  ;;  %808 = vmatpush.bf16.msra.mxu0 %v3331_v0 }
  0xd0   : > { %836 = vmatpush.bf16.msra.mxu2 %v3335_v3 }
  0xd2   : > { %865 = vmatmul.bf16.vlgmr.msrb.gmra.mxu1 %v3323_v4  ;;  %809 = vmatmul.bf16.vlgmr.msra.gmra.mxu0 %v3323_v4 }
  0xd3   : > { %837 = vmatmul.bf16.vlgmr.msra.gmra.mxu2 %v3323_v4 }
 0x11f   : > { %v637_v9 = vpop.permute.xlu0 %636 }
 0x120   : > { %v642_v19 = vpop.permute.xlu1 %641 }
 0x12f   : > { %v824_v5 = vpop.f32.mrf.mxu1 }
 0x135   : > { %v852_v1 = vpop.f32.mrf.mxu3 }
 0x137   : > { %v826_v7 = vpop.f32.mrf.mxu1 }
 0x13d   : > { %v854_v6 = vpop.f32.mrf.mxu3 }
 0x145   : > { %v880_v8 = vpop.f32.mrf.mxu3 }
 0x14d   : > { %v882_v21 = vpop.f32.mrf.mxu3 }
 0x14f   : > { %v866_v10 = vpop.f32.mrf.mxu1  ;;  %v810_v13 = vpop.f32.mrf.mxu0 }
 0x150   : > { %v867_v11 = vadd.f32 %v866_v10, %v637_v9  ;;  %v811_v17 = vadd.f32 %v810_v13, %v637_v9 }
 0x152   : > { %v881_v15 = vadd.f32 %v880_v8, %v867_v11  ;;  %v825_v24 = vadd.f32 %v824_v5, %v811_v17 }
 0x154   : > { %v887_v18 = vmax.f32 %v881_v15, 0.0  ;;  %v885_v34 = vmax.f32 %v825_v24, 0.0 }
 0x156   : > { %v900_v20 = vmul.f32 %v5038_v16, %v887_v18  ;;  %v838_v22 = vpop.f32.mrf.mxu2  ;;  %v898_v42 = vmul.f32 %v5041_v33, %v885_v34 }
 0x157   : > { %v868_v23 = vpop.f32.mrf.mxu1  ;;  %v839_v25 = vadd.f32 %v838_v22, %v637_v9  ;;  %v812_v28 = vpop.f32.mrf.mxu0 }
 0x158   : > { %v1012_v26 = vpack.c.bf16 %v900_v20, %v900_v20  ;;  %v869_v27 = vadd.f32 %v868_v23, %v642_v19  ;;  %v813_v30 = vadd.f32 %v812_v28, %v642_v19 }
 0x159   : > { %v853_v29 = vadd.f32 %v852_v1, %v839_v25 }
 0x15a   : > { %1016 = vst [vmem:[#allocation2 + $0x68] sm:$0xf] %v1012_v26  ;;  %v883_v31 = vadd.f32 %v882_v21, %v869_v27  ;;  %v827_v35 = vadd.f32 %v826_v7, %v813_v30 }
 0x15b   : > { %v886_v37 = vmax.f32 %v853_v29, 0.0 }
 0x15c   : > { %v890_v36 = vmax.f32 %v883_v31, 0.0  ;;  %v888_v39 = vmax.f32 %v827_v35, 0.0 }
 0x15d   : > { %v899_v46 = vmul.f32 %v5043_v38, %v886_v37 }
 0x15e   : > { %v903_v40 = vmul.f32 %v5038_v16, %v890_v36  ;;  %v840_v41 = vpop.f32.mrf.mxu2  ;;  %v901_v43 = vmul.f32 %v5041_v33, %v888_v39 }
 0x15f   : > { %v841_v44 = vadd.f32 %v840_v41, %v642_v19  ;;  %v1011_v51 = vpack.c.bf16 %v899_v46, %v898_v42 }
 0x160   : > { %v1014_v45 = vpack.c.bf16 %v903_v40, %v903_v40  ;;  %v4238_v48 = vpack.i.bf16 %v901_v43, %v898_v42  ;;  %v4343_v50 = vpack.i.bf16 %v903_v40, %v900_v20 }
 0x161   : > { %v855_v47 = vadd.f32 %v854_v6, %v841_v44  ;;  %1015 = vst [vmem:[#allocation2 + $0x60] sm:$0xff] %v1011_v51 }
 0x162   : > { %1018 = vst [vmem:[#allocation2 + $0x74] sm:$0xf] %v1014_v45  ;;  %4239 = vrot.lane.b32.xlu0 %v4238_v48, %s4746_s20  ;;  %4229 = vrot.lane.b32.xlu2 %v4238_v48, %s4745_s19 }
 0x163   : > { %v889_v49 = vmax.f32 %v855_v47, 0.0 }
 0x165   : > { %v902_v52 = vmul.f32 %v5043_v38, %v889_v49 }
 0x167   : > { %v4303_v53 = vpack.i.bf16 %v902_v52, %v899_v46  ;;  %v1013_v54 = vpack.c.bf16 %v902_v52, %v901_v43 }
 0x169   : > { %4304 = vrot.lane.b32.xlu1 %v4303_v53, %s4745_s19  ;;  %1017 = vst [vmem:[#allocation2 + $0x6c] sm:$0xff] %v1013_v54 }
 0x16a   : > { %4249 = vrot.lane.b32.xlu0 %v4238_v48, %s4747_s21  ;;  %4234 = vrot.lane.b32.xlu2 %v4343_v50, %s4745_s19 }
 0x171   : > { %4309 = vrot.lane.b32.xlu1 %v4303_v53, %s4746_s20 }
 0x172   : > { %4259 = vrot.lane.b32.xlu0 %v4238_v48, %s4749_s23  ;;  %4244 = vrot.lane.b32.xlu2 %v4343_v50, %s4746_s20 }
 0x179   : > { %4314 = vrot.lane.b32.xlu1 %v4303_v53, %s4747_s21 }
 0x17a   : > { %4269 = vrot.lane.b32.xlu0 %v4238_v48, %s4750_s24  ;;  %4254 = vrot.lane.b32.xlu2 %v4343_v50, %s4747_s21 }
 0x181   : > { %4319 = vrot.lane.b32.xlu1 %v4303_v53, %s4749_s23 }
 0x182   : > { %4279 = vrot.lane.b32.xlu0 %v4238_v48, %s4748_s22  ;;  %4264 = vrot.lane.b32.xlu2 %v4343_v50, %s4749_s23 }
 0x189   : > { %4324 = vrot.lane.b32.xlu1 %v4303_v53, %s4750_s24 }
 0x18a   : > { %4289 = vrot.lane.b32.xlu0 %v4238_v48, %s4751_s25  ;;  %4274 = vrot.lane.b32.xlu2 %v4343_v50, %s4750_s24 }
 0x191   : > { %4329 = vrot.lane.b32.xlu1 %v4303_v53, %s4748_s22 }
 0x192   : > { %4299 = vrot.lane.b32.xlu0 %v4238_v48, %s4752_s26  ;;  %4284 = vrot.lane.b32.xlu2 %v4343_v50, %s4748_s22 }
 0x199   : > { %4334 = vrot.lane.b32.xlu1 %v4303_v53, %s4751_s25 }
 0x19a   : > { %1169 = vperm.xlu0 %4226, %v3442_v55   ;;  %4294 = vrot.lane.b32.xlu2 %v4343_v50, %s4751_s25 }
 0x1a1   : > { %4339 = vrot.lane.b32.xlu1 %v4303_v53, %s4752_s26 }
 0x1a2   : > { %4344 = vrot.lane.b32.xlu2 %v4343_v50, %s4752_s26 }
 0x1a9   : > { %1164 = vperm.xlu1 %4227, %v3441_v56  }
 0x1bc   : > { %v4230_v57 = vpop.permute.xlu2 %4229 }
 0x1bd   : > { %v4232_v32 = vunpack.i.h.bf16 %v4230_v57  ;;  %v4231_v59 = vunpack.i.l.bf16 %v4230_v57 }
 0x1c4   : > { %v4235_v58 = vpop.permute.xlu2 %4234 }
 0x1c5   : > { %v4237_v60 = vunpack.i.h.bf16 %v4235_v58  ;;  %v4236_v61 = vunpack.i.l.bf16 %v4235_v58 }
 0x1c7   : > { %v1087_v62 = vsel %vm554_vm0, %v4236_v61, %v4231_v59  ;;  %v1088_v63 = vsel %vm554_vm0, %v4237_v60, %v4232_v32 }
 0x1c8   : > { %v1090_v2 = vpack.c.bf16 %v1087_v62, %v1087_v62  ;;  %v1092_v0 = vpack.c.bf16 %v1088_v63, %v1088_v63 }
 0x1ca   : > { %1094 = vst [vmem:[#allocation2 + $0xb0] sm:$0xf] %v1090_v2 }
 0x1cb   : > { %1096 = vst [vmem:[#allocation2 + $0xbc] sm:$0xf] %v1092_v0 }
 0x1cc   : > { %v4245_v3 = vpop.permute.xlu2 %4244 }
 0x1cd   : > { %v4247_v1 = vunpack.i.h.bf16 %v4245_v3  ;;  %v4246_v5 = vunpack.i.l.bf16 %v4245_v3 }
 0x1d4   : > { %v4240_v4 = vpop.permute.xlu0 %4239  ;;  %v4255_v8 = vpop.permute.xlu2 %4254 }
 0x1d5   : > { %v4242_v6 = vunpack.i.h.bf16 %v4240_v4  ;;  %v4241_v7 = vunpack.i.l.bf16 %v4240_v4  ;;  %v4257_v18 = vunpack.i.h.bf16 %v4255_v8  ;;  %v4256_v19 = vunpack.i.l.bf16 %v4255_v8 }
 0x1d7   : > { %v1061_v9 = vsel %vm527_vm1, %v4246_v5, %v4241_v7  ;;  %v1062_v10 = vsel %vm527_vm1, %v4247_v1, %v4242_v6 }
 0x1d8   : > { %v1064_v11 = vpack.c.bf16 %v1061_v9, %v1061_v9  ;;  %v1066_v13 = vpack.c.bf16 %v1062_v10, %v1062_v10 }
 0x1da   : > { %1068 = vst [vmem:[#allocation2 + $0x98] sm:$0xf] %v1064_v11 }
 0x1db   : > { %v4305_v14 = vpop.permute.xlu1 %4304  ;;  %1070 = vst [vmem:[#allocation2 + $0xa4] sm:$0xf] %v1066_v13 }
 0x1dc   : > { %v4307_v15 = vunpack.i.h.bf16 %v4305_v14  ;;  %v4306_v17 = vunpack.i.l.bf16 %v4305_v14  ;;  %v4250_v20 = vpop.permute.xlu0 %4249  ;;  %v5096_v29 = vpop.permute.xlu2 %4264 }
 0x1dd   : > { %v4252_v27 = vunpack.i.h.bf16 %v4250_v20  ;;  %v4251_v28 = vunpack.i.l.bf16 %v4250_v20  ;;  %v4266_v8 = vunpack.i.l.bf16 %v5096_v29 }
 0x1de   : > { %v1084_v21 = vsel %vm554_vm0, %v4307_v15, %v4237_v60  ;;  %v1086_v22 = vsel %vm554_vm0, %v4232_v32, %v4307_v15  ;;  %v1083_v23 = vsel %vm554_vm0, %v4306_v17, %v4236_v61  ;;  %v1085_v24 = vsel %vm554_vm0, %v4231_v59, %v4306_v17 }
 0x1df   : > { %v1091_v25 = vpack.c.bf16 %v1084_v21, %v1086_v22  ;;  %v1089_v26 = vpack.c.bf16 %v1083_v23, %v1085_v24  ;;  %v1035_v30 = vsel %vm500_vm2, %v4256_v19, %v4251_v28  ;;  %v1036_v31 = vsel %vm500_vm2, %v4257_v18, %v4252_v27 }
 0x1e0   : > { %v1038_v34 = vpack.c.bf16 %v1035_v30, %v1035_v30  ;;  %v1040_v35 = vpack.c.bf16 %v1036_v31, %v1036_v31 }
 0x1e1   : > { %1095 = vst [vmem:[#allocation2 + $0xb4] sm:$0xff] %v1091_v25 }
 0x1e2   : > { %1093 = vst [vmem:[#allocation2 + $0xa8] sm:$0xff] %v1089_v26 }
 0x1e3   : > { %v4310_v36 = vpop.permute.xlu1 %4309  ;;  %1042 = vst [vmem:[#allocation2 + $0x80] sm:$0xf] %v1038_v34 }
 0x1e4   : > { %v4312_v37 = vunpack.i.h.bf16 %v4310_v36  ;;  %v4311_v39 = vunpack.i.l.bf16 %v4310_v36  ;;  %1044 = vst [vmem:[#allocation2 + $0x8c] sm:$0xf] %v1040_v35  ;;  %v4260_v40 = vpop.permute.xlu0 %4259  ;;  %v5110_v51 = vpop.permute.xlu2 %4274 }
 0x1e5   : > { %v4262_v0 = vunpack.i.h.bf16 %v4260_v40  ;;  %v4261_v3 = vunpack.i.l.bf16 %v4260_v40 }
 0x1e6   : > { %v1058_v41 = vsel %vm527_vm1, %v4312_v37, %v4247_v1  ;;  %v1060_v42 = vsel %vm527_vm1, %v4242_v6, %v4312_v37  ;;  %v1057_v43 = vsel %vm527_vm1, %v4311_v39, %v4246_v5  ;;  %v1059_v44 = vsel %vm527_vm1, %v4241_v7, %v4311_v39 }
 0x1e7   : > { %v1065_v45 = vpack.c.bf16 %v1058_v41, %v1060_v42  ;;  %v1063_v46 = vpack.c.bf16 %v1057_v43, %v1059_v44  ;;  %v4267_v7 = vunpack.i.h.bf16 %v5096_v29  ;;  %v1001_v14 = vsel %vm465_vm4, %v4266_v8, %v4261_v3  ;;  %v3987_v43 = vld [vmem:[#allocation2 + $0x68] sm:$0xf0]  ;;  %v3503_v44 = vld [vmem:[#allocation2 + $0x6c] sm:$0xf0] }
 0x1e8   : > { %v3996_v47 = vld [vmem:[#allocation2 + $0xb0] sm:$0xf0]  ;;  %v3539_v48 = vld [vmem:[#allocation2 + $0xb4] sm:$0xf0] }
 0x1e9   : > { %1069 = vst [vmem:[#allocation2 + $0x9c] sm:$0xff] %v1065_v45  ;;  %v3537_v49 = vld [vmem:[#allocation2 + $0xa8] sm:$0xf]  ;;  %v3995_v50 = vld [vmem:[#allocation2 + $0xac] sm:$0xf]  ;;  %v1002_v15 = vsel %vm465_vm4, %v4267_v7, %v4262_v0  ;;  %v4277_v45 = vunpack.i.h.bf16 %v5110_v51 }
 0x1ea   : > { %1067 = vst [vmem:[#allocation2 + $0x90] sm:$0xff] %v1063_v46  ;;  %v3538_v52 = vor.u32 %v3996_v47, %v3537_v49  ;;  %v3542_v53 = vor.u32 %v3995_v50, %v3539_v48  ;;  %v4276_v46 = vunpack.i.l.bf16 %v5110_v51 }
 0x1eb   : > { %v4315_v54 = vpop.permute.xlu1 %4314 }
 0x1ec   : > { %v4317_v55 = vunpack.i.h.bf16 %v4315_v54  ;;  %v4316_v56 = vunpack.i.l.bf16 %v4315_v54  ;;  %1328 = vmatpush.bf16.msra.mxu3 %v3538_v52  ;;  %1356 = vmatpush.bf16.msrb.mxu2 %v3542_v53  ;;  %v5112_v57 = vpop.permute.xlu0 %4269  ;;  %v5124_v10 = vpop.permute.xlu2 %4284  ;;  %v3501_v53 = vld [vmem:[#allocation2 + $0x60] sm:$0xf]  ;;  %v3986_v54 = vld [vmem:[#allocation2 + $0x64] sm:$0xf] }
 0x1ed   : > { %v4287_v22 = vunpack.i.h.bf16 %v5124_v10  ;;  %v4286_v26 = vunpack.i.l.bf16 %v5124_v10  ;;  %v4272_v34 = vunpack.i.h.bf16 %v5112_v57  ;;  %v4271_v35 = vunpack.i.l.bf16 %v5112_v57 }
 0x1ee   : > { %v1032_v58 = vsel %vm500_vm2, %v4317_v55, %v4257_v18  ;;  %v1034_v32 = vsel %vm500_vm2, %v4252_v27, %v4317_v55  ;;  %v1031_v59 = vsel %vm500_vm2, %v4316_v56, %v4256_v19  ;;  %v1033_v60 = vsel %vm500_vm2, %v4251_v28, %v4316_v56 }
 0x1ef   : > { %v1039_v61 = vpack.c.bf16 %v1032_v58, %v1034_v32  ;;  %v1037_v62 = vpack.c.bf16 %v1031_v59, %v1033_v60  ;;  %v975_v55 = vsel %vm438_vm5, %v4276_v46, %v4271_v35  ;;  %v976_v56 = vsel %vm438_vm5, %v4277_v45, %v4272_v34 }
 0x1f0   : > { %v3993_v63 = vld [vmem:[#allocation2 + $0x98] sm:$0xf0]  ;;  %v3527_v2 = vld [vmem:[#allocation2 + $0x9c] sm:$0xf0]  ;;  %v3502_v57 = vor.u32 %v3987_v43, %v3501_v53  ;;  %v3506_v51 = vor.u32 %v3986_v54, %v3503_v44  ;;  %v3545_v43 = vld [vmem:[#allocation2 + $0xb0] sm:$0xf] }
 0x1f1   : > { %1043 = vst [vmem:[#allocation2 + $0x84] sm:$0xff] %v1039_v61  ;;  %v3525_v4 = vld [vmem:[#allocation2 + $0x90] sm:$0xf]  ;;  %v3992_v1 = vld [vmem:[#allocation2 + $0x94] sm:$0xf] }
 0x1f2   : > { %1041 = vst [vmem:[#allocation2 + $0x78] sm:$0xff] %v1037_v62  ;;  %v3526_v5 = vor.u32 %v3993_v63, %v3525_v4  ;;  %v3530_v6 = vor.u32 %v3992_v1, %v3527_v2  ;;  %v3997_v44 = vld [vmem:[#allocation2 + $0xb8] sm:$0xf0] }
 0x1f3   : > { %v4320_v9 = vpop.permute.xlu1 %4319 }
 0x1f4   : > { %v4322_v11 = vunpack.i.h.bf16 %v4320_v9  ;;  %v4321_v13 = vunpack.i.l.bf16 %v4320_v9  ;;  %1329 = vmatpush.bf16.msra.mxu3 %v3526_v5  ;;  %1357 = vmatpush.bf16.msrb.mxu2 %v3530_v6  ;;  %v5130_v17 = vpop.permute.xlu0 %4279 }
 0x1f5   : > { %v4282_v28 = vunpack.i.h.bf16 %v5130_v17  ;;  %v4281_v29 = vunpack.i.l.bf16 %v5130_v17 }
 0x1f6   : > { %v998_v18 = vsel %vm465_vm4, %v4322_v11, %v4267_v7  ;;  %v1000_v19 = vsel %vm465_vm4, %v4262_v0, %v4322_v11  ;;  %v997_v20 = vsel %vm465_vm4, %v4321_v13, %v4266_v8  ;;  %v999_v21 = vsel %vm465_vm4, %v4261_v3, %v4321_v13  ;;  %v4295_v13 = vpop.permute.xlu2 %4294 }
 0x1f7   : > { %v1005_v23 = vpack.c.bf16 %v1000_v19, %v1002_v15  ;;  %v1006_v24 = vpack.c.bf16 %v998_v18, %v998_v18  ;;  %v1003_v25 = vpack.c.bf16 %v999_v21, %v1001_v14  ;;  %v1004_v27 = vpack.c.bf16 %v997_v20, %v997_v20 }
 0x1f8   : > { %v3990_v30 = vld [vmem:[#allocation2 + $0x80] sm:$0xf0]  ;;  %v3515_v31 = vld [vmem:[#allocation2 + $0x84] sm:$0xf0]  ;;  %v1113_v39 = vsel %vm581_vm3, %v4286_v26, %v4281_v29  ;;  %v1114_v40 = vsel %vm581_vm3, %v4287_v22, %v4282_v28  ;;  %v4296_v10 = vunpack.i.l.bf16 %v4295_v13 }
 0x1f9   : > { %1009 = vst [vmem:[#allocation2 + $0x54] sm:$0xff] %v1005_v23  ;;  %v3513_v36 = vld [vmem:[#allocation2 + $0x78] sm:$0xf]  ;;  %v3989_v37 = vld [vmem:[#allocation2 + $0x7c] sm:$0xf]  ;;  %v1116_v47 = vpack.c.bf16 %v1113_v39, %v1113_v39  ;;  %v1118_v48 = vpack.c.bf16 %v1114_v40, %v1114_v40 }
 0x1fa   : > { %1010 = vst [vmem:[#allocation2 + $0x5c] sm:$0xf] %v1006_v24  ;;  %v3514_v41 = vor.u32 %v3990_v30, %v3513_v36  ;;  %v3518_v42 = vor.u32 %v3989_v37, %v3515_v31  ;;  %v4297_v30 = vunpack.i.h.bf16 %v4295_v13 }
 0x1fb   : > { %1007 = vst [vmem:[#allocation2 + $0x48] sm:$0xff] %v1003_v25  ;;  %v4325_v49 = vpop.permute.xlu1 %4324 }
 0x1fc   : > { %1008 = vst [vmem:[#allocation2 + $0x50] sm:$0xf] %v1004_v27  ;;  %v4327_v50 = vunpack.i.h.bf16 %v4325_v49  ;;  %v4326_v52 = vunpack.i.l.bf16 %v4325_v49  ;;  %1330 = vmatpush.bf16.msra.mxu3 %v3514_v41  ;;  %1358 = vmatpush.bf16.msrb.mxu2 %v3518_v42  ;;  %v4290_v8 = vpop.permute.xlu0 %4289  ;;  %v3972_v49 = vld [vmem:[%s5986_s1 + $0x14] sm:$0xf] }
 0x1fd   : > { %1120 = vst [vmem:[#allocation2 + $0xc8] sm:$0xf] %v1116_v47  ;;  %v4291_v25 = vunpack.i.l.bf16 %v4290_v8 }
 0x1fe   : > { %1122 = vst [vmem:[#allocation2 + $0xd4] sm:$0xf] %v1118_v48  ;;  %v972_v58 = vsel %vm438_vm5, %v4327_v50, %v4277_v45  ;;  %v974_v32 = vsel %vm438_vm5, %v4272_v34, %v4327_v50  ;;  %v971_v59 = vsel %vm438_vm5, %v4326_v52, %v4276_v46  ;;  %v973_v60 = vsel %vm438_vm5, %v4271_v35, %v4326_v52  ;;  %v3447_v50 = vld [vmem:[%s5986_s1 + $0x18] sm:$0xf0]  ;;  %v4345_v52 = vpop.permute.xlu2 %4344 }
 0x1ff   : > { %v979_v61 = vpack.c.bf16 %v974_v32, %v976_v56  ;;  %v980_v62 = vpack.c.bf16 %v972_v58, %v972_v58  ;;  %v977_v63 = vpack.c.bf16 %v973_v60, %v975_v55  ;;  %v978_v2 = vpack.c.bf16 %v971_v59, %v971_v59 }
 0x200   : > { %1331 = vmatpush.bf16.msra.mxu3 %v3502_v57  ;;  %1359 = vmatpush.bf16.msrb.mxu2 %v3506_v51  ;;  %v3984_v0 = vld [vmem:[#allocation2 + $0x50] sm:$0xf0]  ;;  %v3491_v3 = vld [vmem:[#allocation2 + $0x54] sm:$0xf0] }
 0x201   : > { %983 = vst [vmem:[#allocation2 + $0x3c] sm:$0xff] %v979_v61  ;;  %v3546_v61 = vor.u32 %v3997_v44, %v3545_v43 }
 0x202   : > { %984 = vst [vmem:[#allocation2 + $0x44] sm:$0xf] %v980_v62  ;;  %v3489_v4 = vld [vmem:[#allocation2 + $0x48] sm:$0xf]  ;;  %v3983_v1 = vld [vmem:[#allocation2 + $0x4c] sm:$0xf]  ;;  %v4347_v62 = vunpack.i.h.bf16 %v4345_v52 }
 0x203   : > { %981 = vst [vmem:[#allocation2 + $0x30] sm:$0xff] %v977_v63  ;;  %v4330_v5 = vpop.permute.xlu1 %4329  ;;  %v3490_v6 = vor.u32 %v3984_v0, %v3489_v4  ;;  %v3494_v7 = vor.u32 %v3983_v1, %v3491_v3  ;;  %v4346_v63 = vunpack.i.l.bf16 %v4345_v52  ;;  %v5206_v3 = vor.u32 %v3972_v49, %v3447_v50 }
 0x204   : > { %982 = vst [vmem:[#allocation2 + $0x38] sm:$0xf] %v978_v2  ;;  %v4332_v9 = vunpack.i.h.bf16 %v4330_v5  ;;  %v4331_v11 = vunpack.i.l.bf16 %v4330_v5  ;;  %v4300_v37 = vpop.permute.xlu0 %4299  ;;  %v3557_v48 = vld [vmem:[#allocation2 + $0xc8] sm:$0xf]  ;;  %v3533_v5 = vld [vmem:[#allocation2 + $0x98] sm:$0xf] }
 0x205   : > { %1332 = vmatpush.bf16.msra.mxu3 %v3490_v6  ;;  %1360 = vmatpush.bf16.msrb.mxu2 %v3494_v7  ;;  %v4000_v56 = vld [vmem:[#allocation2 + $0xd0] sm:$0xf0]  ;;  %v4302_v57 = vunpack.i.h.bf16 %v4300_v37  ;;  %v4301_v51 = vunpack.i.l.bf16 %v4300_v37  ;;  %v3994_v6 = vld [vmem:[#allocation2 + $0xa0] sm:$0xf0]  ;;  %v3497_v37 = vld [vmem:[#allocation2 + $0x50] sm:$0xf] }
 0x206   : > { %v1110_v14 = vsel %vm581_vm3, %v4332_v9, %v4287_v22  ;;  %v1112_v15 = vsel %vm581_vm3, %v4282_v28, %v4332_v9  ;;  %v1109_v18 = vsel %vm581_vm3, %v4331_v11, %v4286_v26  ;;  %v1111_v19 = vsel %vm581_vm3, %v4281_v29, %v4331_v11 }
 0x207   : > { %v1117_v20 = vpack.c.bf16 %v1110_v14, %v1112_v15  ;;  %v1115_v21 = vpack.c.bf16 %v1109_v18, %v1111_v19  ;;  %v4292_v22 = vunpack.i.h.bf16 %v4290_v8  ;;  %v949_v29 = vsel %vm411_vm7, %v4296_v10, %v4291_v25 }
 0x208   : > { %v3981_v23 = vld [vmem:[#allocation2 + $0x38] sm:$0xf0]  ;;  %v3479_v24 = vld [vmem:[#allocation2 + $0x3c] sm:$0xf0]  ;;  %v3558_v0 = vor.u32 %v4000_v56, %v3557_v48  ;;  %v923_v7 = vsel %vm384_vm8, %v4346_v63, %v4301_v51  ;;  %v924_v8 = vsel %vm384_vm8, %v4347_v62, %v4302_v57 }
 0x209   : > { %1121 = vst [vmem:[#allocation2 + $0xcc] sm:$0xff] %v1117_v20  ;;  %v950_v36 = vsel %vm411_vm7, %v4297_v30, %v4292_v22  ;;  %v3534_v20 = vor.u32 %v3994_v6, %v3533_v5  ;;  %v3982_v48 = vld [vmem:[#allocation2 + $0x40] sm:$0xf0] }
 0x20a   : > { %1119 = vst [vmem:[#allocation2 + $0xc0] sm:$0xff] %v1115_v21  ;;  %v3477_v27 = vld [vmem:[#allocation2 + $0x30] sm:$0xf]  ;;  %v3980_v28 = vld [vmem:[#allocation2 + $0x34] sm:$0xf] }
 0x20b   : > { %v4335_v31 = vpop.permute.xlu1 %4334  ;;  %v3478_v34 = vor.u32 %v3981_v23, %v3477_v27  ;;  %v3482_v26 = vor.u32 %v3980_v28, %v3479_v24 }
 0x20c   : > { %v4337_v35 = vunpack.i.h.bf16 %v4335_v31  ;;  %v4336_v17 = vunpack.i.l.bf16 %v4335_v31 }
 0x20d   : > { %1333 = vmatpush.bf16.msra.mxu3 %v3478_v34  ;;  %1361 = vmatpush.bf16.msrb.mxu2 %v3482_v26  ;;  %v3509_v34 = vld [vmem:[#allocation2 + $0x68] sm:$0xf]  ;;  %v3988_v26 = vld [vmem:[#allocation2 + $0x70] sm:$0xf0] }
 0x20e   : > { %v946_v39 = vsel %vm411_vm7, %v4337_v35, %v4297_v30  ;;  %v948_v40 = vsel %vm411_vm7, %v4292_v22, %v4337_v35  ;;  %v945_v41 = vsel %vm411_vm7, %v4336_v17, %v4296_v10  ;;  %v947_v42 = vsel %vm411_vm7, %v4291_v25, %v4336_v17  ;;  %v3521_v22 = vld [vmem:[#allocation2 + $0x80] sm:$0xf]  ;;  %v3991_v25 = vld [vmem:[#allocation2 + $0x88] sm:$0xf0] }
 0x20f   : > { %v953_v45 = vpack.c.bf16 %v948_v40, %v950_v36  ;;  %v954_v46 = vpack.c.bf16 %v946_v39, %v946_v39  ;;  %v951_v47 = vpack.c.bf16 %v947_v42, %v949_v29  ;;  %v952_v53 = vpack.c.bf16 %v945_v41, %v945_v41  ;;  %v3985_v36 = vld [vmem:[#allocation2 + $0x58] sm:$0xf0]  ;;  %v3445_v39 = vld [vmem:[%s5986_s1 + $0x10] sm:$0xf]  ;;  %v3973_v40 = vld [vmem:[%s5986_s1 + $0x14] sm:$0xf0] }
 0x210   : > { %v3999_v54 = vld [vmem:[#allocation2 + $0xc8] sm:$0xf0]  ;;  %v3551_v55 = vld [vmem:[#allocation2 + $0xcc] sm:$0xf0]  ;;  %v3522_v31 = vor.u32 %v3991_v25, %v3521_v22  ;;  %v3510_v35 = vor.u32 %v3988_v26, %v3509_v34 }
 0x211   : > { %957 = vst [vmem:[#allocation2 + $0x24] sm:$0xff] %v953_v45  ;;  %v3549_v58 = vld [vmem:[#allocation2 + $0xc0] sm:$0xf]  ;;  %v3998_v32 = vld [vmem:[#allocation2 + $0xc4] sm:$0xf]  ;;  %v3498_v45 = vor.u32 %v3985_v36, %v3497_v37 }
 0x212   : > { %958 = vst [vmem:[#allocation2 + $0x2c] sm:$0xf] %v954_v46  ;;  %v3550_v59 = vor.u32 %v3999_v54, %v3549_v58  ;;  %v3554_v60 = vor.u32 %v3998_v32, %v3551_v55  ;;  %v3446_v46 = vor.u32 %v3973_v40, %v3445_v39  ;;  %v1429_v36 = vld [vmem:[%s5989_s4] sm:$0xf] }
 0x213   : > { %955 = vst [vmem:[#allocation2 + $0x18] sm:$0xff] %v951_v47  ;;  %v4340_v2 = vpop.permute.xlu1 %4339  ;;  %v3485_v47 = vld [vmem:[#allocation2 + $0x38] sm:$0xf] }
 0x214   : > { %956 = vst [vmem:[#allocation2 + $0x20] sm:$0xf] %v952_v53  ;;  %v4342_v4 = vunpack.i.h.bf16 %v4340_v2  ;;  %v4341_v1 = vunpack.i.l.bf16 %v4340_v2  ;;  %1349 = vmatpush.bf16.msrb.mxu0 %v3550_v59  ;;  %1377 = vmatpush.bf16.msra.mxu1 %v3554_v60  ;;  %v3486_v49 = vor.u32 %v3982_v48, %v3485_v47  ;;  %v1457_v48 = vld [vmem:[%s5991_s6 + $0x8] sm:$0xff] }
 0x216   : > { %v920_v9 = vsel %vm384_vm8, %v4342_v4, %v4347_v62  ;;  %v922_v11 = vsel %vm384_vm8, %v4302_v57, %v4342_v4  ;;  %v919_v13 = vsel %vm384_vm8, %v4341_v1, %v4346_v63  ;;  %v921_v14 = vsel %vm384_vm8, %v4301_v51, %v4341_v1 }
 0x217   : > { %v927_v15 = vpack.c.bf16 %v922_v11, %v924_v8  ;;  %v928_v18 = vpack.c.bf16 %v920_v9, %v920_v9  ;;  %v925_v19 = vpack.c.bf16 %v921_v14, %v923_v7  ;;  %3559 = vmatmul.msk.bf16.vlgmr.msrb.gmra.mxu0 %vm5998_vm6, %v5206_v3  ;;  %v926_v21 = vpack.c.bf16 %v919_v13, %v919_v13 }
 0x218   : > { %1384 = vmatpush.bf16.msra.mxu0 %v3546_v61  ;;  %1405 = vmatpush.bf16.msrb.mxu1 %v3558_v0  ;;  %v3978_v23 = vld [vmem:[#allocation2 + $0x20] sm:$0xf0]  ;;  %v3467_v24 = vld [vmem:[#allocation2 + $0x24] sm:$0xf0] }
 0x219   : > { %3560 = vmatmul.msk.bf16.vlgmr.msra.gmra.mxu1 %vm5998_vm6, %v5206_v3  ;;  %931 = vst [vmem:[#allocation2 + $0xc] sm:$0xff] %v927_v15  ;;  %v3979_v52 = vld [vmem:[#allocation2 + $0x28] sm:$0xf0] }
 0x21a   : > { %932 = vst [vmem:[#allocation2 + $0x14] sm:$0xf] %v928_v18  ;;  %v3465_v27 = vld [vmem:[#allocation2 + $0x18] sm:$0xf]  ;;  %v3977_v28 = vld [vmem:[#allocation2 + $0x1c] sm:$0xf] }
 0x21b   : > { %929 = vst [vmem:[#allocation2] sm:$0xff] %v925_v19  ;;  %v3466_v30 = vor.u32 %v3978_v23, %v3465_v27  ;;  %v3470_v10 = vor.u32 %v3977_v28, %v3467_v24  ;;  %v3473_v50 = vld [vmem:[#allocation2 + $0x20] sm:$0xf]  ;;  %v1165_v32 = vpop.permute.xlu1 %1164 }
 0x21c   : > { %1385 = vmatpush.bf16.msra.mxu0 %v3534_v20  ;;  %930 = vst [vmem:[#allocation2 + $0x8] sm:$0xf] %v926_v21  ;;  %v3474_v53 = vor.u32 %v3979_v52, %v3473_v50 }
 0x21d   : > { %1334 = vmatpush.bf16.msra.mxu3 %v3466_v30  ;;  %1362 = vmatpush.bf16.msrb.mxu2 %v3470_v10 }
 0x220   : > { %1386 = vmatpush.bf16.msra.mxu0 %v3522_v31  ;;  %v3975_v17 = vld [vmem:[#allocation2 + $0x8] sm:$0xf0]  ;;  %v3455_v29 = vld [vmem:[#allocation2 + $0xc] sm:$0xf0] }
 0x221   : > { %v3976_v55 = vld [vmem:[#allocation2 + $0x10] sm:$0xf0] }
 0x222   : > { %v3453_v41 = vld [vmem:[#allocation2] sm:$0xf]  ;;  %v3974_v42 = vld [vmem:[#allocation2 + $0x4] sm:$0xf] }
 0x223   : > { %v3454_v43 = vor.u32 %v3975_v17, %v3453_v41  ;;  %v3458_v44 = vor.u32 %v3974_v42, %v3455_v29  ;;  %v3461_v54 = vld [vmem:[#allocation2 + $0x8] sm:$0xf]  ;;  %v1428_v29 = vld [vmem:[%s5988_s3] sm:$0xf] }
 0x224   : > { %1387 = vmatpush.bf16.msra.mxu0 %v3510_v35  ;;  %v3462_v56 = vor.u32 %v3976_v55, %v3461_v54  ;;  %v1454_v41 = vld [vmem:[%s5990_s5] sm:$0xff]  ;;  %v1455_v42 = vld [vmem:[%s5990_s5 + $0x8] sm:$0xff] }
 0x225   : > { %1335 = vmatpush.bf16.msra.mxu3 %v3454_v43  ;;  %1363 = vmatpush.bf16.msrb.mxu2 %v3458_v44  ;;  %v1456_v43 = vld [vmem:[%s5991_s6] sm:$0xff] }
 0x228   : > { %1388 = vmatpush.bf16.msra.mxu0 %v3498_v45  ;;  %1336 = vmatmul.bf16.vlgmr.msra.gmra.mxu3 %v3446_v46 }
 0x229   : > { %1364 = vmatmul.bf16.vlgmr.msrb.gmra.mxu2 %v3446_v46  ;;  %3561 = vmatmul.msk.bf16.vlgmr.msrb.gmra.mxu1 %vm5998_vm6, %v5206_v3  ;;  %v1170_v3 = vpop.permute.xlu0 %1169 }
 0x22c   : > { %1389 = vmatpush.bf16.msra.mxu0 %v3486_v49 }
 0x230   : > { %1390 = vmatpush.bf16.msra.mxu0 %v3474_v53 }
 0x234   : > { %1391 = vmatpush.bf16.msra.mxu0 %v3462_v56 }
 0x237   : > { %1392 = vmatmul.bf16.vlgmr.msra.gmra.mxu0 %v3446_v46 }
 0x294   : > { %v1351_v51 = vpop.f32.mrf.mxu0 }
 0x296   : > { %v1379_v57 = vpop.f32.mrf.mxu1 }
 0x29c   : > { %v1353_v59 = vpop.f32.mrf.mxu0 }
 0x29e   : > { %v1381_v58 = vpop.f32.mrf.mxu1 }
 0x2a6   : > { %v1407_v4 = vpop.f32.mrf.mxu1 }
 0x2ab   : > { %v1337_v60 = vpop.f32.mrf.mxu3 }
 0x2ac   : > { %v1365_v61 = vpop.f32.mrf.mxu2  ;;  %v1338_v62 = vadd.f32 %v1337_v60, %v1165_v32 }
 0x2ad   : > { %v1366_v63 = vadd.f32 %v1365_v61, %v1165_v32 }
 0x2ae   : > { %v5232_v2 = vadd.f32 %v1351_v51, %v1338_v62  ;;  %v1409_v27 = vpop.f32.mrf.mxu1 }
 0x2af   : > { %v5234_v0 = vadd.f32 %v1379_v57, %v1366_v63 }
 0x2b0   : > { %v1412_v5 = vmul.f32 %v5232_v2, %v5041_v33 }
 0x2b1   : > { %v1413_v6 = vmul.f32 %v5234_v0, %v5043_v38 }
 0x2b3   : > { %v1339_v8 = vpop.f32.mrf.mxu3  ;;  %v1418_v20 = vadd.f32 %v1413_v6, %v1412_v5 }
 0x2b4   : > { %v1393_v1 = vpop.f32.mrf.mxu0  ;;  %v1367_v9 = vpop.f32.mrf.mxu2  ;;  %v1340_v11 = vadd.f32 %v1339_v8, %v1170_v3 }
 0x2b5   : > { %v1394_v7 = vadd.f32 %v1393_v1, %v1165_v32  ;;  %v1368_v13 = vadd.f32 %v1367_v9, %v1170_v3 }
 0x2b6   : > { %v5242_v15 = vadd.f32 %v1353_v59, %v1340_v11 }
 0x2b7   : > { %v5240_v14 = vadd.f32 %v1407_v4, %v1394_v7  ;;  %v5244_v18 = vadd.f32 %v1381_v58, %v1368_v13 }
 0x2b8   : > { %v1415_v24 = vmul.f32 %v5242_v15, %v5041_v33 }
 0x2b9   : > { %v1414_v19 = vmul.f32 %v5240_v14, %v5038_v16  ;;  %v1416_v22 = vmul.f32 %v5244_v18, %v5043_v38 }
 0x2bb   : > { %v1419_v21 = vadd.f32 %v1418_v20, %v1414_v19  ;;  %v1422_v10 = vadd.f32 %v1416_v22, %v1415_v24 }
 0x2bc   : > { %v1395_v23 = vpop.f32.mrf.mxu0 }
 0x2bd   : > { %v1396_v25 = vadd.f32 %v1395_v23, %v1170_v3  ;;  %1420 = vadd.xlane.f32.xlu0 %v1419_v21 }
 0x2bf   : > { %v5252_v28 = vadd.f32 %v1409_v27, %v1396_v25 }
 0x2c1   : > { %v1417_v30 = vmul.f32 %v5252_v28, %v5038_v16 }
 0x2c3   : > { %v1423_v31 = vadd.f32 %v1422_v10, %v1417_v30  ;;  %v4725_v10 = vld [vmem:[%s4825_s18] sm:$0xff] }
 0x2c5   : > { %1424 = vadd.xlane.f32.xlu2 %v1423_v31 }
 0x330   : > { %v1421_v34 = vpop.xlane.xlu0 %1420 }
 0x331   : > { %v1426_v17 = vmul.f32 0.00390625, %v1421_v34  ;;  %v4726_v34 = vld [vmem:[%s4825_s18 + $0x8] sm:$0xff] }
 0x338   : > { %v1425_v26 = vpop.xlane.xlu2 %1424 }
 0x339   : > { %v1427_v35 = vmul.f32 0.00390625, %v1425_v26 }
 0x33b   : > { %1447 = vmatpush.msrb.mxu3 %v1427_v35  ;;  %v4727_v35 = vld [vmem:[%s4825_s18 + $0x10] sm:$0xff] }
 0x33d   : > { %1448 = vmatpush.msrb.mxu3 %v1426_v17 }
 0x33e   : > { %3562 = vmatmul.msk.f32.vlgmr.msrb.gmra.mxu3 %vm5998_vm6, %v1428_v29 }
 0x3c1   : > { %v1450_v37 = vpop.f32.mrf.mxu3 }
 0x3c2   : > { %v1451_v39 = vadd.f32 %v1450_v37, %v1429_v36 }
 0x3c4   : > { %v1453_v40 = vmax.f32 %v1451_v39, 0.0 }
 0x3c6   : > { %3563 = vmatpush.msk.msra.mxu3 %vm5997_vm9, %v1453_v40 }
 0x3c7   : > { %3564 = vmatmul.msk.f32.vlgmr.msra.gmra.mxu3 %vm5996_vm10, %v1454_v41 }
 0x3cf   : > { %3565 = vmatmul.msk.f32.gmra.mxu3 %vm5996_vm10, %v1455_v42  ;;  %v4728_v42 = vld [vmem:[%s4825_s18 + $0x18] sm:$0xff] }
 0x44a   : > { %v1486_v44 = vpop.f32.mrf.mxu3 }
 0x44b   : > { %v1487_v45 = vadd.f32 %v1486_v44, %v1456_v43  ;;  %v4729_v44 = vld [vmem:[%s4825_s18 + $0x28] sm:$0xff] }
 0x44d   : > { %v1492_v46 = vsub.f32 0.0, %v1487_v45 }
 0x44f   : > { %v1494_v47 = vmul.f32 1.442695, %v1492_v46 }
 0x451   : > { %4709 = vpow2.f32 %v1494_v47 }
 0x452   : > { %v1489_v49 = vpop.f32.mrf.mxu3 }
 0x453   : > { %v1490_v50 = vadd.f32 %v1489_v49, %v1457_v48 }
 0x455   : > { %v1493_v52 = vsub.f32 0.0, %v1490_v50  ;;  %v3568_v50 = vld [vmem:[%s5987_s2 + $0x20] sm:$0xff] }
 0x457   : > { %v4710_v53 = vpop.eup %4709  ;;  %v1496_v54 = vmul.f32 1.442695, %v1493_v52  ;;  %v3569_v52 = vld [vmem:[%s5987_s2 + $0x28] sm:$0xff] }
 0x458   : > { %v1498_v55 = vadd.f32 1.0, %v4710_v53 }
 0x459   : > { %4711 = vpow2.f32 %v1496_v54 }
 0x45a   : > { %4713 = vrcp.f32 %v1498_v55  ;;  %v1511_v59 = vand.u32 2147483648, %v1498_v55  ;;  %v1509_v61 = vand.u32 2147483647, %v1498_v55  ;;  %vm1505_vm12 = vweird.f32 %v1498_v55 }
 0x45c   : > { %v1512_v3 = vor.u32 1.1754944e-38, %v1511_v59  ;;  %vm1510_vm14 = vcmp.eq.f32.partialorder %v1509_v61, 8.507059e+37 }
 0x45f   : > { %v4712_v56 = vpop.eup %4711 }
 0x460   : > { %v4714_v57 = vpop.eup %4713  ;;  %v1499_v51 = vadd.f32 1.0, %v4712_v56 }
 0x461   : > { %v1501_v58 = vmul.f32 %v4714_v57, %v1498_v55  ;;  %vm1506_vm11 = vweird.f32 %v4714_v57 }
 0x462   : > { %4715 = vrcp.f32 %v1499_v51  ;;  %vm1507_vm13 = vmor %vm1505_vm12, %vm1506_vm11  ;;  %v1526_v7 = vand.u32 2147483648, %v1499_v51  ;;  %v1524_v9 = vand.u32 2147483647, %v1499_v51  ;;  %vm1520_vm10 = vweird.f32 %v1499_v51 }
 0x463   : > { %v1502_v32 = vsub.f32 1.0, %v1501_v58 }
 0x464   : > { %v1527_v13 = vor.u32 1.1754944e-38, %v1526_v7  ;;  %vm1525_vm11 = vcmp.eq.f32.partialorder %v1524_v9, 8.507059e+37 }
 0x465   : > { %v1503_v60 = vmul.f32 %v4714_v57, %v1502_v32 }
 0x467   : > { %v1504_v62 = vadd.f32 %v4714_v57, %v1503_v60 }
 0x468   : > { %v4716_v63 = vpop.eup %4715 }
 0x469   : > { %v1508_v4 = vsel %vm1507_vm13, %v4714_v57, %v1504_v62  ;;  %v1516_v1 = vmul.f32 %v4716_v63, %v1499_v51  ;;  %vm1521_vm15 = vweird.f32 %v4716_v63 }
 0x46a   : > { %v1513_v5 = vsel %vm1510_vm14, %v1512_v3, %v1508_v4  ;;  %vm1522_vm9 = vmor %vm1520_vm10, %vm1521_vm15  ;;  %vm6000_vm10 = vcmask 31744  }
 0x46b   : > { %1532 = vperm.xlu1 %4227, %v1513_v5   ;;  %v1517_v6 = vsub.f32 1.0, %v1516_v1  ;;  %vm6001_vm12 = vmmov %vm6000_vm10 }
 0x46d   : > { %v1518_v8 = vmul.f32 %v4716_v63, %v1517_v6 }
 0x46f   : > { %v1519_v11 = vadd.f32 %v4716_v63, %v1518_v8 }
 0x471   : > { %v1523_v19 = vsel %vm1522_vm9, %v4716_v63, %v1519_v11  ;;  %vm5999_vm9 = vcmask 1043456  }
 0x472   : > { %v1528_v20 = vsel %vm1525_vm11, %v1527_v13, %v1523_v19 }
 0x473   : > { %1537 = vperm.xlu1 %4227, %v1528_v20  }
 0x4dd   : > { %v1533_v21 = vpop.permute.xlu1 %1532 }
 0x4de   : > { %v1540_v23 = vmul.f32 %v1533_v21, %v5232_v2  ;;  %v1541_v24 = vmul.f32 %v1533_v21, %v5234_v0  ;;  %v1542_v22 = vmul.f32 %v1533_v21, %v5240_v14 }
 0x4e0   : > { %v1546_v25 = vmul.f32 %v1540_v23, %v5041_v33  ;;  %v1547_v27 = vmul.f32 %v1541_v24, %v5043_v38  ;;  %v1548_v30 = vmul.f32 %v1542_v22, %v5038_v16 }
 0x4e2   : > { %v5285_v31 = vadd.f32 %v4725_v10, %v1546_v25  ;;  %v5288_v26 = vadd.f32 %v4726_v34, %v1547_v27  ;;  %v5291_v2 = vadd.f32 %v4727_v35, %v1548_v30 }
 0x4e4   : > { %v1665_v0 = vpack.c.bf16 %v5288_v26, %v5285_v31  ;;  %v1666_v14 = vpack.c.bf16 %v5291_v2, %v5291_v2 }
 0x4e5   : > { %v1538_v17 = vpop.permute.xlu1 %1537 }
 0x4e6   : > { %v1543_v29 = vmul.f32 %v1538_v17, %v5242_v15  ;;  %v1544_v36 = vmul.f32 %v1538_v17, %v5244_v18  ;;  %v1545_v37 = vmul.f32 %v1538_v17, %v5252_v28  ;;  %1669 = vst [vmem:[#allocation2 + $0x60] sm:$0xff] %v1665_v0  ;;  %v4730_v28 = vld [vmem:[%s4825_s18 + $0x20] sm:$0xff] }
 0x4e7   : > { %1670 = vst [vmem:[#allocation2 + $0x68] sm:$0xf] %v1666_v14 }
 0x4e8   : > { %v1549_v39 = vmul.f32 %v1543_v29, %v5041_v33  ;;  %v1551_v40 = vmul.f32 %v1545_v37, %v5038_v16  ;;  %v1550_v41 = vmul.f32 %v1544_v36, %v5043_v38 }
 0x4ea   : > { %v5304_v43 = vadd.f32 %v4728_v42, %v1549_v39  ;;  %v5307_v45 = vadd.f32 %v4729_v44, %v1551_v40  ;;  %v5314_v46 = vadd.f32 %v4730_v28, %v1550_v41 }
 0x4ec   : > { %v4373_v15 = vpack.i.bf16 %v5307_v45, %v5291_v2  ;;  %v4363_v18 = vpack.i.bf16 %v5304_v43, %v5285_v31  ;;  %v1667_v47 = vpack.c.bf16 %v5314_v46, %v5304_v43  ;;  %v1668_v48 = vpack.c.bf16 %v5307_v45, %v5307_v45 }
 0x4ed   : > { %v4353_v49 = vpack.i.bf16 %v5314_v46, %v5288_v26 }
 0x4ee   : > { %4374 = vrot.lane.b32.xlu0 %v4373_v15, %s4746_s20  ;;  %4364 = vrot.lane.b32.xlu2 %v4363_v18, %s4746_s20  ;;  %1671 = vst [vmem:[#allocation2 + $0x6c] sm:$0xff] %v1667_v47 }
 0x4ef   : > { %4349 = vrot.lane.b32.xlu1 %v4363_v18, %s4745_s19  ;;  %1672 = vst [vmem:[#allocation2 + $0x74] sm:$0xf] %v1668_v48 }
 0x4f6   : > { %4394 = vrot.lane.b32.xlu0 %v4363_v18, %s4749_s23  ;;  %4389 = vrot.lane.b32.xlu2 %v4373_v15, %s4747_s21 }
 0x4f7   : > { %4354 = vrot.lane.b32.xlu1 %v4353_v49, %s4745_s19 }
 0x4fe   : > { %4409 = vrot.lane.b32.xlu0 %v4363_v18, %s4748_s22  ;;  %4404 = vrot.lane.b32.xlu2 %v4373_v15, %s4749_s23 }
 0x4ff   : > { %4359 = vrot.lane.b32.xlu1 %v4373_v15, %s4745_s19 }
 0x506   : > { %4424 = vrot.lane.b32.xlu0 %v4363_v18, %s4750_s24  ;;  %4419 = vrot.lane.b32.xlu2 %v4373_v15, %s4748_s22 }
 0x507   : > { %4369 = vrot.lane.b32.xlu1 %v4353_v49, %s4746_s20 }
 0x50e   : > { %4439 = vrot.lane.b32.xlu0 %v4363_v18, %s4751_s25  ;;  %4434 = vrot.lane.b32.xlu2 %v4373_v15, %s4750_s24 }
 0x50f   : > { %4379 = vrot.lane.b32.xlu1 %v4363_v18, %s4747_s21 }
 0x516   : > { %4454 = vrot.lane.b32.xlu0 %v4363_v18, %s4752_s26  ;;  %4449 = vrot.lane.b32.xlu2 %v4373_v15, %s4751_s25 }
 0x517   : > { %4384 = vrot.lane.b32.xlu1 %v4353_v49, %s4747_s21 }
 0x51e   : > { %1818 = vperm.xlu0 %4226, %v3568_v50   ;;  %4464 = vrot.lane.b32.xlu2 %v4373_v15, %s4752_s26 }
 0x51f   : > { %4399 = vrot.lane.b32.xlu1 %v4353_v49, %s4749_s23 }
 0x527   : > { %4414 = vrot.lane.b32.xlu1 %v4353_v49, %s4748_s22 }
 0x52f   : > { %4429 = vrot.lane.b32.xlu1 %v4353_v49, %s4750_s24 }
 0x537   : > { %4444 = vrot.lane.b32.xlu1 %v4353_v49, %s4751_s25 }
 0x53f   : > { %4459 = vrot.lane.b32.xlu1 %v4353_v49, %s4752_s26 }
 0x547   : > { %1823 = vperm.xlu1 %4227, %v3569_v52  }
 0x548   : > { %v4365_v53 = vpop.permute.xlu2 %4364 }
 0x549   : > { %v4367_v56 = vunpack.i.h.bf16 %v4365_v53  ;;  %v4366_v57 = vunpack.i.l.bf16 %v4365_v53 }
 0x550   : > { %v5352_v54 = vpop.permute.xlu2 %4389 }
 0x551   : > { %v4392_v52 = vunpack.i.h.bf16 %v5352_v54  ;;  %v4391_v53 = vunpack.i.l.bf16 %v5352_v54 }
 0x558   : > { %v5354_v59 = vpop.permute.xlu2 %4404 }
 0x560   : > { %v4375_v55 = vpop.permute.xlu0 %4374  ;;  %v5362_v1 = vpop.permute.xlu2 %4419 }
 0x561   : > { %v4377_v51 = vunpack.i.h.bf16 %v4375_v55  ;;  %v4376_v58 = vunpack.i.l.bf16 %v4375_v55  ;;  %v4350_v32 = vpop.permute.xlu1 %4349  ;;  %v4422_v6 = vunpack.i.h.bf16 %v5362_v1  ;;  %v4421_v7 = vunpack.i.l.bf16 %v5362_v1 }
 0x562   : > { %v4351_v9 = vunpack.i.l.bf16 %v4350_v32  ;;  %v4352_v24 = vunpack.i.h.bf16 %v4350_v32 }
 0x563   : > { %v1715_v60 = vsel %vm527_vm1, %v4376_v58, %v4366_v57  ;;  %v1716_v61 = vsel %vm527_vm1, %v4377_v51, %v4367_v56 }
 0x564   : > { %v1718_v62 = vpack.c.bf16 %v1715_v60, %v1715_v60  ;;  %v1720_v63 = vpack.c.bf16 %v1716_v61, %v1716_v61 }
 0x566   : > { %1722 = vst [vmem:[#allocation2 + $0x98] sm:$0xf] %v1718_v62 }
 0x567   : > { %1724 = vst [vmem:[#allocation2 + $0xa4] sm:$0xf] %v1720_v63 }
 0x568   : > { %v5360_v3 = vpop.permute.xlu0 %4394 }
 0x569   : > { %v4355_v4 = vpop.permute.xlu1 %4354 }
 0x56a   : > { %v4356_v5 = vunpack.i.l.bf16 %v4355_v4  ;;  %v4357_v11 = vunpack.i.h.bf16 %v4355_v4 }
 0x56c   : > { %v1739_v22 = vsel %vm554_vm0, %v4351_v9, %v4356_v5  ;;  %v1740_v0 = vsel %vm554_vm0, %v4352_v24, %v4357_v11 }
 0x570   : > { %v5366_v8 = vpop.permute.xlu0 %4409 }
 0x571   : > { %v4412_v13 = vunpack.i.h.bf16 %v5366_v8  ;;  %v4411_v19 = vunpack.i.l.bf16 %v5366_v8  ;;  %v4360_v20 = vpop.permute.xlu1 %4359 }
 0x572   : > { %v4362_v21 = vunpack.i.h.bf16 %v4360_v20  ;;  %v4361_v23 = vunpack.i.l.bf16 %v4360_v20 }
 0x573   : > { %v1767_v25 = vsel %vm581_vm3, %v4421_v7, %v4411_v19  ;;  %v1768_v27 = vsel %vm581_vm3, %v4422_v6, %v4412_v13 }
 0x574   : > { %v1770_v30 = vpack.c.bf16 %v1767_v25, %v1767_v25  ;;  %v1772_v10 = vpack.c.bf16 %v1768_v27, %v1768_v27  ;;  %v1737_v34 = vsel %vm554_vm0, %v4356_v5, %v4361_v23  ;;  %v1738_v35 = vsel %vm554_vm0, %v4357_v11, %v4362_v21 }
 0x575   : > { %v1741_v14 = vsel %vm554_vm0, %v4361_v23, %v4351_v9  ;;  %v1742_v17 = vsel %vm554_vm0, %v4362_v21, %v4352_v24  ;;  %v1743_v29 = vpack.c.bf16 %v1737_v34, %v1739_v22  ;;  %v1745_v37 = vpack.c.bf16 %v1738_v35, %v1740_v0 }
 0x576   : > { %1774 = vst [vmem:[#allocation2 + $0xc8] sm:$0xf] %v1770_v30  ;;  %v1744_v36 = vpack.c.bf16 %v1741_v14, %v1741_v14  ;;  %v1746_v39 = vpack.c.bf16 %v1742_v17, %v1742_v17  ;;  %v4397_v0 = vunpack.i.h.bf16 %v5360_v3  ;;  %v4396_v14 = vunpack.i.l.bf16 %v5360_v3 }
 0x577   : > { %1776 = vst [vmem:[#allocation2 + $0xd4] sm:$0xf] %v1772_v10  ;;  %v4407_v17 = vunpack.i.h.bf16 %v5354_v59 }
 0x578   : > { %1747 = vst [vmem:[#allocation2 + $0xa8] sm:$0xff] %v1743_v29  ;;  %v4406_v29 = vunpack.i.l.bf16 %v5354_v59 }
 0x579   : > { %1748 = vst [vmem:[#allocation2 + $0xb0] sm:$0xf] %v1744_v36  ;;  %v4370_v40 = vpop.permute.xlu1 %4369 }
 0x57a   : > { %1749 = vst [vmem:[#allocation2 + $0xb4] sm:$0xff] %v1745_v37  ;;  %v4372_v41 = vunpack.i.h.bf16 %v4370_v40  ;;  %v4371_v42 = vunpack.i.l.bf16 %v4370_v40  ;;  %v1655_v40 = vsel %vm465_vm4, %v4406_v29, %v4396_v14 }
 0x57b   : > { %1750 = vst [vmem:[#allocation2 + $0xbc] sm:$0xf] %v1746_v39 }
 0x57c   : > { %v1712_v44 = vsel %vm527_vm1, %v4372_v41, %v4377_v51  ;;  %v1714_v15 = vsel %vm527_vm1, %v4367_v56, %v4372_v41  ;;  %v1711_v18 = vsel %vm527_vm1, %v4371_v42, %v4376_v58  ;;  %v1713_v28 = vsel %vm527_vm1, %v4366_v57, %v4371_v42 }
 0x57d   : > { %v1719_v47 = vpack.c.bf16 %v1712_v44, %v1714_v15  ;;  %v1717_v48 = vpack.c.bf16 %v1711_v18, %v1713_v28  ;;  %v1656_v41 = vsel %vm465_vm4, %v4407_v17, %v4397_v0 }
 0x57f   : > { %1723 = vst [vmem:[#allocation2 + $0x9c] sm:$0xff] %v1719_v47  ;;  %v3664_v49 = vld [vmem:[#allocation2 + $0xa8] sm:$0xf]  ;;  %v4024_v50 = vld [vmem:[#allocation2 + $0xac] sm:$0xf] }
 0x580   : > { %1721 = vst [vmem:[#allocation2 + $0x90] sm:$0xff] %v1717_v48 }
 0x581   : > { %v4380_v55 = vpop.permute.xlu1 %4379  ;;  %v4025_v51 = vld [vmem:[#allocation2 + $0xb0] sm:$0xf0]  ;;  %v3666_v32 = vld [vmem:[#allocation2 + $0xb4] sm:$0xf0] }
 0x582   : > { %v4382_v56 = vunpack.i.h.bf16 %v4380_v55  ;;  %v4381_v60 = vunpack.i.l.bf16 %v4380_v55  ;;  %v3665_v61 = vor.u32 %v4025_v51, %v3664_v49  ;;  %v3669_v58 = vor.u32 %v4024_v50, %v3666_v32  ;;  %v4016_v32 = vld [vmem:[#allocation2 + $0x68] sm:$0xf0] }
 0x584   : > { %v1690_v57 = vsel %vm500_vm2, %v4392_v52, %v4382_v56  ;;  %v1689_v62 = vsel %vm500_vm2, %v4391_v53, %v4381_v60  ;;  %1982 = vmatpush.bf16.msra.mxu2 %v3665_v61  ;;  %2010 = vmatpush.bf16.msrb.mxu3 %v3669_v58  ;;  %v4435_v61 = vpop.permute.xlu2 %4434 }
 0x585   : > { %v1694_v63 = vpack.c.bf16 %v1690_v57, %v1690_v57  ;;  %v1692_v4 = vpack.c.bf16 %v1689_v62, %v1689_v62  ;;  %v3628_v62 = vld [vmem:[#allocation2 + $0x60] sm:$0xf] }
 0x586   : > { %v4022_v5 = vld [vmem:[#allocation2 + $0x98] sm:$0xf0]  ;;  %v3654_v9 = vld [vmem:[#allocation2 + $0x9c] sm:$0xf0] }
 0x587   : > { %1698 = vst [vmem:[#allocation2 + $0x8c] sm:$0xf] %v1694_v63  ;;  %v3652_v54 = vld [vmem:[#allocation2 + $0x90] sm:$0xf]  ;;  %v4021_v11 = vld [vmem:[#allocation2 + $0x94] sm:$0xf] }
 0x588   : > { %1696 = vst [vmem:[#allocation2 + $0x80] sm:$0xf] %v1692_v4  ;;  %v3653_v20 = vor.u32 %v4022_v5, %v3652_v54  ;;  %v3657_v21 = vor.u32 %v4021_v11, %v3654_v9  ;;  %v4015_v63 = vld [vmem:[#allocation2 + $0x64] sm:$0xf]  ;;  %v3629_v4 = vor.u32 %v4016_v32, %v3628_v62 }
 0x589   : > { %v4385_v23 = vpop.permute.xlu1 %4384 }
 0x58a   : > { %v4387_v24 = vunpack.i.h.bf16 %v4385_v23  ;;  %v4386_v22 = vunpack.i.l.bf16 %v4385_v23  ;;  %1983 = vmatpush.bf16.msra.mxu2 %v3653_v20  ;;  %2011 = vmatpush.bf16.msrb.mxu3 %v3657_v21 }
 0x58c   : > { %v1686_v25 = vsel %vm500_vm2, %v4387_v24, %v4392_v52  ;;  %v1685_v27 = vsel %vm500_vm2, %v4386_v22, %v4391_v53  ;;  %v1687_v30 = vsel %vm500_vm2, %v4381_v60, %v4386_v22  ;;  %v1688_v10 = vsel %vm500_vm2, %v4382_v56, %v4387_v24  ;;  %v4425_v53 = vpop.permute.xlu0 %4424  ;;  %v3630_v56 = vld [vmem:[#allocation2 + $0x6c] sm:$0xf0] }
 0x58d   : > { %v1691_v34 = vpack.c.bf16 %v1685_v27, %v1687_v30  ;;  %v1693_v35 = vpack.c.bf16 %v1686_v25, %v1688_v10  ;;  %v3633_v5 = vor.u32 %v4015_v63, %v3630_v56  ;;  %v4427_v22 = vunpack.i.h.bf16 %v4425_v53 }
 0x58e   : > { %v4426_v25 = vunpack.i.l.bf16 %v4425_v53  ;;  %v4437_v27 = vunpack.i.h.bf16 %v4435_v61  ;;  %v4436_v30 = vunpack.i.l.bf16 %v4435_v61 }
 0x58f   : > { %1695 = vst [vmem:[#allocation2 + $0x78] sm:$0xff] %v1691_v34 }
 0x590   : > { %1697 = vst [vmem:[#allocation2 + $0x84] sm:$0xff] %v1693_v35 }
 0x591   : > { %v4400_v36 = vpop.permute.xlu1 %4399 }
 0x592   : > { %v4402_v37 = vunpack.i.h.bf16 %v4400_v36  ;;  %v4401_v39 = vunpack.i.l.bf16 %v4400_v36 }
 0x594   : > { %v1652_v42 = vsel %vm465_vm4, %v4402_v37, %v4407_v17  ;;  %v1654_v3 = vsel %vm465_vm4, %v4397_v0, %v4402_v37  ;;  %v1651_v44 = vsel %vm465_vm4, %v4401_v39, %v4406_v29  ;;  %v1653_v59 = vsel %vm465_vm4, %v4396_v14, %v4401_v39  ;;  %v4440_v34 = vpop.permute.xlu0 %4439  ;;  %v4450_v17 = vpop.permute.xlu2 %4449 }
 0x595   : > { %v1659_v15 = vpack.c.bf16 %v1654_v3, %v1656_v41  ;;  %v1660_v18 = vpack.c.bf16 %v1652_v42, %v1652_v42  ;;  %v1657_v28 = vpack.c.bf16 %v1653_v59, %v1655_v40  ;;  %v1658_v47 = vpack.c.bf16 %v1651_v44, %v1651_v44  ;;  %v3684_v40 = vld [vmem:[#allocation2 + $0xc8] sm:$0xf]  ;;  %v4029_v41 = vld [vmem:[#allocation2 + $0xd0] sm:$0xf0]  ;;  %v3672_v59 = vld [vmem:[#allocation2 + $0xb0] sm:$0xf] }
 0x596   : > { %v3640_v48 = vld [vmem:[#allocation2 + $0x78] sm:$0xf]  ;;  %v4018_v49 = vld [vmem:[#allocation2 + $0x7c] sm:$0xf]  ;;  %v1629_v0 = vsel %vm438_vm5, %v4436_v30, %v4426_v25  ;;  %v1630_v14 = vsel %vm438_vm5, %v4437_v27, %v4427_v22 }
 0x597   : > { %1663 = vst [vmem:[#allocation2 + $0x54] sm:$0xff] %v1659_v15  ;;  %v4019_v50 = vld [vmem:[#allocation2 + $0x80] sm:$0xf0]  ;;  %v3642_v52 = vld [vmem:[#allocation2 + $0x84] sm:$0xf0] }
 0x598   : > { %1664 = vst [vmem:[#allocation2 + $0x5c] sm:$0xf] %v1660_v18  ;;  %v3641_v55 = vor.u32 %v4019_v50, %v3640_v48  ;;  %v3645_v51 = vor.u32 %v4018_v49, %v3642_v52  ;;  %v4026_v15 = vld [vmem:[#allocation2 + $0xb8] sm:$0xf0]  ;;  %v4001_v18 = vld [vmem:[%s5986_s1 + $0x24] sm:$0xf]  ;;  %v4442_v50 = vunpack.i.h.bf16 %v4440_v34  ;;  %v4441_v52 = vunpack.i.l.bf16 %v4440_v34 }
 0x599   : > { %1661 = vst [vmem:[#allocation2 + $0x48] sm:$0xff] %v1657_v28  ;;  %v4415_v60 = vpop.permute.xlu1 %4414  ;;  %v3574_v49 = vld [vmem:[%s5986_s1 + $0x28] sm:$0xf0] }
 0x59a   : > { %1662 = vst [vmem:[#allocation2 + $0x50] sm:$0xf] %v1658_v47  ;;  %v4417_v58 = vunpack.i.h.bf16 %v4415_v60  ;;  %v4416_v57 = vunpack.i.l.bf16 %v4415_v60  ;;  %1984 = vmatpush.bf16.msra.mxu2 %v3641_v55  ;;  %2012 = vmatpush.bf16.msrb.mxu3 %v3645_v51  ;;  %v4452_v51 = vunpack.i.h.bf16 %v4450_v17  ;;  %v4451_v60 = vunpack.i.l.bf16 %v4450_v17 }
 0x59b   : > { %v5466_v62 = vor.u32 %v4001_v18, %v3574_v49 }
 0x59c   : > { %v1764_v9 = vsel %vm581_vm3, %v4417_v58, %v4422_v6  ;;  %v1766_v54 = vsel %vm581_vm3, %v4412_v13, %v4417_v58  ;;  %v1763_v11 = vsel %vm581_vm3, %v4416_v57, %v4421_v7  ;;  %v1765_v20 = vsel %vm581_vm3, %v4411_v19, %v4416_v57 }
 0x59d   : > { %v1771_v21 = vpack.c.bf16 %v1764_v9, %v1766_v54  ;;  %v1769_v23 = vpack.c.bf16 %v1763_v11, %v1765_v20  ;;  %v3673_v58 = vor.u32 %v4026_v15, %v3672_v59  ;;  %v3685_v57 = vor.u32 %v4029_v41, %v3684_v40  ;;  %v4023_v9 = vld [vmem:[#allocation2 + $0xa0] sm:$0xf0]  ;;  %v4455_v20 = vpop.permute.xlu0 %4454  ;;  %v4017_v59 = vld [vmem:[#allocation2 + $0x70] sm:$0xf0] }
 0x59e   : > { %1985 = vmatpush.bf16.msra.mxu2 %v3629_v4  ;;  %2013 = vmatpush.bf16.msrb.mxu3 %v3633_v5  ;;  %v4013_v6 = vld [vmem:[#allocation2 + $0x50] sm:$0xf0]  ;;  %v3618_v24 = vld [vmem:[#allocation2 + $0x54] sm:$0xf0]  ;;  %v1603_v54 = vsel %vm411_vm7, %v4451_v60, %v4441_v52  ;;  %v1604_v11 = vsel %vm411_vm7, %v4452_v51, %v4442_v50  ;;  %v4456_v34 = vunpack.i.l.bf16 %v4455_v20 }
 0x59f   : > { %1775 = vst [vmem:[#allocation2 + $0xcc] sm:$0xff] %v1771_v21  ;;  %v3660_v5 = vld [vmem:[#allocation2 + $0x98] sm:$0xf] }
 0x5a0   : > { %1773 = vst [vmem:[#allocation2 + $0xc0] sm:$0xff] %v1769_v23  ;;  %v3616_v13 = vld [vmem:[#allocation2 + $0x48] sm:$0xf]  ;;  %v4012_v1 = vld [vmem:[#allocation2 + $0x4c] sm:$0xf] }
 0x5a1   : > { %v4430_v7 = vpop.permute.xlu1 %4429  ;;  %v3617_v10 = vor.u32 %v4013_v6, %v3616_v13  ;;  %v3621_v8 = vor.u32 %v4012_v1, %v3618_v24  ;;  %v3661_v1 = vor.u32 %v4023_v9, %v3660_v5 }
 0x5a2   : > { %v4432_v35 = vunpack.i.h.bf16 %v4430_v7  ;;  %v4431_v19 = vunpack.i.l.bf16 %v4430_v7 }
 0x5a3   : > { %1986 = vmatpush.bf16.msra.mxu2 %v3617_v10  ;;  %2014 = vmatpush.bf16.msrb.mxu3 %v3621_v8  ;;  %v4457_v8 = vunpack.i.h.bf16 %v4455_v20 }
 0x5a4   : > { %v1626_v29 = vsel %vm438_vm5, %v4432_v35, %v4437_v27  ;;  %v1628_v36 = vsel %vm438_vm5, %v4427_v22, %v4432_v35  ;;  %v1625_v37 = vsel %vm438_vm5, %v4431_v19, %v4436_v30  ;;  %v1627_v39 = vsel %vm438_vm5, %v4426_v25, %v4431_v19  ;;  %v4465_v27 = vpop.permute.xlu2 %4464  ;;  %v3648_v35 = vld [vmem:[#allocation2 + $0x80] sm:$0xf]  ;;  %v4020_v19 = vld [vmem:[#allocation2 + $0x88] sm:$0xf0] }
 0x5a5   : > { %v1633_v42 = vpack.c.bf16 %v1628_v36, %v1630_v14  ;;  %v1634_v3 = vpack.c.bf16 %v1626_v29, %v1626_v29  ;;  %v1631_v44 = vpack.c.bf16 %v1627_v39, %v1629_v0  ;;  %v1632_v28 = vpack.c.bf16 %v1625_v37, %v1625_v37 }
 0x5a6   : > { %v4028_v47 = vld [vmem:[#allocation2 + $0xc8] sm:$0xf0]  ;;  %v3678_v48 = vld [vmem:[#allocation2 + $0xcc] sm:$0xf0]  ;;  %v4467_v17 = vunpack.i.h.bf16 %v4465_v27  ;;  %v4466_v29 = vunpack.i.l.bf16 %v4465_v27 }
 0x5a7   : > { %1637 = vst [vmem:[#allocation2 + $0x3c] sm:$0xff] %v1633_v42  ;;  %v3676_v53 = vld [vmem:[#allocation2 + $0xc0] sm:$0xf]  ;;  %v4027_v55 = vld [vmem:[#allocation2 + $0xc4] sm:$0xf]  ;;  %v3649_v42 = vor.u32 %v4020_v19, %v3648_v35 }
 0x5a8   : > { %1638 = vst [vmem:[#allocation2 + $0x44] sm:$0xf] %v1634_v3  ;;  %v3677_v32 = vor.u32 %v4028_v47, %v3676_v53  ;;  %v3681_v56 = vor.u32 %v4027_v55, %v3678_v48  ;;  %v1577_v3 = vsel %vm384_vm8, %v4466_v29, %v4456_v34 }
 0x5a9   : > { %1635 = vst [vmem:[#allocation2 + $0x30] sm:$0xff] %v1631_v44  ;;  %v4445_v61 = vpop.permute.xlu1 %4444  ;;  %v1578_v44 = vsel %vm384_vm8, %v4467_v17, %v4457_v8 }
 0x5aa   : > { %1636 = vst [vmem:[#allocation2 + $0x38] sm:$0xf] %v1632_v28  ;;  %v4447_v63 = vunpack.i.h.bf16 %v4445_v61  ;;  %v4446_v4 = vunpack.i.l.bf16 %v4445_v61  ;;  %2003 = vmatpush.bf16.msra.mxu1 %v3677_v32  ;;  %2031 = vmatpush.bf16.msrb.mxu0 %v3681_v56  ;;  %v3624_v56 = vld [vmem:[#allocation2 + $0x50] sm:$0xf] }
 0x5ac   : > { %v1600_v21 = vsel %vm411_vm7, %v4447_v63, %v4452_v51  ;;  %v1602_v23 = vsel %vm411_vm7, %v4442_v50, %v4447_v63  ;;  %v1599_v6 = vsel %vm411_vm7, %v4446_v4, %v4451_v60  ;;  %v1601_v24 = vsel %vm411_vm7, %v4441_v52, %v4446_v4  ;;  %v3636_v52 = vld [vmem:[#allocation2 + $0x68] sm:$0xf]  ;;  %v4014_v60 = vld [vmem:[#allocation2 + $0x58] sm:$0xf0] }
 0x5ad   : > { %v1607_v22 = vpack.c.bf16 %v1602_v23, %v1604_v11  ;;  %v1608_v25 = vpack.c.bf16 %v1600_v21, %v1600_v21  ;;  %v1605_v13 = vpack.c.bf16 %v1601_v24, %v1603_v54  ;;  %3686 = vmatmul.msk.bf16.vlgmr.msra.gmra.mxu1 %vm5998_vm6, %v5466_v62  ;;  %v1606_v30 = vpack.c.bf16 %v1599_v6, %v1599_v6  ;;  %v3572_v21 = vld [vmem:[%s5986_s1 + $0x20] sm:$0xf]  ;;  %v4002_v24 = vld [vmem:[%s5986_s1 + $0x24] sm:$0xf0] }
 0x5ae   : > { %2038 = vmatpush.bf16.msrb.mxu1 %v3673_v58  ;;  %2059 = vmatpush.bf16.msra.mxu0 %v3685_v57  ;;  %v4010_v7 = vld [vmem:[#allocation2 + $0x38] sm:$0xf0]  ;;  %v3606_v10 = vld [vmem:[#allocation2 + $0x3c] sm:$0xf0]  ;;  %v3637_v55 = vor.u32 %v4017_v59, %v3636_v52  ;;  %v3625_v4 = vor.u32 %v4014_v60, %v3624_v56 }
 0x5af   : > { %3687 = vmatmul.msk.bf16.vlgmr.msrb.gmra.mxu0 %vm5998_vm6, %v5466_v62  ;;  %1611 = vst [vmem:[#allocation2 + $0x24] sm:$0xff] %v1607_v22  ;;  %v4011_v9 = vld [vmem:[#allocation2 + $0x40] sm:$0xf0] }
 0x5b0   : > { %1612 = vst [vmem:[#allocation2 + $0x2c] sm:$0xf] %v1608_v25  ;;  %v3604_v0 = vld [vmem:[#allocation2 + $0x30] sm:$0xf]  ;;  %v4009_v14 = vld [vmem:[#allocation2 + $0x34] sm:$0xf] }
 0x5b1   : > { %1609 = vst [vmem:[#allocation2 + $0x18] sm:$0xff] %v1605_v13  ;;  %v4460_v36 = vpop.permute.xlu1 %4459  ;;  %v3605_v37 = vor.u32 %v4010_v7, %v3604_v0  ;;  %v3609_v39 = vor.u32 %v4009_v14, %v3606_v10  ;;  %v3612_v5 = vld [vmem:[#allocation2 + $0x38] sm:$0xf]  ;;  %v1819_v0 = vpop.permute.xlu0 %1818 }
 0x5b2   : > { %2039 = vmatpush.bf16.msrb.mxu1 %v3661_v1  ;;  %1610 = vst [vmem:[#allocation2 + $0x20] sm:$0xf] %v1606_v30  ;;  %v4462_v40 = vunpack.i.h.bf16 %v4460_v36  ;;  %v4461_v41 = vunpack.i.l.bf16 %v4460_v36  ;;  %v3613_v54 = vor.u32 %v4011_v9, %v3612_v5  ;;  %v3573_v30 = vor.u32 %v4002_v24, %v3572_v21 }
 0x5b3   : > { %1987 = vmatpush.bf16.msra.mxu2 %v3605_v37  ;;  %2015 = vmatpush.bf16.msrb.mxu3 %v3609_v39 }
 0x5b4   : > { %v1574_v15 = vsel %vm384_vm8, %v4462_v40, %v4467_v17  ;;  %v1576_v18 = vsel %vm384_vm8, %v4457_v8, %v4462_v40  ;;  %v1573_v28 = vsel %vm384_vm8, %v4461_v41, %v4466_v29  ;;  %v1575_v47 = vsel %vm384_vm8, %v4456_v34, %v4461_v41 }
 0x5b5   : > { %v1581_v48 = vpack.c.bf16 %v1576_v18, %v1578_v44  ;;  %v1582_v49 = vpack.c.bf16 %v1574_v15, %v1574_v15  ;;  %v1579_v50 = vpack.c.bf16 %v1575_v47, %v1577_v3  ;;  %v1580_v53 = vpack.c.bf16 %v1573_v28, %v1573_v28 }
 0x5b6   : > { %2040 = vmatpush.bf16.msrb.mxu1 %v3649_v42  ;;  %v4007_v51 = vld [vmem:[#allocation2 + $0x20] sm:$0xf0]  ;;  %v3594_v32 = vld [vmem:[#allocation2 + $0x24] sm:$0xf0] }
 0x5b7   : > { %1585 = vst [vmem:[#allocation2 + $0xc] sm:$0xff] %v1581_v48  ;;  %v4008_v6 = vld [vmem:[#allocation2 + $0x28] sm:$0xf0] }
 0x5b8   : > { %1586 = vst [vmem:[#allocation2 + $0x14] sm:$0xf] %v1582_v49  ;;  %v3592_v61 = vld [vmem:[#allocation2 + $0x18] sm:$0xf]  ;;  %v4006_v58 = vld [vmem:[#allocation2 + $0x1c] sm:$0xf] }
 0x5b9   : > { %1583 = vst [vmem:[#allocation2] sm:$0xff] %v1579_v50  ;;  %v3593_v57 = vor.u32 %v4007_v51, %v3592_v61  ;;  %v3597_v63 = vor.u32 %v4006_v58, %v3594_v32  ;;  %v3600_v23 = vld [vmem:[#allocation2 + $0x20] sm:$0xf]  ;;  %v1824_v28 = vpop.permute.xlu1 %1823 }
 0x5ba   : > { %2041 = vmatpush.bf16.msrb.mxu1 %v3637_v55  ;;  %1584 = vst [vmem:[#allocation2 + $0x8] sm:$0xf] %v1580_v53  ;;  %v3601_v27 = vor.u32 %v4008_v6, %v3600_v23 }
 0x5bb   : > { %1988 = vmatpush.bf16.msra.mxu2 %v3593_v57  ;;  %2016 = vmatpush.bf16.msrb.mxu3 %v3597_v63 }
 0x5be   : > { %2042 = vmatpush.bf16.msrb.mxu1 %v3625_v4  ;;  %v4004_v11 = vld [vmem:[#allocation2 + $0x8] sm:$0xf0]  ;;  %v3582_v20 = vld [vmem:[#allocation2 + $0xc] sm:$0xf0] }
 0x5bf   : > { %3688 = vmatmul.msk.bf16.vlgmr.msra.gmra.mxu0 %vm5998_vm6, %v5466_v62  ;;  %v4005_v10 = vld [vmem:[#allocation2 + $0x10] sm:$0xf0] }
 0x5c0   : > { %v3580_v22 = vld [vmem:[#allocation2] sm:$0xf]  ;;  %v4003_v25 = vld [vmem:[#allocation2 + $0x4] sm:$0xf] }
 0x5c1   : > { %v3581_v13 = vor.u32 %v4004_v11, %v3580_v22  ;;  %v3585_v1 = vor.u32 %v4003_v25, %v3582_v20  ;;  %v3588_v7 = vld [vmem:[#allocation2 + $0x8] sm:$0xf]  ;;  %v3691_v22 = vld [vmem:[%s5987_s2 + $0x30] sm:$0xff] }
 0x5c2   : > { %2043 = vmatpush.bf16.msrb.mxu1 %v3613_v54  ;;  %v3589_v62 = vor.u32 %v4005_v10, %v3588_v7 }
 0x5c3   : > { %1989 = vmatpush.bf16.msra.mxu2 %v3581_v13  ;;  %2017 = vmatpush.bf16.msrb.mxu3 %v3585_v1 }
 0x5c6   : > { %2044 = vmatpush.bf16.msrb.mxu1 %v3601_v27  ;;  %1990 = vmatmul.bf16.vlgmr.msra.gmra.mxu2 %v3573_v30 }
 0x5c7   : > { %2018 = vmatmul.bf16.vlgmr.msrb.gmra.mxu3 %v3573_v30 }
 0x5ca   : > { %2045 = vmatpush.bf16.msrb.mxu1 %v3589_v62 }
 0x5cd   : > { %2046 = vmatmul.bf16.vlgmr.msrb.gmra.mxu1 %v3573_v30 }
 0x62a   : > { %v2005_v34 = vpop.f32.mrf.mxu1 }
 0x62c   : > { %v2033_v8 = vpop.f32.mrf.mxu0 }
 0x632   : > { %v2007_v19 = vpop.f32.mrf.mxu1 }
 0x634   : > { %v2035_v35 = vpop.f32.mrf.mxu0 }
 0x63c   : > { %v2061_v14 = vpop.f32.mrf.mxu0 }
 0x644   : > { %v2063_v32 = vpop.f32.mrf.mxu0 }
 0x649   : > { %v1991_v36 = vpop.f32.mrf.mxu2 }
 0x64a   : > { %v2047_v17 = vpop.f32.mrf.mxu1  ;;  %v2019_v37 = vpop.f32.mrf.mxu3  ;;  %v1992_v39 = vadd.f32 %v1991_v36, %v1819_v0 }
 0x64b   : > { %v2048_v29 = vadd.f32 %v2047_v17, %v1819_v0  ;;  %v2020_v40 = vadd.f32 %v2019_v37, %v1819_v0 }
 0x64c   : > { %v2006_v42 = vadd.f32 %v2005_v34, %v1992_v39 }
 0x64d   : > { %v2062_v41 = vadd.f32 %v2061_v14, %v2048_v29  ;;  %v2034_v3 = vadd.f32 %v2033_v8, %v2020_v40 }
 0x64e   : > { %v2066_v59 = vmax.f32 %v2006_v42, 0.0 }
 0x64f   : > { %v2068_v44 = vmax.f32 %v2062_v41, 0.0  ;;  %v2067_v15 = vmax.f32 %v2034_v3, 0.0 }
 0x650   : > { %v2072_v47 = vmul.f32 %v2066_v59, %v5041_v33 }
 0x651   : > { %v2074_v18 = vmul.f32 %v2068_v44, %v5038_v16  ;;  %v2073_v48 = vmul.f32 %v2067_v15, %v5043_v38  ;;  %v1993_v53 = vpop.f32.mrf.mxu2 }
 0x652   : > { %v2049_v49 = vpop.f32.mrf.mxu1  ;;  %v2021_v55 = vpop.f32.mrf.mxu3  ;;  %v1994_v56 = vadd.f32 %v1993_v53, %v1824_v28 }
 0x653   : > { %v2186_v50 = vpack.c.bf16 %v2074_v18, %v2074_v18  ;;  %v2050_v52 = vadd.f32 %v2049_v49, %v1824_v28  ;;  %v2185_v51 = vpack.c.bf16 %v2073_v48, %v2072_v47  ;;  %v2022_v60 = vadd.f32 %v2021_v55, %v1824_v28 }
 0x654   : > { %v2008_v58 = vadd.f32 %v2007_v19, %v1994_v56 }
 0x655   : > { %2190 = vst [vmem:[#allocation2 + $0x68] sm:$0xf] %v2186_v50  ;;  %v2064_v61 = vadd.f32 %v2063_v32, %v2050_v52  ;;  %v2036_v57 = vadd.f32 %v2035_v35, %v2022_v60 }
 0x656   : > { %2189 = vst [vmem:[#allocation2 + $0x60] sm:$0xff] %v2185_v51  ;;  %v2069_v4 = vmax.f32 %v2008_v58, 0.0 }
 0x657   : > { %v2071_v63 = vmax.f32 %v2064_v61, 0.0  ;;  %v2070_v5 = vmax.f32 %v2036_v57, 0.0 }
 0x658   : > { %v2075_v54 = vmul.f32 %v2069_v4, %v5041_v33 }
 0x659   : > { %v2077_v9 = vmul.f32 %v2071_v63, %v5038_v16  ;;  %v2076_v11 = vmul.f32 %v2070_v5, %v5043_v38 }
 0x65a   : > { %v4503_v6 = vpack.i.bf16 %v2075_v54, %v2072_v47 }
 0x65b   : > { %v2188_v20 = vpack.c.bf16 %v2077_v9, %v2077_v9  ;;  %v4468_v21 = vpack.i.bf16 %v2077_v9, %v2074_v18  ;;  %v2187_v23 = vpack.c.bf16 %v2076_v11, %v2075_v54  ;;  %v4508_v24 = vpack.i.bf16 %v2076_v11, %v2073_v48 }
 0x65c   : > { %4504 = vrot.lane.b32.xlu2 %v4503_v6, %s4745_s19 }
 0x65d   : > { %2192 = vst [vmem:[#allocation2 + $0x74] sm:$0xf] %v2188_v20  ;;  %4469 = vrot.lane.b32.xlu1 %v4468_v21, %s4745_s19  ;;  %4509 = vrot.lane.b32.xlu0 %v4508_v24, %s4745_s19 }
 0x65e   : > { %2191 = vst [vmem:[#allocation2 + $0x6c] sm:$0xff] %v2187_v23 }
 0x664   : > { %4514 = vrot.lane.b32.xlu2 %v4503_v6, %s4746_s20 }
 0x665   : > { %4474 = vrot.lane.b32.xlu1 %v4468_v21, %s4746_s20  ;;  %4519 = vrot.lane.b32.xlu0 %v4508_v24, %s4746_s20 }
 0x66c   : > { %4524 = vrot.lane.b32.xlu2 %v4503_v6, %s4747_s21 }
 0x66d   : > { %4479 = vrot.lane.b32.xlu1 %v4468_v21, %s4747_s21  ;;  %4529 = vrot.lane.b32.xlu0 %v4508_v24, %s4747_s21 }
 0x674   : > { %4534 = vrot.lane.b32.xlu2 %v4503_v6, %s4749_s23 }
 0x675   : > { %4484 = vrot.lane.b32.xlu1 %v4468_v21, %s4749_s23  ;;  %4539 = vrot.lane.b32.xlu0 %v4508_v24, %s4749_s23 }
 0x67c   : > { %4544 = vrot.lane.b32.xlu2 %v4503_v6, %s4750_s24 }
 0x67d   : > { %4489 = vrot.lane.b32.xlu1 %v4468_v21, %s4750_s24  ;;  %4549 = vrot.lane.b32.xlu0 %v4508_v24, %s4750_s24 }
 0x684   : > { %4554 = vrot.lane.b32.xlu2 %v4503_v6, %s4751_s25 }
 0x685   : > { %4494 = vrot.lane.b32.xlu1 %v4468_v21, %s4751_s25  ;;  %4559 = vrot.lane.b32.xlu0 %v4508_v24, %s4751_s25 }
 0x68c   : > { %4564 = vrot.lane.b32.xlu2 %v4503_v6, %s4748_s22 }
 0x68d   : > { %4499 = vrot.lane.b32.xlu1 %v4468_v21, %s4748_s22  ;;  %4569 = vrot.lane.b32.xlu0 %v4508_v24, %s4748_s22 }
 0x694   : > { %4574 = vrot.lane.b32.xlu2 %v4503_v6, %s4752_s26 }
 0x695   : > { %4584 = vrot.lane.b32.xlu1 %v4468_v21, %s4752_s26  ;;  %4579 = vrot.lane.b32.xlu0 %v4508_v24, %s4752_s26 }
 0x69d   : > { %2338 = vperm.xlu0 %4226, %v3691_v22  }
 0x6b6   : > { %v4505_v25 = vpop.permute.xlu2 %4504 }
 0x6b7   : > { %v4507_v27 = vunpack.i.h.bf16 %v4505_v25  ;;  %v4506_v30 = vunpack.i.l.bf16 %v4505_v25 }
 0x6be   : > { %v4515_v13 = vpop.permute.xlu2 %4514 }
 0x6bf   : > { %v4517_v3 = vunpack.i.h.bf16 %v4515_v13  ;;  %v4516_v44 = vunpack.i.l.bf16 %v4515_v13 }
 0x6c6   : > { %v5537_v35 = vpop.permute.xlu2 %4524 }
 0x6c7   : > { %v4527_v63 = vunpack.i.h.bf16 %v5537_v35  ;;  %v4526_v4 = vunpack.i.l.bf16 %v5537_v35 }
 0x6ce   : > { %v5559_v51 = vpop.permute.xlu2 %4534 }
 0x6cf   : > { %v4470_v1 = vpop.permute.xlu1 %4469  ;;  %v4510_v62 = vpop.permute.xlu0 %4509 }
 0x6d0   : > { %v4472_v7 = vunpack.i.h.bf16 %v4470_v1  ;;  %v4471_v10 = vunpack.i.l.bf16 %v4470_v1  ;;  %v4512_v8 = vunpack.i.h.bf16 %v4510_v62  ;;  %v4511_v34 = vunpack.i.l.bf16 %v4510_v62 }
 0x6d2   : > { %v2261_v19 = vsel %vm554_vm0, %v4471_v10, %v4506_v30  ;;  %v2262_v0 = vsel %vm554_vm0, %v4472_v7, %v4507_v27  ;;  %v2258_v29 = vsel %vm554_vm0, %v4512_v8, %v4472_v7  ;;  %v2260_v36 = vsel %vm554_vm0, %v4507_v27, %v4512_v8 }
 0x6d3   : > { %v2264_v14 = vpack.c.bf16 %v2261_v19, %v2261_v19  ;;  %v2266_v17 = vpack.c.bf16 %v2262_v0, %v2262_v0  ;;  %v2265_v37 = vpack.c.bf16 %v2258_v29, %v2260_v36  ;;  %v2257_v39 = vsel %vm554_vm0, %v4511_v34, %v4471_v10 }
 0x6d4   : > { %v2259_v40 = vsel %vm554_vm0, %v4506_v30, %v4511_v34 }
 0x6d5   : > { %2268 = vst [vmem:[#allocation2 + $0xb0] sm:$0xf] %v2264_v14  ;;  %v2263_v41 = vpack.c.bf16 %v2257_v39, %v2259_v40  ;;  %v4537_v14 = vunpack.i.h.bf16 %v5559_v51 }
 0x6d6   : > { %2270 = vst [vmem:[#allocation2 + $0xbc] sm:$0xf] %v2266_v17  ;;  %v4545_v35 = vpop.permute.xlu2 %4544  ;;  %v4536_v17 = vunpack.i.l.bf16 %v5559_v51  ;;  %v4045_v51 = vld [vmem:[#allocation2 + $0x68] sm:$0xf0] }
 0x6d7   : > { %2269 = vst [vmem:[#allocation2 + $0xb4] sm:$0xff] %v2265_v37  ;;  %v4475_v42 = vpop.permute.xlu1 %4474  ;;  %v4520_v18 = vpop.permute.xlu0 %4519 }
 0x6d8   : > { %2267 = vst [vmem:[#allocation2 + $0xa8] sm:$0xff] %v2263_v41  ;;  %v4477_v59 = vunpack.i.h.bf16 %v4475_v42  ;;  %v4476_v15 = vunpack.i.l.bf16 %v4475_v42  ;;  %v4522_v28 = vunpack.i.h.bf16 %v4520_v18  ;;  %v4521_v47 = vunpack.i.l.bf16 %v4520_v18 }
 0x6da   : > { %v2235_v48 = vsel %vm527_vm1, %v4476_v15, %v4516_v44  ;;  %v2236_v49 = vsel %vm527_vm1, %v4477_v59, %v4517_v3  ;;  %v2232_v53 = vsel %vm527_vm1, %v4522_v28, %v4477_v59  ;;  %v2234_v55 = vsel %vm527_vm1, %v4517_v3, %v4522_v28 }
 0x6db   : > { %v2238_v50 = vpack.c.bf16 %v2235_v48, %v2235_v48  ;;  %v2240_v52 = vpack.c.bf16 %v2236_v49, %v2236_v49  ;;  %v2239_v32 = vpack.c.bf16 %v2232_v53, %v2234_v55  ;;  %v2231_v56 = vsel %vm527_vm1, %v4521_v47, %v4476_v15 }
 0x6dc   : > { %v2233_v60 = vsel %vm527_vm1, %v4516_v44, %v4521_v47 }
 0x6dd   : > { %2242 = vst [vmem:[#allocation2 + $0x98] sm:$0xf] %v2238_v50  ;;  %v2237_v61 = vpack.c.bf16 %v2231_v56, %v2233_v60  ;;  %v4547_v60 = vunpack.i.h.bf16 %v4545_v35 }
 0x6de   : > { %2244 = vst [vmem:[#allocation2 + $0xa4] sm:$0xf] %v2240_v52  ;;  %v4054_v58 = vld [vmem:[#allocation2 + $0xb0] sm:$0xf0]  ;;  %v3789_v57 = vld [vmem:[#allocation2 + $0xb4] sm:$0xf0] }
 0x6df   : > { %2243 = vst [vmem:[#allocation2 + $0x9c] sm:$0xff] %v2239_v32  ;;  %v4480_v5 = vpop.permute.xlu1 %4479  ;;  %v3787_v9 = vld [vmem:[#allocation2 + $0xa8] sm:$0xf]  ;;  %v4053_v54 = vld [vmem:[#allocation2 + $0xac] sm:$0xf]  ;;  %v4530_v21 = vpop.permute.xlu0 %4529 }
 0x6e0   : > { %2241 = vst [vmem:[#allocation2 + $0x90] sm:$0xff] %v2237_v61  ;;  %v4482_v11 = vunpack.i.h.bf16 %v4480_v5  ;;  %v4481_v20 = vunpack.i.l.bf16 %v4480_v5  ;;  %v3788_v23 = vor.u32 %v4054_v58, %v3787_v9  ;;  %v3792_v6 = vor.u32 %v4053_v54, %v3789_v57 }
 0x6e1   : > { %v4532_v24 = vunpack.i.h.bf16 %v4530_v21  ;;  %v4531_v22 = vunpack.i.l.bf16 %v4530_v21  ;;  %v4546_v61 = vunpack.i.l.bf16 %v4545_v35 }
 0x6e2   : > { %v2209_v25 = vsel %vm500_vm2, %v4481_v20, %v4526_v4  ;;  %v2210_v13 = vsel %vm500_vm2, %v4482_v11, %v4527_v63  ;;  %2502 = vmatpush.bf16.msrb.mxu2 %v3788_v23  ;;  %2530 = vmatpush.bf16.msrb.mxu0 %v3792_v6  ;;  %v3751_v6 = vld [vmem:[#allocation2 + $0x60] sm:$0xf] }
 0x6e3   : > { %v2212_v1 = vpack.c.bf16 %v2209_v25, %v2209_v25  ;;  %v2214_v27 = vpack.c.bf16 %v2210_v13, %v2210_v13  ;;  %v2206_v30 = vsel %vm500_vm2, %v4532_v24, %v4482_v11  ;;  %v2208_v7 = vsel %vm500_vm2, %v4527_v63, %v4532_v24  ;;  %v3753_v24 = vld [vmem:[#allocation2 + $0x6c] sm:$0xf0] }
 0x6e4   : > { %v2213_v10 = vpack.c.bf16 %v2206_v30, %v2208_v7  ;;  %v2205_v62 = vsel %vm500_vm2, %v4531_v22, %v4481_v20  ;;  %v2207_v8 = vsel %vm500_vm2, %v4526_v4, %v4531_v22  ;;  %v4555_v4 = vpop.permute.xlu2 %4554  ;;  %v3752_v13 = vor.u32 %v4045_v51, %v3751_v6 }
 0x6e5   : > { %2216 = vst [vmem:[#allocation2 + $0x80] sm:$0xf] %v2212_v1  ;;  %v2211_v34 = vpack.c.bf16 %v2205_v62, %v2207_v8 }
 0x6e6   : > { %2218 = vst [vmem:[#allocation2 + $0x8c] sm:$0xf] %v2214_v27  ;;  %v4051_v19 = vld [vmem:[#allocation2 + $0x98] sm:$0xf0]  ;;  %v3777_v0 = vld [vmem:[#allocation2 + $0x9c] sm:$0xf0] }
 0x6e7   : > { %2217 = vst [vmem:[#allocation2 + $0x84] sm:$0xff] %v2213_v10  ;;  %v4485_v29 = vpop.permute.xlu1 %4484  ;;  %v3775_v36 = vld [vmem:[#allocation2 + $0x90] sm:$0xf]  ;;  %v4050_v37 = vld [vmem:[#allocation2 + $0x94] sm:$0xf]  ;;  %v4540_v41 = vpop.permute.xlu0 %4539 }
 0x6e8   : > { %2215 = vst [vmem:[#allocation2 + $0x78] sm:$0xff] %v2211_v34  ;;  %v4487_v39 = vunpack.i.h.bf16 %v4485_v29  ;;  %v4486_v40 = vunpack.i.l.bf16 %v4485_v29  ;;  %v3776_v42 = vor.u32 %v4051_v19, %v3775_v36  ;;  %v3780_v3 = vor.u32 %v4050_v37, %v3777_v0  ;;  %v4044_v10 = vld [vmem:[#allocation2 + $0x64] sm:$0xf] }
 0x6e9   : > { %v4542_v44 = vunpack.i.h.bf16 %v4540_v41  ;;  %v4541_v59 = vunpack.i.l.bf16 %v4540_v41  ;;  %v3756_v35 = vor.u32 %v4044_v10, %v3753_v24  ;;  %v4556_v29 = vunpack.i.l.bf16 %v4555_v4 }
 0x6ea   : > { %v2175_v15 = vsel %vm465_vm4, %v4486_v40, %v4536_v17  ;;  %v2176_v18 = vsel %vm465_vm4, %v4487_v39, %v4537_v14  ;;  %2503 = vmatpush.bf16.msrb.mxu2 %v3776_v42  ;;  %2531 = vmatpush.bf16.msrb.mxu0 %v3780_v3 }
 0x6eb   : > { %v2172_v28 = vsel %vm465_vm4, %v4542_v44, %v4487_v39  ;;  %v2174_v47 = vsel %vm465_vm4, %v4537_v14, %v4542_v44  ;;  %v2171_v48 = vsel %vm465_vm4, %v4541_v59, %v4486_v40  ;;  %v2173_v49 = vsel %vm465_vm4, %v4536_v17, %v4541_v59 }
 0x6ec   : > { %v2179_v50 = vpack.c.bf16 %v2174_v47, %v2176_v18  ;;  %v2180_v52 = vpack.c.bf16 %v2172_v28, %v2172_v28  ;;  %v2177_v53 = vpack.c.bf16 %v2173_v49, %v2175_v15  ;;  %v2178_v55 = vpack.c.bf16 %v2171_v48, %v2171_v48  ;;  %v4565_v18 = vpop.permute.xlu2 %4564 }
 0x6ed   : > { %v4557_v17 = vunpack.i.h.bf16 %v4555_v4 }
 0x6ee   : > { %2183 = vst [vmem:[#allocation2 + $0x54] sm:$0xff] %v2179_v50  ;;  %v4048_v32 = vld [vmem:[#allocation2 + $0x80] sm:$0xf0]  ;;  %v3765_v56 = vld [vmem:[#allocation2 + $0x84] sm:$0xf0] }
 0x6ef   : > { %2184 = vst [vmem:[#allocation2 + $0x5c] sm:$0xf] %v2180_v52  ;;  %v4490_v58 = vpop.permute.xlu1 %4489  ;;  %v3763_v57 = vld [vmem:[#allocation2 + $0x78] sm:$0xf]  ;;  %v4047_v63 = vld [vmem:[#allocation2 + $0x7c] sm:$0xf]  ;;  %v4550_v54 = vpop.permute.xlu0 %4549 }
 0x6f0   : > { %2181 = vst [vmem:[#allocation2 + $0x48] sm:$0xff] %v2177_v53  ;;  %v4492_v5 = vunpack.i.h.bf16 %v4490_v58  ;;  %v4491_v9 = vunpack.i.l.bf16 %v4490_v58  ;;  %v3764_v11 = vor.u32 %v4048_v32, %v3763_v57  ;;  %v3768_v20 = vor.u32 %v4047_v63, %v3765_v56 }
 0x6f1   : > { %2182 = vst [vmem:[#allocation2 + $0x50] sm:$0xf] %v2178_v55  ;;  %v4552_v21 = vunpack.i.h.bf16 %v4550_v54  ;;  %v4551_v23 = vunpack.i.l.bf16 %v4550_v54  ;;  %v4566_v58 = vunpack.i.l.bf16 %v4565_v18 }
 0x6f2   : > { %v2149_v22 = vsel %vm438_vm5, %v4491_v9, %v4546_v61  ;;  %v2150_v25 = vsel %vm438_vm5, %v4492_v5, %v4547_v60  ;;  %2504 = vmatpush.bf16.msrb.mxu2 %v3764_v11  ;;  %2532 = vmatpush.bf16.msrb.mxu0 %v3768_v20 }
 0x6f3   : > { %v2146_v1 = vsel %vm438_vm5, %v4552_v21, %v4492_v5  ;;  %v2148_v27 = vsel %vm438_vm5, %v4547_v60, %v4552_v21  ;;  %v2145_v30 = vsel %vm438_vm5, %v4551_v23, %v4491_v9  ;;  %v2147_v7 = vsel %vm438_vm5, %v4546_v61, %v4551_v23 }
 0x6f4   : > { %v2153_v62 = vpack.c.bf16 %v2148_v27, %v2150_v25  ;;  %v2154_v8 = vpack.c.bf16 %v2146_v1, %v2146_v1  ;;  %v2151_v34 = vpack.c.bf16 %v2147_v7, %v2149_v22  ;;  %v2152_v19 = vpack.c.bf16 %v2145_v30, %v2145_v30  ;;  %v4575_v27 = vpop.permute.xlu2 %4574 }
 0x6f5   : > { %v4042_v0 = vld [vmem:[#allocation2 + $0x50] sm:$0xf0]  ;;  %v3741_v14 = vld [vmem:[#allocation2 + $0x54] sm:$0xf0]  ;;  %v4567_v61 = vunpack.i.h.bf16 %v4565_v18 }
 0x6f6   : > { %2157 = vst [vmem:[#allocation2 + $0x3c] sm:$0xff] %v2153_v62  ;;  %2505 = vmatpush.bf16.msrb.mxu2 %v3752_v13  ;;  %2533 = vmatpush.bf16.msrb.mxu0 %v3756_v35  ;;  %v4577_v35 = vunpack.i.h.bf16 %v4575_v27 }
 0x6f7   : > { %2158 = vst [vmem:[#allocation2 + $0x44] sm:$0xf] %v2154_v8  ;;  %v4495_v36 = vpop.permute.xlu1 %4494  ;;  %v3739_v37 = vld [vmem:[#allocation2 + $0x48] sm:$0xf]  ;;  %v4041_v39 = vld [vmem:[#allocation2 + $0x4c] sm:$0xf]  ;;  %v4560_v42 = vpop.permute.xlu0 %4559 }
 0x6f8   : > { %2155 = vst [vmem:[#allocation2 + $0x30] sm:$0xff] %v2151_v34  ;;  %v4497_v40 = vunpack.i.h.bf16 %v4495_v36  ;;  %v4496_v41 = vunpack.i.l.bf16 %v4495_v36  ;;  %v3740_v3 = vor.u32 %v4042_v0, %v3739_v37  ;;  %v3744_v44 = vor.u32 %v4041_v39, %v3741_v14 }
 0x6f9   : > { %2156 = vst [vmem:[#allocation2 + $0x38] sm:$0xf] %v2152_v19  ;;  %v4562_v59 = vunpack.i.h.bf16 %v4560_v42  ;;  %v4561_v15 = vunpack.i.l.bf16 %v4560_v42  ;;  %v4576_v19 = vunpack.i.l.bf16 %v4575_v27 }
 0x6fa   : > { %v2123_v28 = vsel %vm411_vm7, %v4496_v41, %v4556_v29  ;;  %v2124_v47 = vsel %vm411_vm7, %v4497_v40, %v4557_v17  ;;  %2506 = vmatpush.bf16.msrb.mxu2 %v3740_v3  ;;  %2534 = vmatpush.bf16.msrb.mxu0 %v3744_v44 }
 0x6fb   : > { %v2120_v48 = vsel %vm411_vm7, %v4562_v59, %v4497_v40  ;;  %v2122_v49 = vsel %vm411_vm7, %v4557_v17, %v4562_v59  ;;  %v2119_v50 = vsel %vm411_vm7, %v4561_v15, %v4496_v41  ;;  %v2121_v52 = vsel %vm411_vm7, %v4556_v29, %v4561_v15 }
 0x6fc   : > { %v2127_v53 = vpack.c.bf16 %v2122_v49, %v2124_v47  ;;  %v2128_v55 = vpack.c.bf16 %v2120_v48, %v2120_v48  ;;  %v2125_v51 = vpack.c.bf16 %v2121_v52, %v2123_v28  ;;  %v2126_v32 = vpack.c.bf16 %v2119_v50, %v2119_v50  ;;  %v3795_v50 = vld [vmem:[#allocation2 + $0xb0] sm:$0xf] }
 0x6fd   : > { %v4039_v56 = vld [vmem:[#allocation2 + $0x38] sm:$0xf0]  ;;  %v3729_v60 = vld [vmem:[#allocation2 + $0x3c] sm:$0xf0] }
 0x6fe   : > { %2131 = vst [vmem:[#allocation2 + $0x24] sm:$0xff] %v2127_v53  ;;  %v4055_v53 = vld [vmem:[#allocation2 + $0xb8] sm:$0xf0] }
 0x6ff   : > { %2132 = vst [vmem:[#allocation2 + $0x2c] sm:$0xf] %v2128_v55  ;;  %v4500_v57 = vpop.permute.xlu1 %4499  ;;  %v3727_v63 = vld [vmem:[#allocation2 + $0x30] sm:$0xf]  ;;  %v4038_v4 = vld [vmem:[#allocation2 + $0x34] sm:$0xf]  ;;  %v4570_v54 = vpop.permute.xlu0 %4569 }
 0x700   : > { %2129 = vst [vmem:[#allocation2 + $0x18] sm:$0xff] %v2125_v51  ;;  %v4502_v5 = vunpack.i.h.bf16 %v4500_v57  ;;  %v4501_v9 = vunpack.i.l.bf16 %v4500_v57  ;;  %v3728_v11 = vor.u32 %v4039_v56, %v3727_v63  ;;  %v3732_v20 = vor.u32 %v4038_v4, %v3729_v60  ;;  %v4030_v55 = vld [vmem:[%s5986_s1 + $0x34] sm:$0xf]  ;;  %v3697_v51 = vld [vmem:[%s5986_s1 + $0x38] sm:$0xf0] }
 0x701   : > { %2130 = vst [vmem:[#allocation2 + $0x20] sm:$0xf] %v2126_v32  ;;  %v4572_v21 = vunpack.i.h.bf16 %v4570_v54  ;;  %v4571_v23 = vunpack.i.l.bf16 %v4570_v54  ;;  %v3796_v63 = vor.u32 %v4055_v53, %v3795_v50  ;;  %v3700_v4 = vor.u32 %v4030_v55, %v3697_v51  ;;  %v3692_v54 = vld [vmem:[%s5987_s2 + $0x38] sm:$0xff] }
 0x702   : > { %v2287_v6 = vsel %vm581_vm3, %v4501_v9, %v4566_v58  ;;  %v2288_v24 = vsel %vm581_vm3, %v4502_v5, %v4567_v61  ;;  %2507 = vmatpush.bf16.msrb.mxu2 %v3728_v11  ;;  %2535 = vmatpush.bf16.msrb.mxu0 %v3732_v20  ;;  %v3771_v11 = vld [vmem:[#allocation2 + $0x80] sm:$0xf]  ;;  %v4049_v20 = vld [vmem:[#allocation2 + $0x88] sm:$0xf0] }
 0x703   : > { %v2290_v22 = vpack.c.bf16 %v2287_v6, %v2287_v6  ;;  %v2292_v25 = vpack.c.bf16 %v2288_v24, %v2288_v24  ;;  %v2284_v13 = vsel %vm581_vm3, %v4572_v21, %v4502_v5  ;;  %v2286_v1 = vsel %vm581_vm3, %v4567_v61, %v4572_v21  ;;  %v3783_v5 = vld [vmem:[#allocation2 + $0x98] sm:$0xf]  ;;  %2343 = vperm.xlu2 %4588, %v3692_v54   ;;  %v3695_v24 = vld [vmem:[%s5986_s1 + $0x30] sm:$0xf] }
 0x704   : > { %v2291_v30 = vpack.c.bf16 %v2284_v13, %v2286_v1  ;;  %v2283_v7 = vsel %vm581_vm3, %v4571_v23, %v4501_v9  ;;  %v2285_v10 = vsel %vm581_vm3, %v4566_v58, %v4571_v23  ;;  %v4052_v9 = vld [vmem:[#allocation2 + $0xa0] sm:$0xf0]  ;;  %v4031_v13 = vld [vmem:[%s5986_s1 + $0x34] sm:$0xf0] }
 0x705   : > { %2294 = vst [vmem:[#allocation2 + $0xc8] sm:$0xf] %v2290_v22  ;;  %v2289_v62 = vpack.c.bf16 %v2283_v7, %v2285_v10  ;;  %v4036_v8 = vld [vmem:[#allocation2 + $0x20] sm:$0xf0]  ;;  %v3717_v34 = vld [vmem:[#allocation2 + $0x24] sm:$0xf0]  ;;  %v3784_v21 = vor.u32 %v4052_v9, %v3783_v5  ;;  %v3772_v10 = vor.u32 %v4049_v20, %v3771_v11 }
 0x706   : > { %2296 = vst [vmem:[#allocation2 + $0xd4] sm:$0xf] %v2292_v25 }
 0x707   : > { %2295 = vst [vmem:[#allocation2 + $0xcc] sm:$0xff] %v2291_v30  ;;  %v4585_v0 = vpop.permute.xlu1 %4584  ;;  %v3715_v14 = vld [vmem:[#allocation2 + $0x18] sm:$0xf]  ;;  %v4035_v17 = vld [vmem:[#allocation2 + $0x1c] sm:$0xf]  ;;  %v4580_v37 = vpop.permute.xlu0 %4579 }
 0x708   : > { %2293 = vst [vmem:[#allocation2 + $0xc0] sm:$0xff] %v2289_v62  ;;  %v4587_v29 = vunpack.i.h.bf16 %v4585_v0  ;;  %v4586_v36 = vunpack.i.l.bf16 %v4585_v0  ;;  %v3716_v39 = vor.u32 %v4036_v8, %v3715_v14  ;;  %v3720_v40 = vor.u32 %v4035_v17, %v3717_v34  ;;  %v4046_v34 = vld [vmem:[#allocation2 + $0x70] sm:$0xf0]  ;;  %v3747_v0 = vld [vmem:[#allocation2 + $0x50] sm:$0xf] }
 0x709   : > { %v4582_v41 = vunpack.i.h.bf16 %v4580_v37  ;;  %v4581_v42 = vunpack.i.l.bf16 %v4580_v37  ;;  %v3696_v8 = vor.u32 %v4031_v13, %v3695_v24  ;;  %v4043_v14 = vld [vmem:[#allocation2 + $0x58] sm:$0xf0] }
 0x70a   : > { %v2097_v3 = vsel %vm384_vm8, %v4586_v36, %v4576_v19  ;;  %v2098_v44 = vsel %vm384_vm8, %v4587_v29, %v4577_v35  ;;  %2508 = vmatpush.bf16.msrb.mxu2 %v3716_v39  ;;  %2536 = vmatpush.bf16.msrb.mxu0 %v3720_v40  ;;  %v3748_v17 = vor.u32 %v4043_v14, %v3747_v0  ;;  %v3723_v39 = vld [vmem:[#allocation2 + $0x20] sm:$0xf]  ;;  %v4037_v40 = vld [vmem:[#allocation2 + $0x28] sm:$0xf0] }
 0x70b   : > { %v2094_v59 = vsel %vm384_vm8, %v4582_v41, %v4587_v29  ;;  %v2096_v15 = vsel %vm384_vm8, %v4577_v35, %v4582_v41  ;;  %v2093_v18 = vsel %vm384_vm8, %v4581_v42, %v4586_v36  ;;  %v2095_v28 = vsel %vm384_vm8, %v4576_v19, %v4581_v42  ;;  %v3759_v35 = vld [vmem:[#allocation2 + $0x68] sm:$0xf]  ;;  %v3735_v29 = vld [vmem:[#allocation2 + $0x38] sm:$0xf]  ;;  %v4040_v36 = vld [vmem:[#allocation2 + $0x40] sm:$0xf0] }
 0x70c   : > { %v2101_v47 = vpack.c.bf16 %v2096_v15, %v2098_v44  ;;  %v2102_v48 = vpack.c.bf16 %v2094_v59, %v2094_v59  ;;  %v2099_v49 = vpack.c.bf16 %v2095_v28, %v2097_v3  ;;  %v2100_v52 = vpack.c.bf16 %v2093_v18, %v2093_v18  ;;  %v3807_v22 = vld [vmem:[#allocation2 + $0xc8] sm:$0xf] }
 0x70d   : > { %v4058_v25 = vld [vmem:[#allocation2 + $0xd0] sm:$0xf0]  ;;  %v3760_v19 = vor.u32 %v4046_v34, %v3759_v35  ;;  %v3736_v37 = vor.u32 %v4040_v36, %v3735_v29  ;;  %v3724_v41 = vor.u32 %v4037_v40, %v3723_v39  ;;  %v3812_v35 = vld [vmem:[%s5988_s3 + $0x4] sm:$0xf]  ;;  %v3816_v36 = vld [vmem:[%s5990_s5 + $0x18] sm:$0xff] }
 0x70e   : > { %2105 = vst [vmem:[#allocation2 + $0xc] sm:$0xff] %v2101_v47  ;;  %v4057_v32 = vld [vmem:[#allocation2 + $0xc8] sm:$0xf0]  ;;  %v3801_v56 = vld [vmem:[#allocation2 + $0xcc] sm:$0xf0]  ;;  %v3808_v62 = vor.u32 %v4058_v25, %v3807_v22 }
 0x70f   : > { %2106 = vst [vmem:[#allocation2 + $0x14] sm:$0xf] %v2102_v48  ;;  %v3799_v60 = vld [vmem:[#allocation2 + $0xc0] sm:$0xf]  ;;  %v4056_v61 = vld [vmem:[#allocation2 + $0xc4] sm:$0xf]  ;;  %v2339_v47 = vpop.permute.xlu0 %2338 }
 0x710   : > { %2103 = vst [vmem:[#allocation2] sm:$0xff] %v2099_v49  ;;  %v3800_v58 = vor.u32 %v4057_v32, %v3799_v60  ;;  %v3804_v57 = vor.u32 %v4056_v61, %v3801_v56  ;;  %v3815_v29 = vld [vmem:[%s5990_s5 + $0x10] sm:$0xff] }
 0x711   : > { %2104 = vst [vmem:[#allocation2 + $0x8] sm:$0xf] %v2100_v52 }
 0x712   : > { %2523 = vmatpush.bf16.msra.mxu3 %v3800_v58  ;;  %2551 = vmatpush.bf16.msra.mxu1 %v3804_v57 }
 0x715   : > { %v4033_v23 = vld [vmem:[#allocation2 + $0x8] sm:$0xf0]  ;;  %3809 = vmatmul.msk.bf16.vlgmr.msra.gmra.mxu3 %vm5998_vm6, %v3700_v4  ;;  %v3705_v6 = vld [vmem:[#allocation2 + $0xc] sm:$0xf0]  ;;  %3810 = vmatmul.msk.bf16.vlgmr.msra.gmra.mxu1 %vm5998_vm6, %v3700_v4 }
 0x716   : > { %2558 = vmatpush.bf16.msrb.mxu3 %v3796_v63  ;;  %v4034_v3 = vld [vmem:[#allocation2 + $0x10] sm:$0xf0] }
 0x717   : > { %v3703_v1 = vld [vmem:[#allocation2] sm:$0xf]  ;;  %v4032_v27 = vld [vmem:[#allocation2 + $0x4] sm:$0xf] }
 0x718   : > { %v3704_v30 = vor.u32 %v4033_v23, %v3703_v1  ;;  %v3708_v7 = vor.u32 %v4032_v27, %v3705_v6  ;;  %v3711_v42 = vld [vmem:[#allocation2 + $0x8] sm:$0xf] }
 0x719   : > { %v3712_v44 = vor.u32 %v4034_v3, %v3711_v42  ;;  %v3818_v3 = vld [vmem:[%s5991_s6 + $0x18] sm:$0xff] }
 0x71a   : > { %2559 = vmatpush.bf16.msrb.mxu3 %v3784_v21  ;;  %2509 = vmatpush.bf16.msrb.mxu2 %v3704_v30 }
 0x71b   : > { %2537 = vmatpush.bf16.msrb.mxu0 %v3708_v7 }
 0x71d   : > { %2510 = vmatmul.bf16.vlgmr.msrb.gmra.mxu2 %v3696_v8 }
 0x71e   : > { %2560 = vmatpush.bf16.msrb.mxu3 %v3772_v10  ;;  %2579 = vmatpush.bf16.msra.mxu2 %v3808_v62 }
 0x71f   : > { %2538 = vmatmul.bf16.vlgmr.msrb.gmra.mxu0 %v3696_v8 }
 0x722   : > { %2561 = vmatpush.bf16.msrb.mxu3 %v3760_v19  ;;  %v3813_v19 = vld [vmem:[%s5989_s4 + $0x4] sm:$0xf] }
 0x726   : > { %2562 = vmatpush.bf16.msrb.mxu3 %v3748_v17 }
 0x72a   : > { %2563 = vmatpush.bf16.msrb.mxu3 %v3736_v37  ;;  %v3817_v37 = vld [vmem:[%s5991_s6 + $0x10] sm:$0xff] }
 0x72d   : > { %3811 = vmatmul.msk.bf16.vlgmr.msra.gmra.mxu2 %vm5998_vm6, %v3700_v4 }
 0x72e   : > { %2564 = vmatpush.bf16.msrb.mxu3 %v3724_v41 }
 0x732   : > { %2565 = vmatpush.bf16.msrb.mxu3 %v3712_v44 }
 0x735   : > { %2566 = vmatmul.bf16.vlgmr.msrb.gmra.mxu3 %v3696_v8 }
 0x75d   : > { %v2344_v55 = vpop.permute.xlu2 %2343 }
 0x792   : > { %v2553_v50 = vpop.f32.mrf.mxu1 }
 0x798   : > { %v2525_v15 = vpop.f32.mrf.mxu3 }
 0x79a   : > { %v2555_v4 = vpop.f32.mrf.mxu1 }
 0x79c   : > { %v2539_v18 = vpop.f32.mrf.mxu0 }
 0x79d   : > { %v2540_v52 = vadd.f32 %v2539_v18, %v2339_v47 }
 0x79f   : > { %v5661_v32 = vadd.f32 %v2553_v50, %v2540_v52 }
 0x7a0   : > { %v2511_v59 = vpop.f32.mrf.mxu2  ;;  %v2527_v48 = vpop.f32.mrf.mxu3 }
 0x7a1   : > { %v2512_v49 = vadd.f32 %v2511_v59, %v2339_v47  ;;  %v2587_v5 = vmul.f32 %v5661_v32, %v5043_v38 }
 0x7a3   : > { %v5659_v53 = vadd.f32 %v2525_v15, %v2512_v49 }
 0x7a4   : > { %v2541_v51 = vpop.f32.mrf.mxu0 }
 0x7a5   : > { %v2586_v61 = vmul.f32 %v5659_v53, %v5041_v33  ;;  %v2542_v57 = vadd.f32 %v2541_v51, %v2344_v55 }
 0x7a7   : > { %v5671_v11 = vadd.f32 %v2555_v4, %v2542_v57  ;;  %v2592_v21 = vadd.f32 %v2587_v5, %v2586_v61 }
 0x7a8   : > { %v2513_v28 = vpop.f32.mrf.mxu2 }
 0x7a9   : > { %v2514_v58 = vadd.f32 %v2513_v28, %v2344_v55  ;;  %v2590_v22 = vmul.f32 %v5671_v11, %v5043_v38 }
 0x7ab   : > { %v5669_v54 = vadd.f32 %v2527_v48, %v2514_v58 }
 0x7ad   : > { %v2589_v24 = vmul.f32 %v5669_v54, %v5041_v33 }
 0x7af   : > { %v2596_v30 = vadd.f32 %v2590_v22, %v2589_v24 }
 0x7b0   : > { %v2581_v56 = vpop.f32.mrf.mxu2 }
 0x7b8   : > { %v2567_v60 = vpop.f32.mrf.mxu3  ;;  %v2583_v13 = vpop.f32.mrf.mxu2 }
 0x7b9   : > { %v2568_v63 = vadd.f32 %v2567_v60, %v2339_v47 }
 0x7bb   : > { %v5667_v9 = vadd.f32 %v2581_v56, %v2568_v63 }
 0x7bd   : > { %v2588_v20 = vmul.f32 %v5667_v9, %v5038_v16 }
 0x7bf   : > { %v2593_v23 = vadd.f32 %v2592_v21, %v2588_v20 }
 0x7c0   : > { %v2569_v6 = vpop.f32.mrf.mxu3 }
 0x7c1   : > { %v2570_v25 = vadd.f32 %v2569_v6, %v2344_v55  ;;  %2594 = vadd.xlane.f32.xlu2 %v2593_v23 }
 0x7c3   : > { %v5679_v1 = vadd.f32 %v2583_v13, %v2570_v25 }
 0x7c5   : > { %v2591_v27 = vmul.f32 %v5679_v1, %v5038_v16 }
 0x7c7   : > { %v2597_v7 = vadd.f32 %v2596_v30, %v2591_v27 }
 0x7c9   : > { %2598 = vadd.xlane.f32.xlu1 %v2597_v7 }
 0x834   : > { %v2595_v10 = vpop.xlane.xlu2 %2594 }
 0x835   : > { %v2600_v34 = vmul.f32 0.00390625, %v2595_v10 }
 0x83c   : > { %v2599_v62 = vpop.xlane.xlu1 %2598 }
 0x83d   : > { %v2601_v8 = vmul.f32 0.00390625, %v2599_v62 }
 0x83f   : > { %2623 = vmatpush.msrb.mxu1 %v2601_v8 }
 0x841   : > { %2624 = vmatpush.msrb.mxu1 %v2600_v34 }
 0x842   : > { %3814 = vmatmul.msk.f32.vlgmr.msrb.gmra.mxu1 %vm5998_vm6, %v3812_v35 }
 0x8bf   : > { %v2626_v0 = vpop.f32.mrf.mxu1 }
 0x8c0   : > { %v2627_v14 = vadd.f32 %v3813_v19, %v2626_v0 }
 0x8c2   : > { %v2629_v17 = vmax.f32 %v2627_v14, 0.0 }
 0x8c4   : > { %3819 = vmatpush.msk.msra.mxu1 %vm5999_vm9, %v2629_v17 }
 0x8c5   : > { %3820 = vmatmul.msk.f32.vlgmr.msra.gmra.mxu1 %vm6000_vm10, %v3815_v29 }
 0x8cd   : > { %3821 = vmatmul.msk.f32.gmra.mxu1 %vm6001_vm12, %v3816_v36 }
 0x942   : > { %v2662_v39 = vpop.f32.mrf.mxu1 }
 0x943   : > { %v2663_v40 = vadd.f32 %v3817_v37, %v2662_v39 }
 0x945   : > { %v2668_v41 = vsub.f32 0.0, %v2663_v40 }
 0x947   : > { %v2670_v42 = vmul.f32 1.442695, %v2668_v41 }
 0x949   : > { %4717 = vpow2.f32 %v2670_v42 }
 0x94a   : > { %v2665_v44 = vpop.f32.mrf.mxu1 }
 0x94b   : > { %v2666_v59 = vadd.f32 %v3818_v3, %v2665_v44 }
 0x94d   : > { %v2669_v15 = vsub.f32 0.0, %v2666_v59 }
 0x94f   : > { %v4718_v18 = vpop.eup %4717  ;;  %v2672_v28 = vmul.f32 1.442695, %v2669_v15 }
 0x950   : > { %v2674_v47 = vadd.f32 1.0, %v4718_v18 }
 0x951   : > { %4719 = vpow2.f32 %v2672_v28 }
 0x952   : > { %4721 = vrcp.f32 %v2674_v47  ;;  %v2687_v51 = vand.u32 2147483648, %v2674_v47  ;;  %v2685_v60 = vand.u32 2147483647, %v2674_v47  ;;  %vm2681_vm14 = vweird.f32 %v2674_v47 }
 0x954   : > { %v2688_v57 = vor.u32 1.1754944e-38, %v2687_v51  ;;  %vm2686_vm11 = vcmp.eq.f32.partialorder %v2685_v60, 8.507059e+37 }
 0x957   : > { %v4720_v48 = vpop.eup %4719 }
 0x958   : > { %v4722_v49 = vpop.eup %4721  ;;  %v2675_v50 = vadd.f32 1.0, %v4720_v48 }
 0x959   : > { %v2677_v52 = vmul.f32 %v4722_v49, %v2674_v47  ;;  %vm2682_vm13 = vweird.f32 %v4722_v49 }
 0x95a   : > { %4723 = vrcp.f32 %v2675_v50  ;;  %vm2683_vm15 = vmor %vm2681_vm14, %vm2682_vm13  ;;  %v2702_v21 = vand.u32 2147483648, %v2675_v50  ;;  %v2700_v6 = vand.u32 2147483647, %v2675_v50  ;;  %vm2696_vm10 = vweird.f32 %v2675_v50 }
 0x95b   : > { %v2678_v55 = vsub.f32 1.0, %v2677_v52 }
 0x95c   : > { %v2703_v22 = vor.u32 1.1754944e-38, %v2702_v21  ;;  %vm2701_vm6 = vcmp.eq.f32.partialorder %v2700_v6, 8.507059e+37 }
 0x95d   : > { %v2679_v56 = vmul.f32 %v4722_v49, %v2678_v55 }
 0x95f   : > { %v2680_v61 = vadd.f32 %v4722_v49, %v2679_v56 }
 0x960   : > { %v4724_v58 = vpop.eup %4723 }
 0x961   : > { %v2684_v63 = vsel %vm2683_vm15, %v4722_v49, %v2680_v61  ;;  %v2692_v4 = vmul.f32 %v4724_v58, %v2675_v50  ;;  %vm2697_vm9 = vweird.f32 %v4724_v58 }
 0x962   : > { %v2689_v5 = vsel %vm2686_vm11, %v2688_v57, %v2684_v63  ;;  %vm2698_vm12 = vmor %vm2696_vm10, %vm2697_vm9 }
 0x963   : > { %2708 = vperm.xlu0 %4226, %v2689_v5   ;;  %v2693_v20 = vsub.f32 1.0, %v2692_v4 }
 0x965   : > { %v2694_v23 = vmul.f32 %v4724_v58, %v2693_v20 }
 0x967   : > { %v2695_v24 = vadd.f32 %v4724_v58, %v2694_v23 }
 0x969   : > { %v2699_v25 = vsel %vm2698_vm12, %v4724_v58, %v2695_v24 }
 0x96a   : > { %v2704_v13 = vsel %vm2701_vm6, %v2703_v22, %v2699_v25 }
 0x96b   : > { %2713 = vperm.xlu0 %4226, %v2704_v13  }
 0x9d5   : > { %v2709_v27 = vpop.permute.xlu0 %2708 }
 0x9d6   : > { %v2716_v30 = vmul.f32 %v2709_v27, %v5659_v53  ;;  %v2717_v7 = vmul.f32 %v2709_v27, %v5661_v32  ;;  %v2718_v10 = vmul.f32 %v2709_v27, %v5667_v9 }
 0x9d8   : > { %v2722_v62 = vmul.f32 %v2716_v30, %v5041_v33  ;;  %v2723_v8 = vmul.f32 %v2717_v7, %v5043_v38  ;;  %v2724_v34 = vmul.f32 %v2718_v10, %v5038_v16 }
 0x9da   : > { %v2728_v35 = vadd.f32 %v2722_v62, %v5285_v31  ;;  %v2729_v19 = vadd.f32 %v2723_v8, %v5288_v26  ;;  %v2730_v0 = vadd.f32 %v2724_v34, %v5291_v2 }
 0x9dc   : > { %v2840_v14 = vpack.c.bf16 %v2729_v19, %v2728_v35  ;;  %v2841_v17 = vpack.c.bf16 %v2730_v0, %v2730_v0 }
 0x9dd   : > { %v2714_v29 = vpop.permute.xlu0 %2713 }
 0x9de   : > { %2844 = vst [vmem:[#allocation2 + $0x60] sm:$0xff] %v2840_v14  ;;  %v2719_v53 = vmul.f32 %v2714_v29, %v5669_v54  ;;  %v2720_v32 = vmul.f32 %v2714_v29, %v5671_v11  ;;  %v2721_v9 = vmul.f32 %v2714_v29, %v5679_v1 }
 0x9df   : > { %2845 = vst [vmem:[#allocation2 + $0x68] sm:$0xf] %v2841_v17 }
 0x9e0   : > { %v2725_v36 = vmul.f32 %v2719_v53, %v5041_v33  ;;  %v2726_v37 = vmul.f32 %v2720_v32, %v5043_v38  ;;  %v2727_v31 = vmul.f32 %v2721_v9, %v5038_v16 }
 0x9e2   : > { %v2731_v26 = vadd.f32 %v2725_v36, %v5304_v43  ;;  %v2732_v2 = vadd.f32 %v2726_v37, %v5314_v46  ;;  %v2733_v39 = vadd.f32 %v2727_v31, %v5307_v45  ;;  %v2988_v43 = vld [vmem:[%s5993_s8] sm:$0xff]  ;;  %v2989_v45 = vld [vmem:[%s5993_s8 + $0x8] sm:$0xff] }
 0x9e4   : > { %v2842_v40 = vpack.c.bf16 %v2732_v2, %v2731_v26  ;;  %v2843_v41 = vpack.c.bf16 %v2733_v39, %v2733_v39  ;;  %v4604_v54 = vpack.i.bf16 %v2733_v39, %v2730_v0  ;;  %v4609_v42 = vpack.i.bf16 %v2732_v2, %v2729_v19 }
 0x9e5   : > { %v4589_v11 = vpack.i.bf16 %v2731_v26, %v2728_v35 }
 0x9e6   : > { %2846 = vst [vmem:[#allocation2 + $0x6c] sm:$0xff] %v2842_v40  ;;  %4605 = vrot.lane.b32.xlu1 %v4604_v54, %s4746_s20  ;;  %4610 = vrot.lane.b32.xlu2 %v4609_v42, %s4745_s19 }
 0x9e7   : > { %2847 = vst [vmem:[#allocation2 + $0x74] sm:$0xf] %v2843_v41  ;;  %4590 = vrot.lane.b32.xlu0 %v4589_v11, %s4745_s19 }
 0x9ee   : > { %4635 = vrot.lane.b32.xlu1 %v4609_v42, %s4748_s22  ;;  %4630 = vrot.lane.b32.xlu2 %v4589_v11, %s4748_s22 }
 0x9ef   : > { %4595 = vrot.lane.b32.xlu0 %v4604_v54, %s4745_s19 }
 0x9f6   : > { %4650 = vrot.lane.b32.xlu1 %v4609_v42, %s4749_s23  ;;  %4645 = vrot.lane.b32.xlu2 %v4609_v42, %s4747_s21 }
 0x9f7   : > { %4600 = vrot.lane.b32.xlu0 %v4589_v11, %s4746_s20 }
 0x9fe   : > { %4665 = vrot.lane.b32.xlu1 %v4604_v54, %s4750_s24  ;;  %4660 = vrot.lane.b32.xlu2 %v4609_v42, %s4750_s24 }
 0x9ff   : > { %4615 = vrot.lane.b32.xlu0 %v4589_v11, %s4747_s21 }
 0xa06   : > { %4680 = vrot.lane.b32.xlu1 %v4604_v54, %s4751_s25  ;;  %4675 = vrot.lane.b32.xlu2 %v4609_v42, %s4751_s25 }
 0xa07   : > { %4620 = vrot.lane.b32.xlu0 %v4604_v54, %s4747_s21 }
 0xa0e   : > { %4695 = vrot.lane.b32.xlu1 %v4604_v54, %s4752_s26  ;;  %4690 = vrot.lane.b32.xlu2 %v4609_v42, %s4752_s26 }
 0xa0f   : > { %4625 = vrot.lane.b32.xlu0 %v4609_v42, %s4746_s20 }
 0xa16   : > { %2992 = vperm.xlu1 %4227, %v2988_v43   ;;  %4705 = vrot.lane.b32.xlu2 %v4589_v11, %s4752_s26 }
 0xa17   : > { %4640 = vrot.lane.b32.xlu0 %v4604_v54, %s4748_s22 }
 0xa1f   : > { %4655 = vrot.lane.b32.xlu0 %v4604_v54, %s4749_s23 }
 0xa27   : > { %4670 = vrot.lane.b32.xlu0 %v4589_v11, %s4749_s23 }
 0xa2f   : > { %4685 = vrot.lane.b32.xlu0 %v4589_v11, %s4750_s24 }
 0xa37   : > { %4700 = vrot.lane.b32.xlu0 %v4589_v11, %s4751_s25 }
 0xa3f   : > { %2997 = vperm.xlu0 %4226, %v2989_v45  }
 0xa40   : > { %v4611_v46 = vpop.permute.xlu2 %4610 }
 0xa41   : > { %v4613_v48 = vunpack.i.h.bf16 %v4611_v46  ;;  %v4612_v49 = vunpack.i.l.bf16 %v4611_v46 }
 0xa48   : > { %v5753_v1 = vpop.permute.xlu2 %4630 }
 0xa50   : > { %v5755_v3 = vpop.permute.xlu2 %4645 }
 0xa51   : > { %v4647_v40 = vunpack.i.l.bf16 %v5755_v3 }
 0xa58   : > { %v5757_v44 = vpop.permute.xlu1 %4605  ;;  %v5759_v15 = vpop.permute.xlu2 %4660 }
 0xa59   : > { %v4591_v59 = vpop.permute.xlu0 %4590  ;;  %v4608_v24 = vunpack.i.h.bf16 %v5757_v44  ;;  %v4607_v22 = vunpack.i.l.bf16 %v5757_v44  ;;  %v4663_v0 = vunpack.i.h.bf16 %v5759_v15  ;;  %v4662_v14 = vunpack.i.l.bf16 %v5759_v15 }
 0xa5a   : > { %v4593_v18 = vunpack.i.h.bf16 %v4591_v59  ;;  %v4592_v28 = vunpack.i.l.bf16 %v4591_v59  ;;  %v4648_v59 = vunpack.i.h.bf16 %v5755_v3 }
 0xa5c   : > { %v2915_v51 = vsel %vm554_vm0, %v4593_v18, %v4613_v48  ;;  %v2914_v56 = vsel %vm554_vm0, %v4592_v28, %v4612_v49 }
 0xa60   : > { %v5761_v47 = vpop.permute.xlu1 %4635  ;;  %v5775_v21 = vpop.permute.xlu2 %4675 }
 0xa61   : > { %v4596_v50 = vpop.permute.xlu0 %4595  ;;  %v4678_v41 = vunpack.i.h.bf16 %v5775_v21  ;;  %v4677_v42 = vunpack.i.l.bf16 %v5775_v21 }
 0xa62   : > { %v4598_v52 = vunpack.i.h.bf16 %v4596_v50  ;;  %v4597_v55 = vunpack.i.l.bf16 %v4596_v50 }
 0xa64   : > { %v2913_v60 = vsel %vm554_vm0, %v4613_v48, %v4598_v52  ;;  %v2912_v61 = vsel %vm554_vm0, %v4612_v49, %v4597_v55  ;;  %v2916_v58 = vsel %vm554_vm0, %v4597_v55, %v4592_v28  ;;  %v2917_v57 = vsel %vm554_vm0, %v4598_v52, %v4593_v18 }
 0xa65   : > { %v2918_v63 = vpack.c.bf16 %v2912_v61, %v2914_v56  ;;  %v2919_v4 = vpack.c.bf16 %v2916_v58, %v2916_v58  ;;  %v2920_v5 = vpack.c.bf16 %v2913_v60, %v2915_v51  ;;  %v2921_v20 = vpack.c.bf16 %v2917_v57, %v2917_v57 }
 0xa66   : > { %vm6002_vm0 = vcmask 130048  }
 0xa67   : > { %2922 = vst [vmem:[#allocation2 + $0xa8] sm:$0xff] %v2918_v63 }
 0xa68   : > { %2923 = vst [vmem:[#allocation2 + $0xb0] sm:$0xf] %v2919_v4  ;;  %v5777_v23 = vpop.permute.xlu1 %4650  ;;  %v4691_v17 = vpop.permute.xlu2 %4690 }
 0xa69   : > { %2924 = vst [vmem:[#allocation2 + $0xb4] sm:$0xff] %v2920_v5  ;;  %v5779_v6 = vpop.permute.xlu0 %4600 }
 0xa6a   : > { %2925 = vst [vmem:[#allocation2 + $0xbc] sm:$0xf] %v2921_v20  ;;  %v4603_v25 = vunpack.i.h.bf16 %v5779_v6  ;;  %v4602_v13 = vunpack.i.l.bf16 %v5779_v6 }
 0xa6c   : > { %v2891_v27 = vsel %vm527_vm1, %v4608_v24, %v4603_v25  ;;  %v2890_v30 = vsel %vm527_vm1, %v4607_v22, %v4602_v13 }
 0xa6d   : > { %v2895_v7 = vpack.c.bf16 %v2891_v27, %v2891_v27  ;;  %v2893_v10 = vpack.c.bf16 %v2890_v30, %v2890_v30  ;;  %v4693_v30 = vunpack.i.h.bf16 %v4691_v17 }
 0xa6e   : > { %v3916_v62 = vld [vmem:[#allocation2 + $0xa8] sm:$0xf]  ;;  %v4082_v8 = vld [vmem:[#allocation2 + $0xac] sm:$0xf] }
 0xa6f   : > { %2899 = vst [vmem:[#allocation2 + $0xa4] sm:$0xf] %v2895_v7  ;;  %v4692_v7 = vunpack.i.l.bf16 %v4691_v17 }
 0xa70   : > { %2897 = vst [vmem:[#allocation2 + $0x98] sm:$0xf] %v2893_v10  ;;  %v5797_v34 = vpop.permute.xlu1 %4665  ;;  %v4083_v35 = vld [vmem:[#allocation2 + $0xb0] sm:$0xf0]  ;;  %v3918_v19 = vld [vmem:[#allocation2 + $0xb4] sm:$0xf0]  ;;  %v4706_v48 = vpop.permute.xlu2 %4705 }
 0xa71   : > { %v4668_v29 = vunpack.i.h.bf16 %v5797_v34  ;;  %v4667_v53 = vunpack.i.l.bf16 %v5797_v34  ;;  %v4616_v32 = vpop.permute.xlu0 %4615  ;;  %v3917_v9 = vor.u32 %v4083_v35, %v3916_v62  ;;  %v3921_v36 = vor.u32 %v4082_v8, %v3918_v19 }
 0xa72   : > { %v4617_v39 = vunpack.i.l.bf16 %v4616_v32  ;;  %v4618_v11 = vunpack.i.h.bf16 %v4616_v32  ;;  %v4708_v63 = vunpack.i.h.bf16 %v4706_v48  ;;  %v4707_v4 = vunpack.i.l.bf16 %v4706_v48 }
 0xa73   : > { %v2800_v37 = vsel %vm438_vm5, %v4662_v14, %v4667_v53  ;;  %v2801_v31 = vsel %vm438_vm5, %v4663_v0, %v4668_v29  ;;  %3156 = vmatpush.bf16.msra.mxu0 %v3917_v9  ;;  %3184 = vmatpush.bf16.msrb.mxu1 %v3921_v36 }
 0xa74   : > { %v2807_v26 = vpack.c.bf16 %v2800_v37, %v2800_v37  ;;  %v2809_v2 = vpack.c.bf16 %v2801_v31, %v2801_v31  ;;  %v2862_v49 = vsel %vm500_vm2, %v4617_v39, %v4647_v40  ;;  %v2863_v60 = vsel %vm500_vm2, %v4618_v11, %v4648_v59 }
 0xa75   : > { %v2750_v19 = vsel %vm384_vm8, %v4707_v4, %v4692_v7  ;;  %v2751_v32 = vsel %vm384_vm8, %v4708_v63, %v4693_v30 }
 0xa76   : > { %2811 = vst [vmem:[#allocation2 + $0x38] sm:$0xf] %v2807_v26 }
 0xa77   : > { %2813 = vst [vmem:[#allocation2 + $0x44] sm:$0xf] %v2809_v2 }
 0xa78   : > { %v5817_v54 = vpop.permute.xlu1 %4680 }
 0xa79   : > { %v4683_v43 = vunpack.i.h.bf16 %v5817_v54  ;;  %v4682_v45 = vunpack.i.l.bf16 %v5817_v54  ;;  %v4621_v46 = vpop.permute.xlu0 %4620 }
 0xa7a   : > { %v4623_v18 = vunpack.i.h.bf16 %v4621_v46  ;;  %v4622_v28 = vunpack.i.l.bf16 %v4621_v46 }
 0xa7b   : > { %v2774_v50 = vsel %vm411_vm7, %v4677_v42, %v4682_v45  ;;  %v2775_v3 = vsel %vm411_vm7, %v4678_v41, %v4683_v43 }
 0xa7c   : > { %v2781_v52 = vpack.c.bf16 %v2774_v50, %v2774_v50  ;;  %v2783_v55 = vpack.c.bf16 %v2775_v3, %v2775_v3  ;;  %v2861_v51 = vsel %vm500_vm2, %v4648_v59, %v4623_v18  ;;  %v2860_v56 = vsel %vm500_vm2, %v4647_v40, %v4622_v28 }
 0xa7d   : > { %v2864_v61 = vsel %vm500_vm2, %v4622_v28, %v4617_v39  ;;  %v2865_v58 = vsel %vm500_vm2, %v4623_v18, %v4618_v11  ;;  %v2866_v57 = vpack.c.bf16 %v2860_v56, %v2862_v49  ;;  %v2868_v20 = vpack.c.bf16 %v2861_v51, %v2863_v60  ;;  %vm6004_vm2 = vmmov %vm6002_vm0 }
 0xa7e   : > { %2785 = vst [vmem:[#allocation2 + $0x20] sm:$0xf] %v2781_v52  ;;  %v2867_v5 = vpack.c.bf16 %v2864_v61, %v2864_v61  ;;  %v2869_v27 = vpack.c.bf16 %v2865_v58, %v2865_v58  ;;  %v4638_v49 = vunpack.i.h.bf16 %v5761_v47  ;;  %v4632_v50 = vunpack.i.l.bf16 %v5753_v1 }
 0xa7f   : > { %2787 = vst [vmem:[#allocation2 + $0x2c] sm:$0xf] %v2783_v55 }
 0xa80   : > { %2870 = vst [vmem:[#allocation2 + $0x78] sm:$0xff] %v2866_v57  ;;  %v4696_v10 = vpop.permute.xlu1 %4695 }
 0xa81   : > { %2871 = vst [vmem:[#allocation2 + $0x80] sm:$0xf] %v2867_v5  ;;  %v4698_v62 = vunpack.i.h.bf16 %v4696_v10  ;;  %v4697_v8 = vunpack.i.l.bf16 %v4696_v10  ;;  %v4626_v35 = vpop.permute.xlu0 %4625  ;;  %v4653_v5 = vunpack.i.h.bf16 %v5777_v23 }
 0xa82   : > { %2872 = vst [vmem:[#allocation2 + $0x84] sm:$0xff] %v2868_v20  ;;  %v4628_v9 = vunpack.i.h.bf16 %v4626_v35  ;;  %v4627_v36 = vunpack.i.l.bf16 %v4626_v35  ;;  %v4652_v20 = vunpack.i.l.bf16 %v5777_v23  ;;  %v3924_v23 = vld [vmem:[#allocation2 + $0xb0] sm:$0xf] }
 0xa83   : > { %2873 = vst [vmem:[#allocation2 + $0x8c] sm:$0xf] %v2869_v27  ;;  %v2748_v37 = vsel %vm384_vm8, %v4692_v7, %v4697_v8  ;;  %v2749_v17 = vsel %vm384_vm8, %v4693_v30, %v4698_v62  ;;  %v2752_v31 = vsel %vm384_vm8, %v4697_v8, %v4707_v4  ;;  %v2753_v26 = vsel %vm384_vm8, %v4698_v62, %v4708_v63 }
 0xa84   : > { %v2754_v2 = vpack.c.bf16 %v2750_v19, %v2752_v31  ;;  %v2755_v39 = vpack.c.bf16 %v2748_v37, %v2748_v37  ;;  %v2756_v40 = vpack.c.bf16 %v2751_v32, %v2753_v26  ;;  %v2757_v11 = vpack.c.bf16 %v2749_v17, %v2749_v17  ;;  %v4084_v26 = vld [vmem:[#allocation2 + $0xb8] sm:$0xf0] }
 0xa85   : > { %v2887_v46 = vsel %vm527_vm1, %v4628_v9, %v4608_v24  ;;  %v2886_v59 = vsel %vm527_vm1, %v4627_v36, %v4607_v22  ;;  %v2888_v18 = vsel %vm527_vm1, %v4602_v13, %v4627_v36  ;;  %v2889_v28 = vsel %vm527_vm1, %v4603_v25, %v4628_v9  ;;  %vm6003_vm1 = vmmov %vm6002_vm0 }
 0xa86   : > { %2758 = vst [vmem:[#allocation2] sm:$0xff] %v2754_v2  ;;  %v2892_v48 = vpack.c.bf16 %v2886_v59, %v2888_v18  ;;  %v4637_v24 = vunpack.i.l.bf16 %v5761_v47  ;;  %v2894_v44 = vpack.c.bf16 %v2887_v46, %v2889_v28  ;;  %v4633_v22 = vunpack.i.h.bf16 %v5753_v1  ;;  %v4074_v2 = vld [vmem:[#allocation2 + $0x68] sm:$0xf0]  ;;  %v4059_v46 = vld [vmem:[%s5992_s7 + $0x4] sm:$0xf] }
 0xa87   : > { %2759 = vst [vmem:[#allocation2 + $0x8] sm:$0xf] %v2755_v39  ;;  %v3892_v35 = vld [vmem:[#allocation2 + $0x78] sm:$0xf]  ;;  %v4076_v36 = vld [vmem:[#allocation2 + $0x7c] sm:$0xf] }
 0xa88   : > { %2760 = vst [vmem:[#allocation2 + $0xc] sm:$0xff] %v2756_v40  ;;  %v2940_v25 = vsel %vm581_vm3, %v4632_v50, %v4637_v24  ;;  %v2941_v52 = vsel %vm581_vm3, %v4633_v22, %v4638_v49  ;;  %v3882_v40 = vld [vmem:[#allocation2 + $0x6c] sm:$0xf0] }
 0xa89   : > { %2761 = vst [vmem:[#allocation2 + $0x14] sm:$0xf] %v2757_v11  ;;  %v4641_v13 = vpop.permute.xlu0 %4640  ;;  %v4077_v9 = vld [vmem:[#allocation2 + $0x80] sm:$0xf0]  ;;  %v3894_v37 = vld [vmem:[#allocation2 + $0x84] sm:$0xf0] }
 0xa8a   : > { %2896 = vst [vmem:[#allocation2 + $0x90] sm:$0xff] %v2892_v48  ;;  %v4643_v6 = vunpack.i.h.bf16 %v4641_v13  ;;  %v4642_v3 = vunpack.i.l.bf16 %v4641_v13  ;;  %v3893_v59 = vor.u32 %v4077_v9, %v3892_v35  ;;  %v3897_v18 = vor.u32 %v4076_v36, %v3894_v37  ;;  %v3826_v48 = vld [vmem:[%s5992_s7 + $0x8] sm:$0xf0] }
 0xa8b   : > { %2898 = vst [vmem:[#allocation2 + $0x9c] sm:$0xff] %v2894_v44  ;;  %v3925_v13 = vor.u32 %v4084_v26, %v3924_v23  ;;  %v3888_v23 = vld [vmem:[#allocation2 + $0x68] sm:$0xf] }
 0xa8c   : > { %v2939_v47 = vsel %vm581_vm3, %v4638_v49, %v4643_v6  ;;  %v2943_v55 = vsel %vm581_vm3, %v4643_v6, %v4633_v22  ;;  %v2938_v1 = vsel %vm581_vm3, %v4637_v24, %v4642_v3  ;;  %v2942_v51 = vsel %vm581_vm3, %v4642_v3, %v4632_v50 }
 0xa8d   : > { %v2946_v56 = vpack.c.bf16 %v2939_v47, %v2941_v52  ;;  %v2947_v60 = vpack.c.bf16 %v2943_v55, %v2943_v55  ;;  %v2944_v61 = vpack.c.bf16 %v2938_v1, %v2940_v25  ;;  %v2945_v58 = vpack.c.bf16 %v2942_v51, %v2942_v51  ;;  %v3880_v52 = vld [vmem:[#allocation2 + $0x60] sm:$0xf]  ;;  %v4073_v47 = vld [vmem:[#allocation2 + $0x64] sm:$0xf] }
 0xa8e   : > { %v5903_v1 = vor.u32 %v4059_v46, %v3826_v48  ;;  %v3881_v51 = vor.u32 %v4074_v2, %v3880_v52 }
 0xa8f   : > { %2950 = vst [vmem:[#allocation2 + $0xcc] sm:$0xff] %v2946_v56  ;;  %v3885_v56 = vor.u32 %v4073_v47, %v3882_v40  ;;  %v3824_v47 = vld [vmem:[%s5992_s7] sm:$0xf] }
 0xa90   : > { %2951 = vst [vmem:[#allocation2 + $0xd4] sm:$0xf] %v2947_v60  ;;  %v3912_v60 = vld [vmem:[#allocation2 + $0x98] sm:$0xf] }
 0xa91   : > { %2948 = vst [vmem:[#allocation2 + $0xc0] sm:$0xff] %v2944_v61  ;;  %v4656_v57 = vpop.permute.xlu0 %4655  ;;  %v3904_v63 = vld [vmem:[#allocation2 + $0x90] sm:$0xf]  ;;  %v4079_v4 = vld [vmem:[#allocation2 + $0x94] sm:$0xf] }
 0xa92   : > { %2949 = vst [vmem:[#allocation2 + $0xc8] sm:$0xf] %v2945_v58  ;;  %v4658_v27 = vunpack.i.h.bf16 %v4656_v57  ;;  %v4657_v30 = vunpack.i.l.bf16 %v4656_v57  ;;  %v4080_v7 = vld [vmem:[#allocation2 + $0x98] sm:$0xf0]  ;;  %v3906_v10 = vld [vmem:[#allocation2 + $0x9c] sm:$0xf0] }
 0xa93   : > { %v3905_v62 = vor.u32 %v4080_v7, %v3904_v63  ;;  %v3909_v8 = vor.u32 %v4079_v4, %v3906_v10  ;;  %v4081_v61 = vld [vmem:[#allocation2 + $0xa0] sm:$0xf0] }
 0xa94   : > { %v2827_v19 = vsel %vm465_vm4, %v4653_v5, %v4658_v27  ;;  %v2826_v32 = vsel %vm465_vm4, %v4652_v20, %v4657_v30 }
 0xa95   : > { %v2835_v17 = vpack.c.bf16 %v2827_v19, %v2827_v19  ;;  %v2833_v31 = vpack.c.bf16 %v2826_v32, %v2826_v32  ;;  %3157 = vmatpush.bf16.msra.mxu0 %v3905_v62  ;;  %3185 = vmatpush.bf16.msrb.mxu1 %v3909_v8  ;;  %v3913_v62 = vor.u32 %v4081_v61, %v3912_v60  ;;  %v4078_v8 = vld [vmem:[#allocation2 + $0x88] sm:$0xf0]  ;;  %v4075_v19 = vld [vmem:[#allocation2 + $0x70] sm:$0xf0] }
 0xa96   : > { %v4086_v39 = vld [vmem:[#allocation2 + $0xc8] sm:$0xf0]  ;;  %v3930_v11 = vld [vmem:[#allocation2 + $0xcc] sm:$0xf0]  ;;  %v3889_v26 = vor.u32 %v4075_v19, %v3888_v23  ;;  %v2993_v19 = vpop.permute.xlu1 %2992 }
 0xa97   : > { %2839 = vst [vmem:[#allocation2 + $0x5c] sm:$0xf] %v2835_v17  ;;  %v4087_v28 = vld [vmem:[#allocation2 + $0xd0] sm:$0xf0] }
 0xa98   : > { %2837 = vst [vmem:[#allocation2 + $0x50] sm:$0xf] %v2833_v31  ;;  %v3928_v49 = vld [vmem:[#allocation2 + $0xc0] sm:$0xf]  ;;  %v4085_v24 = vld [vmem:[#allocation2 + $0xc4] sm:$0xf] }
 0xa99   : > { %3158 = vmatpush.bf16.msra.mxu0 %v3893_v59  ;;  %3186 = vmatpush.bf16.msrb.mxu1 %v3897_v18  ;;  %v4671_v44 = vpop.permute.xlu0 %4670  ;;  %v3929_v22 = vor.u32 %v4086_v39, %v3928_v49  ;;  %v3933_v50 = vor.u32 %v4085_v24, %v3930_v11  ;;  %v3936_v6 = vld [vmem:[#allocation2 + $0xc8] sm:$0xf]  ;;  %v3864_v18 = vld [vmem:[#allocation2 + $0x38] sm:$0xf] }
 0xa9a   : > { %v4673_v3 = vunpack.i.h.bf16 %v4671_v44  ;;  %v4672_v25 = vunpack.i.l.bf16 %v4671_v44  ;;  %v3937_v55 = vor.u32 %v4087_v28, %v3936_v6  ;;  %v4069_v28 = vld [vmem:[#allocation2 + $0x40] sm:$0xf0] }
 0xa9b   : > { %3177 = vmatpush.bf16.msrb.mxu2 %v3929_v22  ;;  %3205 = vmatpush.bf16.msra.mxu3 %v3933_v50 }
 0xa9c   : > { %v2829_v58 = vsel %vm465_vm4, %v4673_v3, %v4653_v5  ;;  %v2828_v57 = vsel %vm465_vm4, %v4672_v25, %v4652_v20  ;;  %v2830_v63 = vsel %vm465_vm4, %v4657_v30, %v4672_v25  ;;  %v2831_v4 = vsel %vm465_vm4, %v4658_v27, %v4673_v3  ;;  %v3900_v5 = vld [vmem:[#allocation2 + $0x80] sm:$0xf]  ;;  %v4066_v25 = vld [vmem:[#allocation2 + $0x28] sm:$0xf0] }
 0xa9d   : > { %v2832_v7 = vpack.c.bf16 %v2828_v57, %v2830_v63  ;;  %v2834_v10 = vpack.c.bf16 %v2829_v58, %v2831_v4  ;;  %3159 = vmatpush.bf16.msra.mxu0 %v3881_v51  ;;  %3187 = vmatpush.bf16.msrb.mxu1 %v3885_v56  ;;  %v3901_v35 = vor.u32 %v4078_v8, %v3900_v5  ;;  %v3832_v4 = vld [vmem:[#allocation2] sm:$0xf] }
 0xa9e   : > { %3938 = vmatmul.msk.bf16.vlgmr.msrb.gmra.mxu2 %vm6002_vm0, %v5903_v1  ;;  %3939 = vmatmul.msk.bf16.vlgmr.msra.gmra.mxu3 %vm6003_vm1, %v5903_v1 }
 0xa9f   : > { %3212 = vmatpush.bf16.msra.mxu2 %v3925_v13  ;;  %3233 = vmatpush.bf16.msrb.mxu3 %v3937_v55  ;;  %2836 = vst [vmem:[#allocation2 + $0x48] sm:$0xff] %v2832_v7  ;;  %v3876_v40 = vld [vmem:[#allocation2 + $0x50] sm:$0xf]  ;;  %v3852_v13 = vld [vmem:[#allocation2 + $0x20] sm:$0xf] }
 0xaa0   : > { %2838 = vst [vmem:[#allocation2 + $0x54] sm:$0xff] %v2834_v10  ;;  %v3853_v12 = vor.u32 %v4066_v25, %v3852_v13  ;;  %v4060_v55 = vld [vmem:[%s5992_s7 + $0x4] sm:$0xf0]  ;;  %v4062_v7 = vld [vmem:[#allocation2 + $0x8] sm:$0xf0] }
 0xaa1   : > { %v4686_v20 = vpop.permute.xlu0 %4685  ;;  %v3825_v58 = vor.u32 %v4060_v55, %v3824_v47  ;;  %v4061_v10 = vld [vmem:[#allocation2 + $0x4] sm:$0xf]  ;;  %v3833_v5 = vor.u32 %v4062_v7, %v3832_v4 }
 0xaa2   : > { %v4688_v27 = vunpack.i.h.bf16 %v4686_v20  ;;  %v4687_v30 = vunpack.i.l.bf16 %v4686_v20 }
 0xaa3   : > { %3213 = vmatpush.bf16.msra.mxu2 %v3913_v62  ;;  %v3834_v62 = vld [vmem:[#allocation2 + $0xc] sm:$0xf0] }
 0xaa4   : > { %v2803_v32 = vsel %vm438_vm5, %v4688_v27, %v4663_v0  ;;  %v2805_v9 = vsel %vm438_vm5, %v4668_v29, %v4688_v27  ;;  %v2802_v36 = vsel %vm438_vm5, %v4687_v30, %v4662_v14  ;;  %v2804_v37 = vsel %vm438_vm5, %v4667_v53, %v4687_v30  ;;  %v4072_v0 = vld [vmem:[#allocation2 + $0x58] sm:$0xf0] }
 0xaa5   : > { %v2808_v17 = vpack.c.bf16 %v2803_v32, %v2805_v9  ;;  %v2806_v31 = vpack.c.bf16 %v2802_v36, %v2804_v37  ;;  %v3877_v53 = vor.u32 %v4072_v0, %v3876_v40  ;;  %v3837_v8 = vor.u32 %v4061_v10, %v3834_v62 }
 0xaa6   : > { %v3868_v2 = vld [vmem:[#allocation2 + $0x48] sm:$0xf]  ;;  %v4070_v39 = vld [vmem:[#allocation2 + $0x4c] sm:$0xf] }
 0xaa7   : > { %3214 = vmatpush.bf16.msra.mxu2 %v3901_v35  ;;  %2812 = vst [vmem:[#allocation2 + $0x3c] sm:$0xff] %v2808_v17  ;;  %v4071_v29 = vld [vmem:[#allocation2 + $0x50] sm:$0xf0]  ;;  %v3870_v15 = vld [vmem:[#allocation2 + $0x54] sm:$0xf0] }
 0xaa8   : > { %2810 = vst [vmem:[#allocation2 + $0x30] sm:$0xff] %v2806_v31  ;;  %v3869_v14 = vor.u32 %v4071_v29, %v3868_v2  ;;  %v3873_v11 = vor.u32 %v4070_v39, %v3870_v15 }
 0xaa9   : > { %v4701_v34 = vpop.permute.xlu0 %4700 }
 0xaaa   : > { %v4703_v46 = vunpack.i.h.bf16 %v4701_v34  ;;  %v4702_v59 = vunpack.i.l.bf16 %v4701_v34  ;;  %3160 = vmatpush.bf16.msra.mxu0 %v3869_v14  ;;  %3188 = vmatpush.bf16.msrb.mxu1 %v3873_v11  ;;  %v4731_v14 = vld [vmem:[%s4825_s18] sm:$0xff]  ;;  %v4732_v34 = vld [vmem:[%s4825_s18 + $0x10] sm:$0xff] }
 0xaab   : > { %3215 = vmatpush.bf16.msra.mxu2 %v3889_v26 }
 0xaac   : > { %v2777_v48 = vsel %vm411_vm7, %v4703_v46, %v4678_v41  ;;  %v2779_v49 = vsel %vm411_vm7, %v4683_v43, %v4703_v46  ;;  %v2776_v24 = vsel %vm411_vm7, %v4702_v59, %v4677_v42  ;;  %v2778_v44 = vsel %vm411_vm7, %v4682_v45, %v4702_v59  ;;  %v3840_v42 = vld [vmem:[#allocation2 + $0x8] sm:$0xf]  ;;  %v4063_v45 = vld [vmem:[#allocation2 + $0x10] sm:$0xf0] }
 0xaad   : > { %v2782_v22 = vpack.c.bf16 %v2777_v48, %v2779_v49  ;;  %v2780_v50 = vpack.c.bf16 %v2776_v24, %v2778_v44  ;;  %v3865_v41 = vor.u32 %v4069_v28, %v3864_v18  ;;  %v3841_v51 = vor.u32 %v4063_v45, %v3840_v42  ;;  %v4733_v59 = vld [vmem:[%s4825_s18 + $0x8] sm:$0xff] }
 0xaae   : > { %v4068_v6 = vld [vmem:[#allocation2 + $0x38] sm:$0xf0]  ;;  %v3858_v3 = vld [vmem:[#allocation2 + $0x3c] sm:$0xf0]  ;;  %3940 = vmatmul.msk.bf16.vlgmr.msrb.gmra.mxu3 %vm6004_vm2, %v5903_v1 }
 0xaaf   : > { %3216 = vmatpush.bf16.msra.mxu2 %v3877_v53  ;;  %2786 = vst [vmem:[#allocation2 + $0x24] sm:$0xff] %v2782_v22  ;;  %v3856_v43 = vld [vmem:[#allocation2 + $0x30] sm:$0xf]  ;;  %v4067_v52 = vld [vmem:[#allocation2 + $0x34] sm:$0xf] }
 0xab0   : > { %2784 = vst [vmem:[#allocation2 + $0x18] sm:$0xff] %v2780_v50  ;;  %v3857_v21 = vor.u32 %v4068_v6, %v3856_v43  ;;  %v3861_v54 = vor.u32 %v4067_v52, %v3858_v3  ;;  %v4734_v43 = vld [vmem:[%s4825_s18 + $0x18] sm:$0xff] }
 0xab1   : > { %v2998_v15 = vpop.permute.xlu0 %2997 }
 0xab2   : > { %3161 = vmatpush.bf16.msra.mxu0 %v3857_v21  ;;  %3189 = vmatpush.bf16.msrb.mxu1 %v3861_v54  ;;  %v4735_v21 = vld [vmem:[%s4825_s18 + $0x28] sm:$0xff] }
 0xab3   : > { %3217 = vmatpush.bf16.msra.mxu2 %v3865_v41 }
 0xab6   : > { %v4065_v1 = vld [vmem:[#allocation2 + $0x20] sm:$0xf0]  ;;  %v3846_v56 = vld [vmem:[#allocation2 + $0x24] sm:$0xf0] }
 0xab7   : > { %3218 = vmatpush.bf16.msra.mxu2 %v3853_v12  ;;  %v3844_v60 = vld [vmem:[#allocation2 + $0x18] sm:$0xf]  ;;  %v4064_v61 = vld [vmem:[#allocation2 + $0x1c] sm:$0xf]  ;;  %v4736_v12 = vld [vmem:[%s4825_s18 + $0x20] sm:$0xff] }
 0xab8   : > { %v3845_v57 = vor.u32 %v4065_v1, %v3844_v60  ;;  %v3849_v63 = vor.u32 %v4064_v61, %v3846_v56 }
 0xaba   : > { %3162 = vmatpush.bf16.msra.mxu0 %v3845_v57  ;;  %3190 = vmatpush.bf16.msrb.mxu1 %v3849_v63 }
 0xabb   : > { %3219 = vmatpush.bf16.msra.mxu2 %v3841_v51 }
 0xabe   : > { %3220 = vmatmul.bf16.vlgmr.msra.gmra.mxu2 %v3825_v58  ;;  %3163 = vmatpush.bf16.msra.mxu0 %v3833_v5 }
 0xabf   : > { %3191 = vmatpush.bf16.msrb.mxu1 %v3837_v8 }
 0xac1   : > { %3164 = vmatmul.bf16.vlgmr.msra.gmra.mxu0 %v3825_v58 }
 0xac2   : > { %3192 = vmatmul.bf16.vlgmr.msrb.gmra.mxu1 %v3825_v58 }
 0xb21   : > { %v3207_v20 = vpop.f32.mrf.mxu3  ;;  %v3179_v27 = vpop.f32.mrf.mxu2 }
 0xb29   : > { %v3209_v30 = vpop.f32.mrf.mxu3  ;;  %v3181_v35 = vpop.f32.mrf.mxu2 }
 0xb31   : > { %v3235_v32 = vpop.f32.mrf.mxu3 }
 0xb39   : > { %v3237_v22 = vpop.f32.mrf.mxu3 }
 0xb3e   : > { %v3165_v36 = vpop.f32.mrf.mxu0 }
 0xb3f   : > { %v3166_v17 = vadd.f32 %v3165_v36, %v2993_v19  ;;  %v3193_v31 = vpop.f32.mrf.mxu1 }
 0xb40   : > { %v3194_v23 = vadd.f32 %v3193_v31, %v2993_v19 }
 0xb41   : > { %v3221_v9 = vpop.f32.mrf.mxu2  ;;  %v3180_v0 = vadd.f32 %v3179_v27, %v3166_v17 }
 0xb42   : > { %v3222_v37 = vadd.f32 %v3221_v9, %v2993_v19  ;;  %v3208_v2 = vadd.f32 %v3207_v20, %v3194_v23 }
 0xb43   : > { %v3240_v39 = vmul.f32 %v3180_v0, %v5041_v33 }
 0xb44   : > { %v3236_v26 = vadd.f32 %v3235_v32, %v3222_v37  ;;  %v3241_v29 = vmul.f32 %v3208_v2, %v5043_v38 }
 0xb45   : > { %v3246_v11 = vadd.f32 %v4731_v14, %v3240_v39 }
 0xb46   : > { %v3242_v40 = vmul.f32 %v3236_v26, %v5038_v16  ;;  %v3247_v53 = vadd.f32 %v4733_v59, %v3241_v29  ;;  %v3167_v28 = vpop.f32.mrf.mxu0 }
 0xb47   : > { %3252 = vst [vmem:[%s5964_s27] sm:$0xff] %v3246_v11  ;;  %v3168_v49 = vadd.f32 %v3167_v28, %v2998_v15  ;;  %v3195_v24 = vpop.f32.mrf.mxu1 }
 0xb48   : > { %v3248_v46 = vadd.f32 %v4732_v34, %v3242_v40  ;;  %3253 = vst [vmem:[%s5964_s27 + $0x8] sm:$0xff] %v3247_v53  ;;  %v3196_v44 = vadd.f32 %v3195_v24, %v2998_v15 }
 0xb49   : > { %v3223_v18 = vpop.f32.mrf.mxu2  ;;  %v3182_v50 = vadd.f32 %v3181_v35, %v3168_v49 }
 0xb4a   : > { %v3224_v48 = vadd.f32 %v3223_v18, %v2998_v15  ;;  %3254 = vst [vmem:[%s5964_s27 + $0x10] sm:$0xff] %v3248_v46  ;;  %v3210_v41 = vadd.f32 %v3209_v30, %v3196_v44 }
 0xb4b   : > { %v3243_v6 = vmul.f32 %v3182_v50, %v5041_v33 }
 0xb4c   : > { %v3238_v13 = vadd.f32 %v3237_v22, %v3224_v48  ;;  %v3244_v25 = vmul.f32 %v3210_v41, %v5043_v38 }
 0xb4d   : > { %v3249_v52 = vadd.f32 %v4734_v43, %v3243_v6 }
 0xb4e   : > { %v3245_v3 = vmul.f32 %v3238_v13, %v5038_v16  ;;  %v3250_v42 = vadd.f32 %v4736_v12, %v3244_v25 }
 0xb4f   : > { %3255 = vst [vmem:[%s5964_s27 + $0x18] sm:$0xff] %v3249_v52 }
 0xb50   : > { %v3251_v54 = vadd.f32 %v4735_v21, %v3245_v3  ;;  %3256 = vst [vmem:[%s5964_s27 + $0x20] sm:$0xff] %v3250_v42 }
 0xb52   : > { %3257 = vst [vmem:[%s5964_s27 + $0x28] sm:$0xff] %v3251_v54 }
 0xb53 PF: > { %s20_s13 = sadd.s32 1, %s4743_s13  }
 0xb54   : > { %p17_p4 = scmp.ge.s32.totalorder %s20_s13, 4  }
 0xb56   :  { %19 = sbr.rel (!%p17_p4) target bundleno = 1 (0x1), region = 100 }

</bundles_post_ra>
